<compile_context>
chip_gen: v6e
topology: v6e:2x2x1
jax: 0.10.0
libtpu: 0.0.40
codegen_flags: <defaults>
</compile_context>

<pallas_src>
import functools

import jax
import jax.numpy as jnp
from jax.experimental import pallas as pl
from jax.experimental.pallas import tpu as pltpu

_BN_EPS = 1e-5

_COMPILER_PARAMS = pltpu.CompilerParams(
    dimension_semantics=("parallel",),
    vmem_limit_bytes=32 * 1024 * 1024,
)


# ----------------------------- Pallas kernels ------------------------------

def _conv3x3_stats_kernel(xp_ref, w_ref, y_ref, s_ref, ss_ref,
                          *, stride, ho, wo, cin, cout):
    """3x3 conv (pad=1, given stride) for one image + per-image BN partial stats.

    xp_ref: [stride*stride, Hq, Wq, Cin]  phase-decomposed padded input
    w_ref:  [9, Cin, Cout] (bf16), tap index = dy*3 + dx
    y_ref:  [1, Ho, Wo, Cout] (f32)
    s_ref / ss_ref: [1, 1, Cout] per-image sum / sum-of-squares
    """
    acc = jnp.zeros((ho * wo, cout), jnp.float32)
    for dy in range(3):
        for dx in range(3):
            phase = (dy % stride) * stride + (dx % stride)
            oy, ox = dy // stride, dx // stride
            tap = xp_ref[phase, oy:oy + ho, ox:ox + wo, :]          # [Ho, Wo, Cin]
            tap = tap.reshape(ho * wo, cin).astype(jnp.bfloat16)
            acc = acc + jnp.dot(tap, w_ref[dy * 3 + dx],
                                preferred_element_type=jnp.float32)
    y_ref[0] = acc.reshape(ho, wo, cout)
    s_ref[...] = jnp.sum(acc, axis=0, keepdims=True)[None]
    ss_ref[...] = jnp.sum(acc * acc, axis=0, keepdims=True)[None]


def _bnrelu_conv3x3_stats_kernel(y1_ref, s1_ref, ss1_ref, g_ref, b_ref, w_ref,
                                 y2_ref, s2_ref, ss2_ref, pad_ref,
                                 *, count, ho, wo, cin, cout):
    """Fused bn1 + relu + zero-pad + conv2(stride=1) + BN2 partial stats.

    h1 = relu(bn1(y1)) stays in the VMEM scratch `pad_ref` (never hits HBM).
    """
    inv_n = 1.0 / count
    mean = jnp.sum(s1_ref[...], axis=0) * inv_n                      # [1, Cin]
    var = jnp.sum(ss1_ref[...], axis=0) * inv_n - mean * mean
    scale = g_ref[...] * jax.lax.rsqrt(var + _BN_EPS)
    shift = b_ref[...] - mean * scale
    h = jnp.maximum(y1_ref[0] * scale + shift, 0.0)                  # [Ho, Wo, Cin]

    pad_ref[...] = jnp.zeros(pad_ref.shape, pad_ref.dtype)
    pad_ref[1:ho + 1, 1:wo + 1, :] = h

    acc = jnp.zeros((ho * wo, cout), jnp.float32)
    for dy in range(3):
        for dx in range(3):
            tap = pad_ref[dy:dy + ho, dx:dx + wo, :]                 # [Ho, Wo, Cin]
            tap = tap.reshape(ho * wo, cin).astype(jnp.bfloat16)
            acc = acc + jnp.dot(tap, w_ref[dy * 3 + dx],
                                preferred_element_type=jnp.float32)
    y2_ref[0] = acc.reshape(ho, wo, cout)
    s2_ref[...] = jnp.sum(acc, axis=0, keepdims=True)[None]
    ss2_ref[...] = jnp.sum(acc * acc, axis=0, keepdims=True)[None]


def _bn_add_relu_kernel(y_ref, s_ref, ss_ref, g_ref, b_ref, r_ref, o_ref,
                        *, count, ch_pad):
    """bn2 + shortcut add (+ in-kernel option-A channel zero padding) + relu."""
    inv_n = 1.0 / count
    mean = jnp.sum(s_ref[...], axis=0) * inv_n                       # [1, Cout]
    var = jnp.sum(ss_ref[...], axis=0) * inv_n - mean * mean
    scale = g_ref[...] * jax.lax.rsqrt(var + _BN_EPS)
    shift = b_ref[...] - mean * scale
    z = y_ref[...] * scale + shift                                   # [TM, Cout]
    r = r_ref[...].astype(jnp.float32)                               # [TM, Cres]
    if ch_pad > 0:
        zeros = jnp.zeros((r.shape[0], ch_pad), jnp.float32)
        r = jnp.concatenate([zeros, r, zeros], axis=1)               # [TM, Cout]
    o_ref[...] = jnp.maximum(z + r, 0.0)


# --------------------------- kernel call wrappers ---------------------------

def _phase_decompose(x, stride, ho, wo):
    """Pad (3x3, pad=1) and space-to-phase rearrange so that every conv tap
    becomes a contiguous static slice inside the kernel (works for stride 1/2)."""
    n, h, w, c = x.shape
    hq = max(-(-(h + 2) // stride), 2 // stride + ho)
    wq = max(-(-(w + 2) // stride), 2 // stride + wo)
    xp = jnp.pad(x, ((0, 0),
                     (1, hq * stride - (h + 1)),
                     (1, wq * stride - (w + 1)),
                     (0, 0)))
    xp = xp.reshape(n, hq, stride, wq, stride, c)
    xp = jnp.transpose(xp, (0, 2, 4, 1, 3, 5))                       # [n, s, s, hq, wq, c]
    return xp.reshape(n * stride * stride, hq, wq, c), hq, wq


def conv3x3_stats(x, w, stride):
    n, h, wd, cin = x.shape
    cout = w.shape[-1]
    ho = (h - 1) // stride + 1
    wo = (wd - 1) // stride + 1
    xp, hq, wq = _phase_decompose(x.astype(jnp.float32), stride, ho, wo)
    kern = functools.partial(_conv3x3_stats_kernel, stride=stride,
                             ho=ho, wo=wo, cin=cin, cout=cout)
    y, s, ss = pl.pallas_call(
        kern,
        grid=(n,),
        in_specs=[
            pl.BlockSpec((stride * stride, hq, wq, cin), lambda i: (i, 0, 0, 0)),
            pl.BlockSpec((9, cin, cout), lambda i: (0, 0, 0)),
        ],
        out_specs=[
            pl.BlockSpec((1, ho, wo, cout), lambda i: (i, 0, 0, 0)),
            pl.BlockSpec((1, 1, cout), lambda i: (i, 0, 0)),
            pl.BlockSpec((1, 1, cout), lambda i: (i, 0, 0)),
        ],
        out_shape=[
            jax.ShapeDtypeStruct((n, ho, wo, cout), jnp.float32),
            jax.ShapeDtypeStruct((n, 1, cout), jnp.float32),
            jax.ShapeDtypeStruct((n, 1, cout), jnp.float32),
        ],
        compiler_params=_COMPILER_PARAMS,
    )(xp, w.astype(jnp.bfloat16))
    return y, s, ss


def bnrelu_conv3x3_stats(y1, s1, ss1, gamma, beta, w):
    n, ho, wo, cin = y1.shape
    cout = w.shape[-1]
    count = float(n * ho * wo)
    kern = functools.partial(_bnrelu_conv3x3_stats_kernel, count=count,
                             ho=ho, wo=wo, cin=cin, cout=cout)
    y2, s2, ss2 = pl.pallas_call(
        kern,
        grid=(n,),
        in_specs=[
            pl.BlockSpec((1, ho, wo, cin), lambda i: (i, 0, 0, 0)),
            pl.BlockSpec((n, 1, cin), lambda i: (0, 0, 0)),
            pl.BlockSpec((n, 1, cin), lambda i: (0, 0, 0)),
            pl.BlockSpec((1, cin), lambda i: (0, 0)),
            pl.BlockSpec((1, cin), lambda i: (0, 0)),
            pl.BlockSpec((9, cin, cout), lambda i: (0, 0, 0)),
        ],
        out_specs=[
            pl.BlockSpec((1, ho, wo, cout), lambda i: (i, 0, 0, 0)),
            pl.BlockSpec((1, 1, cout), lambda i: (i, 0, 0)),
            pl.BlockSpec((1, 1, cout), lambda i: (i, 0, 0)),
        ],
        out_shape=[
            jax.ShapeDtypeStruct((n, ho, wo, cout), jnp.float32),
            jax.ShapeDtypeStruct((n, 1, cout), jnp.float32),
            jax.ShapeDtypeStruct((n, 1, cout), jnp.float32),
        ],
        scratch_shapes=[pltpu.VMEM((ho + 2, wo + 2, cin), jnp.float32)],
        compiler_params=_COMPILER_PARAMS,
    )(y1, s1, ss1, gamma, beta, w.astype(jnp.bfloat16))
    return y2, s2, ss2


def bn_add_relu(y2, s2, ss2, gamma, beta, residual, ch_pad):
    n, ho, wo, cout = y2.shape
    m = n * ho * wo
    cres = residual.shape[-1]
    yf = y2.reshape(m, cout)
    rf = residual.reshape(m, cres)
    tm = m if m <= 2048 else 1024
    kern = functools.partial(_bn_add_relu_kernel, count=float(m), ch_pad=ch_pad)
    out = pl.pallas_call(
        kern,
        grid=(pl.cdiv(m, tm),),
        in_specs=[
            pl.BlockSpec((tm, cout), lambda i: (i, 0)),
            pl.BlockSpec((n, 1, cout), lambda i: (0, 0, 0)),
            pl.BlockSpec((n, 1, cout), lambda i: (0, 0, 0)),
            pl.BlockSpec((1, cout), lambda i: (0, 0)),
            pl.BlockSpec((1, cout), lambda i: (0, 0)),
            pl.BlockSpec((tm, cres), lambda i: (i, 0)),
        ],
        out_specs=pl.BlockSpec((tm, cout), lambda i: (i, 0)),
        out_shape=jax.ShapeDtypeStruct((m, cout), jnp.float32),
        compiler_params=_COMPILER_PARAMS,
    )(yf, s2, ss2, gamma, beta, rf)
    return out.reshape(n, ho, wo, cout)


# ------------------------------ block forward -------------------------------

def basic_block_rn32(params, x_nhwc, stride):
    """BasicBlock_RN32 forward, NHWC in / NHWC out, train-mode BatchNorm."""
    n, h, w, in_planes = x_nhwc.shape
    planes = params["w1"].shape[-1]
    y1, s1, ss1 = conv3x3_stats(x_nhwc, params["w1"], stride)
    y2, s2, ss2 = bnrelu_conv3x3_stats(y1, s1, ss1, params["g1"], params["b1"],
                                       params["w2"])
    ho, wo = y2.shape[1], y2.shape[2]
    if stride != 1 or in_planes != planes:
        # option 'A' shortcut: spatial subsample here; channel zero-padding
        # happens inside the final kernel.
        r = x_nhwc[:, ::2, ::2, :][:, :ho, :wo, :]
        ch_pad = planes // 4
        assert in_planes + 2 * ch_pad == planes, \
            "option-A shortcut assumes planes == 2 * in_planes"
    else:
        r = x_nhwc
        ch_pad = 0
    return bn_add_relu(y2, s2, ss2, params["g2"], params["b2"], r, ch_pad)


def init_block_params(key, in_planes, planes):
    k1, k2 = jax.random.split(key)

    def kaiming(k, cin, cout):
        w = jax.random.normal(k, (3, 3, cin, cout), jnp.float32)
        return (w * jnp.sqrt(2.0 / (9.0 * cin))).reshape(9, cin, cout)

    return {
        "w1": kaiming(k1, in_planes, planes),
        "g1": jnp.ones((1, planes), jnp.float32),
        "b1": jnp.zeros((1, planes), jnp.float32),
        "w2": kaiming(k2, planes, planes),
        "g2": jnp.ones((1, planes), jnp.float32),
        "b2": jnp.zeros((1, planes), jnp.float32),
    }


# --------------------------- pure-JAX reference ------------------------------

def _reference_block(params, x_nhwc, stride):
    def conv(x, w, s):
        w_hwio = w.reshape(3, 3, w.shape[1], w.shape[2])
        return jax.lax.conv_general_dilated(
            x, w_hwio, window_strides=(s, s), padding=((1, 1), (1, 1)),
            dimension_numbers=("NHWC", "HWIO", "NHWC"),
            precision=jax.lax.Precision.HIGHEST)

    def bn(y, g, b):
        mu = jnp.mean(y, axis=(0, 1, 2), keepdims=True)
        var = jnp.mean((y - mu) ** 2, axis=(0, 1, 2), keepdims=True)
        return ((y - mu) * jax.lax.rsqrt(var + _BN_EPS)
                * g.reshape(1, 1, 1, -1) + b.reshape(1, 1, 1, -1))

    in_planes = x_nhwc.shape[-1]
    planes = params["w1"].shape[-1]
    h = jax.nn.relu(bn(conv(x_nhwc, params["w1"], stride),
                       params["g1"], params["b1"]))
    y = bn(conv(h, params["w2"], 1), params["g2"], params["b2"])
    if stride != 1 or in_planes != planes:
        pad = planes // 4
        r = jnp.pad(x_nhwc[:, ::2, ::2, :],
                    ((0, 0), (0, 0), (0, 0), (pad, pad)))
    else:
        r = x_nhwc
    return jax.nn.relu(y + r)


# ---------------------------------- main -------------------------------------

if __name__ == "__main__":
    key = jax.random.PRNGKey(0)
    kp1, kp2, kx = jax.random.split(key, 3)

    # Block 1: identity shortcut (in_planes == planes, stride=1)
    p_id = init_block_params(kp1, 16, 16)
    # Block 2: option-A shortcut (planes == 2*in_planes, stride=2)
    p_dn = init_block_params(kp2, 16, 32)

    x = jax.random.normal(kx, (2, 16, 16, 16), jnp.float32)  # NCHW like PyTorch

    @jax.jit
    def fwd(pa, pb, x_in):
        h = jnp.transpose(x_in, (0, 2, 3, 1))                 # NCHW -> NHWC
        h = basic_block_rn32(pa, h, stride=1)
        h = basic_block_rn32(pb, h, stride=2)
        return jnp.transpose(h, (0, 3, 1, 2))                 # NHWC -> NCHW

    out = fwd(p_id, p_dn, x)
    jax.block_until_ready(out)
    assert out.shape == (2, 32, 8, 8) and out.dtype == jnp.float32
    assert bool(jnp.all(jnp.isfinite(out)))

    # numerical check against a pure-JAX reference (bf16 MXU operands -> loose tol)
    x_nhwc = jnp.transpose(x, (0, 2, 3, 1))
    ref = _reference_block(p_dn, _reference_block(p_id, x_nhwc, 1), 2)
    ref = jnp.transpose(ref, (0, 3, 1, 2))
    err = float(jnp.max(jnp.abs(out - ref)))
    assert err < 0.25, f"max abs error vs reference too large: {err}"

    print("KERNEL_OK")
</pallas_src>

<mosaic_0001>
module attributes {stable_mosaic.version = 11 : i64} {
  func.func @_bnrelu_conv3x3_stats_kernel(%arg0: i32, %arg1: memref<1x16x16x16xf32, #tpu.memory_space<vmem>>, %arg2: memref<2x1x16xf32, #tpu.memory_space<vmem>>, %arg3: memref<2x1x16xf32, #tpu.memory_space<vmem>>, %arg4: memref<1x16xf32, #tpu.memory_space<vmem>>, %arg5: memref<1x16xf32, #tpu.memory_space<vmem>>, %arg6: memref<9x16x16xbf16, #tpu.memory_space<vmem>>, %arg7: memref<1x16x16x16xf32, #tpu.memory_space<vmem>>, %arg8: memref<1x1x16xf32, #tpu.memory_space<vmem>>, %arg9: memref<1x1x16xf32, #tpu.memory_space<vmem>>, %arg10: memref<18x18x16xf32, #tpu.memory_space<vmem>>) attributes {dimension_semantics = [#tpu.dimension_semantics<parallel>], iteration_bounds = array<i64: 2>, scalar_prefetch = 0 : i64, scratch_operands = 1 : i64, tpu.core_type = #tpu.core_type<tc>, window_params = [{transform_indices = @transform_0, window_bounds = array<i64: 1, 16, 16, 16>}, {pipeline_mode = #tpu.pipeline_mode<synchronous>, transform_indices = @transform_1, window_bounds = array<i64: 2, 1, 16>}, {pipeline_mode = #tpu.pipeline_mode<synchronous>, transform_indices = @transform_2, window_bounds = array<i64: 2, 1, 16>}, {pipeline_mode = #tpu.pipeline_mode<synchronous>, transform_indices = @transform_3, window_bounds = array<i64: 1, 16>}, {pipeline_mode = #tpu.pipeline_mode<synchronous>, transform_indices = @transform_4, window_bounds = array<i64: 1, 16>}, {pipeline_mode = #tpu.pipeline_mode<synchronous>, transform_indices = @transform_5, window_bounds = array<i64: 9, 16, 16>}, {transform_indices = @transform_6, window_bounds = array<i64: 1, 16, 16, 16>}, {transform_indices = @transform_7, window_bounds = array<i64: 1, 1, 16>}, {transform_indices = @transform_8, window_bounds = array<i64: 1, 1, 16>}]} {
    %c0 = arith.constant 0 : index
    %c0_0 = arith.constant 0 : index
    %c0_1 = arith.constant 0 : index
    %0 = vector.load %arg2[%c0, %c0_0, %c0_1] : memref<2x1x16xf32, #tpu.memory_space<vmem>>, vector<2x1x16xf32>
    %cst = arith.constant dense<0.000000e+00> : vector<1x16xf32>
    %1 = vector.multi_reduction <add>, %0, %cst [0] : vector<2x1x16xf32> to vector<1x16xf32>
    %cst_2 = arith.constant 0.001953125 : f32
    %2 = vector.broadcast %cst_2 : f32 to vector<1x16xf32>
    %3 = arith.mulf %1, %2 : vector<1x16xf32>
    %c0_3 = arith.constant 0 : index
    %c0_4 = arith.constant 0 : index
    %c0_5 = arith.constant 0 : index
    %4 = vector.load %arg3[%c0_3, %c0_4, %c0_5] : memref<2x1x16xf32, #tpu.memory_space<vmem>>, vector<2x1x16xf32>
    %cst_6 = arith.constant dense<0.000000e+00> : vector<1x16xf32>
    %5 = vector.multi_reduction <add>, %4, %cst_6 [0] : vector<2x1x16xf32> to vector<1x16xf32>
    %cst_7 = arith.constant 0.001953125 : f32
    %6 = vector.broadcast %cst_7 : f32 to vector<1x16xf32>
    %7 = arith.mulf %5, %6 : vector<1x16xf32>
    %8 = arith.mulf %3, %3 : vector<1x16xf32>
    %9 = arith.subf %7, %8 : vector<1x16xf32>
    %c0_8 = arith.constant 0 : index
    %c0_9 = arith.constant 0 : index
    %10 = vector.load %arg4[%c0_8, %c0_9] : memref<1x16xf32, #tpu.memory_space<vmem>>, vector<1x16xf32>
    %cst_10 = arith.constant 9.99999974E-6 : f32
    %11 = vector.broadcast %cst_10 : f32 to vector<1x16xf32>
    %12 = arith.addf %9, %11 : vector<1x16xf32>
    %13 = math.rsqrt %12 : vector<1x16xf32>
    %14 = arith.mulf %10, %13 : vector<1x16xf32>
    %c0_11 = arith.constant 0 : index
    %c0_12 = arith.constant 0 : index
    %15 = vector.load %arg5[%c0_11, %c0_12] : memref<1x16xf32, #tpu.memory_space<vmem>>, vector<1x16xf32>
    %16 = arith.mulf %3, %14 : vector<1x16xf32>
    %17 = arith.subf %15, %16 : vector<1x16xf32>
    %c0_13 = arith.constant 0 : index
    %c0_14 = arith.constant 0 : index
    %c0_15 = arith.constant 0 : index
    %c0_16 = arith.constant 0 : index
    %18 = vector.load %arg1[%c0_13, %c0_14, %c0_15, %c0_16] : memref<1x16x16x16xf32, #tpu.memory_space<vmem>>, vector<1x16x16x16xf32>
    %19 = vector.shape_cast %18 : vector<1x16x16x16xf32> to vector<16x16x16xf32>
    %20 = vector.shape_cast %14 : vector<1x16xf32> to vector<1x1x16xf32>
    %21 = vector.broadcast %20 : vector<1x1x16xf32> to vector<16x16x16xf32>
    %22 = arith.mulf %19, %21 : vector<16x16x16xf32>
    %23 = vector.shape_cast %17 : vector<1x16xf32> to vector<1x1x16xf32>
    %24 = vector.broadcast %23 : vector<1x1x16xf32> to vector<16x16x16xf32>
    %25 = arith.addf %22, %24 : vector<16x16x16xf32>
    %cst_17 = arith.constant 0.000000e+00 : f32
    %26 = vector.broadcast %cst_17 : f32 to vector<16x16x16xf32>
    %27 = arith.maximumf %25, %26 : vector<16x16x16xf32>
    %cst_18 = arith.constant 0.000000e+00 : f32
    %28 = vector.broadcast %cst_18 : f32 to vector<18x18x16xf32>
    %c0_19 = arith.constant 0 : index
    %c0_20 = arith.constant 0 : index
    %c0_21 = arith.constant 0 : index
    %29 = vector.load %arg10[%c0_19, %c0_20, %c0_21] : memref<18x18x16xf32, #tpu.memory_space<vmem>>, vector<18x18x16xf32>
    tpu.vector_store %arg10[%c0_19, %c0_20, %c0_21], %28 {strides = array<i32>} : memref<18x18x16xf32, #tpu.memory_space<vmem>>, vector<18x18x16xf32>,
    %c1 = arith.constant 1 : index
    %c1_22 = arith.constant 1 : index
    %c0_23 = arith.constant 0 : index
    %30 = vector.load %arg10[%c1, %c1_22, %c0_23] : memref<18x18x16xf32, #tpu.memory_space<vmem>>, vector<16x16x16xf32>
    tpu.vector_store %arg10[%c1, %c1_22, %c0_23], %27 {strides = array<i32>} : memref<18x18x16xf32, #tpu.memory_space<vmem>>, vector<16x16x16xf32>,
    %cst_24 = arith.constant 0.000000e+00 : f32
    %31 = vector.broadcast %cst_24 : f32 to vector<256x16xf32>
    %c0_25 = arith.constant 0 : index
    %c0_26 = arith.constant 0 : index
    %c0_27 = arith.constant 0 : index
    %32 = vector.load %arg10[%c0_25, %c0_26, %c0_27] : memref<18x18x16xf32, #tpu.memory_space<vmem>>, vector<16x16x16xf32>
    %33 = vector.shape_cast %32 : vector<16x16x16xf32> to vector<256x16xf32>
    %34 = arith.truncf %33 : vector<256x16xf32> to vector<256x16xbf16>
    %c0_28 = arith.constant 0 : index
    %c0_29 = arith.constant 0 : index
    %c0_30 = arith.constant 0 : index
    %35 = vector.load %arg6[%c0_28, %c0_29, %c0_30] : memref<9x16x16xbf16, #tpu.memory_space<vmem>>, vector<1x16x16xbf16>
    %36 = vector.shape_cast %35 : vector<1x16x16xbf16> to vector<16x16xbf16>
    %cst_31 = arith.constant dense<0.000000e+00> : vector<256x16xf32>
    %37 = tpu.matmul %34, %36, %cst_31 {dimension_numbers = #tpu.dot_dimension_numbers<[1], [0], [0], [1], [0, 0, 1, 1], [], []>} : vector<256x16xbf16>, vector<16x16xbf16>, vector<256x16xf32> -> vector<256x16xf32>
    %38 = arith.addf %31, %37 : vector<256x16xf32>
    %c0_32 = arith.constant 0 : index
    %c1_33 = arith.constant 1 : index
    %c0_34 = arith.constant 0 : index
    %39 = vector.load %arg10[%c0_32, %c1_33, %c0_34] : memref<18x18x16xf32, #tpu.memory_space<vmem>>, vector<16x16x16xf32>
    %40 = vector.shape_cast %39 : vector<16x16x16xf32> to vector<256x16xf32>
    %41 = arith.truncf %40 : vector<256x16xf32> to vector<256x16xbf16>
    %c1_35 = arith.constant 1 : index
    %c0_36 = arith.constant 0 : index
    %c0_37 = arith.constant 0 : index
    %42 = vector.load %arg6[%c1_35, %c0_36, %c0_37] : memref<9x16x16xbf16, #tpu.memory_space<vmem>>, vector<1x16x16xbf16>
    %43 = vector.shape_cast %42 : vector<1x16x16xbf16> to vector<16x16xbf16>
    %cst_38 = arith.constant dense<0.000000e+00> : vector<256x16xf32>
    %44 = tpu.matmul %41, %43, %cst_38 {dimension_numbers = #tpu.dot_dimension_numbers<[1], [0], [0], [1], [0, 0, 1, 1], [], []>} : vector<256x16xbf16>, vector<16x16xbf16>, vector<256x16xf32> -> vector<256x16xf32>
    %45 = arith.addf %38, %44 : vector<256x16xf32>
    %c0_39 = arith.constant 0 : index
    %c2 = arith.constant 2 : index
    %c0_40 = arith.constant 0 : index
    %46 = vector.load %arg10[%c0_39, %c2, %c0_40] : memref<18x18x16xf32, #tpu.memory_space<vmem>>, vector<16x16x16xf32>
    %47 = vector.shape_cast %46 : vector<16x16x16xf32> to vector<256x16xf32>
    %48 = arith.truncf %47 : vector<256x16xf32> to vector<256x16xbf16>
    %c2_41 = arith.constant 2 : index
    %c0_42 = arith.constant 0 : index
    %c0_43 = arith.constant 0 : index
    %49 = vector.load %arg6[%c2_41, %c0_42, %c0_43] : memref<9x16x16xbf16, #tpu.memory_space<vmem>>, vector<1x16x16xbf16>
    %50 = vector.shape_cast %49 : vector<1x16x16xbf16> to vector<16x16xbf16>
    %cst_44 = arith.constant dense<0.000000e+00> : vector<256x16xf32>
    %51 = tpu.matmul %48, %50, %cst_44 {dimension_numbers = #tpu.dot_dimension_numbers<[1], [0], [0], [1], [0, 0, 1, 1], [], []>} : vector<256x16xbf16>, vector<16x16xbf16>, vector<256x16xf32> -> vector<256x16xf32>
    %52 = arith.addf %45, %51 : vector<256x16xf32>
    %c1_45 = arith.constant 1 : index
    %c0_46 = arith.constant 0 : index
    %c0_47 = arith.constant 0 : index
    %53 = vector.load %arg10[%c1_45, %c0_46, %c0_47] : memref<18x18x16xf32, #tpu.memory_space<vmem>>, vector<16x16x16xf32>
    %54 = vector.shape_cast %53 : vector<16x16x16xf32> to vector<256x16xf32>
    %55 = arith.truncf %54 : vector<256x16xf32> to vector<256x16xbf16>
    %c3 = arith.constant 3 : index
    %c0_48 = arith.constant 0 : index
    %c0_49 = arith.constant 0 : index
    %56 = vector.load %arg6[%c3, %c0_48, %c0_49] : memref<9x16x16xbf16, #tpu.memory_space<vmem>>, vector<1x16x16xbf16>
    %57 = vector.shape_cast %56 : vector<1x16x16xbf16> to vector<16x16xbf16>
    %cst_50 = arith.constant dense<0.000000e+00> : vector<256x16xf32>
    %58 = tpu.matmul %55, %57, %cst_50 {dimension_numbers = #tpu.dot_dimension_numbers<[1], [0], [0], [1], [0, 0, 1, 1], [], []>} : vector<256x16xbf16>, vector<16x16xbf16>, vector<256x16xf32> -> vector<256x16xf32>
    %59 = arith.addf %52, %58 : vector<256x16xf32>
    %c1_51 = arith.constant 1 : index
    %c1_52 = arith.constant 1 : index
    %c0_53 = arith.constant 0 : index
    %60 = vector.load %arg10[%c1_51, %c1_52, %c0_53] : memref<18x18x16xf32, #tpu.memory_space<vmem>>, vector<16x16x16xf32>
    %61 = vector.shape_cast %60 : vector<16x16x16xf32> to vector<256x16xf32>
    %62 = arith.truncf %61 : vector<256x16xf32> to vector<256x16xbf16>
    %c4 = arith.constant 4 : index
    %c0_54 = arith.constant 0 : index
    %c0_55 = arith.constant 0 : index
    %63 = vector.load %arg6[%c4, %c0_54, %c0_55] : memref<9x16x16xbf16, #tpu.memory_space<vmem>>, vector<1x16x16xbf16>
    %64 = vector.shape_cast %63 : vector<1x16x16xbf16> to vector<16x16xbf16>
    %cst_56 = arith.constant dense<0.000000e+00> : vector<256x16xf32>
    %65 = tpu.matmul %62, %64, %cst_56 {dimension_numbers = #tpu.dot_dimension_numbers<[1], [0], [0], [1], [0, 0, 1, 1], [], []>} : vector<256x16xbf16>, vector<16x16xbf16>, vector<256x16xf32> -> vector<256x16xf32>
    %66 = arith.addf %59, %65 : vector<256x16xf32>
    %c1_57 = arith.constant 1 : index
    %c2_58 = arith.constant 2 : index
    %c0_59 = arith.constant 0 : index
    %67 = vector.load %arg10[%c1_57, %c2_58, %c0_59] : memref<18x18x16xf32, #tpu.memory_space<vmem>>, vector<16x16x16xf32>
    %68 = vector.shape_cast %67 : vector<16x16x16xf32> to vector<256x16xf32>
    %69 = arith.truncf %68 : vector<256x16xf32> to vector<256x16xbf16>
    %c5 = arith.constant 5 : index
    %c0_60 = arith.constant 0 : index
    %c0_61 = arith.constant 0 : index
    %70 = vector.load %arg6[%c5, %c0_60, %c0_61] : memref<9x16x16xbf16, #tpu.memory_space<vmem>>, vector<1x16x16xbf16>
    %71 = vector.shape_cast %70 : vector<1x16x16xbf16> to vector<16x16xbf16>
    %cst_62 = arith.constant dense<0.000000e+00> : vector<256x16xf32>
    %72 = tpu.matmul %69, %71, %cst_62 {dimension_numbers = #tpu.dot_dimension_numbers<[1], [0], [0], [1], [0, 0, 1, 1], [], []>} : vector<256x16xbf16>, vector<16x16xbf16>, vector<256x16xf32> -> vector<256x16xf32>
    %73 = arith.addf %66, %72 : vector<256x16xf32>
    %c2_63 = arith.constant 2 : index
    %c0_64 = arith.constant 0 : index
    %c0_65 = arith.constant 0 : index
    %74 = vector.load %arg10[%c2_63, %c0_64, %c0_65] : memref<18x18x16xf32, #tpu.memory_space<vmem>>, vector<16x16x16xf32>
    %75 = vector.shape_cast %74 : vector<16x16x16xf32> to vector<256x16xf32>
    %76 = arith.truncf %75 : vector<256x16xf32> to vector<256x16xbf16>
    %c6 = arith.constant 6 : index
    %c0_66 = arith.constant 0 : index
    %c0_67 = arith.constant 0 : index
    %77 = vector.load %arg6[%c6, %c0_66, %c0_67] : memref<9x16x16xbf16, #tpu.memory_space<vmem>>, vector<1x16x16xbf16>
    %78 = vector.shape_cast %77 : vector<1x16x16xbf16> to vector<16x16xbf16>
    %cst_68 = arith.constant dense<0.000000e+00> : vector<256x16xf32>
    %79 = tpu.matmul %76, %78, %cst_68 {dimension_numbers = #tpu.dot_dimension_numbers<[1], [0], [0], [1], [0, 0, 1, 1], [], []>} : vector<256x16xbf16>, vector<16x16xbf16>, vector<256x16xf32> -> vector<256x16xf32>
    %80 = arith.addf %73, %79 : vector<256x16xf32>
    %c2_69 = arith.constant 2 : index
    %c1_70 = arith.constant 1 : index
    %c0_71 = arith.constant 0 : index
    %81 = vector.load %arg10[%c2_69, %c1_70, %c0_71] : memref<18x18x16xf32, #tpu.memory_space<vmem>>, vector<16x16x16xf32>
    %82 = vector.shape_cast %81 : vector<16x16x16xf32> to vector<256x16xf32>
    %83 = arith.truncf %82 : vector<256x16xf32> to vector<256x16xbf16>
    %c7 = arith.constant 7 : index
    %c0_72 = arith.constant 0 : index
    %c0_73 = arith.constant 0 : index
    %84 = vector.load %arg6[%c7, %c0_72, %c0_73] : memref<9x16x16xbf16, #tpu.memory_space<vmem>>, vector<1x16x16xbf16>
    %85 = vector.shape_cast %84 : vector<1x16x16xbf16> to vector<16x16xbf16>
    %cst_74 = arith.constant dense<0.000000e+00> : vector<256x16xf32>
    %86 = tpu.matmul %83, %85, %cst_74 {dimension_numbers = #tpu.dot_dimension_numbers<[1], [0], [0], [1], [0, 0, 1, 1], [], []>} : vector<256x16xbf16>, vector<16x16xbf16>, vector<256x16xf32> -> vector<256x16xf32>
    %87 = arith.addf %80, %86 : vector<256x16xf32>
    %c2_75 = arith.constant 2 : index
    %c2_76 = arith.constant 2 : index
    %c0_77 = arith.constant 0 : index
    %88 = vector.load %arg10[%c2_75, %c2_76, %c0_77] : memref<18x18x16xf32, #tpu.memory_space<vmem>>, vector<16x16x16xf32>
    %89 = vector.shape_cast %88 : vector<16x16x16xf32> to vector<256x16xf32>
    %90 = arith.truncf %89 : vector<256x16xf32> to vector<256x16xbf16>
    %c8 = arith.constant 8 : index
    %c0_78 = arith.constant 0 : index
    %c0_79 = arith.constant 0 : index
    %91 = vector.load %arg6[%c8, %c0_78, %c0_79] : memref<9x16x16xbf16, #tpu.memory_space<vmem>>, vector<1x16x16xbf16>
    %92 = vector.shape_cast %91 : vector<1x16x16xbf16> to vector<16x16xbf16>
    %cst_80 = arith.constant dense<0.000000e+00> : vector<256x16xf32>
    %93 = tpu.matmul %90, %92, %cst_80 {dimension_numbers = #tpu.dot_dimension_numbers<[1], [0], [0], [1], [0, 0, 1, 1], [], []>} : vector<256x16xbf16>, vector<16x16xbf16>, vector<256x16xf32> -> vector<256x16xf32>
    %94 = arith.addf %87, %93 : vector<256x16xf32>
    %95 = vector.shape_cast %94 : vector<256x16xf32> to vector<16x16x16xf32>
    %c0_81 = arith.constant 0 : index
    %c0_82 = arith.constant 0 : index
    %c0_83 = arith.constant 0 : index
    %c0_84 = arith.constant 0 : index
    %96 = vector.load %arg7[%c0_81, %c0_82, %c0_83, %c0_84] : memref<1x16x16x16xf32, #tpu.memory_space<vmem>>, vector<1x16x16x16xf32>
    %97 = vector.shape_cast %96 : vector<1x16x16x16xf32> to vector<16x16x16xf32>
    %98 = vector.shape_cast %95 : vector<16x16x16xf32> to vector<1x16x16x16xf32>
    tpu.vector_store %arg7[%c0_81, %c0_82, %c0_83, %c0_84], %98 {strides = array<i32>} : memref<1x16x16x16xf32, #tpu.memory_space<vmem>>, vector<1x16x16x16xf32>,
    %cst_85 = arith.constant dense<0.000000e+00> : vector<16xf32>
    %99 = vector.multi_reduction <add>, %94, %cst_85 [0] : vector<256x16xf32> to vector<16xf32>
    %100 = vector.shape_cast %99 : vector<16xf32> to vector<1x16xf32>
    %101 = vector.shape_cast %100 : vector<1x16xf32> to vector<1x1x16xf32>
    %c0_86 = arith.constant 0 : index
    %c0_87 = arith.constant 0 : index
    %c0_88 = arith.constant 0 : index
    %102 = vector.load %arg8[%c0_86, %c0_87, %c0_88] : memref<1x1x16xf32, #tpu.memory_space<vmem>>, vector<1x1x16xf32>
    tpu.vector_store %arg8[%c0_86, %c0_87, %c0_88], %101 {strides = array<i32>} : memref<1x1x16xf32, #tpu.memory_space<vmem>>, vector<1x1x16xf32>,
    %103 = arith.mulf %94, %94 : vector<256x16xf32>
    %cst_89 = arith.constant dense<0.000000e+00> : vector<16xf32>
    %104 = vector.multi_reduction <add>, %103, %cst_89 [0] : vector<256x16xf32> to vector<16xf32>
    %105 = vector.shape_cast %104 : vector<16xf32> to vector<1x16xf32>
    %106 = vector.shape_cast %105 : vector<1x16xf32> to vector<1x1x16xf32>
    %c0_90 = arith.constant 0 : index
    %c0_91 = arith.constant 0 : index
    %c0_92 = arith.constant 0 : index
    %107 = vector.load %arg9[%c0_90, %c0_91, %c0_92] : memref<1x1x16xf32, #tpu.memory_space<vmem>>, vector<1x1x16xf32>
    tpu.vector_store %arg9[%c0_90, %c0_91, %c0_92], %106 {strides = array<i32>} : memref<1x1x16xf32, #tpu.memory_space<vmem>>, vector<1x1x16xf32>,
    return
  }
  func.func @transform_0(%arg0: i32) -> (i32, i32, i32, i32) {
    %c0_i32 = arith.constant 0 : i32
    %c0_i32_0 = arith.constant 0 : i32
    %c0_i32_1 = arith.constant 0 : i32
    %c0_i32_2 = arith.constant 0 : i32
    return %arg0, %c0_i32, %c0_i32_0, %c0_i32_1 : i32, i32, i32, i32
  }
  func.func @transform_1(%arg0: i32) -> (i32, i32, i32) {
    %c0_i32 = arith.constant 0 : i32
    %c0_i32_0 = arith.constant 0 : i32
    %c0_i32_1 = arith.constant 0 : i32
    %c0_i32_2 = arith.constant 0 : i32
    return %c0_i32, %c0_i32_0, %c0_i32_1 : i32, i32, i32
  }
  func.func @transform_2(%arg0: i32) -> (i32, i32, i32) {
    %c0_i32 = arith.constant 0 : i32
    %c0_i32_0 = arith.constant 0 : i32
    %c0_i32_1 = arith.constant 0 : i32
    %c0_i32_2 = arith.constant 0 : i32
    return %c0_i32, %c0_i32_0, %c0_i32_1 : i32, i32, i32
  }
  func.func @transform_3(%arg0: i32) -> (i32, i32) {
    %c0_i32 = arith.constant 0 : i32
    %c0_i32_0 = arith.constant 0 : i32
    %c0_i32_1 = arith.constant 0 : i32
    return %c0_i32, %c0_i32_0 : i32, i32
  }
  func.func @transform_4(%arg0: i32) -> (i32, i32) {
    %c0_i32 = arith.constant 0 : i32
    %c0_i32_0 = arith.constant 0 : i32
    %c0_i32_1 = arith.constant 0 : i32
    return %c0_i32, %c0_i32_0 : i32, i32
  }
  func.func @transform_5(%arg0: i32) -> (i32, i32, i32) {
    %c0_i32 = arith.constant 0 : i32
    %c0_i32_0 = arith.constant 0 : i32
    %c0_i32_1 = arith.constant 0 : i32
    %c0_i32_2 = arith.constant 0 : i32
    return %c0_i32, %c0_i32_0, %c0_i32_1 : i32, i32, i32
  }
  func.func @transform_6(%arg0: i32) -> (i32, i32, i32, i32) {
    %c0_i32 = arith.constant 0 : i32
    %c0_i32_0 = arith.constant 0 : i32
    %c0_i32_1 = arith.constant 0 : i32
    %c0_i32_2 = arith.constant 0 : i32
    return %arg0, %c0_i32, %c0_i32_0, %c0_i32_1 : i32, i32, i32, i32
  }
  func.func @transform_7(%arg0: i32) -> (i32, i32, i32) {
    %c0_i32 = arith.constant 0 : i32
    %c0_i32_0 = arith.constant 0 : i32
    %c0_i32_1 = arith.constant 0 : i32
    return %arg0, %c0_i32, %c0_i32_0 : i32, i32, i32
  }
  func.func @transform_8(%arg0: i32) -> (i32, i32, i32) {
    %c0_i32 = arith.constant 0 : i32
    %c0_i32_0 = arith.constant 0 : i32
    %c0_i32_1 = arith.constant 0 : i32
    return %arg0, %c0_i32, %c0_i32_0 : i32, i32, i32
  }
}

module attributes {stable_mosaic.version = 11 : i64} {
  func.func @_conv3x3_stats_kernel(%arg0: i32, %arg1: memref<1x18x18x16xf32, #tpu.memory_space<vmem>>, %arg2: memref<9x16x16xbf16, #tpu.memory_space<vmem>>, %arg3: memref<1x16x16x16xf32, #tpu.memory_space<vmem>>, %arg4: memref<1x1x16xf32, #tpu.memory_space<vmem>>, %arg5: memref<1x1x16xf32, #tpu.memory_space<vmem>>) attributes {dimension_semantics = [#tpu.dimension_semantics<parallel>], iteration_bounds = array<i64: 2>, scalar_prefetch = 0 : i64, scratch_operands = 0 : i64, tpu.core_type = #tpu.core_type<tc>, window_params = [{transform_indices = @transform_0, window_bounds = array<i64: 1, 18, 18, 16>}, {pipeline_mode = #tpu.pipeline_mode<synchronous>, transform_indices = @transform_1, window_bounds = array<i64: 9, 16, 16>}, {transform_indices = @transform_2, window_bounds = array<i64: 1, 16, 16, 16>}, {transform_indices = @transform_3, window_bounds = array<i64: 1, 1, 16>}, {transform_indices = @transform_4, window_bounds = array<i64: 1, 1, 16>}]} {
    %cst = arith.constant 0.000000e+00 : f32
    %0 = vector.broadcast %cst : f32 to vector<256x16xf32>
    %c0 = arith.constant 0 : index
    %c0_0 = arith.constant 0 : index
    %c0_1 = arith.constant 0 : index
    %c0_2 = arith.constant 0 : index
    %1 = vector.load %arg1[%c0, %c0_0, %c0_1, %c0_2] : memref<1x18x18x16xf32, #tpu.memory_space<vmem>>, vector<1x16x16x16xf32>
    %2 = vector.shape_cast %1 : vector<1x16x16x16xf32> to vector<16x16x16xf32>
    %3 = vector.shape_cast %2 : vector<16x16x16xf32> to vector<256x16xf32>
    %4 = arith.truncf %3 : vector<256x16xf32> to vector<256x16xbf16>
    %c0_3 = arith.constant 0 : index
    %c0_4 = arith.constant 0 : index
    %c0_5 = arith.constant 0 : index
    %5 = vector.load %arg2[%c0_3, %c0_4, %c0_5] : memref<9x16x16xbf16, #tpu.memory_space<vmem>>, vector<1x16x16xbf16>
    %6 = vector.shape_cast %5 : vector<1x16x16xbf16> to vector<16x16xbf16>
    %cst_6 = arith.constant dense<0.000000e+00> : vector<256x16xf32>
    %7 = tpu.matmul %4, %6, %cst_6 {dimension_numbers = #tpu.dot_dimension_numbers<[1], [0], [0], [1], [0, 0, 1, 1], [], []>} : vector<256x16xbf16>, vector<16x16xbf16>, vector<256x16xf32> -> vector<256x16xf32>
    %8 = arith.addf %0, %7 : vector<256x16xf32>
    %c0_7 = arith.constant 0 : index
    %c0_8 = arith.constant 0 : index
    %c1 = arith.constant 1 : index
    %c0_9 = arith.constant 0 : index
    %9 = vector.load %arg1[%c0_7, %c0_8, %c1, %c0_9] : memref<1x18x18x16xf32, #tpu.memory_space<vmem>>, vector<1x16x16x16xf32>
    %10 = vector.shape_cast %9 : vector<1x16x16x16xf32> to vector<16x16x16xf32>
    %11 = vector.shape_cast %10 : vector<16x16x16xf32> to vector<256x16xf32>
    %12 = arith.truncf %11 : vector<256x16xf32> to vector<256x16xbf16>
    %c1_10 = arith.constant 1 : index
    %c0_11 = arith.constant 0 : index
    %c0_12 = arith.constant 0 : index
    %13 = vector.load %arg2[%c1_10, %c0_11, %c0_12] : memref<9x16x16xbf16, #tpu.memory_space<vmem>>, vector<1x16x16xbf16>
    %14 = vector.shape_cast %13 : vector<1x16x16xbf16> to vector<16x16xbf16>
    %cst_13 = arith.constant dense<0.000000e+00> : vector<256x16xf32>
    %15 = tpu.matmul %12, %14, %cst_13 {dimension_numbers = #tpu.dot_dimension_numbers<[1], [0], [0], [1], [0, 0, 1, 1], [], []>} : vector<256x16xbf16>, vector<16x16xbf16>, vector<256x16xf32> -> vector<256x16xf32>
    %16 = arith.addf %8, %15 : vector<256x16xf32>
    %c0_14 = arith.constant 0 : index
    %c0_15 = arith.constant 0 : index
    %c2 = arith.constant 2 : index
    %c0_16 = arith.constant 0 : index
    %17 = vector.load %arg1[%c0_14, %c0_15, %c2, %c0_16] : memref<1x18x18x16xf32, #tpu.memory_space<vmem>>, vector<1x16x16x16xf32>
    %18 = vector.shape_cast %17 : vector<1x16x16x16xf32> to vector<16x16x16xf32>
    %19 = vector.shape_cast %18 : vector<16x16x16xf32> to vector<256x16xf32>
    %20 = arith.truncf %19 : vector<256x16xf32> to vector<256x16xbf16>
    %c2_17 = arith.constant 2 : index
    %c0_18 = arith.constant 0 : index
    %c0_19 = arith.constant 0 : index
    %21 = vector.load %arg2[%c2_17, %c0_18, %c0_19] : memref<9x16x16xbf16, #tpu.memory_space<vmem>>, vector<1x16x16xbf16>
    %22 = vector.shape_cast %21 : vector<1x16x16xbf16> to vector<16x16xbf16>
    %cst_20 = arith.constant dense<0.000000e+00> : vector<256x16xf32>
    %23 = tpu.matmul %20, %22, %cst_20 {dimension_numbers = #tpu.dot_dimension_numbers<[1], [0], [0], [1], [0, 0, 1, 1], [], []>} : vector<256x16xbf16>, vector<16x16xbf16>, vector<256x16xf32> -> vector<256x16xf32>
    %24 = arith.addf %16, %23 : vector<256x16xf32>
    %c0_21 = arith.constant 0 : index
    %c1_22 = arith.constant 1 : index
    %c0_23 = arith.constant 0 : index
    %c0_24 = arith.constant 0 : index
    %25 = vector.load %arg1[%c0_21, %c1_22, %c0_23, %c0_24] : memref<1x18x18x16xf32, #tpu.memory_space<vmem>>, vector<1x16x16x16xf32>
    %26 = vector.shape_cast %25 : vector<1x16x16x16xf32> to vector<16x16x16xf32>
    %27 = vector.shape_cast %26 : vector<16x16x16xf32> to vector<256x16xf32>
    %28 = arith.truncf %27 : vector<256x16xf32> to vector<256x16xbf16>
    %c3 = arith.constant 3 : index
    %c0_25 = arith.constant 0 : index
    %c0_26 = arith.constant 0 : index
    %29 = vector.load %arg2[%c3, %c0_25, %c0_26] : memref<9x16x16xbf16, #tpu.memory_space<vmem>>, vector<1x16x16xbf16>
    %30 = vector.shape_cast %29 : vector<1x16x16xbf16> to vector<16x16xbf16>
    %cst_27 = arith.constant dense<0.000000e+00> : vector<256x16xf32>
    %31 = tpu.matmul %28, %30, %cst_27 {dimension_numbers = #tpu.dot_dimension_numbers<[1], [0], [0], [1], [0, 0, 1, 1], [], []>} : vector<256x16xbf16>, vector<16x16xbf16>, vector<256x16xf32> -> vector<256x16xf32>
    %32 = arith.addf %24, %31 : vector<256x16xf32>
    %c0_28 = arith.constant 0 : index
    %c1_29 = arith.constant 1 : index
    %c1_30 = arith.constant 1 : index
    %c0_31 = arith.constant 0 : index
    %33 = vector.load %arg1[%c0_28, %c1_29, %c1_30, %c0_31] : memref<1x18x18x16xf32, #tpu.memory_space<vmem>>, vector<1x16x16x16xf32>
    %34 = vector.shape_cast %33 : vector<1x16x16x16xf32> to vector<16x16x16xf32>
    %35 = vector.shape_cast %34 : vector<16x16x16xf32> to vector<256x16xf32>
    %36 = arith.truncf %35 : vector<256x16xf32> to vector<256x16xbf16>
    %c4 = arith.constant 4 : index
    %c0_32 = arith.constant 0 : index
    %c0_33 = arith.constant 0 : index
    %37 = vector.load %arg2[%c4, %c0_32, %c0_33] : memref<9x16x16xbf16, #tpu.memory_space<vmem>>, vector<1x16x16xbf16>
    %38 = vector.shape_cast %37 : vector<1x16x16xbf16> to vector<16x16xbf16>
    %cst_34 = arith.constant dense<0.000000e+00> : vector<256x16xf32>
    %39 = tpu.matmul %36, %38, %cst_34 {dimension_numbers = #tpu.dot_dimension_numbers<[1], [0], [0], [1], [0, 0, 1, 1], [], []>} : vector<256x16xbf16>, vector<16x16xbf16>, vector<256x16xf32> -> vector<256x16xf32>
    %40 = arith.addf %32, %39 : vector<256x16xf32>
    %c0_35 = arith.constant 0 : index
    %c1_36 = arith.constant 1 : index
    %c2_37 = arith.constant 2 : index
    %c0_38 = arith.constant 0 : index
    %41 = vector.load %arg1[%c0_35, %c1_36, %c2_37, %c0_38] : memref<1x18x18x16xf32, #tpu.memory_space<vmem>>, vector<1x16x16x16xf32>
    %42 = vector.shape_cast %41 : vector<1x16x16x16xf32> to vector<16x16x16xf32>
    %43 = vector.shape_cast %42 : vector<16x16x16xf32> to vector<256x16xf32>
    %44 = arith.truncf %43 : vector<256x16xf32> to vector<256x16xbf16>
    %c5 = arith.constant 5 : index
    %c0_39 = arith.constant 0 : index
    %c0_40 = arith.constant 0 : index
    %45 = vector.load %arg2[%c5, %c0_39, %c0_40] : memref<9x16x16xbf16, #tpu.memory_space<vmem>>, vector<1x16x16xbf16>
    %46 = vector.shape_cast %45 : vector<1x16x16xbf16> to vector<16x16xbf16>
    %cst_41 = arith.constant dense<0.000000e+00> : vector<256x16xf32>
    %47 = tpu.matmul %44, %46, %cst_41 {dimension_numbers = #tpu.dot_dimension_numbers<[1], [0], [0], [1], [0, 0, 1, 1], [], []>} : vector<256x16xbf16>, vector<16x16xbf16>, vector<256x16xf32> -> vector<256x16xf32>
    %48 = arith.addf %40, %47 : vector<256x16xf32>
    %c0_42 = arith.constant 0 : index
    %c2_43 = arith.constant 2 : index
    %c0_44 = arith.constant 0 : index
    %c0_45 = arith.constant 0 : index
    %49 = vector.load %arg1[%c0_42, %c2_43, %c0_44, %c0_45] : memref<1x18x18x16xf32, #tpu.memory_space<vmem>>, vector<1x16x16x16xf32>
    %50 = vector.shape_cast %49 : vector<1x16x16x16xf32> to vector<16x16x16xf32>
    %51 = vector.shape_cast %50 : vector<16x16x16xf32> to vector<256x16xf32>
    %52 = arith.truncf %51 : vector<256x16xf32> to vector<256x16xbf16>
    %c6 = arith.constant 6 : index
    %c0_46 = arith.constant 0 : index
    %c0_47 = arith.constant 0 : index
    %53 = vector.load %arg2[%c6, %c0_46, %c0_47] : memref<9x16x16xbf16, #tpu.memory_space<vmem>>, vector<1x16x16xbf16>
    %54 = vector.shape_cast %53 : vector<1x16x16xbf16> to vector<16x16xbf16>
    %cst_48 = arith.constant dense<0.000000e+00> : vector<256x16xf32>
    %55 = tpu.matmul %52, %54, %cst_48 {dimension_numbers = #tpu.dot_dimension_numbers<[1], [0], [0], [1], [0, 0, 1, 1], [], []>} : vector<256x16xbf16>, vector<16x16xbf16>, vector<256x16xf32> -> vector<256x16xf32>
    %56 = arith.addf %48, %55 : vector<256x16xf32>
    %c0_49 = arith.constant 0 : index
    %c2_50 = arith.constant 2 : index
    %c1_51 = arith.constant 1 : index
    %c0_52 = arith.constant 0 : index
    %57 = vector.load %arg1[%c0_49, %c2_50, %c1_51, %c0_52] : memref<1x18x18x16xf32, #tpu.memory_space<vmem>>, vector<1x16x16x16xf32>
    %58 = vector.shape_cast %57 : vector<1x16x16x16xf32> to vector<16x16x16xf32>
    %59 = vector.shape_cast %58 : vector<16x16x16xf32> to vector<256x16xf32>
    %60 = arith.truncf %59 : vector<256x16xf32> to vector<256x16xbf16>
    %c7 = arith.constant 7 : index
    %c0_53 = arith.constant 0 : index
    %c0_54 = arith.constant 0 : index
    %61 = vector.load %arg2[%c7, %c0_53, %c0_54] : memref<9x16x16xbf16, #tpu.memory_space<vmem>>, vector<1x16x16xbf16>
    %62 = vector.shape_cast %61 : vector<1x16x16xbf16> to vector<16x16xbf16>
    %cst_55 = arith.constant dense<0.000000e+00> : vector<256x16xf32>
    %63 = tpu.matmul %60, %62, %cst_55 {dimension_numbers = #tpu.dot_dimension_numbers<[1], [0], [0], [1], [0, 0, 1, 1], [], []>} : vector<256x16xbf16>, vector<16x16xbf16>, vector<256x16xf32> -> vector<256x16xf32>
    %64 = arith.addf %56, %63 : vector<256x16xf32>
    %c0_56 = arith.constant 0 : index
    %c2_57 = arith.constant 2 : index
    %c2_58 = arith.constant 2 : index
    %c0_59 = arith.constant 0 : index
    %65 = vector.load %arg1[%c0_56, %c2_57, %c2_58, %c0_59] : memref<1x18x18x16xf32, #tpu.memory_space<vmem>>, vector<1x16x16x16xf32>
    %66 = vector.shape_cast %65 : vector<1x16x16x16xf32> to vector<16x16x16xf32>
    %67 = vector.shape_cast %66 : vector<16x16x16xf32> to vector<256x16xf32>
    %68 = arith.truncf %67 : vector<256x16xf32> to vector<256x16xbf16>
    %c8 = arith.constant 8 : index
    %c0_60 = arith.constant 0 : index
    %c0_61 = arith.constant 0 : index
    %69 = vector.load %arg2[%c8, %c0_60, %c0_61] : memref<9x16x16xbf16, #tpu.memory_space<vmem>>, vector<1x16x16xbf16>
    %70 = vector.shape_cast %69 : vector<1x16x16xbf16> to vector<16x16xbf16>
    %cst_62 = arith.constant dense<0.000000e+00> : vector<256x16xf32>
    %71 = tpu.matmul %68, %70, %cst_62 {dimension_numbers = #tpu.dot_dimension_numbers<[1], [0], [0], [1], [0, 0, 1, 1], [], []>} : vector<256x16xbf16>, vector<16x16xbf16>, vector<256x16xf32> -> vector<256x16xf32>
    %72 = arith.addf %64, %71 : vector<256x16xf32>
    %73 = vector.shape_cast %72 : vector<256x16xf32> to vector<16x16x16xf32>
    %c0_63 = arith.constant 0 : index
    %c0_64 = arith.constant 0 : index
    %c0_65 = arith.constant 0 : index
    %c0_66 = arith.constant 0 : index
    %74 = vector.load %arg3[%c0_63, %c0_64, %c0_65, %c0_66] : memref<1x16x16x16xf32, #tpu.memory_space<vmem>>, vector<1x16x16x16xf32>
    %75 = vector.shape_cast %74 : vector<1x16x16x16xf32> to vector<16x16x16xf32>
    %76 = vector.shape_cast %73 : vector<16x16x16xf32> to vector<1x16x16x16xf32>
    tpu.vector_store %arg3[%c0_63, %c0_64, %c0_65, %c0_66], %76 {strides = array<i32>} : memref<1x16x16x16xf32, #tpu.memory_space<vmem>>, vector<1x16x16x16xf32>,
    %cst_67 = arith.constant dense<0.000000e+00> : vector<16xf32>
    %77 = vector.multi_reduction <add>, %72, %cst_67 [0] : vector<256x16xf32> to vector<16xf32>
    %78 = vector.shape_cast %77 : vector<16xf32> to vector<1x16xf32>
    %79 = vector.shape_cast %78 : vector<1x16xf32> to vector<1x1x16xf32>
    %c0_68 = arith.constant 0 : index
    %c0_69 = arith.constant 0 : index
    %c0_70 = arith.constant 0 : index
    %80 = vector.load %arg4[%c0_68, %c0_69, %c0_70] : memref<1x1x16xf32, #tpu.memory_space<vmem>>, vector<1x1x16xf32>
    tpu.vector_store %arg4[%c0_68, %c0_69, %c0_70], %79 {strides = array<i32>} : memref<1x1x16xf32, #tpu.memory_space<vmem>>, vector<1x1x16xf32>,
    %81 = arith.mulf %72, %72 : vector<256x16xf32>
    %cst_71 = arith.constant dense<0.000000e+00> : vector<16xf32>
    %82 = vector.multi_reduction <add>, %81, %cst_71 [0] : vector<256x16xf32> to vector<16xf32>
    %83 = vector.shape_cast %82 : vector<16xf32> to vector<1x16xf32>
    %84 = vector.shape_cast %83 : vector<1x16xf32> to vector<1x1x16xf32>
    %c0_72 = arith.constant 0 : index
    %c0_73 = arith.constant 0 : index
    %c0_74 = arith.constant 0 : index
    %85 = vector.load %arg5[%c0_72, %c0_73, %c0_74] : memref<1x1x16xf32, #tpu.memory_space<vmem>>, vector<1x1x16xf32>
    tpu.vector_store %arg5[%c0_72, %c0_73, %c0_74], %84 {strides = array<i32>} : memref<1x1x16xf32, #tpu.memory_space<vmem>>, vector<1x1x16xf32>,
    return
  }
  func.func @transform_0(%arg0: i32) -> (i32, i32, i32, i32) {
    %c0_i32 = arith.constant 0 : i32
    %c0_i32_0 = arith.constant 0 : i32
    %c0_i32_1 = arith.constant 0 : i32
    %c0_i32_2 = arith.constant 0 : i32
    return %arg0, %c0_i32, %c0_i32_0, %c0_i32_1 : i32, i32, i32, i32
  }
  func.func @transform_1(%arg0: i32) -> (i32, i32, i32) {
    %c0_i32 = arith.constant 0 : i32
    %c0_i32_0 = arith.constant 0 : i32
    %c0_i32_1 = arith.constant 0 : i32
    %c0_i32_2 = arith.constant 0 : i32
    return %c0_i32, %c0_i32_0, %c0_i32_1 : i32, i32, i32
  }
  func.func @transform_2(%arg0: i32) -> (i32, i32, i32, i32) {
    %c0_i32 = arith.constant 0 : i32
    %c0_i32_0 = arith.constant 0 : i32
    %c0_i32_1 = arith.constant 0 : i32
    %c0_i32_2 = arith.constant 0 : i32
    return %arg0, %c0_i32, %c0_i32_0, %c0_i32_1 : i32, i32, i32, i32
  }
  func.func @transform_3(%arg0: i32) -> (i32, i32, i32) {
    %c0_i32 = arith.constant 0 : i32
    %c0_i32_0 = arith.constant 0 : i32
    %c0_i32_1 = arith.constant 0 : i32
    return %arg0, %c0_i32, %c0_i32_0 : i32, i32, i32
  }
  func.func @transform_4(%arg0: i32) -> (i32, i32, i32) {
    %c0_i32 = arith.constant 0 : i32
    %c0_i32_0 = arith.constant 0 : i32
    %c0_i32_1 = arith.constant 0 : i32
    return %arg0, %c0_i32, %c0_i32_0 : i32, i32, i32
  }
}

module attributes {stable_mosaic.version = 11 : i64} {
  func.func @_bn_add_relu_kernel(%arg0: i32, %arg1: memref<512x16xf32, #tpu.memory_space<vmem>>, %arg2: memref<2x1x16xf32, #tpu.memory_space<vmem>>, %arg3: memref<2x1x16xf32, #tpu.memory_space<vmem>>, %arg4: memref<1x16xf32, #tpu.memory_space<vmem>>, %arg5: memref<1x16xf32, #tpu.memory_space<vmem>>, %arg6: memref<512x16xf32, #tpu.memory_space<vmem>>, %arg7: memref<512x16xf32, #tpu.memory_space<vmem>>) attributes {dimension_semantics = [#tpu.dimension_semantics<parallel>], iteration_bounds = array<i64: 1>, scalar_prefetch = 0 : i64, scratch_operands = 0 : i64, tpu.core_type = #tpu.core_type<tc>, window_params = [{transform_indices = @transform_0, window_bounds = array<i64: 512, 16>}, {pipeline_mode = #tpu.pipeline_mode<synchronous>, transform_indices = @transform_1, window_bounds = array<i64: 2, 1, 16>}, {pipeline_mode = #tpu.pipeline_mode<synchronous>, transform_indices = @transform_2, window_bounds = array<i64: 2, 1, 16>}, {pipeline_mode = #tpu.pipeline_mode<synchronous>, transform_indices = @transform_3, window_bounds = array<i64: 1, 16>}, {pipeline_mode = #tpu.pipeline_mode<synchronous>, transform_indices = @transform_4, window_bounds = array<i64: 1, 16>}, {transform_indices = @transform_5, window_bounds = array<i64: 512, 16>}, {transform_indices = @transform_6, window_bounds = array<i64: 512, 16>}]} {
    %c0 = arith.constant 0 : index
    %c0_0 = arith.constant 0 : index
    %c0_1 = arith.constant 0 : index
    %0 = vector.load %arg2[%c0, %c0_0, %c0_1] : memref<2x1x16xf32, #tpu.memory_space<vmem>>, vector<2x1x16xf32>
    %cst = arith.constant dense<0.000000e+00> : vector<1x16xf32>
    %1 = vector.multi_reduction <add>, %0, %cst [0] : vector<2x1x16xf32> to vector<1x16xf32>
    %cst_2 = arith.constant 0.001953125 : f32
    %2 = vector.broadcast %cst_2 : f32 to vector<1x16xf32>
    %3 = arith.mulf %1, %2 : vector<1x16xf32>
    %c0_3 = arith.constant 0 : index
    %c0_4 = arith.constant 0 : index
    %c0_5 = arith.constant 0 : index
    %4 = vector.load %arg3[%c0_3, %c0_4, %c0_5] : memref<2x1x16xf32, #tpu.memory_space<vmem>>, vector<2x1x16xf32>
    %cst_6 = arith.constant dense<0.000000e+00> : vector<1x16xf32>
    %5 = vector.multi_reduction <add>, %4, %cst_6 [0] : vector<2x1x16xf32> to vector<1x16xf32>
    %cst_7 = arith.constant 0.001953125 : f32
    %6 = vector.broadcast %cst_7 : f32 to vector<1x16xf32>
    %7 = arith.mulf %5, %6 : vector<1x16xf32>
    %8 = arith.mulf %3, %3 : vector<1x16xf32>
    %9 = arith.subf %7, %8 : vector<1x16xf32>
    %c0_8 = arith.constant 0 : index
    %c0_9 = arith.constant 0 : index
    %10 = vector.load %arg4[%c0_8, %c0_9] : memref<1x16xf32, #tpu.memory_space<vmem>>, vector<1x16xf32>
    %cst_10 = arith.constant 9.99999974E-6 : f32
    %11 = vector.broadcast %cst_10 : f32 to vector<1x16xf32>
    %12 = arith.addf %9, %11 : vector<1x16xf32>
    %13 = math.rsqrt %12 : vector<1x16xf32>
    %14 = arith.mulf %10, %13 : vector<1x16xf32>
    %c0_11 = arith.constant 0 : index
    %c0_12 = arith.constant 0 : index
    %15 = vector.load %arg5[%c0_11, %c0_12] : memref<1x16xf32, #tpu.memory_space<vmem>>, vector<1x16xf32>
    %16 = arith.mulf %3, %14 : vector<1x16xf32>
    %17 = arith.subf %15, %16 : vector<1x16xf32>
    %c0_13 = arith.constant 0 : index
    %c0_14 = arith.constant 0 : index
    %18 = vector.load %arg1[%c0_13, %c0_14] : memref<512x16xf32, #tpu.memory_space<vmem>>, vector<512x16xf32>
    %19 = vector.broadcast %14 : vector<1x16xf32> to vector<512x16xf32>
    %20 = arith.mulf %18, %19 : vector<512x16xf32>
    %21 = vector.broadcast %17 : vector<1x16xf32> to vector<512x16xf32>
    %22 = arith.addf %20, %21 : vector<512x16xf32>
    %c0_15 = arith.constant 0 : index
    %c0_16 = arith.constant 0 : index
    %23 = vector.load %arg6[%c0_15, %c0_16] : memref<512x16xf32, #tpu.memory_space<vmem>>, vector<512x16xf32>
    %24 = arith.addf %22, %23 : vector<512x16xf32>
    %cst_17 = arith.constant 0.000000e+00 : f32
    %25 = vector.broadcast %cst_17 : f32 to vector<512x16xf32>
    %26 = arith.maximumf %24, %25 : vector<512x16xf32>
    %c0_18 = arith.constant 0 : index
    %c0_19 = arith.constant 0 : index
    %27 = vector.load %arg7[%c0_18, %c0_19] : memref<512x16xf32, #tpu.memory_space<vmem>>, vector<512x16xf32>
    tpu.vector_store %arg7[%c0_18, %c0_19], %26 {strides = array<i32>} : memref<512x16xf32, #tpu.memory_space<vmem>>, vector<512x16xf32>,
    return
  }
  func.func @transform_0(%arg0: i32) -> (i32, i32) {
    %c0_i32 = arith.constant 0 : i32
    %c0_i32_0 = arith.constant 0 : i32
    return %arg0, %c0_i32 : i32, i32
  }
  func.func @transform_1(%arg0: i32) -> (i32, i32, i32) {
    %c0_i32 = arith.constant 0 : i32
    %c0_i32_0 = arith.constant 0 : i32
    %c0_i32_1 = arith.constant 0 : i32
    %c0_i32_2 = arith.constant 0 : i32
    return %c0_i32, %c0_i32_0, %c0_i32_1 : i32, i32, i32
  }
  func.func @transform_2(%arg0: i32) -> (i32, i32, i32) {
    %c0_i32 = arith.constant 0 : i32
    %c0_i32_0 = arith.constant 0 : i32
    %c0_i32_1 = arith.constant 0 : i32
    %c0_i32_2 = arith.constant 0 : i32
    return %c0_i32, %c0_i32_0, %c0_i32_1 : i32, i32, i32
  }
  func.func @transform_3(%arg0: i32) -> (i32, i32) {
    %c0_i32 = arith.constant 0 : i32
    %c0_i32_0 = arith.constant 0 : i32
    %c0_i32_1 = arith.constant 0 : i32
    return %c0_i32, %c0_i32_0 : i32, i32
  }
  func.func @transform_4(%arg0: i32) -> (i32, i32) {
    %c0_i32 = arith.constant 0 : i32
    %c0_i32_0 = arith.constant 0 : i32
    %c0_i32_1 = arith.constant 0 : i32
    return %c0_i32, %c0_i32_0 : i32, i32
  }
  func.func @transform_5(%arg0: i32) -> (i32, i32) {
    %c0_i32 = arith.constant 0 : i32
    %c0_i32_0 = arith.constant 0 : i32
    return %arg0, %c0_i32 : i32, i32
  }
  func.func @transform_6(%arg0: i32) -> (i32, i32) {
    %c0_i32 = arith.constant 0 : i32
    %c0_i32_0 = arith.constant 0 : i32
    return %arg0, %c0_i32 : i32, i32
  }
}

module attributes {stable_mosaic.version = 11 : i64} {
  func.func @_conv3x3_stats_kernel(%arg0: i32, %arg1: memref<4x9x9x16xf32, #tpu.memory_space<vmem>>, %arg2: memref<9x16x32xbf16, #tpu.memory_space<vmem>>, %arg3: memref<1x8x8x32xf32, #tpu.memory_space<vmem>>, %arg4: memref<1x1x32xf32, #tpu.memory_space<vmem>>, %arg5: memref<1x1x32xf32, #tpu.memory_space<vmem>>) attributes {dimension_semantics = [#tpu.dimension_semantics<parallel>], iteration_bounds = array<i64: 2>, scalar_prefetch = 0 : i64, scratch_operands = 0 : i64, tpu.core_type = #tpu.core_type<tc>, window_params = [{transform_indices = @transform_0, window_bounds = array<i64: 4, 9, 9, 16>}, {pipeline_mode = #tpu.pipeline_mode<synchronous>, transform_indices = @transform_1, window_bounds = array<i64: 9, 16, 32>}, {transform_indices = @transform_2, window_bounds = array<i64: 1, 8, 8, 32>}, {transform_indices = @transform_3, window_bounds = array<i64: 1, 1, 32>}, {transform_indices = @transform_4, window_bounds = array<i64: 1, 1, 32>}]} {
    %cst = arith.constant 0.000000e+00 : f32
    %0 = vector.broadcast %cst : f32 to vector<64x32xf32>
    %c0 = arith.constant 0 : index
    %c0_0 = arith.constant 0 : index
    %c0_1 = arith.constant 0 : index
    %c0_2 = arith.constant 0 : index
    %1 = vector.load %arg1[%c0, %c0_0, %c0_1, %c0_2] : memref<4x9x9x16xf32, #tpu.memory_space<vmem>>, vector<1x8x8x16xf32>
    %2 = vector.shape_cast %1 : vector<1x8x8x16xf32> to vector<8x8x16xf32>
    %3 = vector.shape_cast %2 : vector<8x8x16xf32> to vector<64x16xf32>
    %4 = arith.truncf %3 : vector<64x16xf32> to vector<64x16xbf16>
    %c0_3 = arith.constant 0 : index
    %c0_4 = arith.constant 0 : index
    %c0_5 = arith.constant 0 : index
    %5 = vector.load %arg2[%c0_3, %c0_4, %c0_5] : memref<9x16x32xbf16, #tpu.memory_space<vmem>>, vector<1x16x32xbf16>
    %6 = vector.shape_cast %5 : vector<1x16x32xbf16> to vector<16x32xbf16>
    %cst_6 = arith.constant dense<0.000000e+00> : vector<64x32xf32>
    %7 = tpu.matmul %4, %6, %cst_6 {dimension_numbers = #tpu.dot_dimension_numbers<[1], [0], [0], [1], [0, 0, 1, 1], [], []>} : vector<64x16xbf16>, vector<16x32xbf16>, vector<64x32xf32> -> vector<64x32xf32>
    %8 = arith.addf %0, %7 : vector<64x32xf32>
    %c1 = arith.constant 1 : index
    %c0_7 = arith.constant 0 : index
    %c0_8 = arith.constant 0 : index
    %c0_9 = arith.constant 0 : index
    %9 = vector.load %arg1[%c1, %c0_7, %c0_8, %c0_9] : memref<4x9x9x16xf32, #tpu.memory_space<vmem>>, vector<1x8x8x16xf32>
    %10 = vector.shape_cast %9 : vector<1x8x8x16xf32> to vector<8x8x16xf32>
    %11 = vector.shape_cast %10 : vector<8x8x16xf32> to vector<64x16xf32>
    %12 = arith.truncf %11 : vector<64x16xf32> to vector<64x16xbf16>
    %c1_10 = arith.constant 1 : index
    %c0_11 = arith.constant 0 : index
    %c0_12 = arith.constant 0 : index
    %13 = vector.load %arg2[%c1_10, %c0_11, %c0_12] : memref<9x16x32xbf16, #tpu.memory_space<vmem>>, vector<1x16x32xbf16>
    %14 = vector.shape_cast %13 : vector<1x16x32xbf16> to vector<16x32xbf16>
    %cst_13 = arith.constant dense<0.000000e+00> : vector<64x32xf32>
    %15 = tpu.matmul %12, %14, %cst_13 {dimension_numbers = #tpu.dot_dimension_numbers<[1], [0], [0], [1], [0, 0, 1, 1], [], []>} : vector<64x16xbf16>, vector<16x32xbf16>, vector<64x32xf32> -> vector<64x32xf32>
    %16 = arith.addf %8, %15 : vector<64x32xf32>
    %c0_14 = arith.constant 0 : index
    %c0_15 = arith.constant 0 : index
    %c1_16 = arith.constant 1 : index
    %c0_17 = arith.constant 0 : index
    %17 = vector.load %arg1[%c0_14, %c0_15, %c1_16, %c0_17] : memref<4x9x9x16xf32, #tpu.memory_space<vmem>>, vector<1x8x8x16xf32>
    %18 = vector.shape_cast %17 : vector<1x8x8x16xf32> to vector<8x8x16xf32>
    %19 = vector.shape_cast %18 : vector<8x8x16xf32> to vector<64x16xf32>
    %20 = arith.truncf %19 : vector<64x16xf32> to vector<64x16xbf16>
    %c2 = arith.constant 2 : index
    %c0_18 = arith.constant 0 : index
    %c0_19 = arith.constant 0 : index
    %21 = vector.load %arg2[%c2, %c0_18, %c0_19] : memref<9x16x32xbf16, #tpu.memory_space<vmem>>, vector<1x16x32xbf16>
    %22 = vector.shape_cast %21 : vector<1x16x32xbf16> to vector<16x32xbf16>
    %cst_20 = arith.constant dense<0.000000e+00> : vector<64x32xf32>
    %23 = tpu.matmul %20, %22, %cst_20 {dimension_numbers = #tpu.dot_dimension_numbers<[1], [0], [0], [1], [0, 0, 1, 1], [], []>} : vector<64x16xbf16>, vector<16x32xbf16>, vector<64x32xf32> -> vector<64x32xf32>
    %24 = arith.addf %16, %23 : vector<64x32xf32>
    %c2_21 = arith.constant 2 : index
    %c0_22 = arith.constant 0 : index
    %c0_23 = arith.constant 0 : index
    %c0_24 = arith.constant 0 : index
    %25 = vector.load %arg1[%c2_21, %c0_22, %c0_23, %c0_24] : memref<4x9x9x16xf32, #tpu.memory_space<vmem>>, vector<1x8x8x16xf32>
    %26 = vector.shape_cast %25 : vector<1x8x8x16xf32> to vector<8x8x16xf32>
    %27 = vector.shape_cast %26 : vector<8x8x16xf32> to vector<64x16xf32>
    %28 = arith.truncf %27 : vector<64x16xf32> to vector<64x16xbf16>
    %c3 = arith.constant 3 : index
    %c0_25 = arith.constant 0 : index
    %c0_26 = arith.constant 0 : index
    %29 = vector.load %arg2[%c3, %c0_25, %c0_26] : memref<9x16x32xbf16, #tpu.memory_space<vmem>>, vector<1x16x32xbf16>
    %30 = vector.shape_cast %29 : vector<1x16x32xbf16> to vector<16x32xbf16>
    %cst_27 = arith.constant dense<0.000000e+00> : vector<64x32xf32>
    %31 = tpu.matmul %28, %30, %cst_27 {dimension_numbers = #tpu.dot_dimension_numbers<[1], [0], [0], [1], [0, 0, 1, 1], [], []>} : vector<64x16xbf16>, vector<16x32xbf16>, vector<64x32xf32> -> vector<64x32xf32>
    %32 = arith.addf %24, %31 : vector<64x32xf32>
    %c3_28 = arith.constant 3 : index
    %c0_29 = arith.constant 0 : index
    %c0_30 = arith.constant 0 : index
    %c0_31 = arith.constant 0 : index
    %33 = vector.load %arg1[%c3_28, %c0_29, %c0_30, %c0_31] : memref<4x9x9x16xf32, #tpu.memory_space<vmem>>, vector<1x8x8x16xf32>
    %34 = vector.shape_cast %33 : vector<1x8x8x16xf32> to vector<8x8x16xf32>
    %35 = vector.shape_cast %34 : vector<8x8x16xf32> to vector<64x16xf32>
    %36 = arith.truncf %35 : vector<64x16xf32> to vector<64x16xbf16>
    %c4 = arith.constant 4 : index
    %c0_32 = arith.constant 0 : index
    %c0_33 = arith.constant 0 : index
    %37 = vector.load %arg2[%c4, %c0_32, %c0_33] : memref<9x16x32xbf16, #tpu.memory_space<vmem>>, vector<1x16x32xbf16>
    %38 = vector.shape_cast %37 : vector<1x16x32xbf16> to vector<16x32xbf16>
    %cst_34 = arith.constant dense<0.000000e+00> : vector<64x32xf32>
    %39 = tpu.matmul %36, %38, %cst_34 {dimension_numbers = #tpu.dot_dimension_numbers<[1], [0], [0], [1], [0, 0, 1, 1], [], []>} : vector<64x16xbf16>, vector<16x32xbf16>, vector<64x32xf32> -> vector<64x32xf32>
    %40 = arith.addf %32, %39 : vector<64x32xf32>
    %c2_35 = arith.constant 2 : index
    %c0_36 = arith.constant 0 : index
    %c1_37 = arith.constant 1 : index
    %c0_38 = arith.constant 0 : index
    %41 = vector.load %arg1[%c2_35, %c0_36, %c1_37, %c0_38] : memref<4x9x9x16xf32, #tpu.memory_space<vmem>>, vector<1x8x8x16xf32>
    %42 = vector.shape_cast %41 : vector<1x8x8x16xf32> to vector<8x8x16xf32>
    %43 = vector.shape_cast %42 : vector<8x8x16xf32> to vector<64x16xf32>
    %44 = arith.truncf %43 : vector<64x16xf32> to vector<64x16xbf16>
    %c5 = arith.constant 5 : index
    %c0_39 = arith.constant 0 : index
    %c0_40 = arith.constant 0 : index
    %45 = vector.load %arg2[%c5, %c0_39, %c0_40] : memref<9x16x32xbf16, #tpu.memory_space<vmem>>, vector<1x16x32xbf16>
    %46 = vector.shape_cast %45 : vector<1x16x32xbf16> to vector<16x32xbf16>
    %cst_41 = arith.constant dense<0.000000e+00> : vector<64x32xf32>
    %47 = tpu.matmul %44, %46, %cst_41 {dimension_numbers = #tpu.dot_dimension_numbers<[1], [0], [0], [1], [0, 0, 1, 1], [], []>} : vector<64x16xbf16>, vector<16x32xbf16>, vector<64x32xf32> -> vector<64x32xf32>
    %48 = arith.addf %40, %47 : vector<64x32xf32>
    %c0_42 = arith.constant 0 : index
    %c1_43 = arith.constant 1 : index
    %c0_44 = arith.constant 0 : index
    %c0_45 = arith.constant 0 : index
    %49 = vector.load %arg1[%c0_42, %c1_43, %c0_44, %c0_45] : memref<4x9x9x16xf32, #tpu.memory_space<vmem>>, vector<1x8x8x16xf32>
    %50 = vector.shape_cast %49 : vector<1x8x8x16xf32> to vector<8x8x16xf32>
    %51 = vector.shape_cast %50 : vector<8x8x16xf32> to vector<64x16xf32>
    %52 = arith.truncf %51 : vector<64x16xf32> to vector<64x16xbf16>
    %c6 = arith.constant 6 : index
    %c0_46 = arith.constant 0 : index
    %c0_47 = arith.constant 0 : index
    %53 = vector.load %arg2[%c6, %c0_46, %c0_47] : memref<9x16x32xbf16, #tpu.memory_space<vmem>>, vector<1x16x32xbf16>
    %54 = vector.shape_cast %53 : vector<1x16x32xbf16> to vector<16x32xbf16>
    %cst_48 = arith.constant dense<0.000000e+00> : vector<64x32xf32>
    %55 = tpu.matmul %52, %54, %cst_48 {dimension_numbers = #tpu.dot_dimension_numbers<[1], [0], [0], [1], [0, 0, 1, 1], [], []>} : vector<64x16xbf16>, vector<16x32xbf16>, vector<64x32xf32> -> vector<64x32xf32>
    %56 = arith.addf %48, %55 : vector<64x32xf32>
    %c1_49 = arith.constant 1 : index
    %c1_50 = arith.constant 1 : index
    %c0_51 = arith.constant 0 : index
    %c0_52 = arith.constant 0 : index
    %57 = vector.load %arg1[%c1_49, %c1_50, %c0_51, %c0_52] : memref<4x9x9x16xf32, #tpu.memory_space<vmem>>, vector<1x8x8x16xf32>
    %58 = vector.shape_cast %57 : vector<1x8x8x16xf32> to vector<8x8x16xf32>
    %59 = vector.shape_cast %58 : vector<8x8x16xf32> to vector<64x16xf32>
    %60 = arith.truncf %59 : vector<64x16xf32> to vector<64x16xbf16>
    %c7 = arith.constant 7 : index
    %c0_53 = arith.constant 0 : index
    %c0_54 = arith.constant 0 : index
    %61 = vector.load %arg2[%c7, %c0_53, %c0_54] : memref<9x16x32xbf16, #tpu.memory_space<vmem>>, vector<1x16x32xbf16>
    %62 = vector.shape_cast %61 : vector<1x16x32xbf16> to vector<16x32xbf16>
    %cst_55 = arith.constant dense<0.000000e+00> : vector<64x32xf32>
    %63 = tpu.matmul %60, %62, %cst_55 {dimension_numbers = #tpu.dot_dimension_numbers<[1], [0], [0], [1], [0, 0, 1, 1], [], []>} : vector<64x16xbf16>, vector<16x32xbf16>, vector<64x32xf32> -> vector<64x32xf32>
    %64 = arith.addf %56, %63 : vector<64x32xf32>
    %c0_56 = arith.constant 0 : index
    %c1_57 = arith.constant 1 : index
    %c1_58 = arith.constant 1 : index
    %c0_59 = arith.constant 0 : index
    %65 = vector.load %arg1[%c0_56, %c1_57, %c1_58, %c0_59] : memref<4x9x9x16xf32, #tpu.memory_space<vmem>>, vector<1x8x8x16xf32>
    %66 = vector.shape_cast %65 : vector<1x8x8x16xf32> to vector<8x8x16xf32>
    %67 = vector.shape_cast %66 : vector<8x8x16xf32> to vector<64x16xf32>
    %68 = arith.truncf %67 : vector<64x16xf32> to vector<64x16xbf16>
    %c8 = arith.constant 8 : index
    %c0_60 = arith.constant 0 : index
    %c0_61 = arith.constant 0 : index
    %69 = vector.load %arg2[%c8, %c0_60, %c0_61] : memref<9x16x32xbf16, #tpu.memory_space<vmem>>, vector<1x16x32xbf16>
    %70 = vector.shape_cast %69 : vector<1x16x32xbf16> to vector<16x32xbf16>
    %cst_62 = arith.constant dense<0.000000e+00> : vector<64x32xf32>
    %71 = tpu.matmul %68, %70, %cst_62 {dimension_numbers = #tpu.dot_dimension_numbers<[1], [0], [0], [1], [0, 0, 1, 1], [], []>} : vector<64x16xbf16>, vector<16x32xbf16>, vector<64x32xf32> -> vector<64x32xf32>
    %72 = arith.addf %64, %71 : vector<64x32xf32>
    %73 = vector.shape_cast %72 : vector<64x32xf32> to vector<8x8x32xf32>
    %c0_63 = arith.constant 0 : index
    %c0_64 = arith.constant 0 : index
    %c0_65 = arith.constant 0 : index
    %c0_66 = arith.constant 0 : index
    %74 = vector.load %arg3[%c0_63, %c0_64, %c0_65, %c0_66] : memref<1x8x8x32xf32, #tpu.memory_space<vmem>>, vector<1x8x8x32xf32>
    %75 = vector.shape_cast %74 : vector<1x8x8x32xf32> to vector<8x8x32xf32>
    %76 = vector.shape_cast %73 : vector<8x8x32xf32> to vector<1x8x8x32xf32>
    tpu.vector_store %arg3[%c0_63, %c0_64, %c0_65, %c0_66], %76 {strides = array<i32>} : memref<1x8x8x32xf32, #tpu.memory_space<vmem>>, vector<1x8x8x32xf32>,
    %cst_67 = arith.constant dense<0.000000e+00> : vector<32xf32>
    %77 = vector.multi_reduction <add>, %72, %cst_67 [0] : vector<64x32xf32> to vector<32xf32>
    %78 = vector.shape_cast %77 : vector<32xf32> to vector<1x32xf32>
    %79 = vector.shape_cast %78 : vector<1x32xf32> to vector<1x1x32xf32>
    %c0_68 = arith.constant 0 : index
    %c0_69 = arith.constant 0 : index
    %c0_70 = arith.constant 0 : index
    %80 = vector.load %arg4[%c0_68, %c0_69, %c0_70] : memref<1x1x32xf32, #tpu.memory_space<vmem>>, vector<1x1x32xf32>
    tpu.vector_store %arg4[%c0_68, %c0_69, %c0_70], %79 {strides = array<i32>} : memref<1x1x32xf32, #tpu.memory_space<vmem>>, vector<1x1x32xf32>,
    %81 = arith.mulf %72, %72 : vector<64x32xf32>
    %cst_71 = arith.constant dense<0.000000e+00> : vector<32xf32>
    %82 = vector.multi_reduction <add>, %81, %cst_71 [0] : vector<64x32xf32> to vector<32xf32>
    %83 = vector.shape_cast %82 : vector<32xf32> to vector<1x32xf32>
    %84 = vector.shape_cast %83 : vector<1x32xf32> to vector<1x1x32xf32>
    %c0_72 = arith.constant 0 : index
    %c0_73 = arith.constant 0 : index
    %c0_74 = arith.constant 0 : index
    %85 = vector.load %arg5[%c0_72, %c0_73, %c0_74] : memref<1x1x32xf32, #tpu.memory_space<vmem>>, vector<1x1x32xf32>
    tpu.vector_store %arg5[%c0_72, %c0_73, %c0_74], %84 {strides = array<i32>} : memref<1x1x32xf32, #tpu.memory_space<vmem>>, vector<1x1x32xf32>,
    return
  }
  func.func @transform_0(%arg0: i32) -> (i32, i32, i32, i32) {
    %c0_i32 = arith.constant 0 : i32
    %c0_i32_0 = arith.constant 0 : i32
    %c0_i32_1 = arith.constant 0 : i32
    %c0_i32_2 = arith.constant 0 : i32
    return %arg0, %c0_i32, %c0_i32_0, %c0_i32_1 : i32, i32, i32, i32
  }
  func.func @transform_1(%arg0: i32) -> (i32, i32, i32) {
    %c0_i32 = arith.constant 0 : i32
    %c0_i32_0 = arith.constant 0 : i32
    %c0_i32_1 = arith.constant 0 : i32
    %c0_i32_2 = arith.constant 0 : i32
    return %c0_i32, %c0_i32_0, %c0_i32_1 : i32, i32, i32
  }
  func.func @transform_2(%arg0: i32) -> (i32, i32, i32, i32) {
    %c0_i32 = arith.constant 0 : i32
    %c0_i32_0 = arith.constant 0 : i32
    %c0_i32_1 = arith.constant 0 : i32
    %c0_i32_2 = arith.constant 0 : i32
    return %arg0, %c0_i32, %c0_i32_0, %c0_i32_1 : i32, i32, i32, i32
  }
  func.func @transform_3(%arg0: i32) -> (i32, i32, i32) {
    %c0_i32 = arith.constant 0 : i32
    %c0_i32_0 = arith.constant 0 : i32
    %c0_i32_1 = arith.constant 0 : i32
    return %arg0, %c0_i32, %c0_i32_0 : i32, i32, i32
  }
  func.func @transform_4(%arg0: i32) -> (i32, i32, i32) {
    %c0_i32 = arith.constant 0 : i32
    %c0_i32_0 = arith.constant 0 : i32
    %c0_i32_1 = arith.constant 0 : i32
    return %arg0, %c0_i32, %c0_i32_0 : i32, i32, i32
  }
}

module attributes {stable_mosaic.version = 11 : i64} {
  func.func @_bnrelu_conv3x3_stats_kernel(%arg0: i32, %arg1: memref<1x8x8x32xf32, #tpu.memory_space<vmem>>, %arg2: memref<2x1x32xf32, #tpu.memory_space<vmem>>, %arg3: memref<2x1x32xf32, #tpu.memory_space<vmem>>, %arg4: memref<1x32xf32, #tpu.memory_space<vmem>>, %arg5: memref<1x32xf32, #tpu.memory_space<vmem>>, %arg6: memref<9x32x32xbf16, #tpu.memory_space<vmem>>, %arg7: memref<1x8x8x32xf32, #tpu.memory_space<vmem>>, %arg8: memref<1x1x32xf32, #tpu.memory_space<vmem>>, %arg9: memref<1x1x32xf32, #tpu.memory_space<vmem>>, %arg10: memref<10x10x32xf32, #tpu.memory_space<vmem>>) attributes {dimension_semantics = [#tpu.dimension_semantics<parallel>], iteration_bounds = array<i64: 2>, scalar_prefetch = 0 : i64, scratch_operands = 1 : i64, tpu.core_type = #tpu.core_type<tc>, window_params = [{transform_indices = @transform_0, window_bounds = array<i64: 1, 8, 8, 32>}, {pipeline_mode = #tpu.pipeline_mode<synchronous>, transform_indices = @transform_1, window_bounds = array<i64: 2, 1, 32>}, {pipeline_mode = #tpu.pipeline_mode<synchronous>, transform_indices = @transform_2, window_bounds = array<i64: 2, 1, 32>}, {pipeline_mode = #tpu.pipeline_mode<synchronous>, transform_indices = @transform_3, window_bounds = array<i64: 1, 32>}, {pipeline_mode = #tpu.pipeline_mode<synchronous>, transform_indices = @transform_4, window_bounds = array<i64: 1, 32>}, {pipeline_mode = #tpu.pipeline_mode<synchronous>, transform_indices = @transform_5, window_bounds = array<i64: 9, 32, 32>}, {transform_indices = @transform_6, window_bounds = array<i64: 1, 8, 8, 32>}, {transform_indices = @transform_7, window_bounds = array<i64: 1, 1, 32>}, {transform_indices = @transform_8, window_bounds = array<i64: 1, 1, 32>}]} {
    %c0 = arith.constant 0 : index
    %c0_0 = arith.constant 0 : index
    %c0_1 = arith.constant 0 : index
    %0 = vector.load %arg2[%c0, %c0_0, %c0_1] : memref<2x1x32xf32, #tpu.memory_space<vmem>>, vector<2x1x32xf32>
    %cst = arith.constant dense<0.000000e+00> : vector<1x32xf32>
    %1 = vector.multi_reduction <add>, %0, %cst [0] : vector<2x1x32xf32> to vector<1x32xf32>
    %cst_2 = arith.constant 7.812500e-03 : f32
    %2 = vector.broadcast %cst_2 : f32 to vector<1x32xf32>
    %3 = arith.mulf %1, %2 : vector<1x32xf32>
    %c0_3 = arith.constant 0 : index
    %c0_4 = arith.constant 0 : index
    %c0_5 = arith.constant 0 : index
    %4 = vector.load %arg3[%c0_3, %c0_4, %c0_5] : memref<2x1x32xf32, #tpu.memory_space<vmem>>, vector<2x1x32xf32>
    %cst_6 = arith.constant dense<0.000000e+00> : vector<1x32xf32>
    %5 = vector.multi_reduction <add>, %4, %cst_6 [0] : vector<2x1x32xf32> to vector<1x32xf32>
    %cst_7 = arith.constant 7.812500e-03 : f32
    %6 = vector.broadcast %cst_7 : f32 to vector<1x32xf32>
    %7 = arith.mulf %5, %6 : vector<1x32xf32>
    %8 = arith.mulf %3, %3 : vector<1x32xf32>
    %9 = arith.subf %7, %8 : vector<1x32xf32>
    %c0_8 = arith.constant 0 : index
    %c0_9 = arith.constant 0 : index
    %10 = vector.load %arg4[%c0_8, %c0_9] : memref<1x32xf32, #tpu.memory_space<vmem>>, vector<1x32xf32>
    %cst_10 = arith.constant 9.99999974E-6 : f32
    %11 = vector.broadcast %cst_10 : f32 to vector<1x32xf32>
    %12 = arith.addf %9, %11 : vector<1x32xf32>
    %13 = math.rsqrt %12 : vector<1x32xf32>
    %14 = arith.mulf %10, %13 : vector<1x32xf32>
    %c0_11 = arith.constant 0 : index
    %c0_12 = arith.constant 0 : index
    %15 = vector.load %arg5[%c0_11, %c0_12] : memref<1x32xf32, #tpu.memory_space<vmem>>, vector<1x32xf32>
    %16 = arith.mulf %3, %14 : vector<1x32xf32>
    %17 = arith.subf %15, %16 : vector<1x32xf32>
    %c0_13 = arith.constant 0 : index
    %c0_14 = arith.constant 0 : index
    %c0_15 = arith.constant 0 : index
    %c0_16 = arith.constant 0 : index
    %18 = vector.load %arg1[%c0_13, %c0_14, %c0_15, %c0_16] : memref<1x8x8x32xf32, #tpu.memory_space<vmem>>, vector<1x8x8x32xf32>
    %19 = vector.shape_cast %18 : vector<1x8x8x32xf32> to vector<8x8x32xf32>
    %20 = vector.shape_cast %14 : vector<1x32xf32> to vector<1x1x32xf32>
    %21 = vector.broadcast %20 : vector<1x1x32xf32> to vector<8x8x32xf32>
    %22 = arith.mulf %19, %21 : vector<8x8x32xf32>
    %23 = vector.shape_cast %17 : vector<1x32xf32> to vector<1x1x32xf32>
    %24 = vector.broadcast %23 : vector<1x1x32xf32> to vector<8x8x32xf32>
    %25 = arith.addf %22, %24 : vector<8x8x32xf32>
    %cst_17 = arith.constant 0.000000e+00 : f32
    %26 = vector.broadcast %cst_17 : f32 to vector<8x8x32xf32>
    %27 = arith.maximumf %25, %26 : vector<8x8x32xf32>
    %cst_18 = arith.constant 0.000000e+00 : f32
    %28 = vector.broadcast %cst_18 : f32 to vector<10x10x32xf32>
    %c0_19 = arith.constant 0 : index
    %c0_20 = arith.constant 0 : index
    %c0_21 = arith.constant 0 : index
    %29 = vector.load %arg10[%c0_19, %c0_20, %c0_21] : memref<10x10x32xf32, #tpu.memory_space<vmem>>, vector<10x10x32xf32>
    tpu.vector_store %arg10[%c0_19, %c0_20, %c0_21], %28 {strides = array<i32>} : memref<10x10x32xf32, #tpu.memory_space<vmem>>, vector<10x10x32xf32>,
    %c1 = arith.constant 1 : index
    %c1_22 = arith.constant 1 : index
    %c0_23 = arith.constant 0 : index
    %30 = vector.load %arg10[%c1, %c1_22, %c0_23] : memref<10x10x32xf32, #tpu.memory_space<vmem>>, vector<8x8x32xf32>
    tpu.vector_store %arg10[%c1, %c1_22, %c0_23], %27 {strides = array<i32>} : memref<10x10x32xf32, #tpu.memory_space<vmem>>, vector<8x8x32xf32>,
    %cst_24 = arith.constant 0.000000e+00 : f32
    %31 = vector.broadcast %cst_24 : f32 to vector<64x32xf32>
    %c0_25 = arith.constant 0 : index
    %c0_26 = arith.constant 0 : index
    %c0_27 = arith.constant 0 : index
    %32 = vector.load %arg10[%c0_25, %c0_26, %c0_27] : memref<10x10x32xf32, #tpu.memory_space<vmem>>, vector<8x8x32xf32>
    %33 = vector.shape_cast %32 : vector<8x8x32xf32> to vector<64x32xf32>
    %34 = arith.truncf %33 : vector<64x32xf32> to vector<64x32xbf16>
    %c0_28 = arith.constant 0 : index
    %c0_29 = arith.constant 0 : index
    %c0_30 = arith.constant 0 : index
    %35 = vector.load %arg6[%c0_28, %c0_29, %c0_30] : memref<9x32x32xbf16, #tpu.memory_space<vmem>>, vector<1x32x32xbf16>
    %36 = vector.shape_cast %35 : vector<1x32x32xbf16> to vector<32x32xbf16>
    %cst_31 = arith.constant dense<0.000000e+00> : vector<64x32xf32>
    %37 = tpu.matmul %34, %36, %cst_31 {dimension_numbers = #tpu.dot_dimension_numbers<[1], [0], [0], [1], [0, 0, 1, 1], [], []>} : vector<64x32xbf16>, vector<32x32xbf16>, vector<64x32xf32> -> vector<64x32xf32>
    %38 = arith.addf %31, %37 : vector<64x32xf32>
    %c0_32 = arith.constant 0 : index
    %c1_33 = arith.constant 1 : index
    %c0_34 = arith.constant 0 : index
    %39 = vector.load %arg10[%c0_32, %c1_33, %c0_34] : memref<10x10x32xf32, #tpu.memory_space<vmem>>, vector<8x8x32xf32>
    %40 = vector.shape_cast %39 : vector<8x8x32xf32> to vector<64x32xf32>
    %41 = arith.truncf %40 : vector<64x32xf32> to vector<64x32xbf16>
    %c1_35 = arith.constant 1 : index
    %c0_36 = arith.constant 0 : index
    %c0_37 = arith.constant 0 : index
    %42 = vector.load %arg6[%c1_35, %c0_36, %c0_37] : memref<9x32x32xbf16, #tpu.memory_space<vmem>>, vector<1x32x32xbf16>
    %43 = vector.shape_cast %42 : vector<1x32x32xbf16> to vector<32x32xbf16>
    %cst_38 = arith.constant dense<0.000000e+00> : vector<64x32xf32>
    %44 = tpu.matmul %41, %43, %cst_38 {dimension_numbers = #tpu.dot_dimension_numbers<[1], [0], [0], [1], [0, 0, 1, 1], [], []>} : vector<64x32xbf16>, vector<32x32xbf16>, vector<64x32xf32> -> vector<64x32xf32>
    %45 = arith.addf %38, %44 : vector<64x32xf32>
    %c0_39 = arith.constant 0 : index
    %c2 = arith.constant 2 : index
    %c0_40 = arith.constant 0 : index
    %46 = vector.load %arg10[%c0_39, %c2, %c0_40] : memref<10x10x32xf32, #tpu.memory_space<vmem>>, vector<8x8x32xf32>
    %47 = vector.shape_cast %46 : vector<8x8x32xf32> to vector<64x32xf32>
    %48 = arith.truncf %47 : vector<64x32xf32> to vector<64x32xbf16>
    %c2_41 = arith.constant 2 : index
    %c0_42 = arith.constant 0 : index
    %c0_43 = arith.constant 0 : index
    %49 = vector.load %arg6[%c2_41, %c0_42, %c0_43] : memref<9x32x32xbf16, #tpu.memory_space<vmem>>, vector<1x32x32xbf16>
    %50 = vector.shape_cast %49 : vector<1x32x32xbf16> to vector<32x32xbf16>
    %cst_44 = arith.constant dense<0.000000e+00> : vector<64x32xf32>
    %51 = tpu.matmul %48, %50, %cst_44 {dimension_numbers = #tpu.dot_dimension_numbers<[1], [0], [0], [1], [0, 0, 1, 1], [], []>} : vector<64x32xbf16>, vector<32x32xbf16>, vector<64x32xf32> -> vector<64x32xf32>
    %52 = arith.addf %45, %51 : vector<64x32xf32>
    %c1_45 = arith.constant 1 : index
    %c0_46 = arith.constant 0 : index
    %c0_47 = arith.constant 0 : index
    %53 = vector.load %arg10[%c1_45, %c0_46, %c0_47] : memref<10x10x32xf32, #tpu.memory_space<vmem>>, vector<8x8x32xf32>
    %54 = vector.shape_cast %53 : vector<8x8x32xf32> to vector<64x32xf32>
    %55 = arith.truncf %54 : vector<64x32xf32> to vector<64x32xbf16>
    %c3 = arith.constant 3 : index
    %c0_48 = arith.constant 0 : index
    %c0_49 = arith.constant 0 : index
    %56 = vector.load %arg6[%c3, %c0_48, %c0_49] : memref<9x32x32xbf16, #tpu.memory_space<vmem>>, vector<1x32x32xbf16>
    %57 = vector.shape_cast %56 : vector<1x32x32xbf16> to vector<32x32xbf16>
    %cst_50 = arith.constant dense<0.000000e+00> : vector<64x32xf32>
    %58 = tpu.matmul %55, %57, %cst_50 {dimension_numbers = #tpu.dot_dimension_numbers<[1], [0], [0], [1], [0, 0, 1, 1], [], []>} : vector<64x32xbf16>, vector<32x32xbf16>, vector<64x32xf32> -> vector<64x32xf32>
    %59 = arith.addf %52, %58 : vector<64x32xf32>
    %c1_51 = arith.constant 1 : index
    %c1_52 = arith.constant 1 : index
    %c0_53 = arith.constant 0 : index
    %60 = vector.load %arg10[%c1_51, %c1_52, %c0_53] : memref<10x10x32xf32, #tpu.memory_space<vmem>>, vector<8x8x32xf32>
    %61 = vector.shape_cast %60 : vector<8x8x32xf32> to vector<64x32xf32>
    %62 = arith.truncf %61 : vector<64x32xf32> to vector<64x32xbf16>
    %c4 = arith.constant 4 : index
    %c0_54 = arith.constant 0 : index
    %c0_55 = arith.constant 0 : index
    %63 = vector.load %arg6[%c4, %c0_54, %c0_55] : memref<9x32x32xbf16, #tpu.memory_space<vmem>>, vector<1x32x32xbf16>
    %64 = vector.shape_cast %63 : vector<1x32x32xbf16> to vector<32x32xbf16>
    %cst_56 = arith.constant dense<0.000000e+00> : vector<64x32xf32>
    %65 = tpu.matmul %62, %64, %cst_56 {dimension_numbers = #tpu.dot_dimension_numbers<[1], [0], [0], [1], [0, 0, 1, 1], [], []>} : vector<64x32xbf16>, vector<32x32xbf16>, vector<64x32xf32> -> vector<64x32xf32>
    %66 = arith.addf %59, %65 : vector<64x32xf32>
    %c1_57 = arith.constant 1 : index
    %c2_58 = arith.constant 2 : index
    %c0_59 = arith.constant 0 : index
    %67 = vector.load %arg10[%c1_57, %c2_58, %c0_59] : memref<10x10x32xf32, #tpu.memory_space<vmem>>, vector<8x8x32xf32>
    %68 = vector.shape_cast %67 : vector<8x8x32xf32> to vector<64x32xf32>
    %69 = arith.truncf %68 : vector<64x32xf32> to vector<64x32xbf16>
    %c5 = arith.constant 5 : index
    %c0_60 = arith.constant 0 : index
    %c0_61 = arith.constant 0 : index
    %70 = vector.load %arg6[%c5, %c0_60, %c0_61] : memref<9x32x32xbf16, #tpu.memory_space<vmem>>, vector<1x32x32xbf16>
    %71 = vector.shape_cast %70 : vector<1x32x32xbf16> to vector<32x32xbf16>
    %cst_62 = arith.constant dense<0.000000e+00> : vector<64x32xf32>
    %72 = tpu.matmul %69, %71, %cst_62 {dimension_numbers = #tpu.dot_dimension_numbers<[1], [0], [0], [1], [0, 0, 1, 1], [], []>} : vector<64x32xbf16>, vector<32x32xbf16>, vector<64x32xf32> -> vector<64x32xf32>
    %73 = arith.addf %66, %72 : vector<64x32xf32>
    %c2_63 = arith.constant 2 : index
    %c0_64 = arith.constant 0 : index
    %c0_65 = arith.constant 0 : index
    %74 = vector.load %arg10[%c2_63, %c0_64, %c0_65] : memref<10x10x32xf32, #tpu.memory_space<vmem>>, vector<8x8x32xf32>
    %75 = vector.shape_cast %74 : vector<8x8x32xf32> to vector<64x32xf32>
    %76 = arith.truncf %75 : vector<64x32xf32> to vector<64x32xbf16>
    %c6 = arith.constant 6 : index
    %c0_66 = arith.constant 0 : index
    %c0_67 = arith.constant 0 : index
    %77 = vector.load %arg6[%c6, %c0_66, %c0_67] : memref<9x32x32xbf16, #tpu.memory_space<vmem>>, vector<1x32x32xbf16>
    %78 = vector.shape_cast %77 : vector<1x32x32xbf16> to vector<32x32xbf16>
    %cst_68 = arith.constant dense<0.000000e+00> : vector<64x32xf32>
    %79 = tpu.matmul %76, %78, %cst_68 {dimension_numbers = #tpu.dot_dimension_numbers<[1], [0], [0], [1], [0, 0, 1, 1], [], []>} : vector<64x32xbf16>, vector<32x32xbf16>, vector<64x32xf32> -> vector<64x32xf32>
    %80 = arith.addf %73, %79 : vector<64x32xf32>
    %c2_69 = arith.constant 2 : index
    %c1_70 = arith.constant 1 : index
    %c0_71 = arith.constant 0 : index
    %81 = vector.load %arg10[%c2_69, %c1_70, %c0_71] : memref<10x10x32xf32, #tpu.memory_space<vmem>>, vector<8x8x32xf32>
    %82 = vector.shape_cast %81 : vector<8x8x32xf32> to vector<64x32xf32>
    %83 = arith.truncf %82 : vector<64x32xf32> to vector<64x32xbf16>
    %c7 = arith.constant 7 : index
    %c0_72 = arith.constant 0 : index
    %c0_73 = arith.constant 0 : index
    %84 = vector.load %arg6[%c7, %c0_72, %c0_73] : memref<9x32x32xbf16, #tpu.memory_space<vmem>>, vector<1x32x32xbf16>
    %85 = vector.shape_cast %84 : vector<1x32x32xbf16> to vector<32x32xbf16>
    %cst_74 = arith.constant dense<0.000000e+00> : vector<64x32xf32>
    %86 = tpu.matmul %83, %85, %cst_74 {dimension_numbers = #tpu.dot_dimension_numbers<[1], [0], [0], [1], [0, 0, 1, 1], [], []>} : vector<64x32xbf16>, vector<32x32xbf16>, vector<64x32xf32> -> vector<64x32xf32>
    %87 = arith.addf %80, %86 : vector<64x32xf32>
    %c2_75 = arith.constant 2 : index
    %c2_76 = arith.constant 2 : index
    %c0_77 = arith.constant 0 : index
    %88 = vector.load %arg10[%c2_75, %c2_76, %c0_77] : memref<10x10x32xf32, #tpu.memory_space<vmem>>, vector<8x8x32xf32>
    %89 = vector.shape_cast %88 : vector<8x8x32xf32> to vector<64x32xf32>
    %90 = arith.truncf %89 : vector<64x32xf32> to vector<64x32xbf16>
    %c8 = arith.constant 8 : index
    %c0_78 = arith.constant 0 : index
    %c0_79 = arith.constant 0 : index
    %91 = vector.load %arg6[%c8, %c0_78, %c0_79] : memref<9x32x32xbf16, #tpu.memory_space<vmem>>, vector<1x32x32xbf16>
    %92 = vector.shape_cast %91 : vector<1x32x32xbf16> to vector<32x32xbf16>
    %cst_80 = arith.constant dense<0.000000e+00> : vector<64x32xf32>
    %93 = tpu.matmul %90, %92, %cst_80 {dimension_numbers = #tpu.dot_dimension_numbers<[1], [0], [0], [1], [0, 0, 1, 1], [], []>} : vector<64x32xbf16>, vector<32x32xbf16>, vector<64x32xf32> -> vector<64x32xf32>
    %94 = arith.addf %87, %93 : vector<64x32xf32>
    %95 = vector.shape_cast %94 : vector<64x32xf32> to vector<8x8x32xf32>
    %c0_81 = arith.constant 0 : index
    %c0_82 = arith.constant 0 : index
    %c0_83 = arith.constant 0 : index
    %c0_84 = arith.constant 0 : index
    %96 = vector.load %arg7[%c0_81, %c0_82, %c0_83, %c0_84] : memref<1x8x8x32xf32, #tpu.memory_space<vmem>>, vector<1x8x8x32xf32>
    %97 = vector.shape_cast %96 : vector<1x8x8x32xf32> to vector<8x8x32xf32>
    %98 = vector.shape_cast %95 : vector<8x8x32xf32> to vector<1x8x8x32xf32>
    tpu.vector_store %arg7[%c0_81, %c0_82, %c0_83, %c0_84], %98 {strides = array<i32>} : memref<1x8x8x32xf32, #tpu.memory_space<vmem>>, vector<1x8x8x32xf32>,
    %cst_85 = arith.constant dense<0.000000e+00> : vector<32xf32>
    %99 = vector.multi_reduction <add>, %94, %cst_85 [0] : vector<64x32xf32> to vector<32xf32>
    %100 = vector.shape_cast %99 : vector<32xf32> to vector<1x32xf32>
    %101 = vector.shape_cast %100 : vector<1x32xf32> to vector<1x1x32xf32>
    %c0_86 = arith.constant 0 : index
    %c0_87 = arith.constant 0 : index
    %c0_88 = arith.constant 0 : index
    %102 = vector.load %arg8[%c0_86, %c0_87, %c0_88] : memref<1x1x32xf32, #tpu.memory_space<vmem>>, vector<1x1x32xf32>
    tpu.vector_store %arg8[%c0_86, %c0_87, %c0_88], %101 {strides = array<i32>} : memref<1x1x32xf32, #tpu.memory_space<vmem>>, vector<1x1x32xf32>,
    %103 = arith.mulf %94, %94 : vector<64x32xf32>
    %cst_89 = arith.constant dense<0.000000e+00> : vector<32xf32>
    %104 = vector.multi_reduction <add>, %103, %cst_89 [0] : vector<64x32xf32> to vector<32xf32>
    %105 = vector.shape_cast %104 : vector<32xf32> to vector<1x32xf32>
    %106 = vector.shape_cast %105 : vector<1x32xf32> to vector<1x1x32xf32>
    %c0_90 = arith.constant 0 : index
    %c0_91 = arith.constant 0 : index
    %c0_92 = arith.constant 0 : index
    %107 = vector.load %arg9[%c0_90, %c0_91, %c0_92] : memref<1x1x32xf32, #tpu.memory_space<vmem>>, vector<1x1x32xf32>
    tpu.vector_store %arg9[%c0_90, %c0_91, %c0_92], %106 {strides = array<i32>} : memref<1x1x32xf32, #tpu.memory_space<vmem>>, vector<1x1x32xf32>,
    return
  }
  func.func @transform_0(%arg0: i32) -> (i32, i32, i32, i32) {
    %c0_i32 = arith.constant 0 : i32
    %c0_i32_0 = arith.constant 0 : i32
    %c0_i32_1 = arith.constant 0 : i32
    %c0_i32_2 = arith.constant 0 : i32
    return %arg0, %c0_i32, %c0_i32_0, %c0_i32_1 : i32, i32, i32, i32
  }
  func.func @transform_1(%arg0: i32) -> (i32, i32, i32) {
    %c0_i32 = arith.constant 0 : i32
    %c0_i32_0 = arith.constant 0 : i32
    %c0_i32_1 = arith.constant 0 : i32
    %c0_i32_2 = arith.constant 0 : i32
    return %c0_i32, %c0_i32_0, %c0_i32_1 : i32, i32, i32
  }
  func.func @transform_2(%arg0: i32) -> (i32, i32, i32) {
    %c0_i32 = arith.constant 0 : i32
    %c0_i32_0 = arith.constant 0 : i32
    %c0_i32_1 = arith.constant 0 : i32
    %c0_i32_2 = arith.constant 0 : i32
    return %c0_i32, %c0_i32_0, %c0_i32_1 : i32, i32, i32
  }
  func.func @transform_3(%arg0: i32) -> (i32, i32) {
    %c0_i32 = arith.constant 0 : i32
    %c0_i32_0 = arith.constant 0 : i32
    %c0_i32_1 = arith.constant 0 : i32
    return %c0_i32, %c0_i32_0 : i32, i32
  }
  func.func @transform_4(%arg0: i32) -> (i32, i32) {
    %c0_i32 = arith.constant 0 : i32
    %c0_i32_0 = arith.constant 0 : i32
    %c0_i32_1 = arith.constant 0 : i32
    return %c0_i32, %c0_i32_0 : i32, i32
  }
  func.func @transform_5(%arg0: i32) -> (i32, i32, i32) {
    %c0_i32 = arith.constant 0 : i32
    %c0_i32_0 = arith.constant 0 : i32
    %c0_i32_1 = arith.constant 0 : i32
    %c0_i32_2 = arith.constant 0 : i32
    return %c0_i32, %c0_i32_0, %c0_i32_1 : i32, i32, i32
  }
  func.func @transform_6(%arg0: i32) -> (i32, i32, i32, i32) {
    %c0_i32 = arith.constant 0 : i32
    %c0_i32_0 = arith.constant 0 : i32
    %c0_i32_1 = arith.constant 0 : i32
    %c0_i32_2 = arith.constant 0 : i32
    return %arg0, %c0_i32, %c0_i32_0, %c0_i32_1 : i32, i32, i32, i32
  }
  func.func @transform_7(%arg0: i32) -> (i32, i32, i32) {
    %c0_i32 = arith.constant 0 : i32
    %c0_i32_0 = arith.constant 0 : i32
    %c0_i32_1 = arith.constant 0 : i32
    return %arg0, %c0_i32, %c0_i32_0 : i32, i32, i32
  }
  func.func @transform_8(%arg0: i32) -> (i32, i32, i32) {
    %c0_i32 = arith.constant 0 : i32
    %c0_i32_0 = arith.constant 0 : i32
    %c0_i32_1 = arith.constant 0 : i32
    return %arg0, %c0_i32, %c0_i32_0 : i32, i32, i32
  }
}

module attributes {stable_mosaic.version = 11 : i64} {
  func.func @_bn_add_relu_kernel(%arg0: i32, %arg1: memref<128x32xf32, #tpu.memory_space<vmem>>, %arg2: memref<2x1x32xf32, #tpu.memory_space<vmem>>, %arg3: memref<2x1x32xf32, #tpu.memory_space<vmem>>, %arg4: memref<1x32xf32, #tpu.memory_space<vmem>>, %arg5: memref<1x32xf32, #tpu.memory_space<vmem>>, %arg6: memref<128x16xf32, #tpu.memory_space<vmem>>, %arg7: memref<128x32xf32, #tpu.memory_space<vmem>>) attributes {dimension_semantics = [#tpu.dimension_semantics<parallel>], iteration_bounds = array<i64: 1>, scalar_prefetch = 0 : i64, scratch_operands = 0 : i64, tpu.core_type = #tpu.core_type<tc>, window_params = [{transform_indices = @transform_0, window_bounds = array<i64: 128, 32>}, {pipeline_mode = #tpu.pipeline_mode<synchronous>, transform_indices = @transform_1, window_bounds = array<i64: 2, 1, 32>}, {pipeline_mode = #tpu.pipeline_mode<synchronous>, transform_indices = @transform_2, window_bounds = array<i64: 2, 1, 32>}, {pipeline_mode = #tpu.pipeline_mode<synchronous>, transform_indices = @transform_3, window_bounds = array<i64: 1, 32>}, {pipeline_mode = #tpu.pipeline_mode<synchronous>, transform_indices = @transform_4, window_bounds = array<i64: 1, 32>}, {transform_indices = @transform_5, window_bounds = array<i64: 128, 16>}, {transform_indices = @transform_6, window_bounds = array<i64: 128, 32>}]} {
    %c0 = arith.constant 0 : index
    %c0_0 = arith.constant 0 : index
    %c0_1 = arith.constant 0 : index
    %0 = vector.load %arg2[%c0, %c0_0, %c0_1] : memref<2x1x32xf32, #tpu.memory_space<vmem>>, vector<2x1x32xf32>
    %cst = arith.constant dense<0.000000e+00> : vector<1x32xf32>
    %1 = vector.multi_reduction <add>, %0, %cst [0] : vector<2x1x32xf32> to vector<1x32xf32>
    %cst_2 = arith.constant 7.812500e-03 : f32
    %2 = vector.broadcast %cst_2 : f32 to vector<1x32xf32>
    %3 = arith.mulf %1, %2 : vector<1x32xf32>
    %c0_3 = arith.constant 0 : index
    %c0_4 = arith.constant 0 : index
    %c0_5 = arith.constant 0 : index
    %4 = vector.load %arg3[%c0_3, %c0_4, %c0_5] : memref<2x1x32xf32, #tpu.memory_space<vmem>>, vector<2x1x32xf32>
    %cst_6 = arith.constant dense<0.000000e+00> : vector<1x32xf32>
    %5 = vector.multi_reduction <add>, %4, %cst_6 [0] : vector<2x1x32xf32> to vector<1x32xf32>
    %cst_7 = arith.constant 7.812500e-03 : f32
    %6 = vector.broadcast %cst_7 : f32 to vector<1x32xf32>
    %7 = arith.mulf %5, %6 : vector<1x32xf32>
    %8 = arith.mulf %3, %3 : vector<1x32xf32>
    %9 = arith.subf %7, %8 : vector<1x32xf32>
    %c0_8 = arith.constant 0 : index
    %c0_9 = arith.constant 0 : index
    %10 = vector.load %arg4[%c0_8, %c0_9] : memref<1x32xf32, #tpu.memory_space<vmem>>, vector<1x32xf32>
    %cst_10 = arith.constant 9.99999974E-6 : f32
    %11 = vector.broadcast %cst_10 : f32 to vector<1x32xf32>
    %12 = arith.addf %9, %11 : vector<1x32xf32>
    %13 = math.rsqrt %12 : vector<1x32xf32>
    %14 = arith.mulf %10, %13 : vector<1x32xf32>
    %c0_11 = arith.constant 0 : index
    %c0_12 = arith.constant 0 : index
    %15 = vector.load %arg5[%c0_11, %c0_12] : memref<1x32xf32, #tpu.memory_space<vmem>>, vector<1x32xf32>
    %16 = arith.mulf %3, %14 : vector<1x32xf32>
    %17 = arith.subf %15, %16 : vector<1x32xf32>
    %c0_13 = arith.constant 0 : index
    %c0_14 = arith.constant 0 : index
    %18 = vector.load %arg1[%c0_13, %c0_14] : memref<128x32xf32, #tpu.memory_space<vmem>>, vector<128x32xf32>
    %19 = vector.broadcast %14 : vector<1x32xf32> to vector<128x32xf32>
    %20 = arith.mulf %18, %19 : vector<128x32xf32>
    %21 = vector.broadcast %17 : vector<1x32xf32> to vector<128x32xf32>
    %22 = arith.addf %20, %21 : vector<128x32xf32>
    %c0_15 = arith.constant 0 : index
    %c0_16 = arith.constant 0 : index
    %23 = vector.load %arg6[%c0_15, %c0_16] : memref<128x16xf32, #tpu.memory_space<vmem>>, vector<128x16xf32>
    %cst_17 = arith.constant 0.000000e+00 : f32
    %24 = vector.broadcast %cst_17 : f32 to vector<128x8xf32>
    %25 = tpu.concatenate %24, %23, %24 in 1 : vector<128x8xf32>, vector<128x16xf32>, vector<128x8xf32> -> vector<128x32xf32>
    %26 = arith.addf %22, %25 : vector<128x32xf32>
    %cst_18 = arith.constant 0.000000e+00 : f32
    %27 = vector.broadcast %cst_18 : f32 to vector<128x32xf32>
    %28 = arith.maximumf %26, %27 : vector<128x32xf32>
    %c0_19 = arith.constant 0 : index
    %c0_20 = arith.constant 0 : index
    %29 = vector.load %arg7[%c0_19, %c0_20] : memref<128x32xf32, #tpu.memory_space<vmem>>, vector<128x32xf32>
    tpu.vector_store %arg7[%c0_19, %c0_20], %28 {strides = array<i32>} : memref<128x32xf32, #tpu.memory_space<vmem>>, vector<128x32xf32>,
    return
  }
  func.func @transform_0(%arg0: i32) -> (i32, i32) {
    %c0_i32 = arith.constant 0 : i32
    %c0_i32_0 = arith.constant 0 : i32
    return %arg0, %c0_i32 : i32, i32
  }
  func.func @transform_1(%arg0: i32) -> (i32, i32, i32) {
    %c0_i32 = arith.constant 0 : i32
    %c0_i32_0 = arith.constant 0 : i32
    %c0_i32_1 = arith.constant 0 : i32
    %c0_i32_2 = arith.constant 0 : i32
    return %c0_i32, %c0_i32_0, %c0_i32_1 : i32, i32, i32
  }
  func.func @transform_2(%arg0: i32) -> (i32, i32, i32) {
    %c0_i32 = arith.constant 0 : i32
    %c0_i32_0 = arith.constant 0 : i32
    %c0_i32_1 = arith.constant 0 : i32
    %c0_i32_2 = arith.constant 0 : i32
    return %c0_i32, %c0_i32_0, %c0_i32_1 : i32, i32, i32
  }
  func.func @transform_3(%arg0: i32) -> (i32, i32) {
    %c0_i32 = arith.constant 0 : i32
    %c0_i32_0 = arith.constant 0 : i32
    %c0_i32_1 = arith.constant 0 : i32
    return %c0_i32, %c0_i32_0 : i32, i32
  }
  func.func @transform_4(%arg0: i32) -> (i32, i32) {
    %c0_i32 = arith.constant 0 : i32
    %c0_i32_0 = arith.constant 0 : i32
    %c0_i32_1 = arith.constant 0 : i32
    return %c0_i32, %c0_i32_0 : i32, i32
  }
  func.func @transform_5(%arg0: i32) -> (i32, i32) {
    %c0_i32 = arith.constant 0 : i32
    %c0_i32_0 = arith.constant 0 : i32
    return %arg0, %c0_i32 : i32, i32
  }
  func.func @transform_6(%arg0: i32) -> (i32, i32) {
    %c0_i32 = arith.constant 0 : i32
    %c0_i32_0 = arith.constant 0 : i32
    return %arg0, %c0_i32 : i32, i32
  }
}

</mosaic_0001>

<bundles_post_ra>
// kernel: fwd.8
= control target key start
LH: loop header
LB: loop body
LE: loop exit
PB: predicated region body
PF: predicated region fallthrough
CT: control target
= control target key end

     0   :  { %vm25_vm0 = vcmask 122880   ;;  %v110_v15 = vlaneseq  ;;  %vm441_vm1 = vcmask 130048   ;;  %s1337_s1 = inlined_call_operand.vmem [shape: f32[2,1,16], index: 1, kind: input, shape index: {}]   ;;  %s1338_s2 = inlined_call_operand.vmem [shape: f32[2,1,16], index: 2, kind: input, shape index: {}]   ;;  %s1339_s3 = inlined_call_operand.vmem [shape: f32[1,16], index: 3, kind: input, shape index: {}]   ;;  %s1340_s0 = inlined_call_operand.vmem [shape: f32[512,16], index: 0, kind: input, shape index: {}]   ;;  %s1341_s4 = inlined_call_operand.vmem [shape: f32[1,16], index: 4, kind: input, shape index: {}]   ;;  %s1342_s5 = inlined_call_operand.vmem [shape: f32[512,16], index: 5, kind: input, shape index: {}]   ;;  %s1343_s6 = inlined_call_operand.vmem [shape: f32[512,16], index: 6, kind: output, shape index: {}]  }
   0x1   :  { %v23_v0 = vld [vmem:[%s1337_s1] sm:$0x1]  ;;  %v24_v1 = vld [vmem:[%s1337_s1 + $0x1] sm:$0x1]  ;;  %v46_v23 = vld [vmem:[%s1340_s0 + $0x8] sm:$0xff] }
   0x2   :  { %v30_v2 = vld [vmem:[%s1338_s2] sm:$0x1]  ;;  %v26_v3 = vsel %vm25_vm0, %v23_v0, 0.0  ;;  %v27_v4 = vsel %vm25_vm0, %v24_v1, 0.0  ;;  %v31_v5 = vld [vmem:[%s1338_s2 + $0x1] sm:$0x1] }
   0x3   :  { %v32_v6 = vsel %vm25_vm0, %v30_v2, 0.0  ;;  %v28_v7 = vadd.f32 %v27_v4, %v26_v3  ;;  %v33_v8 = vsel %vm25_vm0, %v31_v5, 0.0  ;;  %v111_v16 = vshrl.u32 %v110_v15, 7  ;;  %v38_v17 = vld [vmem:[%s1339_s3] sm:$0x1]  ;;  %v47_v24 = vld [vmem:[%s1340_s0 + $0x10] sm:$0xff] }
   0x4   :  { %v34_v9 = vadd.f32 %v33_v8, %v32_v6  ;;  %v42_v21 = vld [vmem:[%s1341_s4] sm:$0x1]  ;;  %v48_v25 = vld [vmem:[%s1340_s0 + $0x18] sm:$0xff]  ;;  %v50_v29 = vld [vmem:[%s1340_s0 + $0x28] sm:$0xff] }
   0x5   :  { %v29_v10 = vmul.f32 0.001953125, %v28_v7  ;;  %v112_v18 = vsub.s32 0, %v111_v16  ;;  %v45_v22 = vld [vmem:[%s1340_s0] sm:$0xff]  ;;  %v51_v30 = vld [vmem:[%s1340_s0 + $0x30] sm:$0xff]  ;;  %v52_v31 = vld [vmem:[%s1340_s0 + $0x38] sm:$0xff] }
   0x6   :  { %v35_v11 = vmul.f32 0.001953125, %v34_v9  ;;  %v49_v26 = vld [vmem:[%s1340_s0 + $0x20] sm:$0xff]  ;;  %v54_v33 = vld [vmem:[%s1340_s0 + $0x48] sm:$0xff]  ;;  %v55_v34 = vld [vmem:[%s1340_s0 + $0x50] sm:$0xff] }
   0x7   :  { %v36_v12 = vmul.f32 %v29_v10, %v29_v10  ;;  %v53_v32 = vld [vmem:[%s1340_s0 + $0x40] sm:$0xff]  ;;  %v56_v39 = vld [vmem:[%s1340_s0 + $0x58] sm:$0xff]  ;;  %v58_v41 = vld [vmem:[%s1340_s0 + $0x68] sm:$0xff] }
   0x8   :  { %v57_v40 = vld [vmem:[%s1340_s0 + $0x60] sm:$0xff]  ;;  %v250_v48 = vld [vmem:[%s1342_s5 + $0x8] sm:$0xff]  ;;  %v251_v52 = vld [vmem:[%s1342_s5 + $0x10] sm:$0xff] }
   0x9   :  { %v37_v13 = vsub.f32 %v35_v11, %v36_v12  ;;  %v249_v47 = vld [vmem:[%s1342_s5] sm:$0xff]  ;;  %v252_v53 = vld [vmem:[%s1342_s5 + $0x18] sm:$0xff]  ;;  %v254_v63 = vld [vmem:[%s1342_s5 + $0x28] sm:$0xff] }
   0xa   :  { %v253_v54 = vld [vmem:[%s1342_s5 + $0x20] sm:$0xff]  ;;  %v255_v0 = vld [vmem:[%s1342_s5 + $0x30] sm:$0xff]  ;;  %v256_v1 = vld [vmem:[%s1342_s5 + $0x38] sm:$0xff] }
   0xb   :  { %v39_v14 = vadd.f32 1e-05, %v37_v13  ;;  %v258_v15 = vld [vmem:[%s1342_s5 + $0x48] sm:$0xff] }
   0xd   :  { %510 = vrsqrt.f32 %v39_v14  ;;  %v257_v14 = vld [vmem:[%s1342_s5 + $0x40] sm:$0xff] }
  0x1a   :  { %v511_v19 = vpop.eup %510 }
  0x1b   :  { %v41_v20 = vmul.f32 %v511_v19, %v38_v17 }
  0x1d   :  { %v43_v27 = vmul.f32 %v41_v20, %v29_v10  ;;  %v580_v28 = vrot.slane %v41_v20, %v112_v18  ;;  %v59_v20 = vld [vmem:[%s1340_s0 + $0x70] sm:$0xff] }
  0x1f   :  { %v44_v35 = vsub.f32 %v42_v21, %v43_v27  ;;  %v115_v36 = vmul.f32 %v580_v28, %v45_v22  ;;  %v116_v37 = vmul.f32 %v580_v28, %v46_v23  ;;  %v117_v38 = vmul.f32 %v580_v28, %v47_v24  ;;  %v60_v21 = vld [vmem:[%s1340_s0 + $0x78] sm:$0xff] }
  0x20   :  { %v118_v42 = vmul.f32 %v580_v28, %v48_v25  ;;  %v119_v43 = vmul.f32 %v580_v28, %v49_v26  ;;  %v120_v44 = vmul.f32 %v580_v28, %v50_v29  ;;  %v121_v45 = vmul.f32 %v580_v28, %v51_v30  ;;  %v259_v26 = vld [vmem:[%s1342_s5 + $0x50] sm:$0xff]  ;;  %v260_v27 = vld [vmem:[%s1342_s5 + $0x58] sm:$0xff] }
  0x21   :  { %v616_v46 = vrot.slane %v44_v35, %v112_v18  ;;  %v122_v49 = vmul.f32 %v580_v28, %v52_v31  ;;  %v123_v50 = vmul.f32 %v580_v28, %v53_v32  ;;  %v124_v51 = vmul.f32 %v580_v28, %v54_v33  ;;  %v261_v33 = vld [vmem:[%s1342_s5 + $0x60] sm:$0xff] }
  0x22   :  { %v125_v55 = vmul.f32 %v580_v28, %v55_v34  ;;  %v126_v56 = vmul.f32 %v580_v28, %v56_v39  ;;  %v127_v57 = vmul.f32 %v580_v28, %v57_v40  ;;  %v128_v58 = vmul.f32 %v580_v28, %v58_v41  ;;  %v262_v34 = vld [vmem:[%s1342_s5 + $0x68] sm:$0xff] }
  0x23   :  { %v185_v59 = vadd.f32 %v616_v46, %v115_v36  ;;  %v186_v60 = vadd.f32 %v616_v46, %v116_v37  ;;  %v187_v61 = vadd.f32 %v616_v46, %v117_v38  ;;  %v188_v62 = vadd.f32 %v616_v46, %v118_v42 }
  0x24   :  { %v189_v2 = vadd.f32 %v616_v46, %v119_v43  ;;  %v190_v3 = vadd.f32 %v616_v46, %v120_v44  ;;  %v191_v4 = vadd.f32 %v616_v46, %v121_v45  ;;  %v192_v5 = vadd.f32 %v616_v46, %v122_v49  ;;  %v263_v43 = vld [vmem:[%s1342_s5 + $0x70] sm:$0xff]  ;;  %v264_v44 = vld [vmem:[%s1342_s5 + $0x78] sm:$0xff]  ;;  %v61_v45 = vld [vmem:[%s1340_s0 + $0x80] sm:$0xff] }
  0x25   :  { %v313_v6 = vadd.f32 %v249_v47, %v185_v59  ;;  %v314_v7 = vadd.f32 %v250_v48, %v186_v60  ;;  %v315_v8 = vadd.f32 %v251_v52, %v187_v61  ;;  %v316_v9 = vadd.f32 %v252_v53, %v188_v62  ;;  %v63_v52 = vld [vmem:[%s1340_s0 + $0x90] sm:$0xff]  ;;  %v64_v53 = vld [vmem:[%s1340_s0 + $0x98] sm:$0xff]  ;;  %v66_v59 = vld [vmem:[%s1340_s0 + $0xa8] sm:$0xff] }
  0x26   :  { %v317_v10 = vadd.f32 %v253_v54, %v189_v2  ;;  %v318_v11 = vadd.f32 %v254_v63, %v190_v3  ;;  %v319_v12 = vadd.f32 %v255_v0, %v191_v4  ;;  %v320_v13 = vadd.f32 %v256_v1, %v192_v5  ;;  %v265_v1 = vld [vmem:[%s1342_s5 + $0x80] sm:$0xff]  ;;  %v67_v5 = vld [vmem:[%s1340_s0 + $0xb0] sm:$0xff] }
  0x27   :  { %v377_v16 = vmax.f32 %v313_v6, 0.0  ;;  %v378_v17 = vmax.f32 %v314_v7, 0.0  ;;  %v379_v18 = vmax.f32 %v315_v8, 0.0  ;;  %v380_v19 = vmax.f32 %v316_v9, 0.0  ;;  %v68_v6 = vld [vmem:[%s1340_s0 + $0xb8] sm:$0xff]  ;;  %v266_v9 = vld [vmem:[%s1342_s5 + $0x88] sm:$0xff] }
  0x28   :  { %v381_v22 = vmax.f32 %v317_v10, 0.0  ;;  %v382_v23 = vmax.f32 %v318_v11, 0.0  ;;  %v383_v24 = vmax.f32 %v319_v12, 0.0  ;;  %v384_v25 = vmax.f32 %v320_v13, 0.0  ;;  %v267_v10 = vld [vmem:[%s1342_s5 + $0x90] sm:$0xff]  ;;  %v268_v11 = vld [vmem:[%s1342_s5 + $0x98] sm:$0xff] }
  0x29   :  { %442 = vst.msk [vmem:[%s1343_s6] sm:$0xff] %vm441_vm1, %v377_v16  ;;  %443 = vst.msk [vmem:[%s1343_s6 + $0x8] sm:$0xff] %vm441_vm1, %v378_v17  ;;  %v193_v29 = vadd.f32 %v616_v46, %v123_v50  ;;  %v194_v30 = vadd.f32 %v616_v46, %v124_v51  ;;  %v195_v31 = vadd.f32 %v616_v46, %v125_v55  ;;  %v62_v51 = vld [vmem:[%s1340_s0 + $0x88] sm:$0xff] }
  0x2a   :  { %444 = vst.msk [vmem:[%s1343_s6 + $0x10] sm:$0xff] %vm441_vm1, %v379_v18  ;;  %445 = vst.msk [vmem:[%s1343_s6 + $0x18] sm:$0xff] %vm441_vm1, %v380_v19  ;;  %v196_v32 = vadd.f32 %v616_v46, %v126_v56  ;;  %v197_v35 = vadd.f32 %v616_v46, %v127_v57  ;;  %v198_v36 = vadd.f32 %v616_v46, %v128_v58  ;;  %v65_v58 = vld [vmem:[%s1340_s0 + $0xa0] sm:$0xff]  ;;  %v270_v19 = vld [vmem:[%s1342_s5 + $0xa8] sm:$0xff] }
  0x2b   :  { %446 = vst.msk [vmem:[%s1343_s6 + $0x20] sm:$0xff] %vm441_vm1, %v381_v22  ;;  %447 = vst.msk [vmem:[%s1343_s6 + $0x28] sm:$0xff] %vm441_vm1, %v382_v23  ;;  %v129_v37 = vmul.f32 %v580_v28, %v59_v20  ;;  %v130_v38 = vmul.f32 %v580_v28, %v60_v21  ;;  %v321_v39 = vadd.f32 %v257_v14, %v193_v29  ;;  %v269_v18 = vld [vmem:[%s1342_s5 + $0xa0] sm:$0xff]  ;;  %v271_v29 = vld [vmem:[%s1342_s5 + $0xb0] sm:$0xff] }
  0x2c   :  { %448 = vst.msk [vmem:[%s1343_s6 + $0x30] sm:$0xff] %vm441_vm1, %v383_v24  ;;  %449 = vst.msk [vmem:[%s1343_s6 + $0x38] sm:$0xff] %vm441_vm1, %v384_v25  ;;  %v322_v40 = vadd.f32 %v258_v15, %v194_v30  ;;  %v323_v41 = vadd.f32 %v259_v26, %v195_v31  ;;  %v324_v42 = vadd.f32 %v260_v27, %v196_v32  ;;  %v272_v30 = vld [vmem:[%s1342_s5 + $0xb8] sm:$0xff]  ;;  %v69_v31 = vld [vmem:[%s1340_s0 + $0xc0] sm:$0xff] }
  0x2d   :  { %v325_v47 = vadd.f32 %v261_v33, %v197_v35  ;;  %v326_v48 = vadd.f32 %v262_v34, %v198_v36  ;;  %v199_v49 = vadd.f32 %v616_v46, %v129_v37  ;;  %v200_v50 = vadd.f32 %v616_v46, %v130_v38  ;;  %v70_v36 = vld [vmem:[%s1340_s0 + $0xc8] sm:$0xff]  ;;  %v71_v37 = vld [vmem:[%s1340_s0 + $0xd0] sm:$0xff]  ;;  %v72_v38 = vld [vmem:[%s1340_s0 + $0xd8] sm:$0xff] }
  0x2e   :  { %v385_v54 = vmax.f32 %v321_v39, 0.0  ;;  %v386_v55 = vmax.f32 %v322_v40, 0.0  ;;  %v387_v56 = vmax.f32 %v323_v41, 0.0  ;;  %v388_v57 = vmax.f32 %v324_v42, 0.0 }
  0x2f   :  { %v389_v60 = vmax.f32 %v325_v47, 0.0  ;;  %v390_v61 = vmax.f32 %v326_v48, 0.0  ;;  %v327_v62 = vadd.f32 %v263_v43, %v199_v49  ;;  %v328_v63 = vadd.f32 %v264_v44, %v200_v50  ;;  %v73_v43 = vld [vmem:[%s1340_s0 + $0xe0] sm:$0xff]  ;;  %v74_v44 = vld [vmem:[%s1340_s0 + $0xe8] sm:$0xff] }
  0x30   :  { %450 = vst.msk [vmem:[%s1343_s6 + $0x40] sm:$0xff] %vm441_vm1, %v385_v54  ;;  %451 = vst.msk [vmem:[%s1343_s6 + $0x48] sm:$0xff] %vm441_vm1, %v386_v55  ;;  %v131_v0 = vmul.f32 %v580_v28, %v61_v45  ;;  %v132_v2 = vmul.f32 %v580_v28, %v62_v51  ;;  %v133_v3 = vmul.f32 %v580_v28, %v63_v52  ;;  %v273_v51 = vld [vmem:[%s1342_s5 + $0xc0] sm:$0xff]  ;;  %v75_v55 = vld [vmem:[%s1340_s0 + $0xf0] sm:$0xff] }
  0x31   :  { %452 = vst.msk [vmem:[%s1343_s6 + $0x50] sm:$0xff] %vm441_vm1, %v387_v56  ;;  %453 = vst.msk [vmem:[%s1343_s6 + $0x58] sm:$0xff] %vm441_vm1, %v388_v57  ;;  %v134_v4 = vmul.f32 %v580_v28, %v64_v53  ;;  %v391_v7 = vmax.f32 %v327_v62, 0.0  ;;  %v392_v8 = vmax.f32 %v328_v63, 0.0  ;;  %v135_v12 = vmul.f32 %v580_v28, %v65_v58  ;;  %v76_v56 = vld [vmem:[%s1340_s0 + $0xf8] sm:$0xff] }
  0x32   :  { %454 = vst.msk [vmem:[%s1343_s6 + $0x60] sm:$0xff] %vm441_vm1, %v389_v60  ;;  %455 = vst.msk [vmem:[%s1343_s6 + $0x68] sm:$0xff] %vm441_vm1, %v390_v61  ;;  %v136_v13 = vmul.f32 %v580_v28, %v66_v59  ;;  %v201_v14 = vadd.f32 %v616_v46, %v131_v0  ;;  %v202_v15 = vadd.f32 %v616_v46, %v132_v2  ;;  %v274_v59 = vld [vmem:[%s1342_s5 + $0xc8] sm:$0xff]  ;;  %v275_v60 = vld [vmem:[%s1342_s5 + $0xd0] sm:$0xff] }
  0x33   :  { %v203_v16 = vadd.f32 %v616_v46, %v133_v3  ;;  %v204_v17 = vadd.f32 %v616_v46, %v134_v4  ;;  %456 = vst.msk [vmem:[%s1343_s6 + $0x70] sm:$0xff] %vm441_vm1, %v391_v7  ;;  %457 = vst.msk [vmem:[%s1343_s6 + $0x78] sm:$0xff] %vm441_vm1, %v392_v8  ;;  %v205_v20 = vadd.f32 %v616_v46, %v135_v12  ;;  %v276_v61 = vld [vmem:[%s1342_s5 + $0xd8] sm:$0xff]  ;;  %v277_v4 = vld [vmem:[%s1342_s5 + $0xe0] sm:$0xff] }
  0x34   :  { %v206_v21 = vadd.f32 %v616_v46, %v136_v13  ;;  %v137_v22 = vmul.f32 %v580_v28, %v67_v5  ;;  %v138_v23 = vmul.f32 %v580_v28, %v68_v6  ;;  %v329_v24 = vadd.f32 %v265_v1, %v201_v14  ;;  %v278_v5 = vld [vmem:[%s1342_s5 + $0xe8] sm:$0xff]  ;;  %v279_v14 = vld [vmem:[%s1342_s5 + $0xf0] sm:$0xff] }
  0x35   :  { %v330_v25 = vadd.f32 %v266_v9, %v202_v15  ;;  %v331_v26 = vadd.f32 %v267_v10, %v203_v16  ;;  %v332_v27 = vadd.f32 %v268_v11, %v204_v17  ;;  %v333_v32 = vadd.f32 %v269_v18, %v205_v20  ;;  %v280_v15 = vld [vmem:[%s1342_s5 + $0xf8] sm:$0xff]  ;;  %v77_v16 = vld [vmem:[%s1340_s0 + $0x100] sm:$0xff] }
  0x36   :  { %v334_v33 = vadd.f32 %v270_v19, %v206_v21  ;;  %v207_v34 = vadd.f32 %v616_v46, %v137_v22  ;;  %v208_v35 = vadd.f32 %v616_v46, %v138_v23  ;;  %v393_v39 = vmax.f32 %v329_v24, 0.0  ;;  %v78_v21 = vld [vmem:[%s1340_s0 + $0x108] sm:$0xff]  ;;  %v79_v22 = vld [vmem:[%s1340_s0 + $0x110] sm:$0xff]  ;;  %v80_v23 = vld [vmem:[%s1340_s0 + $0x118] sm:$0xff] }
  0x37   :  { %v394_v40 = vmax.f32 %v330_v25, 0.0  ;;  %v395_v41 = vmax.f32 %v331_v26, 0.0  ;;  %v396_v42 = vmax.f32 %v332_v27, 0.0  ;;  %v397_v45 = vmax.f32 %v333_v32, 0.0 }
  0x38   :  { %v398_v47 = vmax.f32 %v334_v33, 0.0  ;;  %v335_v48 = vadd.f32 %v271_v29, %v207_v34  ;;  %v336_v49 = vadd.f32 %v272_v30, %v208_v35  ;;  %458 = vst.msk [vmem:[%s1343_s6 + $0x80] sm:$0xff] %vm441_vm1, %v393_v39  ;;  %v139_v50 = vmul.f32 %v580_v28, %v69_v31  ;;  %v81_v29 = vld [vmem:[%s1340_s0 + $0x120] sm:$0xff]  ;;  %v82_v30 = vld [vmem:[%s1340_s0 + $0x128] sm:$0xff] }
  0x39   :  { %459 = vst.msk [vmem:[%s1343_s6 + $0x88] sm:$0xff] %vm441_vm1, %v394_v40  ;;  %460 = vst.msk [vmem:[%s1343_s6 + $0x90] sm:$0xff] %vm441_vm1, %v395_v41  ;;  %v140_v52 = vmul.f32 %v580_v28, %v70_v36  ;;  %v141_v53 = vmul.f32 %v580_v28, %v71_v37  ;;  %v142_v54 = vmul.f32 %v580_v28, %v72_v38  ;;  %v281_v36 = vld [vmem:[%s1342_s5 + $0x100] sm:$0xff]  ;;  %v83_v40 = vld [vmem:[%s1340_s0 + $0x130] sm:$0xff] }
  0x3a   :  { %461 = vst.msk [vmem:[%s1343_s6 + $0x98] sm:$0xff] %vm441_vm1, %v396_v42  ;;  %462 = vst.msk [vmem:[%s1343_s6 + $0xa0] sm:$0xff] %vm441_vm1, %v397_v45  ;;  %v399_v57 = vmax.f32 %v335_v48, 0.0  ;;  %v400_v58 = vmax.f32 %v336_v49, 0.0  ;;  %v143_v62 = vmul.f32 %v580_v28, %v73_v43  ;;  %v144_v63 = vmul.f32 %v580_v28, %v74_v44  ;;  %v84_v41 = vld [vmem:[%s1340_s0 + $0x138] sm:$0xff]  ;;  %v282_v44 = vld [vmem:[%s1342_s5 + $0x108] sm:$0xff] }
  0x3b   :  { %463 = vst.msk [vmem:[%s1343_s6 + $0xa8] sm:$0xff] %vm441_vm1, %v398_v47  ;;  %v209_v0 = vadd.f32 %v616_v46, %v139_v50  ;;  %v210_v1 = vadd.f32 %v616_v46, %v140_v52  ;;  %v211_v2 = vadd.f32 %v616_v46, %v141_v53  ;;  %v212_v3 = vadd.f32 %v616_v46, %v142_v54  ;;  %v283_v45 = vld [vmem:[%s1342_s5 + $0x110] sm:$0xff]  ;;  %v284_v47 = vld [vmem:[%s1342_s5 + $0x118] sm:$0xff]  ;;  %v285_v54 = vld [vmem:[%s1342_s5 + $0x120] sm:$0xff] }
  0x3c   :  { %464 = vst.msk [vmem:[%s1343_s6 + $0xb0] sm:$0xff] %vm441_vm1, %v399_v57  ;;  %465 = vst.msk [vmem:[%s1343_s6 + $0xb8] sm:$0xff] %vm441_vm1, %v400_v58  ;;  %v213_v6 = vadd.f32 %v616_v46, %v143_v62  ;;  %v214_v7 = vadd.f32 %v616_v46, %v144_v63  ;;  %v145_v8 = vmul.f32 %v580_v28, %v75_v55  ;;  %v286_v55 = vld [vmem:[%s1342_s5 + $0x128] sm:$0xff] }
  0x3d   :  { %v146_v9 = vmul.f32 %v580_v28, %v76_v56  ;;  %v337_v10 = vadd.f32 %v273_v51, %v209_v0  ;;  %v338_v11 = vadd.f32 %v274_v59, %v210_v1  ;;  %v339_v12 = vadd.f32 %v275_v60, %v211_v2  ;;  %v287_v0 = vld [vmem:[%s1342_s5 + $0x130] sm:$0xff]  ;;  %v288_v1 = vld [vmem:[%s1342_s5 + $0x138] sm:$0xff]  ;;  %v85_v2 = vld [vmem:[%s1340_s0 + $0x140] sm:$0xff] }
  0x3e   :  { %v340_v13 = vadd.f32 %v276_v61, %v212_v3  ;;  %v341_v17 = vadd.f32 %v277_v4, %v213_v6  ;;  %v342_v18 = vadd.f32 %v278_v5, %v214_v7  ;;  %v215_v19 = vadd.f32 %v616_v46, %v145_v8  ;;  %v86_v7 = vld [vmem:[%s1340_s0 + $0x148] sm:$0xff]  ;;  %v87_v8 = vld [vmem:[%s1340_s0 + $0x150] sm:$0xff] }
  0x3f   :  { %v216_v20 = vadd.f32 %v616_v46, %v146_v9  ;;  %v401_v24 = vmax.f32 %v337_v10, 0.0  ;;  %v402_v25 = vmax.f32 %v338_v11, 0.0  ;;  %v403_v26 = vmax.f32 %v339_v12, 0.0  ;;  %v88_v9 = vld [vmem:[%s1340_s0 + $0x158] sm:$0xff] }
  0x40   :  { %v404_v27 = vmax.f32 %v340_v13, 0.0  ;;  %v405_v31 = vmax.f32 %v341_v17, 0.0  ;;  %v406_v32 = vmax.f32 %v342_v18, 0.0  ;;  %v343_v33 = vadd.f32 %v279_v14, %v215_v19  ;;  %v89_v14 = vld [vmem:[%s1340_s0 + $0x160] sm:$0xff] }
  0x41   :  { %v344_v34 = vadd.f32 %v280_v15, %v216_v20  ;;  %466 = vst.msk [vmem:[%s1343_s6 + $0xc0] sm:$0xff] %vm441_vm1, %v401_v24  ;;  %467 = vst.msk [vmem:[%s1343_s6 + $0xc8] sm:$0xff] %vm441_vm1, %v402_v25  ;;  %v147_v35 = vmul.f32 %v580_v28, %v77_v16  ;;  %v148_v37 = vmul.f32 %v580_v28, %v78_v21  ;;  %v90_v15 = vld [vmem:[%s1340_s0 + $0x168] sm:$0xff]  ;;  %v289_v21 = vld [vmem:[%s1342_s5 + $0x140] sm:$0xff] }
  0x42   :  { %468 = vst.msk [vmem:[%s1343_s6 + $0xd0] sm:$0xff] %vm441_vm1, %v403_v26  ;;  %469 = vst.msk [vmem:[%s1343_s6 + $0xd8] sm:$0xff] %vm441_vm1, %v404_v27  ;;  %v149_v38 = vmul.f32 %v580_v28, %v79_v22  ;;  %v150_v39 = vmul.f32 %v580_v28, %v80_v23  ;;  %v407_v42 = vmax.f32 %v343_v33, 0.0  ;;  %v151_v48 = vmul.f32 %v580_v28, %v81_v29  ;;  %v91_v25 = vld [vmem:[%s1340_s0 + $0x170] sm:$0xff]  ;;  %v92_v26 = vld [vmem:[%s1340_s0 + $0x178] sm:$0xff] }
  0x43   :  { %470 = vst.msk [vmem:[%s1343_s6 + $0xe0] sm:$0xff] %vm441_vm1, %v405_v31  ;;  %471 = vst.msk [vmem:[%s1343_s6 + $0xe8] sm:$0xff] %vm441_vm1, %v406_v32  ;;  %v408_v43 = vmax.f32 %v344_v34, 0.0  ;;  %v152_v49 = vmul.f32 %v580_v28, %v82_v30  ;;  %v217_v50 = vadd.f32 %v616_v46, %v147_v35  ;;  %v218_v51 = vadd.f32 %v616_v46, %v148_v37  ;;  %v290_v30 = vld [vmem:[%s1342_s5 + $0x148] sm:$0xff]  ;;  %v291_v31 = vld [vmem:[%s1342_s5 + $0x150] sm:$0xff] }
  0x44   :  { %v219_v52 = vadd.f32 %v616_v46, %v149_v38  ;;  %v220_v53 = vadd.f32 %v616_v46, %v150_v39  ;;  %472 = vst.msk [vmem:[%s1343_s6 + $0xf0] sm:$0xff] %vm441_vm1, %v407_v42  ;;  %v221_v56 = vadd.f32 %v616_v46, %v151_v48  ;;  %v153_v58 = vmul.f32 %v580_v28, %v83_v40  ;;  %v292_v32 = vld [vmem:[%s1342_s5 + $0x158] sm:$0xff]  ;;  %v293_v39 = vld [vmem:[%s1342_s5 + $0x160] sm:$0xff]  ;;  %v294_v40 = vld [vmem:[%s1342_s5 + $0x168] sm:$0xff] }
  0x45   :  { %473 = vst.msk [vmem:[%s1343_s6 + $0xf8] sm:$0xff] %vm441_vm1, %v408_v43  ;;  %v222_v57 = vadd.f32 %v616_v46, %v152_v49  ;;  %v154_v59 = vmul.f32 %v580_v28, %v84_v41  ;;  %v345_v60 = vadd.f32 %v281_v36, %v217_v50  ;;  %v346_v61 = vadd.f32 %v282_v44, %v218_v51  ;;  %v295_v50 = vld [vmem:[%s1342_s5 + $0x170] sm:$0xff]  ;;  %v296_v51 = vld [vmem:[%s1342_s5 + $0x178] sm:$0xff] }
  0x46   :  { %v347_v62 = vadd.f32 %v283_v45, %v219_v52  ;;  %v348_v63 = vadd.f32 %v284_v47, %v220_v53  ;;  %v349_v3 = vadd.f32 %v285_v54, %v221_v56  ;;  %v223_v5 = vadd.f32 %v616_v46, %v153_v58  ;;  %v93_v52 = vld [vmem:[%s1340_s0 + $0x180] sm:$0xff]  ;;  %v95_v58 = vld [vmem:[%s1340_s0 + $0x190] sm:$0xff] }
  0x47   :  { %v350_v4 = vadd.f32 %v286_v55, %v222_v57  ;;  %v224_v6 = vadd.f32 %v616_v46, %v154_v59  ;;  %v409_v10 = vmax.f32 %v345_v60, 0.0  ;;  %v410_v11 = vmax.f32 %v346_v61, 0.0  ;;  %v94_v57 = vld [vmem:[%s1340_s0 + $0x188] sm:$0xff]  ;;  %v96_v59 = vld [vmem:[%s1340_s0 + $0x198] sm:$0xff] }
  0x48   :  { %v411_v12 = vmax.f32 %v347_v62, 0.0  ;;  %v412_v13 = vmax.f32 %v348_v63, 0.0  ;;  %v413_v16 = vmax.f32 %v349_v3, 0.0  ;;  %v351_v18 = vadd.f32 %v287_v0, %v223_v5  ;;  %v97_v0 = vld [vmem:[%s1340_s0 + $0x1a0] sm:$0xff] }
  0x49   :  { %v414_v17 = vmax.f32 %v350_v4, 0.0  ;;  %v352_v19 = vadd.f32 %v288_v1, %v224_v6  ;;  %474 = vst.msk [vmem:[%s1343_s6 + $0x100] sm:$0xff] %vm441_vm1, %v409_v10  ;;  %475 = vst.msk [vmem:[%s1343_s6 + $0x108] sm:$0xff] %vm441_vm1, %v410_v11  ;;  %v155_v20 = vmul.f32 %v580_v28, %v85_v2  ;;  %v156_v22 = vmul.f32 %v580_v28, %v86_v7  ;;  %v98_v1 = vld [vmem:[%s1340_s0 + $0x1a8] sm:$0xff]  ;;  %v297_v7 = vld [vmem:[%s1342_s5 + $0x180] sm:$0xff] }
  0x4a   :  { %476 = vst.msk [vmem:[%s1343_s6 + $0x110] sm:$0xff] %vm441_vm1, %v411_v12  ;;  %477 = vst.msk [vmem:[%s1343_s6 + $0x118] sm:$0xff] %vm441_vm1, %v412_v13  ;;  %v157_v23 = vmul.f32 %v580_v28, %v87_v8  ;;  %v158_v24 = vmul.f32 %v580_v28, %v88_v9  ;;  %v415_v27 = vmax.f32 %v351_v18, 0.0  ;;  %v159_v33 = vmul.f32 %v580_v28, %v89_v14  ;;  %v99_v11 = vld [vmem:[%s1340_s0 + $0x1b0] sm:$0xff]  ;;  %v100_v12 = vld [vmem:[%s1340_s0 + $0x1b8] sm:$0xff] }
  0x4b   :  { %478 = vst.msk [vmem:[%s1343_s6 + $0x120] sm:$0xff] %vm441_vm1, %v413_v16  ;;  %479 = vst.msk [vmem:[%s1343_s6 + $0x128] sm:$0xff] %vm441_vm1, %v414_v17  ;;  %v416_v29 = vmax.f32 %v352_v19, 0.0  ;;  %v160_v34 = vmul.f32 %v580_v28, %v90_v15  ;;  %v225_v35 = vadd.f32 %v616_v46, %v155_v20  ;;  %v226_v36 = vadd.f32 %v616_v46, %v156_v22  ;;  %v298_v15 = vld [vmem:[%s1342_s5 + $0x188] sm:$0xff]  ;;  %v299_v16 = vld [vmem:[%s1342_s5 + $0x190] sm:$0xff] }
  0x4c   :  { %v227_v37 = vadd.f32 %v616_v46, %v157_v23  ;;  %v228_v38 = vadd.f32 %v616_v46, %v158_v24  ;;  %480 = vst.msk [vmem:[%s1343_s6 + $0x130] sm:$0xff] %vm441_vm1, %v415_v27  ;;  %v229_v41 = vadd.f32 %v616_v46, %v159_v33  ;;  %v161_v43 = vmul.f32 %v580_v28, %v91_v25  ;;  %v300_v17 = vld [vmem:[%s1342_s5 + $0x198] sm:$0xff]  ;;  %v301_v24 = vld [vmem:[%s1342_s5 + $0x1a0] sm:$0xff]  ;;  %v302_v25 = vld [vmem:[%s1342_s5 + $0x1a8] sm:$0xff] }
  0x4d   :  { %481 = vst.msk [vmem:[%s1343_s6 + $0x138] sm:$0xff] %vm441_vm1, %v416_v29  ;;  %v230_v42 = vadd.f32 %v616_v46, %v160_v34  ;;  %v162_v44 = vmul.f32 %v580_v28, %v92_v26  ;;  %v353_v45 = vadd.f32 %v289_v21, %v225_v35  ;;  %v354_v47 = vadd.f32 %v290_v30, %v226_v36  ;;  %v303_v35 = vld [vmem:[%s1342_s5 + $0x1b0] sm:$0xff]  ;;  %v304_v36 = vld [vmem:[%s1342_s5 + $0x1b8] sm:$0xff] }
  0x4e   :  { %v355_v48 = vadd.f32 %v291_v31, %v227_v37  ;;  %v356_v49 = vadd.f32 %v292_v32, %v228_v38  ;;  %v357_v53 = vadd.f32 %v293_v39, %v229_v41  ;;  %v231_v55 = vadd.f32 %v616_v46, %v161_v43  ;;  %v101_v37 = vld [vmem:[%s1340_s0 + $0x1c0] sm:$0xff]  ;;  %v103_v43 = vld [vmem:[%s1340_s0 + $0x1d0] sm:$0xff] }
  0x4f   :  { %v358_v54 = vadd.f32 %v294_v40, %v230_v42  ;;  %v232_v56 = vadd.f32 %v616_v46, %v162_v44  ;;  %v417_v60 = vmax.f32 %v353_v45, 0.0  ;;  %v418_v61 = vmax.f32 %v354_v47, 0.0  ;;  %v102_v42 = vld [vmem:[%s1340_s0 + $0x1c8] sm:$0xff]  ;;  %v104_v44 = vld [vmem:[%s1340_s0 + $0x1d8] sm:$0xff] }
  0x50   :  { %v419_v62 = vmax.f32 %v355_v48, 0.0  ;;  %v420_v63 = vmax.f32 %v356_v49, 0.0  ;;  %v421_v2 = vmax.f32 %v357_v53, 0.0  ;;  %v359_v4 = vadd.f32 %v295_v50, %v231_v55  ;;  %v105_v50 = vld [vmem:[%s1340_s0 + $0x1e0] sm:$0xff] }
  0x51   :  { %v422_v3 = vmax.f32 %v358_v54, 0.0  ;;  %v360_v5 = vadd.f32 %v296_v51, %v232_v56  ;;  %482 = vst.msk [vmem:[%s1343_s6 + $0x140] sm:$0xff] %vm441_vm1, %v417_v60  ;;  %483 = vst.msk [vmem:[%s1343_s6 + $0x148] sm:$0xff] %vm441_vm1, %v418_v61  ;;  %v163_v6 = vmul.f32 %v580_v28, %v93_v52  ;;  %v164_v8 = vmul.f32 %v580_v28, %v94_v57  ;;  %v106_v51 = vld [vmem:[%s1340_s0 + $0x1e8] sm:$0xff]  ;;  %v305_v57 = vld [vmem:[%s1342_s5 + $0x1c0] sm:$0xff] }
  0x52   :  { %484 = vst.msk [vmem:[%s1343_s6 + $0x150] sm:$0xff] %vm441_vm1, %v419_v62  ;;  %485 = vst.msk [vmem:[%s1343_s6 + $0x158] sm:$0xff] %vm441_vm1, %v420_v63  ;;  %v165_v9 = vmul.f32 %v580_v28, %v95_v58  ;;  %v166_v10 = vmul.f32 %v580_v28, %v96_v59  ;;  %v423_v13 = vmax.f32 %v359_v4, 0.0  ;;  %v167_v18 = vmul.f32 %v580_v28, %v97_v0  ;;  %v107_v61 = vld [vmem:[%s1340_s0 + $0x1f0] sm:$0xff]  ;;  %v108_v62 = vld [vmem:[%s1340_s0 + $0x1f8] sm:$0xff] }
  0x53   :  { %486 = vst.msk [vmem:[%s1343_s6 + $0x160] sm:$0xff] %vm441_vm1, %v421_v2  ;;  %487 = vst.msk [vmem:[%s1343_s6 + $0x168] sm:$0xff] %vm441_vm1, %v422_v3  ;;  %v424_v14 = vmax.f32 %v360_v5, 0.0  ;;  %v168_v19 = vmul.f32 %v580_v28, %v98_v1  ;;  %v233_v20 = vadd.f32 %v616_v46, %v163_v6  ;;  %v234_v21 = vadd.f32 %v616_v46, %v164_v8  ;;  %v306_v1 = vld [vmem:[%s1342_s5 + $0x1c8] sm:$0xff]  ;;  %v307_v2 = vld [vmem:[%s1342_s5 + $0x1d0] sm:$0xff] }
  0x54   :  { %v235_v22 = vadd.f32 %v616_v46, %v165_v9  ;;  %v236_v23 = vadd.f32 %v616_v46, %v166_v10  ;;  %488 = vst.msk [vmem:[%s1343_s6 + $0x170] sm:$0xff] %vm441_vm1, %v423_v13  ;;  %v237_v26 = vadd.f32 %v616_v46, %v167_v18  ;;  %v169_v29 = vmul.f32 %v580_v28, %v99_v11  ;;  %v308_v3 = vld [vmem:[%s1342_s5 + $0x1d8] sm:$0xff]  ;;  %v309_v10 = vld [vmem:[%s1342_s5 + $0x1e0] sm:$0xff]  ;;  %v310_v11 = vld [vmem:[%s1342_s5 + $0x1e8] sm:$0xff] }
  0x55   :  { %489 = vst.msk [vmem:[%s1343_s6 + $0x178] sm:$0xff] %vm441_vm1, %v424_v14  ;;  %v238_v27 = vadd.f32 %v616_v46, %v168_v19  ;;  %v170_v30 = vmul.f32 %v580_v28, %v100_v12  ;;  %v361_v31 = vadd.f32 %v297_v7, %v233_v20  ;;  %v362_v32 = vadd.f32 %v298_v15, %v234_v21  ;;  %v311_v20 = vld [vmem:[%s1342_s5 + $0x1f0] sm:$0xff]  ;;  %v312_v21 = vld [vmem:[%s1342_s5 + $0x1f8] sm:$0xff] }
  0x56   :  { %v363_v33 = vadd.f32 %v299_v16, %v235_v22  ;;  %v364_v34 = vadd.f32 %v300_v17, %v236_v23  ;;  %v365_v38 = vadd.f32 %v301_v24, %v237_v26  ;;  %v239_v40 = vadd.f32 %v616_v46, %v169_v29 }
  0x57   :  { %v366_v39 = vadd.f32 %v302_v25, %v238_v27  ;;  %v240_v41 = vadd.f32 %v616_v46, %v170_v30  ;;  %v425_v45 = vmax.f32 %v361_v31, 0.0  ;;  %v426_v47 = vmax.f32 %v362_v32, 0.0 }
  0x58   :  { %v427_v48 = vmax.f32 %v363_v33, 0.0  ;;  %v428_v49 = vmax.f32 %v364_v34, 0.0  ;;  %v429_v52 = vmax.f32 %v365_v38, 0.0  ;;  %v367_v54 = vadd.f32 %v303_v35, %v239_v40 }
  0x59   :  { %v430_v53 = vmax.f32 %v366_v39, 0.0  ;;  %v368_v55 = vadd.f32 %v304_v36, %v240_v41  ;;  %490 = vst.msk [vmem:[%s1343_s6 + $0x180] sm:$0xff] %vm441_vm1, %v425_v45  ;;  %491 = vst.msk [vmem:[%s1343_s6 + $0x188] sm:$0xff] %vm441_vm1, %v426_v47  ;;  %v171_v56 = vmul.f32 %v580_v28, %v101_v37  ;;  %v172_v58 = vmul.f32 %v580_v28, %v102_v42 }
  0x5a   :  { %492 = vst.msk [vmem:[%s1343_s6 + $0x190] sm:$0xff] %vm441_vm1, %v427_v48  ;;  %493 = vst.msk [vmem:[%s1343_s6 + $0x198] sm:$0xff] %vm441_vm1, %v428_v49  ;;  %v173_v59 = vmul.f32 %v580_v28, %v103_v43  ;;  %v174_v60 = vmul.f32 %v580_v28, %v104_v44  ;;  %v431_v63 = vmax.f32 %v367_v54, 0.0  ;;  %v175_v4 = vmul.f32 %v580_v28, %v105_v50 }
  0x5b   :  { %494 = vst.msk [vmem:[%s1343_s6 + $0x1a0] sm:$0xff] %vm441_vm1, %v429_v52  ;;  %495 = vst.msk [vmem:[%s1343_s6 + $0x1a8] sm:$0xff] %vm441_vm1, %v430_v53  ;;  %v432_v0 = vmax.f32 %v368_v55, 0.0  ;;  %v176_v5 = vmul.f32 %v580_v28, %v106_v51  ;;  %v241_v6 = vadd.f32 %v616_v46, %v171_v56  ;;  %v242_v7 = vadd.f32 %v616_v46, %v172_v58 }
  0x5c   :  { %v243_v8 = vadd.f32 %v616_v46, %v173_v59  ;;  %v244_v9 = vadd.f32 %v616_v46, %v174_v60  ;;  %496 = vst.msk [vmem:[%s1343_s6 + $0x1b0] sm:$0xff] %vm441_vm1, %v431_v63  ;;  %v245_v12 = vadd.f32 %v616_v46, %v175_v4  ;;  %v177_v14 = vmul.f32 %v580_v28, %v107_v61 }
  0x5d   :  { %497 = vst.msk [vmem:[%s1343_s6 + $0x1b8] sm:$0xff] %vm441_vm1, %v432_v0  ;;  %v246_v13 = vadd.f32 %v616_v46, %v176_v5  ;;  %v178_v15 = vmul.f32 %v580_v28, %v108_v62  ;;  %v369_v16 = vadd.f32 %v305_v57, %v241_v6  ;;  %v370_v17 = vadd.f32 %v306_v1, %v242_v7 }
  0x5e   :  { %v371_v18 = vadd.f32 %v307_v2, %v243_v8  ;;  %v372_v19 = vadd.f32 %v308_v3, %v244_v9  ;;  %v373_v22 = vadd.f32 %v309_v10, %v245_v12  ;;  %v247_v24 = vadd.f32 %v616_v46, %v177_v14 }
  0x5f   :  { %v374_v23 = vadd.f32 %v310_v11, %v246_v13  ;;  %v248_v25 = vadd.f32 %v616_v46, %v178_v15  ;;  %v433_v26 = vmax.f32 %v369_v16, 0.0  ;;  %v434_v28 = vmax.f32 %v370_v17, 0.0 }
  0x60   :  { %v435_v27 = vmax.f32 %v371_v18, 0.0  ;;  %v436_v29 = vmax.f32 %v372_v19, 0.0  ;;  %v437_v30 = vmax.f32 %v373_v22, 0.0  ;;  %v375_v32 = vadd.f32 %v311_v20, %v247_v24 }
  0x61   :  { %v438_v31 = vmax.f32 %v374_v23, 0.0  ;;  %v376_v33 = vadd.f32 %v312_v21, %v248_v25  ;;  %498 = vst.msk [vmem:[%s1343_s6 + $0x1c0] sm:$0xff] %vm441_vm1, %v433_v26  ;;  %499 = vst.msk [vmem:[%s1343_s6 + $0x1c8] sm:$0xff] %vm441_vm1, %v434_v28 }
  0x62   :  { %500 = vst.msk [vmem:[%s1343_s6 + $0x1d0] sm:$0xff] %vm441_vm1, %v435_v27  ;;  %501 = vst.msk [vmem:[%s1343_s6 + $0x1d8] sm:$0xff] %vm441_vm1, %v436_v29  ;;  %v439_v46 = vmax.f32 %v375_v32, 0.0 }
  0x63   :  { %502 = vst.msk [vmem:[%s1343_s6 + $0x1e0] sm:$0xff] %vm441_vm1, %v437_v30  ;;  %503 = vst.msk [vmem:[%s1343_s6 + $0x1e8] sm:$0xff] %vm441_vm1, %v438_v31  ;;  %v440_v34 = vmax.f32 %v376_v33, 0.0 }
  0x64   :  { %504 = vst.msk [vmem:[%s1343_s6 + $0x1f0] sm:$0xff] %vm441_vm1, %v439_v46 }
  0x65   :  { %505 = vst.msk [vmem:[%s1343_s6 + $0x1f8] sm:$0xff] %vm441_vm1, %v440_v34 }

// kernel: fwd.6
= control target key start
LH: loop header
LB: loop body
LE: loop exit
PB: predicated region body
PF: predicated region fallthrough
CT: control target
= control target key end

     0   :  { %s4030_s15 = smov 0   ;;  %s5242_s0 = inlined_call_operand.vmem [shape: f32[2,18,18,16], index: 0, kind: input, shape index: {}]   ;;  %s5243_s1 = inlined_call_operand.vmem [shape: bf16[9,16,16], index: 1, kind: input, shape index: {}]   ;;  %s5244_s2 = inlined_call_operand.vmem [shape: f32[2,16,16,16], index: 2, kind: output, shape index: {0}]   ;;  %s5245_s3 = inlined_call_operand.vmem [shape: f32[2,1,16], index: 3, kind: output, shape index: {1}]   ;;  %s5246_s4 = inlined_call_operand.vmem [shape: f32[2,1,16], index: 4, kind: output, shape index: {2}]  }
   0x1 LB: > { %s3146_s16 = sadd.s32 4294967295, %s4003_s15   ;;  %p3150_p0 = scmp.ge.s32.totalorder %s4003_s15, 1  ;;  %s4003_s15 = sphi %s4030_s15, %s15_s15  }
   0x2   : > { %p167_p1 = scmp.lt.s32.totalorder %s4003_s15, 3 }
   0x4   : > { %p168_p2 = pnand %p3150_p0, %p167_p1 }
   0x6   : > { %171 = sbr.rel (%p168_p2) target bundleno = 528 (0x210), region = 28 }
   0xb   : > { %v3988_v0 = vld [vmem:[%s5243_s1 + $0x8] sm:$0xff]   ;;  %p199_p3 = scmp.lt.s32.totalorder %s3146_s16, 1  ;;  %v3989_v1 = vld [vmem:[%s5243_s1] sm:$0xff]   ;;  %v3990_v2 = vld [vmem:[%s5243_s1 + $0x10] sm:$0xff]   ;;  %vm323_vm0 = vcmask 130048   ;;  %vm2937_vm1 = vcmask 122880  }
   0xc   : > { %3977 = vmatprep.subr.bf16.mxu1 %v3988_v0  ;;  %3671 = vmatprep.subr.bf16.mxu0 %v3988_v0  ;;  %v4064_v10 = vld [vmem:[%s5243_s1 + $0x18] sm:$0xff]   ;;  %v4090_v22 = vld [vmem:[%s5243_s1 + $0x20] sm:$0xff]  }
   0xd   : > { %s5328_s16 = smov (!%p199_p3, %s3146_s16), 1  ;;  %3978 = vmatpush3.bf16.msra.mxu1 %v3988_v0  ;;  %3672 = vmatpush3.bf16.msra.mxu0 %v3988_v0 }
   0xe   : > { %s3979_s23 = smul.u32 432, %s5328_s16  ;;  %3705 = vmatprep.subr.bf16.mxu1 %v3989_v1  ;;  %3739 = vmatprep.subr.bf16.mxu0 %v3990_v2  ;;  %s3517_s13 = sshll.u32 %s5328_s16, 8 }
   0xf   : > { %s4974_s18 = scalar_lea.vmem %s5244_s2, %s3517_s13  ;;  %s211_s21 = scalar_lea.vmem %s5245_s3, %s5328_s16 }
  0x10   : > { %s4053_s26 = scalar_lea.vmem %s5242_s0, %s3979_s23  ;;  %s214_s24 = scalar_lea.vmem %s5246_s4, %s5328_s16 }
  0x11   : > { %v266_v3 = vld [vmem:[%s4053_s26 + $0x1] sm:$0xff]  ;;  %v267_v4 = vld [vmem:[%s4053_s26 + $0x9] sm:$0xff]  ;;  %v268_v8 = vld [vmem:[%s4053_s26 + $0x19] sm:$0xff] }
  0x12   : > { %v282_v5 = vld [vmem:[%s4053_s26 + $0xc1] sm:$0xff]  ;;  %v298_v6 = vpack.c.bf16 %v267_v4, %v266_v3  ;;  %v283_v7 = vld [vmem:[%s4053_s26 + $0xc9] sm:$0xff]  ;;  %v284_v13 = vld [vmem:[%s4053_s26 + $0xd9] sm:$0xff] }
  0x13   : > { %v269_v9 = vld [vmem:[%s4053_s26 + $0x21] sm:$0xff]  ;;  %v4066_v11 = vpack.c.bf16 %v283_v7, %v282_v5  ;;  %v270_v15 = vld [vmem:[%s4053_s26 + $0x31] sm:$0xff]  ;;  %v271_v17 = vld [vmem:[%s4053_s26 + $0x39] sm:$0xff] }
  0x14   : > { %v4068_v12 = vpack.c.bf16 %v269_v9, %v268_v8  ;;  %v285_v14 = vld [vmem:[%s4053_s26 + $0xe1] sm:$0xff]  ;;  %3673 = vmatprep.mubr.msk.bf16.mxu0 %vm323_vm0, %v298_v6  ;;  %v286_v18 = vld [vmem:[%s4053_s26 + $0xf1] sm:$0xff]  ;;  %v287_v19 = vld [vmem:[%s4053_s26 + $0xf9] sm:$0xff]  ;;  %v4083_v20 = vpack.c.bf16 %v271_v17, %v270_v15 }
  0x15   : > { %v4074_v16 = vpack.c.bf16 %v285_v14, %v284_v13  ;;  %3689 = vmatprep.mubr.msk.bf16.mxu1 %vm323_vm0, %v4066_v11  ;;  %v4085_v21 = vpack.c.bf16 %v287_v19, %v286_v18  ;;  %v272_v23 = vld [vmem:[%s4053_s26 + $0x49] sm:$0xff]  ;;  %v273_v24 = vld [vmem:[%s4053_s26 + $0x51] sm:$0xff]  ;;  %v274_v27 = vld [vmem:[%s4053_s26 + $0x61] sm:$0xff] }
  0x16   : > { %3674 = vmatmul.mubr.msk.bf16.vlgmr.msra.gmra.mxu0 %vm323_vm0, %v4068_v12  ;;  %v288_v25 = vld [vmem:[%s4053_s26 + $0x109] sm:$0xff]  ;;  %v289_v26 = vld [vmem:[%s4053_s26 + $0x111] sm:$0xff]  ;;  %v290_v29 = vld [vmem:[%s4053_s26 + $0x121] sm:$0xff]  ;;  %v4107_v31 = vpack.c.bf16 %v273_v24, %v272_v23 }
  0x17   : > { %3690 = vmatmul.mubr.msk.bf16.vlgmr.msra.gmra.mxu1 %vm323_vm0, %v4074_v16  ;;  %3740 = vmatpush3.bf16.msra.mxu0 %v3990_v2  ;;  %v275_v28 = vld [vmem:[%s4053_s26 + $0x69] sm:$0xff]  ;;  %v4110_v32 = vpack.c.bf16 %v289_v26, %v288_v25  ;;  %v276_v35 = vld [vmem:[%s4053_s26 + $0x79] sm:$0xff]  ;;  %v277_v36 = vld [vmem:[%s4053_s26 + $0x81] sm:$0xff] }
  0x18   : > { %3706 = vmatpush3.bf16.msra.mxu1 %v3989_v1  ;;  %3677 = vmatprep.mubr.msk.bf16.mxu0 %vm323_vm0, %v4083_v20  ;;  %v291_v30 = vld [vmem:[%s4053_s26 + $0x129] sm:$0xff]  ;;  %v4112_v33 = vpack.c.bf16 %v275_v28, %v274_v27  ;;  %v292_v37 = vld [vmem:[%s4053_s26 + $0x139] sm:$0xff]  ;;  %v293_v38 = vld [vmem:[%s4053_s26 + $0x141] sm:$0xff]  ;;  %v4132_v43 = vpack.c.bf16 %v277_v36, %v276_v35 }
  0x19   : > { %3693 = vmatprep.mubr.msk.bf16.mxu1 %vm323_vm0, %v4085_v21  ;;  %3773 = vmatprep.subr.bf16.mxu1 %v4064_v10  ;;  %v4114_v34 = vpack.c.bf16 %v291_v30, %v290_v29  ;;  %v278_v39 = vld [vmem:[%s4053_s26 + $0x91] sm:$0xff]  ;;  %v279_v40 = vld [vmem:[%s4053_s26 + $0x99] sm:$0xff]  ;;  %v4134_v44 = vpack.c.bf16 %v293_v38, %v292_v37  ;;  %v280_v47 = vld [vmem:[%s4053_s26 + $0xa9] sm:$0xff] }
  0x1a   : > { %3807 = vmatprep.subr.bf16.mxu0 %v4090_v22  ;;  %v294_v41 = vld [vmem:[%s4053_s26 + $0x151] sm:$0xff]  ;;  %v295_v42 = vld [vmem:[%s4053_s26 + $0x159] sm:$0xff]  ;;  %v4136_v45 = vpack.c.bf16 %v279_v40, %v278_v39  ;;  %v296_v49 = vld [vmem:[%s4053_s26 + $0x169] sm:$0xff] }
  0x1b   : > { %v4138_v46 = vpack.c.bf16 %v295_v42, %v294_v41  ;;  %v281_v48 = vld [vmem:[%s4053_s26 + $0xb1] sm:$0xff]  ;;  %v748_v51 = vld [vmem:[%s4053_s26 + $0x2] sm:$0xff]  ;;  %v750_v59 = vld [vmem:[%s4053_s26 + $0x1a] sm:$0xff] }
  0x1c   : > { %v297_v50 = vld [vmem:[%s4053_s26 + $0x171] sm:$0xff]  ;;  %v216_v53 = vld [vmem:[%s4053_s26] sm:$0xff]  ;;  %v217_v54 = vld [vmem:[%s4053_s26 + $0x8] sm:$0xff]  ;;  %v4156_v55 = vpack.c.bf16 %v281_v48, %v280_v47 }
  0x1d   : > { %v749_v52 = vld [vmem:[%s4053_s26 + $0xa] sm:$0xff]  ;;  %v4158_v56 = vpack.c.bf16 %v297_v50, %v296_v49  ;;  %v248_v58 = vpack.c.bf16 %v217_v54, %v216_v53  ;;  %v751_v60 = vld [vmem:[%s4053_s26 + $0x22] sm:$0xff]  ;;  %v218_v61 = vld [vmem:[%s4053_s26 + $0x18] sm:$0xff] }
  0x1e   : > { %3678 = vmatmul.mubr.msk.bf16.gmra.mxu0 %vm323_vm0, %v4107_v31  ;;  %v780_v57 = vpack.c.bf16 %v749_v52, %v748_v51  ;;  %v219_v62 = vld [vmem:[%s4053_s26 + $0x20] sm:$0xff]  ;;  %v220_v63 = vld [vmem:[%s4053_s26 + $0x30] sm:$0xff]  ;;  %v221_v0 = vld [vmem:[%s4053_s26 + $0x38] sm:$0xff]  ;;  %v4172_v1 = vpack.c.bf16 %v751_v60, %v750_v59 }
  0x1f   : > { %3694 = vmatmul.mubr.msk.bf16.gmra.mxu1 %vm323_vm0, %v4110_v32  ;;  %3681 = vmatprep.mubr.msk.bf16.mxu0 %vm323_vm0, %v4112_v33  ;;  %v752_v2 = vld [vmem:[%s4053_s26 + $0x32] sm:$0xff]  ;;  %v753_v3 = vld [vmem:[%s4053_s26 + $0x3a] sm:$0xff]  ;;  %v4176_v4 = vpack.c.bf16 %v219_v62, %v218_v61  ;;  %v4178_v5 = vpack.c.bf16 %v221_v0, %v220_v63  ;;  %v4185_v7 = vld [vmem:[%s5243_s1 + $0x28] sm:$0xff]  }
  0x20   : > { %3697 = vmatprep.mubr.msk.bf16.mxu1 %vm323_vm0, %v4114_v34  ;;  %v4180_v6 = vpack.c.bf16 %v753_v3, %v752_v2  ;;  %v4192_v8 = vld [vmem:[%s5243_s1 + $0x30] sm:$0xff]   ;;  %v222_v9 = vld [vmem:[%s4053_s26 + $0x48] sm:$0xff]  ;;  %v224_v19 = vld [vmem:[%s4053_s26 + $0x60] sm:$0xff] }
  0x21   : > { %v754_v13 = vld [vmem:[%s4053_s26 + $0x4a] sm:$0xff]  ;;  %v755_v14 = vld [vmem:[%s4053_s26 + $0x52] sm:$0xff]  ;;  %v756_v17 = vld [vmem:[%s4053_s26 + $0x62] sm:$0xff] }
  0x22   : > { %v223_v15 = vld [vmem:[%s4053_s26 + $0x50] sm:$0xff]  ;;  %v226_v26 = vld [vmem:[%s4053_s26 + $0x78] sm:$0xff]  ;;  %v759_v28 = vld [vmem:[%s4053_s26 + $0x82] sm:$0xff] }
  0x23   : > { %v757_v18 = vld [vmem:[%s4053_s26 + $0x6a] sm:$0xff]  ;;  %v4214_v23 = vpack.c.bf16 %v223_v15, %v222_v9  ;;  %v758_v27 = vld [vmem:[%s4053_s26 + $0x7a] sm:$0xff]  ;;  %v760_v30 = vld [vmem:[%s4053_s26 + $0x92] sm:$0xff] }
  0x24   : > { %v4216_v24 = vpack.c.bf16 %v757_v18, %v756_v17  ;;  %v227_v29 = vld [vmem:[%s4053_s26 + $0x80] sm:$0xff]  ;;  %v228_v36 = vld [vmem:[%s4053_s26 + $0x90] sm:$0xff]  ;;  %v229_v37 = vld [vmem:[%s4053_s26 + $0x98] sm:$0xff]  ;;  %v4236_v38 = vpack.c.bf16 %v759_v28, %v758_v27 }
  0x25   : > { %v761_v35 = vld [vmem:[%s4053_s26 + $0x9a] sm:$0xff]  ;;  %v4238_v39 = vpack.c.bf16 %v227_v29, %v226_v26  ;;  %v4242_v41 = vpack.c.bf16 %v229_v37, %v228_v36  ;;  %v230_v42 = vld [vmem:[%s4053_s26 + $0xa8] sm:$0xff]  ;;  %v763_v48 = vld [vmem:[%s4053_s26 + $0xb2] sm:$0xff] }
  0x26   : > { %3682 = vmatmul.mubr.msk.bf16.gmra.mxu0 %vm323_vm0, %v4132_v43  ;;  %v4240_v40 = vpack.c.bf16 %v761_v35, %v760_v30  ;;  %v762_v47 = vld [vmem:[%s4053_s26 + $0xaa] sm:$0xff]  ;;  %v764_v50 = vld [vmem:[%s4053_s26 + $0xc2] sm:$0xff]  ;;  %v234_v60 = vld [vmem:[%s4053_s26 + $0xd8] sm:$0xff] }
  0x27   : > { %3698 = vmatmul.mubr.msk.bf16.gmra.mxu1 %vm323_vm0, %v4134_v44  ;;  %3685 = vmatprep.mubr.msk.bf16.mxu0 %vm323_vm0, %v4136_v45  ;;  %v231_v49 = vld [vmem:[%s4053_s26 + $0xb0] sm:$0xff]  ;;  %v232_v52 = vld [vmem:[%s4053_s26 + $0xc0] sm:$0xff]  ;;  %v233_v53 = vld [vmem:[%s4053_s26 + $0xc8] sm:$0xff]  ;;  %v4260_v54 = vpack.c.bf16 %v763_v48, %v762_v47 }
  0x28   : > { %3701 = vmatprep.mubr.msk.bf16.mxu1 %vm323_vm0, %v4138_v46  ;;  %v765_v51 = vld [vmem:[%s4053_s26 + $0xca] sm:$0xff]  ;;  %v4266_v59 = vpack.c.bf16 %v233_v53, %v232_v52  ;;  %v766_v61 = vld [vmem:[%s4053_s26 + $0xda] sm:$0xff]  ;;  %v767_v62 = vld [vmem:[%s4053_s26 + $0xe2] sm:$0xff] }
  0x29   : > { %v235_v63 = vld [vmem:[%s4053_s26 + $0xe0] sm:$0xff]  ;;  %v768_v0 = vld [vmem:[%s4053_s26 + $0xf2] sm:$0xff]  ;;  %v238_v18 = vld [vmem:[%s4053_s26 + $0x108] sm:$0xff] }
  0x2a   : > { %v769_v2 = vld [vmem:[%s4053_s26 + $0xfa] sm:$0xff]  ;;  %v236_v3 = vld [vmem:[%s4053_s26 + $0xf0] sm:$0xff]  ;;  %v772_v27 = vld [vmem:[%s4053_s26 + $0x122] sm:$0xff] }
  0x2b   : > { %v237_v9 = vld [vmem:[%s4053_s26 + $0xf8] sm:$0xff]  ;;  %v4288_v15 = vpack.c.bf16 %v769_v2, %v768_v0  ;;  %v239_v26 = vld [vmem:[%s4053_s26 + $0x110] sm:$0xff]  ;;  %v240_v29 = vld [vmem:[%s4053_s26 + $0x120] sm:$0xff] }
  0x2c   : > { %v4290_v17 = vpack.c.bf16 %v237_v9, %v236_v3  ;;  %v773_v28 = vld [vmem:[%s4053_s26 + $0x12a] sm:$0xff]  ;;  %v4310_v36 = vpack.c.bf16 %v239_v26, %v238_v18  ;;  %v242_v47 = vld [vmem:[%s4053_s26 + $0x138] sm:$0xff] }
  0x2d   : > { %v241_v30 = vld [vmem:[%s4053_s26 + $0x128] sm:$0xff]  ;;  %v4312_v37 = vpack.c.bf16 %v773_v28, %v772_v27  ;;  %v774_v48 = vld [vmem:[%s4053_s26 + $0x13a] sm:$0xff]  ;;  %v244_v53 = vld [vmem:[%s4053_s26 + $0x150] sm:$0xff] }
  0x2e   : > { %3686 = vmatmul.mubr.msk.bf16.gmra.mxu0 %vm323_vm0, %v4156_v55  ;;  %v777_v52 = vld [vmem:[%s4053_s26 + $0x15a] sm:$0xff]  ;;  %v778_v2 = vld [vmem:[%s4053_s26 + $0x16a] sm:$0xff]  ;;  %v779_v3 = vld [vmem:[%s4053_s26 + $0x172] sm:$0xff] }
  0x2f   : > { %3702 = vmatmul.mubr.msk.bf16.gmra.mxu1 %vm323_vm0, %v4158_v56  ;;  %3741 = vmatprep.mubr.msk.bf16.mxu0 %vm323_vm0, %v780_v57  ;;  %v4262_v57 = vpack.c.bf16 %v231_v49, %v230_v42  ;;  %v4314_v42 = vpack.c.bf16 %v241_v30, %v240_v29  ;;  %v775_v49 = vld [vmem:[%s4053_s26 + $0x142] sm:$0xff]  ;;  %v247_v18 = vld [vmem:[%s4053_s26 + $0x170] sm:$0xff]  ;;  %v3995_v26 = vld [vmem:[%s5243_s1 + $0x38] sm:$0xff]  }
  0x30   : > { %3707 = vmatprep.mubr.msk.bf16.mxu1 %vm323_vm0, %v248_v58  ;;  %v4264_v58 = vpack.c.bf16 %v765_v51, %v764_v50  ;;  %v243_v50 = vld [vmem:[%s4053_s26 + $0x140] sm:$0xff]  ;;  %v776_v51 = vld [vmem:[%s4053_s26 + $0x152] sm:$0xff]  ;;  %v246_v9 = vld [vmem:[%s4053_s26 + $0x168] sm:$0xff] }
  0x31   : > { %v3996_v27 = vld [vmem:[%s5243_s1 + $0x40] sm:$0xff]  }
  0x32   : > { %v3393_v28 = vld [vmem:[%s4053_s26 + $0x1a0] sm:$0xff] }
  0x33   : > { %v3341_v30 = vld [vmem:[%s4053_s26 + $0x182] sm:$0xff] }
  0x36   : > { %3742 = vmatmul.mubr.msk.bf16.vlgmr.msra.gmra.mxu0 %vm323_vm0, %v4172_v1 }
  0x37   : > { %3708 = vmatmul.mubr.msk.bf16.vlgmr.msra.gmra.mxu1 %vm323_vm0, %v4176_v4  ;;  %3808 = vmatpush3.bf16.msra.mxu0 %v4090_v22  ;;  %v225_v22 = vld [vmem:[%s4053_s26 + $0x68] sm:$0xff] }
  0x38   : > { %3774 = vmatpush3.bf16.msra.mxu1 %v4064_v10  ;;  %3711 = vmatprep.mubr.msk.bf16.mxu1 %vm323_vm0, %v4178_v5  ;;  %v4211_v10 = vpack.c.bf16 %v755_v14, %v754_v13  ;;  %v4218_v25 = vpack.c.bf16 %v225_v22, %v224_v19  ;;  %v4284_v13 = vpack.c.bf16 %v767_v62, %v766_v61  ;;  %v770_v19 = vld [vmem:[%s4053_s26 + $0x10a] sm:$0xff]  ;;  %v771_v22 = vld [vmem:[%s4053_s26 + $0x112] sm:$0xff] }
  0x39   : > { %3745 = vmatprep.mubr.msk.bf16.mxu0 %vm323_vm0, %v4180_v6  ;;  %3841 = vmatprep.subr.bf16.mxu1 %v4185_v7  ;;  %v4286_v14 = vpack.c.bf16 %v235_v63, %v234_v60  ;;  %v4308_v35 = vpack.c.bf16 %v771_v22, %v770_v19  ;;  %v245_v60 = vld [vmem:[%s4053_s26 + $0x158] sm:$0xff]  ;;  %v4332_v61 = vpack.c.bf16 %v775_v49, %v774_v48 }
  0x3a   : > { %3875 = vmatprep.subr.bf16.mxu0 %v4192_v8  ;;  %v4334_v62 = vpack.c.bf16 %v243_v50, %v242_v47  ;;  %v4336_v63 = vpack.c.bf16 %v777_v52, %v776_v51  ;;  %v4338_v0 = vpack.c.bf16 %v245_v60, %v244_v53  ;;  %v4352_v19 = vpack.c.bf16 %v779_v3, %v778_v2 }
  0x3b   : > { %v4354_v22 = vpack.c.bf16 %v247_v18, %v246_v9 }
  0x3e   : > { %3746 = vmatmul.mubr.msk.bf16.gmra.mxu0 %vm323_vm0, %v4211_v10 }
  0x3f   : > { %3712 = vmatmul.mubr.msk.bf16.gmra.mxu1 %vm323_vm0, %v4214_v23  ;;  %3749 = vmatprep.mubr.msk.bf16.mxu0 %vm323_vm0, %v4216_v24 }
  0x40   : > { %3715 = vmatprep.mubr.msk.bf16.mxu1 %vm323_vm0, %v4218_v25 }
  0x46   : > { %3750 = vmatmul.mubr.msk.bf16.gmra.mxu0 %vm323_vm0, %v4236_v38 }
  0x47   : > { %3716 = vmatmul.mubr.msk.bf16.gmra.mxu1 %vm323_vm0, %v4238_v39  ;;  %3753 = vmatprep.mubr.msk.bf16.mxu0 %vm323_vm0, %v4240_v40 }
  0x48   : > { %3719 = vmatprep.mubr.msk.bf16.mxu1 %vm323_vm0, %v4242_v41 }
  0x4e   : > { %3754 = vmatmul.mubr.msk.bf16.gmra.mxu0 %vm323_vm0, %v4260_v54 }
  0x4f   : > { %3720 = vmatmul.mubr.msk.bf16.gmra.mxu1 %vm323_vm0, %v4262_v57  ;;  %3757 = vmatprep.mubr.msk.bf16.mxu0 %vm323_vm0, %v4264_v58 }
  0x50   : > { %3723 = vmatprep.mubr.msk.bf16.mxu1 %vm323_vm0, %v4266_v59 }
  0x56   : > { %3758 = vmatmul.mubr.msk.bf16.gmra.mxu0 %vm323_vm0, %v4284_v13 }
  0x57   : > { %3724 = vmatmul.mubr.msk.bf16.gmra.mxu1 %vm323_vm0, %v4286_v14  ;;  %3761 = vmatprep.mubr.msk.bf16.mxu0 %vm323_vm0, %v4288_v15 }
  0x58   : > { %3727 = vmatprep.mubr.msk.bf16.mxu1 %vm323_vm0, %v4290_v17 }
  0x5e   : > { %3762 = vmatmul.mubr.msk.bf16.gmra.mxu0 %vm323_vm0, %v4308_v35 }
  0x5f   : > { %3728 = vmatmul.mubr.msk.bf16.gmra.mxu1 %vm323_vm0, %v4310_v36  ;;  %3765 = vmatprep.mubr.msk.bf16.mxu0 %vm323_vm0, %v4312_v37 }
  0x60   : > { %3731 = vmatprep.mubr.msk.bf16.mxu1 %vm323_vm0, %v4314_v42 }
  0x66   : > { %3766 = vmatmul.mubr.msk.bf16.gmra.mxu0 %vm323_vm0, %v4332_v61 }
  0x67   : > { %3732 = vmatmul.mubr.msk.bf16.gmra.mxu1 %vm323_vm0, %v4334_v62  ;;  %3769 = vmatprep.mubr.msk.bf16.mxu0 %vm323_vm0, %v4336_v63 }
  0x68   : > { %3735 = vmatprep.mubr.msk.bf16.mxu1 %vm323_vm0, %v4338_v0 }
  0x6e   : > { %3770 = vmatmul.mubr.msk.bf16.gmra.mxu0 %vm323_vm0, %v4352_v19 }
  0x6f   : > { %3736 = vmatmul.mubr.msk.bf16.gmra.mxu1 %vm323_vm0, %v4354_v22  ;;  %3809 = vmatprep.mubr.msk.bf16.mxu0 %vm323_vm0, %v4068_v12  ;;  %v3291_v12 = vld [vmem:[%s4053_s26 + $0x189] sm:$0xff] }
  0x70   : > { %3775 = vmatprep.mubr.msk.bf16.mxu1 %vm323_vm0, %v4176_v4 }
  0x76   : > { %3810 = vmatmul.mubr.msk.bf16.vlgmr.msra.gmra.mxu0 %vm323_vm0, %v4083_v20 }
  0x77   : > { %3776 = vmatmul.mubr.msk.bf16.vlgmr.msra.gmra.mxu1 %vm323_vm0, %v4178_v5  ;;  %3876 = vmatpush3.bf16.msra.mxu0 %v4192_v8 }
  0x78   : > { %3842 = vmatpush3.bf16.msra.mxu1 %v4185_v7  ;;  %3779 = vmatprep.mubr.msk.bf16.mxu1 %vm323_vm0, %v4214_v23 }
  0x79   : > { %3813 = vmatprep.mubr.msk.bf16.mxu0 %vm323_vm0, %v4107_v31  ;;  %3909 = vmatprep.subr.bf16.mxu1 %v3995_v26 }
  0x7a   : > { %3943 = vmatprep.subr.bf16.mxu0 %v3996_v27 }
  0x7e   : > { %3814 = vmatmul.mubr.msk.bf16.gmra.mxu0 %vm323_vm0, %v4112_v33 }
  0x7f   : > { %3780 = vmatmul.mubr.msk.bf16.gmra.mxu1 %vm323_vm0, %v4218_v25  ;;  %3817 = vmatprep.mubr.msk.bf16.mxu0 %vm323_vm0, %v4132_v43 }
  0x80   : > { %3783 = vmatprep.mubr.msk.bf16.mxu1 %vm323_vm0, %v4238_v39 }
  0x86   : > { %3818 = vmatmul.mubr.msk.bf16.gmra.mxu0 %vm323_vm0, %v4136_v45 }
  0x87   : > { %3784 = vmatmul.mubr.msk.bf16.gmra.mxu1 %vm323_vm0, %v4242_v41  ;;  %3821 = vmatprep.mubr.msk.bf16.mxu0 %vm323_vm0, %v4156_v55 }
  0x88   : > { %3787 = vmatprep.mubr.msk.bf16.mxu1 %vm323_vm0, %v4262_v57 }
  0x8e   : > { %3822 = vmatmul.mubr.msk.bf16.gmra.mxu0 %vm323_vm0, %v4066_v11  ;;  %v3290_v11 = vld [vmem:[%s4053_s26 + $0x181] sm:$0xff] }
  0x8f   : > { %3788 = vmatmul.mubr.msk.bf16.gmra.mxu1 %vm323_vm0, %v4266_v59  ;;  %3825 = vmatprep.mubr.msk.bf16.mxu0 %vm323_vm0, %v4074_v16  ;;  %v3239_v16 = vld [vmem:[%s4053_s26 + $0x180] sm:$0xff] }
  0x90   : > { %3791 = vmatprep.mubr.msk.bf16.mxu1 %vm323_vm0, %v4286_v14 }
  0x96   : > { %3826 = vmatmul.mubr.msk.bf16.gmra.mxu0 %vm323_vm0, %v4085_v21  ;;  %v3240_v21 = vld [vmem:[%s4053_s26 + $0x188] sm:$0xff] }
  0x97   : > { %3792 = vmatmul.mubr.msk.bf16.gmra.mxu1 %vm323_vm0, %v4290_v17  ;;  %3829 = vmatprep.mubr.msk.bf16.mxu0 %vm323_vm0, %v4110_v32  ;;  %v4432_v32 = vpack.c.bf16 %v3291_v12, %v3290_v11  ;;  %v3421_v11 = vld [vmem:[%s4053_s26 + $0x91] sm:$0xff]  ;;  %v3422_v12 = vld [vmem:[%s4053_s26 + $0x99] sm:$0xff] }
  0x98   : > { %3795 = vmatprep.mubr.msk.bf16.mxu1 %vm323_vm0, %v4310_v36 }
  0x9e   : > { %3830 = vmatmul.mubr.msk.bf16.gmra.mxu0 %vm323_vm0, %v4114_v34  ;;  %v1094_v34 = vpack.c.bf16 %v3240_v21, %v3239_v16 }
  0x9f   : > { %3796 = vmatmul.mubr.msk.bf16.gmra.mxu1 %vm323_vm0, %v4314_v42  ;;  %3833 = vmatprep.mubr.msk.bf16.mxu0 %vm323_vm0, %v4134_v44 }
  0xa0   : > { %3799 = vmatprep.mubr.msk.bf16.mxu1 %vm323_vm0, %v4334_v62 }
  0xa6   : > { %3834 = vmatmul.mubr.msk.bf16.gmra.mxu0 %vm323_vm0, %v4138_v46 }
  0xa7   : > { %3800 = vmatmul.mubr.msk.bf16.gmra.mxu1 %vm323_vm0, %v4338_v0  ;;  %3837 = vmatprep.mubr.msk.bf16.mxu0 %vm323_vm0, %v4158_v56 }
  0xa8   : > { %3803 = vmatprep.mubr.msk.bf16.mxu1 %vm323_vm0, %v4354_v22 }
  0xae   : > { %3838 = vmatmul.mubr.msk.bf16.gmra.mxu0 %vm323_vm0, %v4432_v32 }
  0xaf   : > { %3804 = vmatmul.mubr.msk.bf16.gmra.mxu1 %vm323_vm0, %v1094_v34  ;;  %3877 = vmatprep.mubr.msk.bf16.mxu0 %vm323_vm0, %v4178_v5 }
  0xb0   : > { %3843 = vmatprep.mubr.msk.bf16.mxu1 %vm323_vm0, %v4172_v1 }
  0xb6   : > { %3878 = vmatmul.mubr.msk.bf16.vlgmr.msra.gmra.mxu0 %vm323_vm0, %v4214_v23 }
  0xb7   : > { %3844 = vmatmul.mubr.msk.bf16.vlgmr.msra.gmra.mxu1 %vm323_vm0, %v4180_v6  ;;  %3944 = vmatpush3.bf16.msra.mxu0 %v3996_v27 }
  0xb8   : > { %3910 = vmatpush3.bf16.msra.mxu1 %v3995_v26  ;;  %3847 = vmatprep.mubr.msk.bf16.mxu1 %vm323_vm0, %v4211_v10  ;;  %v3420_v26 = vld [vmem:[%s4053_s26 + $0x81] sm:$0xff] }
  0xb9   : > { %3881 = vmatprep.mubr.msk.bf16.mxu0 %vm323_vm0, %v4218_v25 }
  0xbe   : > { %3882 = vmatmul.mubr.msk.bf16.gmra.mxu0 %vm323_vm0, %v4238_v39 }
  0xbf   : > { %3848 = vmatmul.mubr.msk.bf16.gmra.mxu1 %vm323_vm0, %v4216_v24  ;;  %3885 = vmatprep.mubr.msk.bf16.mxu0 %vm323_vm0, %v4242_v41 }
  0xc0   : > { %3851 = vmatprep.mubr.msk.bf16.mxu1 %vm323_vm0, %v4236_v38 }
  0xc6   : > { %3886 = vmatmul.mubr.msk.bf16.gmra.mxu0 %vm323_vm0, %v4262_v57 }
  0xc7   : > { %3852 = vmatmul.mubr.msk.bf16.gmra.mxu1 %vm323_vm0, %v4240_v40  ;;  %3889 = vmatprep.mubr.msk.bf16.mxu0 %vm323_vm0, %v4266_v59 }
  0xc8   : > { %3855 = vmatprep.mubr.msk.bf16.mxu1 %vm323_vm0, %v4260_v54 }
  0xce   : > { %3890 = vmatmul.mubr.msk.bf16.gmra.mxu0 %vm323_vm0, %v4286_v14 }
  0xcf   : > { %3856 = vmatmul.mubr.msk.bf16.gmra.mxu1 %vm323_vm0, %v4264_v58  ;;  %3893 = vmatprep.mubr.msk.bf16.mxu0 %vm323_vm0, %v4290_v17  ;;  %v3392_v17 = vld [vmem:[%s4053_s26 + $0x198] sm:$0xff] }
  0xd0   : > { %3859 = vmatprep.mubr.msk.bf16.mxu1 %vm323_vm0, %v4284_v13  ;;  %v1989_v48 = vpack.c.bf16 %v3393_v28, %v3392_v17 }
  0xd6   : > { %v3675_v43 = vpop.f32.mrf.mxu0  ;;  %3894 = vmatmul.mubr.msk.bf16.gmra.mxu0 %vm323_vm0, %v4310_v36  ;;  %v3342_v36 = vld [vmem:[%s4053_s26 + $0x18a] sm:$0xff] }
  0xd7   : > { %v4475_v44 = vpop.f32.mrf.mxu1  ;;  %3860 = vmatmul.mubr.msk.bf16.gmra.mxu1 %vm323_vm0, %v4288_v15  ;;  %3897 = vmatprep.mubr.msk.bf16.mxu0 %vm323_vm0, %v4314_v42  ;;  %v4542_v50 = vpack.c.bf16 %v3342_v36, %v3341_v30 }
  0xd8   : > { %v4481_v45 = vpop.f32.mrf.mxu0  ;;  %3863 = vmatprep.mubr.msk.bf16.mxu1 %vm323_vm0, %v4308_v35 }
  0xd9   : > { %v4485_v46 = vpop.f32.mrf.mxu1 }
  0xda   : > { %v4487_v55 = vpop.f32.mrf.mxu0 }
  0xdb   : > { %v4489_v56 = vpop.f32.mrf.mxu1 }
  0xdc   : > { %v4491_v1 = vpop.f32.mrf.mxu0 }
  0xdd   : > { %v4493_v4 = vpop.f32.mrf.mxu1 }
  0xde   : > { %v4495_v5 = vpop.f32.mrf.mxu0  ;;  %3898 = vmatmul.mubr.msk.bf16.gmra.mxu0 %vm323_vm0, %v4334_v62 }
  0xdf   : > { %v4499_v7 = vpop.f32.mrf.mxu1  ;;  %3864 = vmatmul.mubr.msk.bf16.gmra.mxu1 %vm323_vm0, %v4312_v37  ;;  %3901 = vmatprep.mubr.msk.bf16.mxu0 %vm323_vm0, %v4338_v0 }
  0xe0   : > { %v4505_v8 = vpop.f32.mrf.mxu0  ;;  %3867 = vmatprep.mubr.msk.bf16.mxu1 %vm323_vm0, %v4332_v61 }
  0xe1   : > { %v4509_v23 = vpop.f32.mrf.mxu1 }
  0xe2   : > { %v4511_v25 = vpop.f32.mrf.mxu0 }
  0xe3   : > { %v4513_v39 = vpop.f32.mrf.mxu1 }
  0xe4   : > { %v4515_v41 = vpop.f32.mrf.mxu0 }
  0xe5   : > { %v4517_v57 = vpop.f32.mrf.mxu1 }
  0xe6   : > { %v4519_v59 = vpop.f32.mrf.mxu0  ;;  %3902 = vmatmul.mubr.msk.bf16.gmra.mxu0 %vm323_vm0, %v4354_v22  ;;  %v3419_v22 = vld [vmem:[%s4053_s26 + $0x79] sm:$0xff] }
  0xe7   : > { %v4523_v14 = vpop.f32.mrf.mxu1  ;;  %3868 = vmatmul.mubr.msk.bf16.gmra.mxu1 %vm323_vm0, %v4336_v63  ;;  %3905 = vmatprep.mubr.msk.bf16.mxu0 %vm323_vm0, %v1094_v34 }
  0xe8   : > { %v4530_v29 = vpop.f32.mrf.mxu0  ;;  %3871 = vmatprep.mubr.msk.bf16.mxu1 %vm323_vm0, %v4352_v19 }
  0xe9   : > { %v4536_v42 = vpop.f32.mrf.mxu1 }
  0xea   : > { %v4538_v47 = vpop.f32.mrf.mxu0 }
  0xeb   : > { %v4540_v49 = vpop.f32.mrf.mxu1 }
  0xec   : > { %v4544_v51 = vpop.f32.mrf.mxu0 }
  0xed   : > { %v4546_v52 = vpop.f32.mrf.mxu1 }
  0xee   : > { %v4548_v53 = vpop.f32.mrf.mxu0  ;;  %3906 = vmatmul.mubr.msk.bf16.gmra.mxu0 %vm323_vm0, %v1989_v48 }
  0xef   : > { %v4551_v60 = vpop.f32.mrf.mxu1  ;;  %3872 = vmatmul.mubr.msk.bf16.gmra.mxu1 %vm323_vm0, %v4542_v50  ;;  %3945 = vmatprep.mubr.msk.bf16.mxu0 %vm323_vm0, %v4180_v6 }
  0xf0   : > { %v4557_v62 = vpop.f32.mrf.mxu0  ;;  %3911 = vmatprep.mubr.msk.bf16.mxu1 %vm323_vm0, %v4083_v20 }
  0xf1   : > { %v4561_v63 = vpop.f32.mrf.mxu1 }
  0xf2   : > { %v4563_v0 = vpop.f32.mrf.mxu0 }
  0xf3   : > { %v4565_v2 = vpop.f32.mrf.mxu1 }
  0xf4   : > { %v4567_v3 = vpop.f32.mrf.mxu0 }
  0xf5   : > { %v4569_v9 = vpop.f32.mrf.mxu1 }
  0xf6   : > { %v3743_v6 = vpop.f32.mrf.mxu0  ;;  %3946 = vmatmul.mubr.msk.bf16.vlgmr.msra.gmra.mxu0 %vm323_vm0, %v4211_v10 }
  0xf7   : > { %v3709_v18 = vpop.f32.mrf.mxu1  ;;  %3912 = vmatmul.mubr.msk.bf16.vlgmr.msra.gmra.mxu1 %vm323_vm0, %v4107_v31  ;;  %3949 = vmatprep.mubr.msk.bf16.mxu0 %vm323_vm0, %v4216_v24  ;;  %v2275_v31 = vpack.c.bf16 %v3420_v26, %v3419_v22  ;;  %v3425_v22 = vld [vmem:[%s4053_s26 + $0xc1] sm:$0xff]  ;;  %v3426_v26 = vld [vmem:[%s4053_s26 + $0xc9] sm:$0xff] }
  0xf8   : > { %v630_v20 = vadd.f32 %v3709_v18, %v3675_v43  ;;  %v887_v19 = vpop.f32.mrf.mxu0  ;;  %3915 = vmatprep.mubr.msk.bf16.mxu1 %vm323_vm0, %v4112_v33  ;;  %v2276_v33 = vpack.c.bf16 %v3422_v12, %v3421_v11 }
  0xf9   : > { %v621_v27 = vpop.f32.mrf.mxu1 }
  0xfa   : > { %v4583_v16 = vadd.f32 %v3743_v6, %v630_v20  ;;  %v622_v10 = vadd.f32 %v621_v27, %v4481_v45  ;;  %v3744_v21 = vpop.f32.mrf.mxu0  ;;  %v3423_v20 = vld [vmem:[%s4053_s26 + $0xa9] sm:$0xff] }
  0xfb   : > { %v3710_v34 = vpop.f32.mrf.mxu1 }
  0xfc   : > { %v4586_v17 = vadd.f32 %v887_v19, %v622_v10  ;;  %v633_v24 = vadd.f32 %v3710_v34, %v4487_v55  ;;  %v890_v43 = vpop.f32.mrf.mxu0  ;;  %v3424_v19 = vld [vmem:[%s4053_s26 + $0xb1] sm:$0xff]  ;;  %v2278_v34 = vpack.c.bf16 %v3426_v26, %v3425_v22 }
  0xfd   : > { %v624_v28 = vpop.f32.mrf.mxu1  ;;  %v2277_v10 = vpack.c.bf16 %v3424_v19, %v3423_v20 }
  0xfe   : > { %v4589_v30 = vadd.f32 %v3744_v21, %v633_v24  ;;  %v625_v36 = vadd.f32 %v624_v28, %v4491_v1  ;;  %v3747_v48 = vpop.f32.mrf.mxu0  ;;  %3950 = vmatmul.mubr.msk.bf16.gmra.mxu0 %vm323_vm0, %v4236_v38 }
  0xff   : > { %v3713_v45 = vpop.f32.mrf.mxu1  ;;  %3916 = vmatmul.mubr.msk.bf16.gmra.mxu1 %vm323_vm0, %v2275_v31  ;;  %3953 = vmatprep.mubr.msk.bf16.mxu0 %vm323_vm0, %v4240_v40 }
 0x100   : > { %v4597_v55 = vadd.f32 %v890_v43, %v625_v36  ;;  %v646_v6 = vadd.f32 %v3713_v45, %v4495_v5  ;;  %v903_v18 = vpop.f32.mrf.mxu0  ;;  %3919 = vmatprep.mubr.msk.bf16.mxu1 %vm323_vm0, %v2276_v33  ;;  %v3428_v45 = vld [vmem:[%s4053_s26 + $0xe1] sm:$0xff] }
 0x101   : > { %v637_v1 = vpop.f32.mrf.mxu1 }
 0x102   : > { %v4605_v27 = vadd.f32 %v3747_v48, %v646_v6  ;;  %v638_v38 = vadd.f32 %v637_v1, %v4505_v8  ;;  %v3748_v11 = vpop.f32.mrf.mxu0  ;;  %v3427_v48 = vld [vmem:[%s4053_s26 + $0xd9] sm:$0xff]  ;;  %v3429_v6 = vld [vmem:[%s4053_s26 + $0xf1] sm:$0xff] }
 0x103   : > { %v3714_v12 = vpop.f32.mrf.mxu1  ;;  %v2279_v22 = vpack.c.bf16 %v3428_v45, %v3427_v48 }
 0x104   : > { %v4608_v40 = vadd.f32 %v903_v18, %v638_v38  ;;  %v649_v5 = vadd.f32 %v3714_v12, %v4511_v25  ;;  %v906_v21 = vpop.f32.mrf.mxu0  ;;  %v3430_v18 = vld [vmem:[%s4053_s26 + $0xf9] sm:$0xff] }
 0x105   : > { %v640_v31 = vpop.f32.mrf.mxu1  ;;  %v2280_v38 = vpack.c.bf16 %v3430_v18, %v3429_v6 }
 0x106   : > { %v4611_v24 = vadd.f32 %v3748_v11, %v649_v5  ;;  %v641_v43 = vadd.f32 %v640_v31, %v4515_v41  ;;  %v3751_v33 = vpop.f32.mrf.mxu0  ;;  %3954 = vmatmul.mubr.msk.bf16.gmra.mxu0 %vm323_vm0, %v4260_v54  ;;  %v3431_v31 = vld [vmem:[%s4053_s26 + $0x109] sm:$0xff] }
 0x107   : > { %v3717_v8 = vpop.f32.mrf.mxu1  ;;  %3920 = vmatmul.mubr.msk.bf16.gmra.mxu1 %vm323_vm0, %v2277_v10  ;;  %3957 = vmatprep.mubr.msk.bf16.mxu0 %vm323_vm0, %v4264_v58 }
 0x108   : > { %v4619_v25 = vadd.f32 %v906_v21, %v641_v43  ;;  %v662_v28 = vadd.f32 %v3717_v8, %v4519_v59  ;;  %v919_v36 = vpop.f32.mrf.mxu0  ;;  %3923 = vmatprep.mubr.msk.bf16.mxu1 %vm323_vm0, %v2278_v34  ;;  %v3432_v43 = vld [vmem:[%s4053_s26 + $0x111] sm:$0xff]  ;;  %v3434_v8 = vld [vmem:[%s4053_s26 + $0x129] sm:$0xff] }
 0x109   : > { %v653_v41 = vpop.f32.mrf.mxu1 }
 0x10a   : > { %v4627_v20 = vadd.f32 %v3751_v33, %v662_v28  ;;  %v654_v54 = vadd.f32 %v653_v41, %v4530_v29  ;;  %v3752_v19 = vpop.f32.mrf.mxu0  ;;  %v3433_v33 = vld [vmem:[%s4053_s26 + $0x121] sm:$0xff] }
 0x10b   : > { %v3718_v1 = vpop.f32.mrf.mxu1  ;;  %v2282_v6 = vpack.c.bf16 %v3434_v8, %v3433_v33 }
 0x10c   : > { %v4630_v58 = vadd.f32 %v919_v36, %v654_v54  ;;  %v665_v59 = vadd.f32 %v3718_v1, %v4538_v47  ;;  %v922_v26 = vpop.f32.mrf.mxu0 }
 0x10d   : > { %v656_v11 = vpop.f32.mrf.mxu1 }
 0x10e   : > { %v4633_v12 = vadd.f32 %v3752_v19, %v665_v59  ;;  %v657_v10 = vadd.f32 %v656_v11, %v4544_v51  ;;  %v3755_v5 = vpop.f32.mrf.mxu0  ;;  %3958 = vmatmul.mubr.msk.bf16.gmra.mxu0 %vm323_vm0, %v4284_v13  ;;  %v3489_v11 = vld [vmem:[%s4053_s26 + $0x15a] sm:$0xff] }
 0x10f   : > { %v3721_v29 = vpop.f32.mrf.mxu1  ;;  %3924 = vmatmul.mubr.msk.bf16.gmra.mxu1 %vm323_vm0, %v2279_v22  ;;  %3961 = vmatprep.mubr.msk.bf16.mxu0 %vm323_vm0, %v4288_v15  ;;  %v2281_v15 = vpack.c.bf16 %v3432_v43, %v3431_v31 }
 0x110   : > { %v4641_v47 = vadd.f32 %v922_v26, %v657_v10  ;;  %v678_v21 = vadd.f32 %v3721_v29, %v4548_v53  ;;  %v935_v34 = vpop.f32.mrf.mxu0  ;;  %3927 = vmatprep.mubr.msk.bf16.mxu1 %vm323_vm0, %v2280_v38  ;;  %v3488_v38 = vld [vmem:[%s4053_s26 + $0x152] sm:$0xff] }
 0x111   : > { %v669_v51 = vpop.f32.mrf.mxu1  ;;  %v2582_v43 = vpack.c.bf16 %v3489_v11, %v3488_v38 }
 0x112   : > { %v4649_v28 = vadd.f32 %v3755_v5, %v678_v21  ;;  %v670_v13 = vadd.f32 %v669_v51, %v4557_v62  ;;  %v3756_v36 = vpop.f32.mrf.mxu0  ;;  %v3437_v5 = vld [vmem:[%s4053_s26 + $0x151] sm:$0xff] }
 0x113   : > { %v3722_v48 = vpop.f32.mrf.mxu1 }
 0x114   : > { %v4652_v45 = vadd.f32 %v935_v34, %v670_v13  ;;  %v681_v53 = vadd.f32 %v3722_v48, %v4563_v0  ;;  %v938_v41 = vpop.f32.mrf.mxu0  ;;  %v3435_v0 = vld [vmem:[%s4053_s26 + $0x139] sm:$0xff] }
 0x115   : > { %v672_v18 = vpop.f32.mrf.mxu1 }
 0x116   : > { %v4655_v54 = vadd.f32 %v3756_v36, %v681_v53  ;;  %v673_v19 = vadd.f32 %v672_v18, %v4567_v3  ;;  %v3759_v62 = vpop.f32.mrf.mxu0  ;;  %3962 = vmatmul.mubr.msk.bf16.gmra.mxu0 %vm323_vm0, %v4308_v35  ;;  %v3436_v3 = vld [vmem:[%s4053_s26 + $0x141] sm:$0xff]  ;;  %v3438_v35 = vld [vmem:[%s4053_s26 + $0x159] sm:$0xff]  ;;  %v3490_v53 = vld [vmem:[%s4053_s26 + $0x16a] sm:$0xff] }
 0x117   : > { %v3725_v1 = vpop.f32.mrf.mxu1  ;;  %3928 = vmatmul.mubr.msk.bf16.gmra.mxu1 %vm323_vm0, %v2281_v15  ;;  %3965 = vmatprep.mubr.msk.bf16.mxu0 %vm323_vm0, %v4312_v37  ;;  %v2283_v31 = vpack.c.bf16 %v3436_v3, %v3435_v0  ;;  %v2284_v8 = vpack.c.bf16 %v3438_v35, %v3437_v5 }
 0x118   : > { %v4664_v22 = vadd.f32 %v938_v41, %v673_v19  ;;  %v694_v59 = vadd.f32 %v3725_v1, %v4475_v44  ;;  %v951_v26 = vpop.f32.mrf.mxu0  ;;  %3931 = vmatprep.mubr.msk.bf16.mxu1 %vm323_vm0, %v2282_v6  ;;  %v3439_v19 = vld [vmem:[%s4053_s26 + $0x169] sm:$0xff] }
 0x119   : > { %v685_v10 = vpop.f32.mrf.mxu1 }
 0x11a   : > { %v4673_v29 = vadd.f32 %v3759_v62, %v694_v59  ;;  %v686_v21 = vadd.f32 %v685_v10, %v4485_v46  ;;  %v3760_v34 = vpop.f32.mrf.mxu0 }
 0x11b   : > { %v3726_v37 = vpop.f32.mrf.mxu1 }
 0x11c   : > { %v4676_v44 = vadd.f32 %v951_v26, %v686_v21  ;;  %v697_v51 = vadd.f32 %v3726_v37, %v4489_v56  ;;  %v954_v33 = vpop.f32.mrf.mxu0  ;;  %v3491_v56 = vld [vmem:[%s4053_s26 + $0x172] sm:$0xff]  ;;  %v3495_v37 = vld [vmem:[%s4053_s26 + $0x1a2] sm:$0xff] }
 0x11d   : > { %v688_v13 = vpop.f32.mrf.mxu1  ;;  %v2583_v59 = vpack.c.bf16 %v3491_v56, %v3490_v53 }
 0x11e   : > { %v4679_v36 = vadd.f32 %v3760_v34, %v697_v51  ;;  %v689_v48 = vadd.f32 %v688_v13, %v4493_v4  ;;  %v3763_v46 = vpop.f32.mrf.mxu0  ;;  %3966 = vmatmul.mubr.msk.bf16.gmra.mxu0 %vm323_vm0, %v4332_v61  ;;  %v3440_v4 = vld [vmem:[%s4053_s26 + $0x171] sm:$0xff]  ;;  %v3494_v34 = vld [vmem:[%s4053_s26 + $0x19a] sm:$0xff] }
 0x11f   : > { %v3729_v15 = vpop.f32.mrf.mxu1  ;;  %3932 = vmatmul.mubr.msk.bf16.gmra.mxu1 %vm323_vm0, %v2283_v31  ;;  %3969 = vmatprep.mubr.msk.bf16.mxu0 %vm323_vm0, %v2582_v43  ;;  %v2285_v3 = vpack.c.bf16 %v3440_v4, %v3439_v19  ;;  %v3444_v51 = vld [vmem:[%s4053_s26 + $0x1a1] sm:$0xff] }
 0x120   : > { %v4688_v41 = vadd.f32 %v954_v33, %v689_v48  ;;  %v710_v6 = vadd.f32 %v3729_v15, %v4499_v7  ;;  %v967_v18 = vpop.f32.mrf.mxu0  ;;  %3935 = vmatprep.mubr.msk.bf16.mxu1 %vm323_vm0, %v2284_v8 }
 0x121   : > { %v701_v62 = vpop.f32.mrf.mxu1 }
 0x122   : > { %v4694_v1 = vadd.f32 %v3763_v46, %v710_v6  ;;  %v702_v61 = vadd.f32 %v701_v62, %v4509_v23  ;;  %v3764_v0 = vpop.f32.mrf.mxu0  ;;  %v2585_v46 = vpack.c.bf16 %v3495_v37, %v3494_v34 }
 0x123   : > { %v3730_v26 = vpop.f32.mrf.mxu1 }
 0x124   : > { %v4697_v38 = vadd.f32 %v967_v18, %v702_v61  ;;  %v713_v7 = vadd.f32 %v3730_v26, %v4513_v39  ;;  %v970_v11 = vpop.f32.mrf.mxu0 }
 0x125   : > { %v704_v10 = vpop.f32.mrf.mxu1 }
 0x126   : > { %v4700_v5 = vadd.f32 %v3764_v0, %v713_v7  ;;  %v705_v35 = vadd.f32 %v704_v10, %v4517_v57  ;;  %v3767_v21 = vpop.f32.mrf.mxu0  ;;  %3970 = vmatmul.mubr.msk.bf16.gmra.mxu0 %vm323_vm0, %v2583_v59  ;;  %v3443_v57 = vld [vmem:[%s4053_s26 + $0x199] sm:$0xff] }
 0x127   : > { %v3733_v23 = vpop.f32.mrf.mxu1  ;;  %3936 = vmatmul.mubr.msk.bf16.gmra.mxu1 %vm323_vm0, %v2285_v3  ;;  %3973 = vmatprep.mubr.msk.bf16.mxu0 %vm323_vm0, %v4542_v50  ;;  %v2287_v15 = vpack.c.bf16 %v3444_v51, %v3443_v57 }
 0x128   : > { %v4709_v39 = vadd.f32 %v970_v11, %v705_v35  ;;  %v726_v31 = vadd.f32 %v3733_v23, %v4523_v14  ;;  %v983_v43 = vpop.f32.mrf.mxu0  ;;  %3939 = vmatprep.mubr.msk.bf16.mxu1 %vm323_vm0, %v4432_v32 }
 0x129   : > { %v717_v33 = vpop.f32.mrf.mxu1 }
 0x12a   : > { %v4716_v8 = vadd.f32 %v3767_v21, %v726_v31  ;;  %v718_v13 = vadd.f32 %v717_v33, %v4536_v42  ;;  %v3768_v48 = vpop.f32.mrf.mxu0 }
 0x12b   : > { %v3734_v50 = vpop.f32.mrf.mxu1 }
 0x12c   : > { %v4719_v53 = vadd.f32 %v983_v43, %v718_v13  ;;  %v729_v56 = vadd.f32 %v3734_v50, %v4540_v49  ;;  %v986_v14 = vpop.f32.mrf.mxu0 }
 0x12d   : > { %v720_v6 = vpop.f32.mrf.mxu1 }
 0x12e   : > { %v4722_v18 = vadd.f32 %v3768_v48, %v729_v56  ;;  %v721_v32 = vadd.f32 %v720_v6, %v4546_v52  ;;  %v3771_v19 = vpop.f32.mrf.mxu0  ;;  %3974 = vmatmul.mubr.msk.bf16.gmra.mxu0 %vm323_vm0, %v2585_v46 }
 0x12f   : > { %v3737_v4 = vpop.f32.mrf.mxu1  ;;  %3940 = vmatmul.mubr.msk.bf16.gmra.mxu1 %vm323_vm0, %v2287_v15 }
 0x130   : > { %v4727_v42 = vadd.f32 %v986_v14, %v721_v32  ;;  %v742_v62 = vadd.f32 %v3737_v4, %v4551_v60  ;;  %v999_v61 = vpop.f32.mrf.mxu0 }
 0x131   : > { %v733_v0 = vpop.f32.mrf.mxu1 }
 0x132   : > { %v4730_v59 = vadd.f32 %v3771_v19, %v742_v62  ;;  %v734_v49 = vadd.f32 %v733_v0, %v4561_v63  ;;  %v3772_v26 = vpop.f32.mrf.mxu0 }
 0x133   : > { %v3738_v3 = vpop.f32.mrf.mxu1 }
 0x134   : > { %v4733_v7 = vadd.f32 %v999_v61, %v734_v49  ;;  %v745_v52 = vadd.f32 %v3738_v3, %v4565_v2  ;;  %v1002_v11 = vpop.f32.mrf.mxu0 }
 0x135   : > { %v736_v10 = vpop.f32.mrf.mxu1 }
 0x136   : > { %v4736_v35 = vadd.f32 %v3772_v26, %v745_v52  ;;  %v737_v21 = vadd.f32 %v736_v10, %v4569_v9  ;;  %v3811_v23 = vpop.f32.mrf.mxu0 }
 0x137   : > { %v3777_v60 = vpop.f32.mrf.mxu1 }
 0x138   : > { %v4739_v34 = vadd.f32 %v1002_v11, %v737_v21  ;;  %v1315_v37 = vadd.f32 %v3777_v60, %v4583_v16  ;;  %v1484_v31 = vpop.f32.mrf.mxu0 }
 0x139   : > { %v1186_v63 = vpop.f32.mrf.mxu1 }
 0x13a   : > { %v4742_v43 = vadd.f32 %v3811_v23, %v1315_v37  ;;  %v1313_v57 = vadd.f32 %v1186_v63, %v4586_v17  ;;  %v3812_v51 = vpop.f32.mrf.mxu0 }
 0x13b   : > { %v3778_v2 = vpop.f32.mrf.mxu1 }
 0x13c   : > { %v4745_v33 = vadd.f32 %v1484_v31, %v1313_v57  ;;  %v1316_v13 = vadd.f32 %v3778_v2, %v4589_v30  ;;  %v1487_v48 = vpop.f32.mrf.mxu0 }
 0x13d   : > { %v1189_v9 = vpop.f32.mrf.mxu1 }
 0x13e   : > { %v4748_v46 = vadd.f32 %v3812_v51, %v1316_v13  ;;  %v1314_v50 = vadd.f32 %v1189_v9, %v4597_v55  ;;  %v3815_v15 = vpop.f32.mrf.mxu0 }
 0x13f   : > { %v3781_v16 = vpop.f32.mrf.mxu1 }
 0x140   : > { %v4751_v56 = vadd.f32 %v1487_v48, %v1314_v50  ;;  %v1319_v14 = vadd.f32 %v3781_v16, %v4605_v27  ;;  %v1500_v6 = vpop.f32.mrf.mxu0 }
 0x141   : > { %v1202_v17 = vpop.f32.mrf.mxu1 }
 0x142   : > { %v4754_v32 = vadd.f32 %v3815_v15, %v1319_v14  ;;  %v1317_v19 = vadd.f32 %v1202_v17, %v4608_v40  ;;  %v3816_v4 = vpop.f32.mrf.mxu0 }
 0x143   : > { %v3782_v30 = vpop.f32.mrf.mxu1 }
 0x144   : > { %v4757_v62 = vadd.f32 %v1500_v6, %v1317_v19  ;;  %v1320_v61 = vadd.f32 %v3782_v30, %v4611_v24  ;;  %v1503_v0 = vpop.f32.mrf.mxu0 }
 0x145   : > { %v1205_v55 = vpop.f32.mrf.mxu1 }
 0x146   : > { %v4760_v49 = vadd.f32 %v3816_v4, %v1320_v61  ;;  %v1318_v26 = vadd.f32 %v1205_v55, %v4619_v25  ;;  %v3819_v3 = vpop.f32.mrf.mxu0 }
 0x147   : > { %v3785_v27 = vpop.f32.mrf.mxu1 }
 0x148   : > { %v4763_v52 = vadd.f32 %v1503_v0, %v1318_v26  ;;  %v1323_v11 = vadd.f32 %v3785_v27, %v4627_v20  ;;  %v1516_v10 = vpop.f32.mrf.mxu0 }
 0x149   : > { %v1218_v40 = vpop.f32.mrf.mxu1 }
 0x14a   : > { %v4766_v21 = vadd.f32 %v3819_v3, %v1323_v11  ;;  %v1321_v23 = vadd.f32 %v1218_v40, %v4630_v58  ;;  %v3820_v60 = vpop.f32.mrf.mxu0 }
 0x14b   : > { %v3786_v24 = vpop.f32.mrf.mxu1 }
 0x14c   : > { %v4769_v37 = vadd.f32 %v1516_v10, %v1321_v23  ;;  %v1324_v31 = vadd.f32 %v3786_v24, %v4633_v12  ;;  %v1519_v63 = vpop.f32.mrf.mxu0 }
 0x14d   : > { %v1221_v25 = vpop.f32.mrf.mxu1 }
 0x14e   : > { %v4772_v57 = vadd.f32 %v3820_v60, %v1324_v31  ;;  %v1322_v51 = vadd.f32 %v1221_v25, %v4641_v47  ;;  %v3823_v2 = vpop.f32.mrf.mxu0 }
 0x14f   : > { %v3789_v20 = vpop.f32.mrf.mxu1 }
 0x150   : > { %v4775_v13 = vadd.f32 %v1519_v63, %v1322_v51  ;;  %v1327_v48 = vadd.f32 %v3789_v20, %v4649_v28  ;;  %v1532_v9 = vpop.f32.mrf.mxu0 }
 0x151   : > { %v1234_v58 = vpop.f32.mrf.mxu1 }
 0x152   : > { %v4778_v50 = vadd.f32 %v3823_v2, %v1327_v48  ;;  %v1325_v15 = vadd.f32 %v1234_v58, %v4652_v45  ;;  %v3824_v16 = vpop.f32.mrf.mxu0 }
 0x153   : > { %v3790_v12 = vpop.f32.mrf.mxu1 }
 0x154   : > { %v4781_v14 = vadd.f32 %v1532_v9, %v1325_v15  ;;  %v1328_v6 = vadd.f32 %v3790_v12, %v4655_v54  ;;  %v1535_v17 = vpop.f32.mrf.mxu0 }
 0x155   : > { %v1237_v47 = vpop.f32.mrf.mxu1 }
 0x156   : > { %v4784_v19 = vadd.f32 %v3824_v16, %v1328_v6  ;;  %v1326_v4 = vadd.f32 %v1237_v47, %v4664_v22  ;;  %v3827_v30 = vpop.f32.mrf.mxu0 }
 0x157   : > { %v3793_v28 = vpop.f32.mrf.mxu1 }
 0x158   : > { %v4787_v61 = vadd.f32 %v1535_v17, %v1326_v4  ;;  %v1331_v0 = vadd.f32 %v3793_v28, %v4673_v29  ;;  %v1548_v55 = vpop.f32.mrf.mxu0 }
 0x159   : > { %v1250_v45 = vpop.f32.mrf.mxu1 }
 0x15a   : > { %v4790_v26 = vadd.f32 %v3827_v30, %v1331_v0  ;;  %v1329_v3 = vadd.f32 %v1250_v45, %v4676_v44  ;;  %v3828_v27 = vpop.f32.mrf.mxu0 }
 0x15b   : > { %v3794_v54 = vpop.f32.mrf.mxu1 }
 0x15c   : > { %v4793_v11 = vadd.f32 %v1548_v55, %v1329_v3  ;;  %v1332_v10 = vadd.f32 %v3794_v54, %v4679_v36  ;;  %v1551_v40 = vpop.f32.mrf.mxu0 }
 0x15d   : > { %v1253_v22 = vpop.f32.mrf.mxu1 }
 0x15e   : > { %v4796_v23 = vadd.f32 %v3828_v27, %v1332_v10  ;;  %v1330_v60 = vadd.f32 %v1253_v22, %v4688_v41  ;;  %v3831_v24 = vpop.f32.mrf.mxu0 }
 0x15f   : > { %v3797_v29 = vpop.f32.mrf.mxu1 }
 0x160   : > { %v4799_v31 = vadd.f32 %v1551_v40, %v1330_v60  ;;  %v1335_v63 = vadd.f32 %v3797_v29, %v4694_v1  ;;  %v1564_v25 = vpop.f32.mrf.mxu0 }
 0x161   : > { %v1266_v44 = vpop.f32.mrf.mxu1 }
 0x162   : > { %5247 = vst [vmem:[#allocation2_spill] sm:$0xff] %v4799_v31  ;;  %v4802_v51 = vadd.f32 %v3831_v24, %v1335_v63  ;;  %v1333_v2 = vadd.f32 %v1266_v44, %v4697_v38  ;;  %v3832_v20 = vpop.f32.mrf.mxu0 }
 0x163   : > { %v3798_v36 = vpop.f32.mrf.mxu1 }
 0x164   : > { %5248 = vst [vmem:[#allocation3_spill] sm:$0xff] %v4802_v51  ;;  %v4805_v48 = vadd.f32 %v1564_v25, %v1333_v2  ;;  %v1336_v9 = vadd.f32 %v3798_v36, %v4700_v5  ;;  %v1567_v58 = vpop.f32.mrf.mxu0 }
 0x165   : > { %v1269_v41 = vpop.f32.mrf.mxu1 }
 0x166   : > { %5249 = vst [vmem:[#allocation4_spill] sm:$0xff] %v4805_v48  ;;  %v4808_v15 = vadd.f32 %v3832_v20, %v1336_v9  ;;  %v1334_v16 = vadd.f32 %v1269_v41, %v4709_v39  ;;  %v3835_v12 = vpop.f32.mrf.mxu0 }
 0x167   : > { %v3801_v1 = vpop.f32.mrf.mxu1 }
 0x168   : > { %5250 = vst [vmem:[#allocation5_spill] sm:$0xff] %v4808_v15  ;;  %v4811_v6 = vadd.f32 %v1567_v58, %v1334_v16  ;;  %v1339_v17 = vadd.f32 %v3801_v1, %v4716_v8  ;;  %v1580_v47 = vpop.f32.mrf.mxu0 }
 0x169   : > { %v1282_v38 = vpop.f32.mrf.mxu1 }
 0x16a   : > { %5251 = vst [vmem:[#allocation6_spill] sm:$0xff] %v4811_v6  ;;  %v4814_v4 = vadd.f32 %v3835_v12, %v1339_v17  ;;  %v1337_v30 = vadd.f32 %v1282_v38, %v4719_v53  ;;  %v3836_v28 = vpop.f32.mrf.mxu0 }
 0x16b   : > { %v3802_v5 = vpop.f32.mrf.mxu1 }
 0x16c   : > { %5252 = vst [vmem:[#allocation7_spill] sm:$0xff] %v4814_v4  ;;  %v4817_v0 = vadd.f32 %v1580_v47, %v1337_v30  ;;  %v1340_v55 = vadd.f32 %v3802_v5, %v4722_v18  ;;  %v1583_v45 = vpop.f32.mrf.mxu0 }
 0x16d   : > { %v1285_v39 = vpop.f32.mrf.mxu1 }
 0x16e   : > { %5253 = vst [vmem:[#allocation8_spill] sm:$0xff] %v4817_v0  ;;  %v4820_v3 = vadd.f32 %v3836_v28, %v1340_v55  ;;  %v1338_v27 = vadd.f32 %v1285_v39, %v4727_v42  ;;  %v3839_v54 = vpop.f32.mrf.mxu0 }
 0x16f   : > { %v3805_v8 = vpop.f32.mrf.mxu1 }
 0x170   : > { %5254 = vst [vmem:[#allocation9_spill] sm:$0xff] %v4820_v3  ;;  %v4823_v10 = vadd.f32 %v1583_v45, %v1338_v27  ;;  %v1343_v40 = vadd.f32 %v3805_v8, %v4730_v59  ;;  %v1596_v22 = vpop.f32.mrf.mxu0 }
 0x171   : > { %v1298_v53 = vpop.f32.mrf.mxu1 }
 0x172   : > { %5255 = vst [vmem:[#allocation10_spill] sm:$0xff] %v4823_v10  ;;  %v4826_v60 = vadd.f32 %v3839_v54, %v1343_v40  ;;  %v1341_v24 = vadd.f32 %v1298_v53, %v4733_v7  ;;  %v3840_v29 = vpop.f32.mrf.mxu0 }
 0x173   : > { %v3806_v18 = vpop.f32.mrf.mxu1 }
 0x174   : > { %5256 = vst [vmem:[#allocation11_spill] sm:$0xff] %v4826_v60  ;;  %v4829_v63 = vadd.f32 %v1596_v22, %v1341_v24  ;;  %v1344_v25 = vadd.f32 %v3806_v18, %v4736_v35  ;;  %v1599_v44 = vpop.f32.mrf.mxu0 }
 0x175   : > { %v1301_v42 = vpop.f32.mrf.mxu1 }
 0x176   : > { %5257 = vst [vmem:[#allocation12_spill] sm:$0xff] %v4829_v63  ;;  %v4832_v2 = vadd.f32 %v3840_v29, %v1344_v25  ;;  %v1342_v20 = vadd.f32 %v1301_v42, %v4739_v34  ;;  %v4835_v36 = vpop.f32.mrf.mxu0 }
 0x177   : > { %v3845_v59 = vpop.f32.mrf.mxu1 }
 0x178   : > { %5258 = vst [vmem:[#allocation13_spill] sm:$0xff] %v4832_v2  ;;  %v4837_v9 = vadd.f32 %v1599_v44, %v1342_v20  ;;  %v4839_v58 = vpop.f32.mrf.mxu0 }
 0x179   : > { %v1782_v7 = vpop.f32.mrf.mxu1 }
 0x17a   : > { %5259 = vst [vmem:[#allocation14_spill] sm:$0xff] %v4837_v9  ;;  %v4841_v41 = vpop.f32.mrf.mxu0 }
 0x17b   : > { %v3846_v16 = vpop.f32.mrf.mxu1 }
 0x17c   : > { %v4843_v12 = vpop.f32.mrf.mxu0 }
 0x17d   : > { %v1785_v35 = vpop.f32.mrf.mxu1 }
 0x17e   : > { %v4845_v1 = vpop.f32.mrf.mxu0 }
 0x17f   : > { %v3849_v17 = vpop.f32.mrf.mxu1 }
 0x180   : > { %v4847_v47 = vpop.f32.mrf.mxu0 }
 0x181   : > { %v1798_v34 = vpop.f32.mrf.mxu1 }
 0x182   : > { %v4849_v38 = vpop.f32.mrf.mxu0 }
 0x183   : > { %v4851_v30 = vpop.f32.mrf.mxu1 }
 0x184   : > { %v4853_v28 = vpop.f32.mrf.mxu0 }
 0x185   : > { %v4855_v5 = vpop.f32.mrf.mxu1 }
 0x186   : > { %v4857_v55 = vpop.f32.mrf.mxu0 }
 0x187   : > { %v4859_v45 = vpop.f32.mrf.mxu1 }
 0x188   : > { %v4861_v39 = vpop.f32.mrf.mxu0 }
 0x189   : > { %v4863_v27 = vpop.f32.mrf.mxu1 }
 0x18a   : > { %v4865_v54 = vpop.f32.mrf.mxu0 }
 0x18b   : > { %v4867_v8 = vpop.f32.mrf.mxu1 }
 0x18c   : > { %v4869_v40 = vpop.f32.mrf.mxu0 }
 0x18d   : > { %v4871_v22 = vpop.f32.mrf.mxu1 }
 0x18e   : > { %v4873_v53 = vpop.f32.mrf.mxu0 }
 0x18f   : > { %v4875_v24 = vpop.f32.mrf.mxu1 }
 0x190   : > { %v4877_v29 = vpop.f32.mrf.mxu0 }
 0x191   : > { %v4879_v18 = vpop.f32.mrf.mxu1 }
 0x192   : > { %v4881_v25 = vpop.f32.mrf.mxu0 }
 0x193   : > { %v4883_v44 = vpop.f32.mrf.mxu1 }
 0x194   : > { %v4885_v42 = vpop.f32.mrf.mxu0 }
 0x195   : > { %5260 = vst [vmem:[#allocation15_spill] sm:$0xff] %v4885_v42  ;;  %v4887_v20 = vpop.f32.mrf.mxu1 }
 0x196   : > { %v4889_v9 = vpop.f32.mrf.mxu0 }
 0x197   : > { %5261 = vst [vmem:[#allocation16_spill] sm:$0xff] %v4889_v9  ;;  %v4891_v2 = vpop.f32.mrf.mxu1 }
 0x198   : > { %v4893_v63 = vpop.f32.mrf.mxu0 }
 0x199   : > { %5262 = vst [vmem:[#allocation17_spill] sm:$0xff] %v4893_v63  ;;  %v4895_v60 = vpop.f32.mrf.mxu1 }
 0x19a   : > { %v4897_v10 = vpop.f32.mrf.mxu0 }
 0x19b   : > { %5263 = vst [vmem:[#allocation18_spill] sm:$0xff] %v4897_v10  ;;  %v4899_v3 = vpop.f32.mrf.mxu1 }
 0x19c   : > { %v4901_v0 = vpop.f32.mrf.mxu0 }
 0x19d   : > { %5264 = vst [vmem:[#allocation19_spill] sm:$0xff] %v4901_v0  ;;  %v4903_v4 = vpop.f32.mrf.mxu1 }
 0x19e   : > { %5265 = vst [vmem:[#allocation20_spill] sm:$0xff] %v4903_v4  ;;  %v4905_v6 = vpop.f32.mrf.mxu0 }
 0x19f   : > { %5266 = vst [vmem:[#allocation21_spill] sm:$0xff] %v4905_v6  ;;  %v4907_v15 = vpop.f32.mrf.mxu1 }
 0x1a0   : > { %5267 = vst [vmem:[#allocation22_spill] sm:$0xff] %v4907_v15  ;;  %v4909_v48 = vpop.f32.mrf.mxu0 }
 0x1a1   : > { %5268 = vst [vmem:[#allocation23_spill] sm:$0xff] %v4909_v48  ;;  %v4911_v51 = vpop.f32.mrf.mxu1 }
 0x1a2   : > { %5269 = vst [vmem:[#allocation24_spill] sm:$0xff] %v4911_v51  ;;  %v4913_v31 = vpop.f32.mrf.mxu0 }
 0x1a3   : > { %5270 = vst [vmem:[#allocation25_spill] sm:$0xff] %v4913_v31  ;;  %v4915_v63 = vpop.f32.mrf.mxu1 }
 0x1a4   : > { %5271 = vst [vmem:[#allocation26_spill] sm:$0xff] %v4915_v63  ;;  %v4917_v9 = vpop.f32.mrf.mxu0 }
 0x1a5   : > { %5272 = vst [vmem:[#allocation27_spill] sm:$0xff] %v4917_v9  ;;  %v4919_v10 = vpop.f32.mrf.mxu1 }
 0x1a6   : > { %5273 = vst [vmem:[#allocation28_spill] sm:$0xff] %v4919_v10  ;;  %v4921_v42 = vpop.f32.mrf.mxu0 }
 0x1a7   : > { %5274 = vst [vmem:[#allocation29_spill] sm:$0xff] %v4921_v42  ;;  %v4923_v0 = vpop.f32.mrf.mxu1 }
 0x1a8   : > { %5275 = vst [vmem:[#allocation30_spill] sm:$0xff] %v4923_v0  ;;  %v4925_v4 = vpop.f32.mrf.mxu0 }
 0x1a9   : > { %5276 = vst [vmem:[#allocation31_spill] sm:$0xff] %v4925_v4  ;;  %v4927_v6 = vpop.f32.mrf.mxu1  ;;  %v1911_v4 = vadd.f32 %v3845_v59, %v4742_v43  ;;  %v1913_v59 = vadd.f32 %v1798_v34, %v4757_v62  ;;  %v1919_v62 = vadd.f32 %v4859_v45, %v4766_v21  ;;  %v1918_v21 = vadd.f32 %v4871_v22, %v4775_v13 }
 0x1aa   : > { %5277 = vst [vmem:[#allocation32_spill] sm:$0xff] %v4927_v6  ;;  %v4929_v15 = vpop.f32.mrf.mxu0 }
 0x1ab   : > { %5278 = vst [vmem:[#allocation33_spill] sm:$0xff] %v4929_v15  ;;  %v4931_v48 = vpop.f32.mrf.mxu1 }
 0x1ac   : > { %5279 = vst [vmem:[#allocation34_spill] sm:$0xff] %v4931_v48  ;;  %v4933_v51 = vpop.f32.mrf.mxu0  ;;  %v1909_v48 = vadd.f32 %v1782_v7, %v4745_v33 }
 0x1ad   : > { %5280 = vst [vmem:[#allocation35_spill] sm:$0xff] %v4933_v51  ;;  %v4935_v31 = vpop.f32.mrf.mxu1  ;;  %v1912_v51 = vadd.f32 %v3846_v16, %v4748_v46 }
 0x1ae   : > { %5281 = vst [vmem:[#allocation36_spill] sm:$0xff] %v4935_v31  ;;  %v4937_v9 = vpop.f32.mrf.mxu0  ;;  %v1910_v31 = vadd.f32 %v1785_v35, %v4751_v56 }
 0x1af   : > { %5282 = vst [vmem:[#allocation37_spill] sm:$0xff] %v4937_v9  ;;  %v4939_v10 = vpop.f32.mrf.mxu1  ;;  %v1915_v9 = vadd.f32 %v3849_v17, %v4754_v32  ;;  %v2211_v33 = vadd.f32 %v4841_v41, %v1912_v51  ;;  %v1916_v32 = vadd.f32 %v4851_v30, %v4760_v49  ;;  %v1917_v51 = vadd.f32 %v4863_v27, %v4769_v37 }
 0x1b0   : > { %5283 = vst [vmem:[#allocation38_spill] sm:$0xff] %v4939_v10  ;;  %v4941_v42 = vpop.f32.mrf.mxu0  ;;  %v2209_v46 = vadd.f32 %v4843_v12, %v1910_v31  ;;  %v1924_v37 = vadd.f32 %v4883_v44, %v4784_v19  ;;  %v2218_v17 = vadd.f32 %v4857_v55, %v1919_v62  ;;  %v5009_v30 = vadd.f32 %v4869_v40, %v1918_v21  ;;  %v5287_v55 = vld [vmem:[#allocation15_spill] sm:$0xff] }
 0x1b1   : > { %5284 = vst [vmem:[#allocation39_spill] sm:$0xff] %v4941_v42  ;;  %v4943_v0 = vpop.f32.mrf.mxu1  ;;  %v2210_v42 = vadd.f32 %v4835_v36, %v1911_v4  ;;  %v2214_v16 = vadd.f32 %v4845_v1, %v1915_v9  ;;  %v1914_v4 = vadd.f32 %v4855_v5, %v4763_v52  ;;  %v2212_v52 = vadd.f32 %v4847_v47, %v1913_v59 }
 0x1b2   : > { %v4946_v6 = vpop.f32.mrf.mxu0  ;;  %v1923_v9 = vadd.f32 %v4875_v24, %v4778_v50  ;;  %v2215_v13 = vadd.f32 %v4849_v38, %v1916_v32  ;;  %v1925_v1 = vadd.f32 %v4895_v60, %v4793_v11  ;;  %v1928_v11 = vadd.f32 %v4899_v3, %v4796_v23  ;;  %v5289_v23 = vld [vmem:[#allocation17_spill] sm:$0xff]  ;;  %v5290_v24 = vld [vmem:[#allocation2_spill] sm:$0xff] }
 0x1b3   : > { %5285 = vst [vmem:[#allocation40_spill] sm:$0xff] %v4946_v6  ;;  %v4948_v15 = vpop.f32.mrf.mxu1  ;;  %v2213_v50 = vadd.f32 %v4853_v28, %v1914_v4  ;;  %v5020_v5 = vadd.f32 %v4881_v25, %v1924_v37  ;;  %v5294_v32 = vld [vmem:[#allocation22_spill] sm:$0xff] }
 0x1b4   : > { %5286 = vst [vmem:[#allocation41_spill] sm:$0xff] %v4948_v15  ;;  %v4953_v63 = vpop.f32.mrf.mxu0  ;;  %v2208_v15 = vadd.f32 %v4839_v58, %v1909_v48  ;;  %v1920_v48 = vadd.f32 %v4867_v8, %v4772_v57  ;;  %v1921_v58 = vadd.f32 %v4879_v18, %v4781_v14  ;;  %v1922_v57 = vadd.f32 %v4887_v20, %v4787_v61 }
 0x1b5   : > { %v4956_v10 = vpop.f32.mrf.mxu1  ;;  %v1927_v14 = vadd.f32 %v4891_v2, %v4790_v26  ;;  %v5001_v61 = vadd.f32 %v4861_v39, %v1917_v51  ;;  %v5012_v26 = vadd.f32 %v4873_v53, %v1923_v9  ;;  %v5031_v3 = vadd.f32 %v5289_v23, %v1925_v1 }
 0x1b6   : > { %v3947_v43 = vpop.f32.mrf.mxu0  ;;  %v5004_v47 = vadd.f32 %v4865_v54, %v1920_v48  ;;  %v5017_v28 = vadd.f32 %v4877_v29, %v1921_v58  ;;  %v5023_v45 = vadd.f32 %v5287_v55, %v1922_v57  ;;  %v5288_v54 = vld [vmem:[#allocation16_spill] sm:$0xff]  ;;  %v5295_v58 = vld [vmem:[#allocation19_spill] sm:$0xff] }
 0x1b7   : > { %v3913_v6 = vpop.f32.mrf.mxu1  ;;  %v5028_v8 = vadd.f32 %v5288_v54, %v1927_v14  ;;  %v5291_v29 = vld [vmem:[#allocation20_spill] sm:$0xff] }
 0x1b8   : > { %v2508_v56 = vadd.f32 %v3913_v6, %v2210_v42  ;;  %v2677_v7 = vpop.f32.mrf.mxu0  ;;  %v1926_v18 = vadd.f32 %v5291_v29, %v5290_v24 }
 0x1b9   : > { %v2379_v31 = vpop.f32.mrf.mxu1 }
 0x1ba   : > { %v2806_v49 = vadd.f32 %v3947_v43, %v2508_v56  ;;  %v2506_v6 = vadd.f32 %v2379_v31, %v2208_v15  ;;  %v3948_v36 = vpop.f32.mrf.mxu0  ;;  %v5292_v43 = vld [vmem:[#allocation18_spill] sm:$0xff] }
 0x1bb   : > { %v3914_v41 = vpop.f32.mrf.mxu1  ;;  %v5036_v59 = vadd.f32 %v5292_v43, %v1928_v11 }
 0x1bc   : > { %2838 = vst.msk [vmem:[%s4974_s18 + $0x10] sm:$0xff] %vm323_vm0, %v2806_v49  ;;  %v2804_v15 = vadd.f32 %v2677_v7, %v2506_v6  ;;  %v2509_v12 = vadd.f32 %v3914_v41, %v2211_v33  ;;  %v2680_v35 = vpop.f32.mrf.mxu0  ;;  %v2941_v25 = vmul.f32 %v2806_v49, %v2806_v49  ;;  %v2871_v62 = vsel %vm323_vm0, %v2806_v49, 0.0 }
 0x1bd   : > { %v2382_v19 = vpop.f32.mrf.mxu1  ;;  %v5050_v41 = vadd.f32 %v5295_v58, %v1926_v18 }
 0x1be   : > { %2836 = vst.msk [vmem:[%s4974_s18] sm:$0xff] %vm323_vm0, %v2804_v15  ;;  %v2807_v34 = vadd.f32 %v3948_v36, %v2509_v12  ;;  %v3951_v38 = vpop.f32.mrf.mxu0  ;;  %v2507_v60 = vadd.f32 %v2382_v19, %v2209_v46  ;;  %v2939_v40 = vmul.f32 %v2804_v15, %v2804_v15  ;;  %v2868_v33 = vsel %vm323_vm0, %v2804_v15, 0.0 }
 0x1bf   : > { %v3917_v2 = vpop.f32.mrf.mxu1  ;;  %v2974_v37 = vsel %vm323_vm0, %v2941_v25, 0.0 }
 0x1c0   : > { %2839 = vst.msk [vmem:[%s4974_s18 + $0x18] sm:$0xff] %vm323_vm0, %v2807_v34  ;;  %v2512_v39 = vadd.f32 %v3917_v2, %v2214_v16  ;;  %v2693_v27 = vpop.f32.mrf.mxu0  ;;  %v2805_v22 = vadd.f32 %v2680_v35, %v2507_v60  ;;  %v5293_v16 = vld [vmem:[#allocation3_spill] sm:$0xff]  ;;  %v2971_v6 = vsel %vm323_vm0, %v2939_v40, 0.0  ;;  %v2942_v36 = vmul.f32 %v2807_v34, %v2807_v34 }
 0x1c1   : > { %v2395_v53 = vpop.f32.mrf.mxu1  ;;  %v1931_v4 = vadd.f32 %v5294_v32, %v5293_v16  ;;  %v2873_v12 = vsel %vm323_vm0, %v2807_v34, 0.0 }
 0x1c2   : > { %v2810_v44 = vadd.f32 %v3951_v38, %v2512_v39  ;;  %v2510_v42 = vadd.f32 %v2395_v53, %v2212_v52  ;;  %v3952_v20 = vpop.f32.mrf.mxu0  ;;  %2837 = vst.msk [vmem:[%s4974_s18 + $0x8] sm:$0xff] %vm323_vm0, %v2805_v22  ;;  %v2869_v46 = vsel %vm323_vm0, %v2805_v22, 0.0  ;;  %v2940_v56 = vmul.f32 %v2805_v22, %v2805_v22  ;;  %v5296_v38 = vld [vmem:[#allocation4_spill] sm:$0xff] }
 0x1c3   : > { %v3918_v7 = vpop.f32.mrf.mxu1  ;;  %v2870_v31 = vadd.f32 %v2869_v46, %v2868_v33  ;;  %v2976_v23 = vsel %vm323_vm0, %v2942_v36, 0.0  ;;  %v5299_v33 = vld [vmem:[#allocation23_spill] sm:$0xff] }
 0x1c4   : > { %2842 = vst.msk [vmem:[%s4974_s18 + $0x30] sm:$0xff] %vm323_vm0, %v2810_v44  ;;  %v2808_v51 = vadd.f32 %v2693_v27, %v2510_v42  ;;  %v2696_v48 = vpop.f32.mrf.mxu0  ;;  %v2972_v52 = vsel %vm323_vm0, %v2940_v56, 0.0  ;;  %v2513_v21 = vadd.f32 %v3918_v7, %v2215_v13  ;;  %v5297_v13 = vld [vmem:[#allocation24_spill] sm:$0xff]  ;;  %v5298_v27 = vld [vmem:[#allocation21_spill] sm:$0xff]  ;;  %v2879_v56 = vsel %vm323_vm0, %v2810_v44, 0.0 }
 0x1c5   : > { %v2398_v9 = vpop.f32.mrf.mxu1  ;;  %v2872_v57 = vadd.f32 %v2871_v62, %v2870_v31  ;;  %v2973_v15 = vadd.f32 %v2972_v52, %v2971_v6  ;;  %v1929_v11 = vadd.f32 %v5297_v13, %v5296_v38  ;;  %v5059_v54 = vadd.f32 %v5298_v27, %v1931_v4  ;;  %v5301_v6 = vld [vmem:[#allocation26_spill] sm:$0xff] }
 0x1c6   : > { %2840 = vst.msk [vmem:[%s4974_s18 + $0x20] sm:$0xff] %vm323_vm0, %v2808_v51  ;;  %v3955_v49 = vpop.f32.mrf.mxu0  ;;  %v2943_v35 = vmul.f32 %v2808_v51, %v2808_v51  ;;  %v2811_v14 = vadd.f32 %v3952_v20, %v2513_v21  ;;  %v2511_v1 = vadd.f32 %v2398_v9, %v2213_v50  ;;  %v2875_v40 = vsel %vm323_vm0, %v2808_v51, 0.0  ;;  %v5302_v38 = vld [vmem:[#allocation6_spill] sm:$0xff] }
 0x1c7   : > { %v3921_v19 = vpop.f32.mrf.mxu1  ;;  %v2975_v60 = vadd.f32 %v2974_v37, %v2973_v15  ;;  %v2874_v2 = vadd.f32 %v2873_v12, %v2872_v57  ;;  %v5071_v46 = vadd.f32 %v5299_v33, %v1929_v11  ;;  %v5304_v11 = vld [vmem:[#allocation7_spill] sm:$0xff]  ;;  %v5306_v33 = vld [vmem:[#allocation25_spill] sm:$0xff] }
 0x1c8   : > { %v2516_v55 = vadd.f32 %v3921_v19, %v2218_v17  ;;  %v2709_v39 = vpop.f32.mrf.mxu0  ;;  %2843 = vst.msk [vmem:[%s4974_s18 + $0x38] sm:$0xff] %vm323_vm0, %v2811_v14  ;;  %v2809_v34 = vadd.f32 %v2696_v48, %v2511_v1  ;;  %v2945_v17 = vmul.f32 %v2810_v44, %v2810_v44  ;;  %v2978_v25 = vsel %vm323_vm0, %v2943_v35, 0.0  ;;  %v5300_v48 = vld [vmem:[#allocation5_spill] sm:$0xff] }
 0x1c9   : > { %v2411_v50 = vpop.f32.mrf.mxu1  ;;  %v2876_v22 = vadd.f32 %v2875_v40, %v2874_v2  ;;  %v2977_v53 = vadd.f32 %v2976_v23, %v2975_v60  ;;  %v2946_v32 = vmul.f32 %v2811_v14, %v2811_v14  ;;  %v1932_v36 = vadd.f32 %v5301_v6, %v5300_v48  ;;  %v5305_v60 = vld [vmem:[#allocation30_spill] sm:$0xff] }
 0x1ca   : > { %v2814_v24 = vadd.f32 %v3955_v49, %v2516_v55  ;;  %v2514_v29 = vadd.f32 %v2411_v50, %v5001_v61  ;;  %v3956_v18 = vpop.f32.mrf.mxu0  ;;  %2841 = vst.msk [vmem:[%s4974_s18 + $0x28] sm:$0xff] %vm323_vm0, %v2809_v34  ;;  %v2877_v42 = vsel %vm323_vm0, %v2809_v34, 0.0  ;;  %v2944_v20 = vmul.f32 %v2809_v34, %v2809_v34 }
 0x1cb   : > { %v3922_v43 = vpop.f32.mrf.mxu1  ;;  %v2979_v7 = vadd.f32 %v2978_v25, %v2977_v53  ;;  %v2878_v16 = vadd.f32 %v2877_v42, %v2876_v22  ;;  %v2982_v58 = vsel %vm323_vm0, %v2945_v17, 0.0  ;;  %v2881_v37 = vsel %vm323_vm0, %v2811_v14, 0.0 }
 0x1cc   : > { %2846 = vst.msk [vmem:[%s4974_s18 + $0x50] sm:$0xff] %vm323_vm0, %v2814_v24  ;;  %v2712_v61 = vpop.f32.mrf.mxu0  ;;  %v2980_v4 = vsel %vm323_vm0, %v2944_v20, 0.0  ;;  %v2812_v62 = vadd.f32 %v2709_v39, %v2514_v29  ;;  %v2517_v31 = vadd.f32 %v3922_v43, %v5004_v47  ;;  %v1935_v2 = vadd.f32 %v5305_v60, %v5304_v11 }
 0x1cd   : > { %v2414_v51 = vpop.f32.mrf.mxu1  ;;  %v2880_v52 = vadd.f32 %v2879_v56, %v2878_v16  ;;  %v2981_v21 = vadd.f32 %v2980_v4, %v2979_v7  ;;  %v2984_v14 = vsel %vm323_vm0, %v2946_v32, 0.0  ;;  %v2949_v50 = vmul.f32 %v2814_v24, %v2814_v24 }
 0x1ce   : > { %v2515_v44 = vadd.f32 %v2414_v51, %v5009_v30  ;;  %v3959_v9 = vpop.f32.mrf.mxu0  ;;  %2844 = vst.msk [vmem:[%s4974_s18 + $0x40] sm:$0xff] %vm323_vm0, %v2812_v62  ;;  %v2947_v57 = vmul.f32 %v2812_v62, %v2812_v62  ;;  %v2815_v15 = vadd.f32 %v3956_v18, %v2517_v31  ;;  %v5303_v30 = vld [vmem:[#allocation28_spill] sm:$0xff]  ;;  %v2883_v55 = vsel %vm323_vm0, %v2812_v62, 0.0 }
 0x1cf   : > { %v3925_v47 = vpop.f32.mrf.mxu1  ;;  %v2983_v49 = vadd.f32 %v2982_v58, %v2981_v21  ;;  %v2882_v12 = vadd.f32 %v2881_v37, %v2880_v52  ;;  %v1930_v13 = vadd.f32 %v5303_v30, %v5302_v38  ;;  %v5102_v56 = vadd.f32 %v5306_v33, %v1932_v36  ;;  %v5308_v21 = vld [vmem:[#allocation29_spill] sm:$0xff]  ;;  %v5310_v58 = vld [vmem:[#allocation32_spill] sm:$0xff] }
 0x1d0   : > { %v2813_v35 = vadd.f32 %v2712_v61, %v2515_v44  ;;  %v2520_v1 = vadd.f32 %v3925_v47, %v5012_v26  ;;  %v2725_v19 = vpop.f32.mrf.mxu0  ;;  %2847 = vst.msk [vmem:[%s4974_s18 + $0x58] sm:$0xff] %vm323_vm0, %v2815_v15  ;;  %v2986_v22 = vsel %vm323_vm0, %v2947_v57, 0.0  ;;  %v2887_v7 = vsel %vm323_vm0, %v2814_v24, 0.0 }
 0x1d1   : > { %v2427_v39 = vpop.f32.mrf.mxu1  ;;  %v2884_v27 = vadd.f32 %v2883_v55, %v2882_v12  ;;  %v2985_v23 = vadd.f32 %v2984_v14, %v2983_v49  ;;  %v2950_v16 = vmul.f32 %v2815_v15, %v2815_v15  ;;  %v2990_v6 = vsel %vm323_vm0, %v2949_v50, 0.0 }
 0x1d2   : > { %2845 = vst.msk [vmem:[%s4974_s18 + $0x48] sm:$0xff] %vm323_vm0, %v2813_v35  ;;  %v2885_v26 = vsel %vm323_vm0, %v2813_v35, 0.0  ;;  %v2948_v40 = vmul.f32 %v2813_v35, %v2813_v35  ;;  %v3960_v34 = vpop.f32.mrf.mxu0  ;;  %v2818_v53 = vadd.f32 %v3959_v9, %v2520_v1  ;;  %v2518_v29 = vadd.f32 %v2427_v39, %v5017_v28  ;;  %v5309_v9 = vld [vmem:[#allocation8_spill] sm:$0xff] }
 0x1d3   : > { %v3926_v18 = vpop.f32.mrf.mxu1  ;;  %v2987_v17 = vadd.f32 %v2986_v22, %v2985_v23  ;;  %v2886_v25 = vadd.f32 %v2885_v26, %v2884_v27  ;;  %v2889_v36 = vsel %vm323_vm0, %v2815_v15, 0.0  ;;  %v5116_v44 = vadd.f32 %v5308_v21, %v1935_v2 }
 0x1d4   : > { %v2988_v42 = vsel %vm323_vm0, %v2948_v40, 0.0  ;;  %v2521_v20 = vadd.f32 %v3926_v18, %v5020_v5  ;;  %v2728_v43 = vpop.f32.mrf.mxu0  ;;  %2850 = vst.msk [vmem:[%s4974_s18 + $0x70] sm:$0xff] %vm323_vm0, %v2818_v53  ;;  %v2816_v61 = vadd.f32 %v2725_v19, %v2518_v29  ;;  %v5307_v5 = vld [vmem:[#allocation27_spill] sm:$0xff]  ;;  %v1933_v37 = vadd.f32 %v5310_v58, %v5309_v9 }
 0x1d5   : > { %v2430_v32 = vpop.f32.mrf.mxu1  ;;  %v2888_v28 = vadd.f32 %v2887_v7, %v2886_v25  ;;  %v2989_v4 = vadd.f32 %v2988_v42, %v2987_v17  ;;  %v5109_v48 = vadd.f32 %v5307_v5, %v1930_v13  ;;  %v2992_v49 = vsel %vm323_vm0, %v2950_v16, 0.0  ;;  %v5313_v25 = vld [vmem:[#allocation31_spill] sm:$0xff] }
 0x1d6   : > { %v2819_v62 = vadd.f32 %v3960_v34, %v2521_v20  ;;  %v2519_v31 = vadd.f32 %v2430_v32, %v5023_v45  ;;  %v3963_v51 = vpop.f32.mrf.mxu0  ;;  %2848 = vst.msk [vmem:[%s4974_s18 + $0x60] sm:$0xff] %vm323_vm0, %v2816_v61  ;;  %v2951_v24 = vmul.f32 %v2816_v61, %v2816_v61  ;;  %v2891_v15 = vsel %vm323_vm0, %v2816_v61, 0.0  ;;  %v5311_v34 = vld [vmem:[#allocation9_spill] sm:$0xff] }
 0x1d7   : > { %v3929_v52 = vpop.f32.mrf.mxu1  ;;  %v2991_v45 = vadd.f32 %v2990_v6, %v2989_v4  ;;  %v2890_v57 = vadd.f32 %v2889_v36, %v2888_v28  ;;  %v2953_v19 = vmul.f32 %v2818_v53, %v2818_v53  ;;  %v2895_v22 = vsel %vm323_vm0, %v2818_v53, 0.0  ;;  %v5314_v28 = vld [vmem:[#allocation10_spill] sm:$0xff]  ;;  %v5315_v4 = vld [vmem:[#allocation36_spill] sm:$0xff] }
 0x1d8   : > { %2851 = vst.msk [vmem:[%s4974_s18 + $0x78] sm:$0xff] %vm323_vm0, %v2819_v62  ;;  %v2741_v47 = vpop.f32.mrf.mxu0  ;;  %v2817_v12 = vadd.f32 %v2728_v43, %v2519_v31  ;;  %v2524_v35 = vadd.f32 %v3929_v52, %v5028_v8  ;;  %v2994_v60 = vsel %vm323_vm0, %v2951_v24, 0.0  ;;  %v2954_v29 = vmul.f32 %v2819_v62, %v2819_v62  ;;  %v5316_v24 = vld [vmem:[#allocation33_spill] sm:$0xff] }
 0x1d9   : > { %v2443_v1 = vpop.f32.mrf.mxu1  ;;  %v2892_v38 = vadd.f32 %v2891_v15, %v2890_v57  ;;  %v2993_v30 = vadd.f32 %v2992_v49, %v2991_v45  ;;  %v5138_v42 = vadd.f32 %v5313_v25, %v1933_v37  ;;  %v2998_v20 = vsel %vm323_vm0, %v2953_v19, 0.0 }
 0x1da   : > { %v2522_v13 = vadd.f32 %v2443_v1, %v5031_v3  ;;  %v3964_v11 = vpop.f32.mrf.mxu0  ;;  %2849 = vst.msk [vmem:[%s4974_s18 + $0x68] sm:$0xff] %vm323_vm0, %v2817_v12  ;;  %v2893_v2 = vsel %vm323_vm0, %v2817_v12, 0.0  ;;  %v2952_v14 = vmul.f32 %v2817_v12, %v2817_v12  ;;  %v2822_v55 = vadd.f32 %v3963_v51, %v2524_v35  ;;  %v5312_v3 = vld [vmem:[#allocation34_spill] sm:$0xff]  ;;  %v5317_v1 = vld [vmem:[#allocation35_spill] sm:$0xff] }
 0x1db   : > { %v3930_v39 = vpop.f32.mrf.mxu1  ;;  %v2995_v27 = vadd.f32 %v2994_v60, %v2993_v30  ;;  %v2894_v8 = vadd.f32 %v2893_v2, %v2892_v38  ;;  %v1936_v50 = vadd.f32 %v5312_v3, %v5311_v34  ;;  %v2897_v7 = vsel %vm323_vm0, %v2819_v62, 0.0 }
 0x1dc   : > { %v2820_v23 = vadd.f32 %v2741_v47, %v2522_v13  ;;  %v2525_v26 = vadd.f32 %v3930_v39, %v5036_v59  ;;  %v2744_v40 = vpop.f32.mrf.mxu0  ;;  %v2996_v18 = vsel %vm323_vm0, %v2952_v14, 0.0  ;;  %2854 = vst.msk [vmem:[%s4974_s18 + $0x90] sm:$0xff] %vm323_vm0, %v2822_v55  ;;  %v1934_v31 = vadd.f32 %v5315_v4, %v5314_v28 }
 0x1dd   : > { %v2446_v17 = vpop.f32.mrf.mxu1  ;;  %v2896_v43 = vadd.f32 %v2895_v22, %v2894_v8  ;;  %v2997_v33 = vadd.f32 %v2996_v18, %v2995_v27  ;;  %v5149_v52 = vadd.f32 %v5316_v24, %v1936_v50  ;;  %v3000_v21 = vsel %vm323_vm0, %v2954_v29, 0.0  ;;  %v5318_v27 = vld [vmem:[#allocation11_spill] sm:$0xff]  ;;  %v5319_v8 = vld [vmem:[#allocation38_spill] sm:$0xff] }
 0x1de   : > { %2852 = vst.msk [vmem:[%s4974_s18 + $0x80] sm:$0xff] %vm323_vm0, %v2820_v23  ;;  %v3967_v59 = vpop.f32.mrf.mxu0  ;;  %v2955_v53 = vmul.f32 %v2820_v23, %v2820_v23  ;;  %v2823_v16 = vadd.f32 %v3964_v11, %v2525_v26  ;;  %v2523_v61 = vadd.f32 %v2446_v17, %v5050_v41  ;;  %v2899_v62 = vsel %vm323_vm0, %v2820_v23, 0.0 }
 0x1df   : > { %v3933_v32 = vpop.f32.mrf.mxu1  ;;  %v2999_v51 = vadd.f32 %v2998_v20, %v2997_v33  ;;  %v2898_v5 = vadd.f32 %v2897_v7, %v2896_v43  ;;  %v2233_v19 = vadd.f32 %v5317_v1, %v1934_v31  ;;  %v2903_v38 = vsel %vm323_vm0, %v2822_v55, 0.0  ;;  %v5320_v33 = vld [vmem:[#allocation12_spill] sm:$0xff]  ;;  %v5322_v7 = vld [vmem:[#allocation41_spill] sm:$0xff] }
 0x1e0   : > { %v2528_v6 = vadd.f32 %v3933_v32, %v5059_v54  ;;  %v2757_v36 = vpop.f32.mrf.mxu0  ;;  %2855 = vst.msk [vmem:[%s4974_s18 + $0x98] sm:$0xff] %vm323_vm0, %v2823_v16  ;;  %v2821_v41 = vadd.f32 %v2744_v40, %v2523_v61  ;;  %v2957_v54 = vmul.f32 %v2822_v55, %v2822_v55  ;;  %v3002_v49 = vsel %vm323_vm0, %v2955_v53, 0.0 }
 0x1e1   : > { %v2459_v9 = vpop.f32.mrf.mxu1  ;;  %v2900_v58 = vadd.f32 %v2899_v62, %v2898_v5  ;;  %v3001_v37 = vadd.f32 %v3000_v21, %v2999_v51  ;;  %v2958_v11 = vmul.f32 %v2823_v16, %v2823_v16  ;;  %v1939_v23 = vadd.f32 %v5319_v8, %v5318_v27 }
 0x1e2   : > { %v2826_v45 = vadd.f32 %v3967_v59, %v2528_v6  ;;  %v2526_v57 = vadd.f32 %v2459_v9, %v5071_v46  ;;  %v3968_v47 = vpop.f32.mrf.mxu0  ;;  %2853 = vst.msk [vmem:[%s4974_s18 + $0x88] sm:$0xff] %vm323_vm0, %v2821_v41  ;;  %v2901_v15 = vsel %vm323_vm0, %v2821_v41, 0.0  ;;  %v2956_v12 = vmul.f32 %v2821_v41, %v2821_v41  ;;  %v5321_v59 = vld [vmem:[#allocation13_spill] sm:$0xff] }
 0x1e3   : > { %v3934_v35 = vpop.f32.mrf.mxu1  ;;  %v3003_v30 = vadd.f32 %v3002_v49, %v3001_v37  ;;  %v2902_v13 = vadd.f32 %v2901_v15, %v2900_v58  ;;  %v3006_v3 = vsel %vm323_vm0, %v2957_v54, 0.0  ;;  %v2905_v50 = vsel %vm323_vm0, %v2823_v16, 0.0  ;;  %v5323_v37 = vld [vmem:[#allocation37_spill] sm:$0xff] }
 0x1e4   : > { %2858 = vst.msk [vmem:[%s4974_s18 + $0xb0] sm:$0xff] %vm323_vm0, %v2826_v45  ;;  %v2760_v46 = vpop.f32.mrf.mxu0  ;;  %v3004_v60 = vsel %vm323_vm0, %v2956_v12, 0.0  ;;  %v2824_v2 = vadd.f32 %v2757_v36, %v2526_v57  ;;  %v2529_v14 = vadd.f32 %v3934_v35, %v5102_v56  ;;  %v1940_v53 = vadd.f32 %v5322_v7, %v5321_v59 }
 0x1e5   : > { %v2462_v39 = vpop.f32.mrf.mxu1  ;;  %v2904_v26 = vadd.f32 %v2903_v38, %v2902_v13  ;;  %v3005_v40 = vadd.f32 %v3004_v60, %v3003_v30  ;;  %v3008_v16 = vsel %vm323_vm0, %v2958_v11, 0.0  ;;  %v2238_v57 = vadd.f32 %v5323_v37, %v1939_v23  ;;  %v5324_v30 = vld [vmem:[#allocation39_spill] sm:$0xff]  ;;  %v5325_v60 = vld [vmem:[#allocation40_spill] sm:$0xff] }
 0x1e6   : > { %v2527_v55 = vadd.f32 %v2462_v39, %v5109_v48  ;;  %v3971_v34 = vpop.f32.mrf.mxu0  ;;  %2856 = vst.msk [vmem:[%s4974_s18 + $0xa0] sm:$0xff] %vm323_vm0, %v2824_v2  ;;  %v2959_v22 = vmul.f32 %v2824_v2, %v2824_v2  ;;  %v2827_v29 = vadd.f32 %v3968_v47, %v2529_v14  ;;  %v1937_v48 = vadd.f32 %v4943_v0, %v5320_v33  ;;  %v5326_v14 = vld [vmem:[#allocation14_spill] sm:$0xff] }
 0x1e7   : > { %v3937_v56 = vpop.f32.mrf.mxu1  ;;  %v3007_v18 = vadd.f32 %v3006_v3, %v3005_v40  ;;  %v2906_v17 = vadd.f32 %v2905_v50, %v2904_v26  ;;  %v2907_v61 = vsel %vm323_vm0, %v2824_v2, 0.0  ;;  %v2961_v0 = vmul.f32 %v2826_v45, %v2826_v45 }
 0x1e8   : > { %v2825_v25 = vadd.f32 %v2760_v46, %v2527_v55  ;;  %v2532_v20 = vadd.f32 %v3937_v56, %v5116_v44  ;;  %v2773_v43 = vpop.f32.mrf.mxu0  ;;  %2859 = vst.msk [vmem:[%s4974_s18 + $0xb8] sm:$0xff] %vm323_vm0, %v2827_v29  ;;  %v3010_v5 = vsel %vm323_vm0, %v2959_v22, 0.0  ;;  %v2911_v47 = vsel %vm323_vm0, %v2826_v45, 0.0 }
 0x1e9   : > { %v2475_v32 = vpop.f32.mrf.mxu1  ;;  %v2908_v28 = vadd.f32 %v2907_v61, %v2906_v17  ;;  %v3009_v4 = vadd.f32 %v3008_v16, %v3007_v18  ;;  %v2962_v54 = vmul.f32 %v2827_v29, %v2827_v29  ;;  %v2236_v13 = vadd.f32 %v5324_v30, %v1937_v48 }
 0x1ea   : > { %2857 = vst.msk [vmem:[%s4974_s18 + $0xa8] sm:$0xff] %vm323_vm0, %v2825_v25  ;;  %v2909_v44 = vsel %vm323_vm0, %v2825_v25, 0.0  ;;  %v2960_v31 = vmul.f32 %v2825_v25, %v2825_v25  ;;  %v3972_v51 = vpop.f32.mrf.mxu0  ;;  %v2830_v6 = vadd.f32 %v3971_v34, %v2532_v20  ;;  %v2530_v36 = vadd.f32 %v2475_v32, %v5138_v42 }
 0x1eb   : > { %v3938_v24 = vpop.f32.mrf.mxu1  ;;  %v3011_v21 = vadd.f32 %v3010_v5, %v3009_v4  ;;  %v2910_v62 = vadd.f32 %v2909_v44, %v2908_v28  ;;  %v2913_v46 = vsel %vm323_vm0, %v2827_v29, 0.0  ;;  %v2239_v2 = vadd.f32 %v5325_v60, %v1940_v53 }
 0x1ec   : > { %v3012_v41 = vsel %vm323_vm0, %v2960_v31, 0.0  ;;  %v2533_v9 = vadd.f32 %v3938_v24, %v5149_v52  ;;  %v2776_v58 = vpop.f32.mrf.mxu0  ;;  %2862 = vst.msk [vmem:[%s4974_s18 + $0xd0] sm:$0xff] %vm323_vm0, %v2830_v6  ;;  %v2828_v49 = vadd.f32 %v2773_v43, %v2530_v36  ;;  %v3014_v52 = vsel %vm323_vm0, %v2961_v0, 0.0 }
 0x1ed   : > { %v2478_v15 = vpop.f32.mrf.mxu1  ;;  %v2912_v42 = vadd.f32 %v2911_v47, %v2910_v62  ;;  %v3013_v12 = vadd.f32 %v3012_v41, %v3011_v21  ;;  %v1938_v39 = vadd.f32 %v4956_v10, %v5326_v14  ;;  %v3016_v23 = vsel %vm323_vm0, %v2962_v54, 0.0 }
 0x1ee   : > { %v2831_v35 = vadd.f32 %v3972_v51, %v2533_v9  ;;  %v2531_v1 = vadd.f32 %v2478_v15, %v2233_v19  ;;  %v3975_v38 = vpop.f32.mrf.mxu0  ;;  %2860 = vst.msk [vmem:[%s4974_s18 + $0xc0] sm:$0xff] %vm323_vm0, %v2828_v49  ;;  %v2963_v45 = vmul.f32 %v2828_v49, %v2828_v49  ;;  %v2915_v26 = vsel %vm323_vm0, %v2828_v49, 0.0 }
 0x1ef   : > { %v3941_v11 = vpop.f32.mrf.mxu1  ;;  %v3015_v27 = vadd.f32 %v3014_v52, %v3013_v12  ;;  %v2914_v8 = vadd.f32 %v2913_v46, %v2912_v42  ;;  %v2965_v3 = vmul.f32 %v2830_v6, %v2830_v6  ;;  %v2237_v7 = vadd.f32 %v4953_v63, %v1938_v39 }
 0x1f0   : > { %2863 = vst.msk [vmem:[%s4974_s18 + $0xd8] sm:$0xff] %vm323_vm0, %v2831_v35  ;;  %v2789_v19 = vpop.f32.mrf.mxu0  ;;  %v2829_v40 = vadd.f32 %v2776_v58, %v2531_v1  ;;  %v2536_v55 = vadd.f32 %v3941_v11, %v2238_v57  ;;  %v3018_v56 = vsel %vm323_vm0, %v2963_v45, 0.0  ;;  %v2919_v53 = vsel %vm323_vm0, %v2830_v6, 0.0 }
 0x1f1   : > { %v2491_v34 = vpop.f32.mrf.mxu1  ;;  %v2916_v50 = vadd.f32 %v2915_v26, %v2914_v8  ;;  %v3017_v22 = vadd.f32 %v3016_v23, %v3015_v27  ;;  %v2966_v16 = vmul.f32 %v2831_v35, %v2831_v35  ;;  %v3022_v28 = vsel %vm323_vm0, %v2965_v3, 0.0 }
 0x1f2   : > { %v2534_v29 = vadd.f32 %v2491_v34, %v2236_v13  ;;  %2861 = vst.msk [vmem:[%s4974_s18 + $0xc8] sm:$0xff] %vm323_vm0, %v2829_v40  ;;  %v2917_v10 = vsel %vm323_vm0, %v2829_v40, 0.0  ;;  %v2964_v18 = vmul.f32 %v2829_v40, %v2829_v40  ;;  %v2834_v17 = vadd.f32 %v3975_v38, %v2536_v55  ;;  %v3976_v59 = vpop.f32.mrf.mxu0 }
 0x1f3   : > { %v3942_v25 = vpop.f32.mrf.mxu1  ;;  %v3019_v20 = vadd.f32 %v3018_v56, %v3017_v22  ;;  %v2918_v43 = vadd.f32 %v2917_v10, %v2916_v50  ;;  %v2921_v31 = vsel %vm323_vm0, %v2831_v35, 0.0  ;;  %v3024_v24 = vsel %vm323_vm0, %v2966_v16, 0.0 }
 0x1f4   : > { %v2832_v33 = vadd.f32 %v2789_v19, %v2534_v29  ;;  %v2537_v48 = vadd.f32 %v3942_v25, %v2239_v2  ;;  %v3020_v61 = vsel %vm323_vm0, %v2964_v18, 0.0  ;;  %2866 = vst.msk [vmem:[%s4974_s18 + $0xf0] sm:$0xff] %vm323_vm0, %v2834_v17  ;;  %v2792_v36 = vpop.f32.mrf.mxu0  ;;  %v2969_v58 = vmul.f32 %v2834_v17, %v2834_v17 }
 0x1f5   : > { %v2494_v32 = vpop.f32.mrf.mxu1  ;;  %v2920_v4 = vadd.f32 %v2919_v53, %v2918_v43  ;;  %v3021_v44 = vadd.f32 %v3020_v61, %v3019_v20  ;;  %v2927_v15 = vsel %vm323_vm0, %v2834_v17, 0.0 }
 0x1f6   : > { %2864 = vst.msk [vmem:[%s4974_s18 + $0xe0] sm:$0xff] %vm323_vm0, %v2832_v33  ;;  %v2967_v51 = vmul.f32 %v2832_v33, %v2832_v33  ;;  %v2835_v63 = vadd.f32 %v3976_v59, %v2537_v48  ;;  %v2535_v0 = vadd.f32 %v2494_v32, %v2237_v7  ;;  %v2923_v21 = vsel %vm323_vm0, %v2832_v33, 0.0 }
 0x1f7   : > { %v3023_v5 = vadd.f32 %v3022_v28, %v3021_v44  ;;  %v2922_v6 = vadd.f32 %v2921_v31, %v2920_v4  ;;  %v3030_v38 = vsel %vm323_vm0, %v2969_v58, 0.0 }
 0x1f8   : > { %2867 = vst.msk [vmem:[%s4974_s18 + $0xf8] sm:$0xff] %vm323_vm0, %v2835_v63  ;;  %v2833_v62 = vadd.f32 %v2792_v36, %v2535_v0  ;;  %v3026_v37 = vsel %vm323_vm0, %v2967_v51, 0.0  ;;  %v2970_v42 = vmul.f32 %v2835_v63, %v2835_v63  ;;  %v2929_v30 = vsel %vm323_vm0, %v2835_v63, 0.0 }
 0x1f9   : > { %v2924_v41 = vadd.f32 %v2923_v21, %v2922_v6  ;;  %v3025_v9 = vadd.f32 %v3024_v24, %v3023_v5 }
 0x1fa   : > { %2865 = vst.msk [vmem:[%s4974_s18 + $0xe8] sm:$0xff] %vm323_vm0, %v2833_v62  ;;  %v2925_v57 = vsel %vm323_vm0, %v2833_v62, 0.0  ;;  %v2968_v47 = vmul.f32 %v2833_v62, %v2833_v62  ;;  %v3032_v46 = vsel %vm323_vm0, %v2970_v42, 0.0 }
 0x1fb   : > { %v3027_v54 = vadd.f32 %v3026_v37, %v3025_v9  ;;  %v2926_v49 = vadd.f32 %v2925_v57, %v2924_v41 }
 0x1fc   : > { %v3028_v12 = vsel %vm323_vm0, %v2968_v47, 0.0 }
 0x1fd   : > { %v2928_v35 = vadd.f32 %v2927_v15, %v2926_v49  ;;  %v3029_v1 = vadd.f32 %v3028_v12, %v3027_v54 }
 0x1ff   : > { %v2930_v13 = vadd.f32 %v2929_v30, %v2928_v35  ;;  %v3031_v52 = vadd.f32 %v3030_v38, %v3029_v1 }
 0x201   : > { %v2931_v45 = vrot.slane %v2930_v13, 4  ;;  %v3033_v11 = vadd.f32 %v3032_v46, %v3031_v52 }
 0x203   : > { %v2932_v60 = vadd.f32 %v2931_v45, %v2930_v13  ;;  %v3034_v2 = vrot.slane %v3033_v11, 4 }
 0x205   : > { %v2933_v14 = vrot.slane %v2932_v60, 2  ;;  %v3035_v39 = vadd.f32 %v3034_v2, %v3033_v11 }
 0x207   : > { %v2934_v27 = vadd.f32 %v2933_v14, %v2932_v60  ;;  %v3036_v8 = vrot.slane %v3035_v39, 2 }
 0x209   : > { %v2935_v19 = vrot.slane %v2934_v27, 1  ;;  %v3037_v23 = vadd.f32 %v3036_v8, %v3035_v39 }
 0x20b   : > { %v2936_v26 = vadd.f32 %v2935_v19, %v2934_v27  ;;  %v3038_v40 = vrot.slane %v3037_v23, 1 }
 0x20d   : > { %2938 = vst.msk [vmem:[%s211_s21] sm:$0x1] %vm2937_vm1, %v2936_v26  ;;  %v3039_v55 = vadd.f32 %v3038_v40, %v3037_v23 }
 0x20f   : > { %3040 = vst.msk [vmem:[%s214_s24] sm:$0x1] %vm2937_vm1, %v3039_v55 }
 0x210 PF: > { %s15_s15 = sadd.s32 1, %s4003_s15  }
 0x211   : > { %p12_p4 = scmp.ge.s32.totalorder %s15_s15, 4  }
 0x213   :  { %14 = sbr.rel (!%p12_p4) target bundleno = 1 (0x1), region = 92 }

// kernel: fwd.7
= control target key start
LH: loop header
LB: loop body
LE: loop exit
PB: predicated region body
PF: predicated region fallthrough
CT: control target
= control target key end

     0   :  { %s4219_s27 = smov 0   ;;  %s5527_s0 = inlined_call_operand.vmem [shape: f32[2,16,16,16], index: 0, kind: input, shape index: {}]   ;;  %s5528_s1 = inlined_call_operand.vmem [shape: f32[2,1,16], index: 1, kind: input, shape index: {}]   ;;  %s5529_s2 = inlined_call_operand.vmem [shape: f32[2,1,16], index: 2, kind: input, shape index: {}]   ;;  %s5530_s3 = inlined_call_operand.vmem [shape: f32[1,16], index: 3, kind: input, shape index: {}]   ;;  %s5531_s4 = inlined_call_operand.vmem [shape: f32[1,16], index: 4, kind: input, shape index: {}]   ;;  %s5532_s5 = inlined_call_operand.vmem [shape: bf16[9,16,16], index: 5, kind: input, shape index: {}]   ;;  %s5533_s6 = inlined_call_operand.vmem [shape: f32[2,16,16,16], index: 6, kind: output, shape index: {0}]   ;;  %s5534_s7 = inlined_call_operand.vmem [shape: f32[2,1,16], index: 7, kind: output, shape index: {1}]   ;;  %s5535_s8 = inlined_call_operand.vmem [shape: f32[2,1,16], index: 8, kind: output, shape index: {2}]  }
   0x1 LB: > { %s3502_s28 = sadd.s32 4294967295, %s4171_s27   ;;  %p3506_p0 = scmp.ge.s32.totalorder %s4171_s27, 1  ;;  %s4171_s27 = sphi %s4219_s27, %s19_s27  }
   0x2   : > { %p267_p1 = scmp.lt.s32.totalorder %s4171_s27, 3 }
   0x4   : > { %p268_p2 = pnand %p3506_p0, %p267_p1 }
   0x6   : > { %271 = sbr.rel (%p268_p2) target bundleno = 568 (0x238), region = 44 }
   0xb   : > { %v4230_v0 = vld [vmem:[%s5532_s5 + $0x8] sm:$0xff]   ;;  %vm486_vm0 = vcmask 130048   ;;  %vm489_vm1 = vcmask 123904   ;;  %v324_v1 = vld [vmem:[%s5528_s1] sm:$0x1]  ;;  %vm326_vm2 = vcmask 122880   ;;  %v379_v22 = vlaneseq }
   0xc   : > { %3837 = vmatprep.subr.bf16.mxu0 %v4230_v0  ;;  %4143 = vmatprep.subr.bf16.mxu1 %v4230_v0  ;;  %v4173_v2 = vmov 0.0   ;;  %v325_v3 = vld [vmem:[%s5528_s1 + $0x1] sm:$0x1]  ;;  %v327_v4 = vsel %vm326_vm2, %v324_v1, 0.0  ;;  %v331_v5 = vld [vmem:[%s5529_s2] sm:$0x1] }
   0xd   : > { %487 = vst.msk [vmem:[#allocation2] sm:$0xff] %vm486_vm0, %v4173_v2  ;;  %488 = vst.msk [vmem:[#allocation2 + $0x8] sm:$0xff] %vm486_vm0, %v4173_v2  ;;  %3838 = vmatpush3.bf16.msra.mxu0 %v4230_v0  ;;  %4144 = vmatpush3.bf16.msra.mxu1 %v4230_v0  ;;  %v328_v6 = vsel %vm326_vm2, %v325_v3, 0.0  ;;  %v332_v7 = vld [vmem:[%s5529_s2 + $0x1] sm:$0x1]  ;;  %v333_v8 = vsel %vm326_vm2, %v331_v5, 0.0 }
   0xe   : > { %490 = vst.msk [vmem:[#allocation2 + $0x10] sm:$0x3] %vm489_vm1, %v4173_v2  ;;  %493 = vst.msk [vmem:[#allocation2 + $0x28] sm:$0x3] %vm489_vm1, %v4173_v2  ;;  %v4308_v9 = vld [vmem:[%s5532_s5] sm:$0xff]   ;;  %v329_v10 = vadd.f32 %v328_v6, %v327_v4  ;;  %v334_v11 = vsel %vm326_vm2, %v332_v7, 0.0 }
   0xf   : > { %491 = vst.msk [vmem:[#allocation2 + $0x18] sm:$0xff] %vm486_vm0, %v4173_v2  ;;  %492 = vst.msk [vmem:[#allocation2 + $0x20] sm:$0xff] %vm486_vm0, %v4173_v2  ;;  %v335_v12 = vadd.f32 %v334_v11, %v333_v8  ;;  %3871 = vmatprep.subr.bf16.mxu1 %v4308_v9  ;;  %v4315_v13 = vld [vmem:[%s5532_s5 + $0x10] sm:$0xff]   ;;  %p307_p3 = scmp.lt.s32.totalorder %s3502_s28, 1  ;;  %v380_v23 = vshrl.u32 %v379_v22, 7 }
  0x10   : > { %494 = vst.msk [vmem:[#allocation2 + $0x30] sm:$0xff] %vm486_vm0, %v4173_v2  ;;  %495 = vst.msk [vmem:[#allocation2 + $0x38] sm:$0xff] %vm486_vm0, %v4173_v2  ;;  %v330_v14 = vmul.f32 0.001953125, %v329_v10  ;;  %3905 = vmatprep.subr.bf16.mxu0 %v4315_v13  ;;  %v339_v24 = vld [vmem:[%s5530_s3] sm:$0x1] }
  0x11   : > { %496 = vst.msk [vmem:[#allocation2 + $0x40] sm:$0x3] %vm489_vm1, %v4173_v2  ;;  %499 = vst.msk [vmem:[#allocation2 + $0x58] sm:$0x3] %vm489_vm1, %v4173_v2  ;;  %v336_v15 = vmul.f32 0.001953125, %v335_v12  ;;  %s5621_s28 = smov (!%p307_p3, %s3502_s28), 1 }
  0x12   : > { %497 = vst.msk [vmem:[#allocation2 + $0x48] sm:$0xff] %vm486_vm0, %v4173_v2  ;;  %498 = vst.msk [vmem:[#allocation2 + $0x50] sm:$0xff] %vm486_vm0, %v4173_v2  ;;  %v337_v16 = vmul.f32 %v330_v14, %v330_v14  ;;  %s3682_s21 = sshll.u32 %s5621_s28, 8  ;;  %v381_v25 = vsub.s32 0, %v380_v23  ;;  %v343_v28 = vld [vmem:[%s5531_s4] sm:$0x1]  ;;  %s319_s26 = scalar_lea.vmem %s5534_s7, %s5621_s28 }
  0x13   : > { %500 = vst.msk [vmem:[#allocation2 + $0x60] sm:$0xff] %vm486_vm0, %v4173_v2  ;;  %501 = vst.msk [vmem:[#allocation2 + $0x68] sm:$0xff] %vm486_vm0, %v4173_v2  ;;  %s4331_s24 = scalar_lea.vmem %s5527_s0, %s3682_s21  ;;  %s322_s9 = scalar_lea.vmem %s5535_s8, %s5621_s28 }
  0x14   : > { %502 = vst.msk [vmem:[#allocation2 + $0x70] sm:$0x3] %vm489_vm1, %v4173_v2  ;;  %505 = vst.msk [vmem:[#allocation2 + $0x88] sm:$0x3] %vm489_vm1, %v4173_v2  ;;  %v625_v17 = vld [vmem:[#allocation2 + $0x1] sm:$0xff]  ;;  %v338_v20 = vsub.f32 %v336_v15, %v337_v16  ;;  %v360_v31 = vld [vmem:[%s4331_s24 + $0x70] sm:$0xff] }
  0x15   : > { %503 = vst.msk [vmem:[#allocation2 + $0x78] sm:$0xff] %vm486_vm0, %v4173_v2  ;;  %504 = vst.msk [vmem:[#allocation2 + $0x80] sm:$0xff] %vm486_vm0, %v4173_v2  ;;  %v626_v18 = vld [vmem:[#allocation2 + $0x9] sm:$0xff]  ;;  %v346_v29 = vld [vmem:[%s4331_s24] sm:$0xff] }
  0x16   : > { %506 = vst.msk [vmem:[#allocation2 + $0x90] sm:$0xff] %vm486_vm0, %v4173_v2  ;;  %507 = vst.msk [vmem:[#allocation2 + $0x98] sm:$0xff] %vm486_vm0, %v4173_v2  ;;  %v657_v19 = vpack.c.bf16 %v626_v18, %v625_v17  ;;  %v340_v21 = vadd.f32 1e-05, %v338_v20  ;;  %v347_v30 = vld [vmem:[%s4331_s24 + $0x8] sm:$0xff]  ;;  %v361_v32 = vld [vmem:[%s4331_s24 + $0x78] sm:$0xff] }
  0x17   : > { %508 = vst.msk [vmem:[#allocation2 + $0xa0] sm:$0x3] %vm489_vm1, %v4173_v2  ;;  %511 = vst.msk [vmem:[#allocation2 + $0xb8] sm:$0x3] %vm489_vm1, %v4173_v2  ;;  %v362_v33 = vld [vmem:[%s4331_s24 + $0x80] sm:$0xff]  ;;  %v363_v36 = vld [vmem:[%s4331_s24 + $0x88] sm:$0xff] }
  0x18   : > { %509 = vst.msk [vmem:[#allocation2 + $0xa8] sm:$0xff] %vm486_vm0, %v4173_v2  ;;  %510 = vst.msk [vmem:[#allocation2 + $0xb0] sm:$0xff] %vm486_vm0, %v4173_v2  ;;  %3839 = vmatprep.mubr.msk.bf16.mxu0 %vm486_vm0, %v657_v19  ;;  %4163 = vrsqrt.f32 %v340_v21  ;;  %v348_v37 = vld [vmem:[%s4331_s24 + $0x10] sm:$0xff]  ;;  %v349_v38 = vld [vmem:[%s4331_s24 + $0x18] sm:$0xff] }
  0x19   : > { %512 = vst.msk [vmem:[#allocation2 + $0xc0] sm:$0xff] %vm486_vm0, %v4173_v2  ;;  %513 = vst.msk [vmem:[#allocation2 + $0xc8] sm:$0xff] %vm486_vm0, %v4173_v2  ;;  %v350_v39 = vld [vmem:[%s4331_s24 + $0x20] sm:$0xff]  ;;  %v351_v40 = vld [vmem:[%s4331_s24 + $0x28] sm:$0xff] }
  0x1a   : > { %514 = vst.msk [vmem:[#allocation2 + $0xd0] sm:$0x3] %vm489_vm1, %v4173_v2  ;;  %517 = vst.msk [vmem:[#allocation2 + $0xe8] sm:$0x3] %vm489_vm1, %v4173_v2  ;;  %v364_v41 = vld [vmem:[%s4331_s24 + $0x90] sm:$0xff]  ;;  %v365_v46 = vld [vmem:[%s4331_s24 + $0x98] sm:$0xff] }
  0x1b   : > { %515 = vst.msk [vmem:[#allocation2 + $0xd8] sm:$0xff] %vm486_vm0, %v4173_v2  ;;  %516 = vst.msk [vmem:[#allocation2 + $0xe0] sm:$0xff] %vm486_vm0, %v4173_v2  ;;  %v366_v47 = vld [vmem:[%s4331_s24 + $0xa0] sm:$0xff]  ;;  %v367_v48 = vld [vmem:[%s4331_s24 + $0xa8] sm:$0xff] }
  0x1c   : > { %518 = vst.msk [vmem:[#allocation2 + $0xf0] sm:$0xff] %vm486_vm0, %v4173_v2  ;;  %519 = vst.msk [vmem:[#allocation2 + $0xf8] sm:$0xff] %vm486_vm0, %v4173_v2  ;;  %v352_v10 = vld [vmem:[%s4331_s24 + $0x30] sm:$0xff]  ;;  %v353_v11 = vld [vmem:[%s4331_s24 + $0x38] sm:$0xff] }
  0x1d   : > { %520 = vst.msk [vmem:[#allocation2 + $0x100] sm:$0x3] %vm489_vm1, %v4173_v2  ;;  %523 = vst.msk [vmem:[#allocation2 + $0x118] sm:$0x3] %vm489_vm1, %v4173_v2  ;;  %v354_v21 = vld [vmem:[%s4331_s24 + $0x40] sm:$0xff] }
  0x1e   : > { %521 = vst.msk [vmem:[#allocation2 + $0x108] sm:$0xff] %vm486_vm0, %v4173_v2  ;;  %522 = vst.msk [vmem:[#allocation2 + $0x110] sm:$0xff] %vm486_vm0, %v4173_v2 }
  0x1f   : > { %524 = vst.msk [vmem:[#allocation2 + $0x120] sm:$0xff] %vm486_vm0, %v4173_v2  ;;  %525 = vst.msk [vmem:[#allocation2 + $0x128] sm:$0xff] %vm486_vm0, %v4173_v2 }
  0x20   : > { %526 = vst.msk [vmem:[#allocation2 + $0x130] sm:$0x3] %vm489_vm1, %v4173_v2  ;;  %529 = vst.msk [vmem:[#allocation2 + $0x148] sm:$0x3] %vm489_vm1, %v4173_v2 }
  0x21   : > { %527 = vst.msk [vmem:[#allocation2 + $0x138] sm:$0xff] %vm486_vm0, %v4173_v2  ;;  %528 = vst.msk [vmem:[#allocation2 + $0x140] sm:$0xff] %vm486_vm0, %v4173_v2 }
  0x22   : > { %530 = vst.msk [vmem:[#allocation2 + $0x150] sm:$0xff] %vm486_vm0, %v4173_v2  ;;  %531 = vst.msk [vmem:[#allocation2 + $0x158] sm:$0xff] %vm486_vm0, %v4173_v2 }
  0x23   : > { %532 = vst.msk [vmem:[#allocation2 + $0x160] sm:$0x3] %vm489_vm1, %v4173_v2  ;;  %535 = vst.msk [vmem:[#allocation2 + $0x178] sm:$0x3] %vm489_vm1, %v4173_v2 }
  0x24   : > { %533 = vst.msk [vmem:[#allocation2 + $0x168] sm:$0xff] %vm486_vm0, %v4173_v2  ;;  %534 = vst.msk [vmem:[#allocation2 + $0x170] sm:$0xff] %vm486_vm0, %v4173_v2 }
  0x25   : > { %536 = vst.msk [vmem:[#allocation2 + $0x180] sm:$0xff] %vm486_vm0, %v4173_v2  ;;  %537 = vst.msk [vmem:[#allocation2 + $0x188] sm:$0xff] %vm486_vm0, %v4173_v2  ;;  %v4164_v26 = vpop.eup %4163 }
  0x26   : > { %538 = vst.msk [vmem:[#allocation2 + $0x190] sm:$0x3] %vm489_vm1, %v4173_v2  ;;  %541 = vst.msk [vmem:[#allocation2 + $0x1a8] sm:$0x3] %vm489_vm1, %v4173_v2  ;;  %v342_v27 = vmul.f32 %v4164_v26, %v339_v24  ;;  %v355_v26 = vld [vmem:[%s4331_s24 + $0x48] sm:$0xff] }
  0x27   : > { %539 = vst.msk [vmem:[#allocation2 + $0x198] sm:$0xff] %vm486_vm0, %v4173_v2  ;;  %540 = vst.msk [vmem:[#allocation2 + $0x1a0] sm:$0xff] %vm486_vm0, %v4173_v2 }
  0x28   : > { %v344_v34 = vmul.f32 %v342_v27, %v330_v14  ;;  %v4344_v35 = vrot.slane %v342_v27, %v381_v25  ;;  %v368_v27 = vld [vmem:[%s4331_s24 + $0xb0] sm:$0xff] }
  0x2a   : > { %v345_v42 = vsub.f32 %v343_v28, %v344_v34  ;;  %v384_v43 = vmul.f32 %v4344_v35, %v346_v29  ;;  %v385_v44 = vmul.f32 %v4344_v35, %v347_v30  ;;  %v398_v45 = vmul.f32 %v4344_v35, %v360_v31  ;;  %v369_v28 = vld [vmem:[%s4331_s24 + $0xb8] sm:$0xff]  ;;  %v371_v34 = vld [vmem:[%s4331_s24 + $0xc8] sm:$0xff] }
  0x2b   : > { %v399_v49 = vmul.f32 %v4344_v35, %v361_v32  ;;  %v400_v50 = vmul.f32 %v4344_v35, %v362_v33  ;;  %v401_v51 = vmul.f32 %v4344_v35, %v363_v36  ;;  %v386_v52 = vmul.f32 %v4344_v35, %v348_v37  ;;  %v370_v33 = vld [vmem:[%s4331_s24 + $0xc0] sm:$0xff] }
  0x2c   : > { %v4362_v53 = vrot.slane %v345_v42, %v381_v25  ;;  %v387_v54 = vmul.f32 %v4344_v35, %v349_v38  ;;  %v388_v55 = vmul.f32 %v4344_v35, %v350_v39  ;;  %v389_v56 = vmul.f32 %v4344_v35, %v351_v40 }
  0x2d   : > { %v402_v57 = vmul.f32 %v4344_v35, %v364_v41  ;;  %v403_v58 = vmul.f32 %v4344_v35, %v365_v46  ;;  %v404_v59 = vmul.f32 %v4344_v35, %v366_v47  ;;  %v405_v60 = vmul.f32 %v4344_v35, %v367_v48 }
  0x2e   : > { %v422_v61 = vadd.f32 %v4362_v53, %v384_v43  ;;  %v423_v62 = vadd.f32 %v4362_v53, %v385_v44  ;;  %v436_v63 = vadd.f32 %v4362_v53, %v398_v45  ;;  %v437_v0 = vadd.f32 %v4362_v53, %v399_v49  ;;  %v356_v44 = vld [vmem:[%s4331_s24 + $0x50] sm:$0xff]  ;;  %v357_v45 = vld [vmem:[%s4331_s24 + $0x58] sm:$0xff] }
  0x2f   : > { %v438_v1 = vadd.f32 %v4362_v53, %v400_v50  ;;  %v439_v2 = vadd.f32 %v4362_v53, %v401_v51  ;;  %v424_v3 = vadd.f32 %v4362_v53, %v386_v52  ;;  %v425_v4 = vadd.f32 %v4362_v53, %v387_v54 }
  0x30   : > { %v454_v5 = vmax.f32 %v422_v61, 0.0  ;;  %v455_v6 = vmax.f32 %v423_v62, 0.0  ;;  %v468_v7 = vmax.f32 %v436_v63, 0.0  ;;  %v469_v8 = vmax.f32 %v437_v0, 0.0 }
  0x31   : > { %v470_v12 = vmax.f32 %v438_v1, 0.0  ;;  %v471_v14 = vmax.f32 %v439_v2, 0.0  ;;  %v456_v15 = vmax.f32 %v424_v3, 0.0  ;;  %v457_v16 = vmax.f32 %v425_v4, 0.0 }
  0x32   : > { %543 = vst.msk [vmem:[#allocation2 + $0x19] sm:$0xff] %vm486_vm0, %v454_v5  ;;  %544 = vst.msk [vmem:[#allocation2 + $0x21] sm:$0xff] %vm486_vm0, %v455_v6  ;;  %v426_v17 = vadd.f32 %v4362_v53, %v388_v55  ;;  %v427_v18 = vadd.f32 %v4362_v53, %v389_v56  ;;  %v440_v19 = vadd.f32 %v4362_v53, %v402_v57  ;;  %v358_v55 = vld [vmem:[%s4331_s24 + $0x60] sm:$0xff]  ;;  %v359_v56 = vld [vmem:[%s4331_s24 + $0x68] sm:$0xff] }
  0x33   : > { %557 = vst.msk [vmem:[#allocation2 + $0xc1] sm:$0xff] %vm486_vm0, %v468_v7  ;;  %558 = vst.msk [vmem:[#allocation2 + $0xc9] sm:$0xff] %vm486_vm0, %v469_v8  ;;  %v441_v20 = vadd.f32 %v4362_v53, %v403_v58  ;;  %v442_v22 = vadd.f32 %v4362_v53, %v404_v59  ;;  %v443_v23 = vadd.f32 %v4362_v53, %v405_v60  ;;  %v372_v57 = vld [vmem:[%s4331_s24 + $0xd0] sm:$0xff]  ;;  %v4437_v8 = vld [vmem:[%s5532_s5 + $0x18] sm:$0xff]  }
  0x34   : > { %559 = vst.msk [vmem:[#allocation2 + $0xd9] sm:$0xff] %vm486_vm0, %v470_v12  ;;  %560 = vst.msk [vmem:[#allocation2 + $0xe1] sm:$0xff] %vm486_vm0, %v471_v14  ;;  %v390_v24 = vmul.f32 %v4344_v35, %v352_v10  ;;  %v391_v25 = vmul.f32 %v4344_v35, %v353_v11  ;;  %v458_v29 = vmax.f32 %v426_v17, 0.0  ;;  %v459_v30 = vmax.f32 %v427_v18, 0.0  ;;  %v373_v17 = vld [vmem:[%s4331_s24 + $0xd8] sm:$0xff] }
  0x35   : > { %545 = vst.msk [vmem:[#allocation2 + $0x31] sm:$0xff] %vm486_vm0, %v456_v15  ;;  %546 = vst.msk [vmem:[#allocation2 + $0x39] sm:$0xff] %vm486_vm0, %v457_v16  ;;  %v472_v31 = vmax.f32 %v440_v19, 0.0  ;;  %v473_v32 = vmax.f32 %v441_v20, 0.0  ;;  %v474_v36 = vmax.f32 %v442_v22, 0.0  ;;  %v475_v37 = vmax.f32 %v443_v23, 0.0 }
  0x36   : > { %v428_v38 = vadd.f32 %v4362_v53, %v390_v24  ;;  %v429_v39 = vadd.f32 %v4362_v53, %v391_v25  ;;  %547 = vst.msk [vmem:[#allocation2 + $0x49] sm:$0xff] %vm486_vm0, %v458_v29  ;;  %548 = vst.msk [vmem:[#allocation2 + $0x51] sm:$0xff] %vm486_vm0, %v459_v30  ;;  %v392_v40 = vmul.f32 %v4344_v35, %v354_v21  ;;  %v374_v22 = vld [vmem:[%s4331_s24 + $0xe0] sm:$0xff]  ;;  %v375_v23 = vld [vmem:[%s4331_s24 + $0xe8] sm:$0xff] }
  0x37   : > { %561 = vst.msk [vmem:[#allocation2 + $0xf1] sm:$0xff] %vm486_vm0, %v472_v31  ;;  %562 = vst.msk [vmem:[#allocation2 + $0xf9] sm:$0xff] %vm486_vm0, %v473_v32  ;;  %v393_v41 = vmul.f32 %v4344_v35, %v355_v26  ;;  %v406_v42 = vmul.f32 %v4344_v35, %v368_v27  ;;  %v407_v43 = vmul.f32 %v4344_v35, %v369_v28  ;;  %v4458_v24 = vld [vmem:[%s5532_s5 + $0x20] sm:$0xff]  }
  0x38   : > { %563 = vst.msk [vmem:[#allocation2 + $0x109] sm:$0xff] %vm486_vm0, %v474_v36  ;;  %564 = vst.msk [vmem:[#allocation2 + $0x111] sm:$0xff] %vm486_vm0, %v475_v37  ;;  %v460_v46 = vmax.f32 %v428_v38, 0.0  ;;  %v461_v47 = vmax.f32 %v429_v39, 0.0  ;;  %v408_v48 = vmul.f32 %v4344_v35, %v370_v33  ;;  %v409_v49 = vmul.f32 %v4344_v35, %v371_v34 }
  0x39   : > { %v430_v50 = vadd.f32 %v4362_v53, %v392_v40  ;;  %v431_v51 = vadd.f32 %v4362_v53, %v393_v41  ;;  %v444_v52 = vadd.f32 %v4362_v53, %v406_v42  ;;  %v445_v54 = vadd.f32 %v4362_v53, %v407_v43  ;;  %v627_v58 = vld [vmem:[#allocation2 + $0x19] sm:$0xff]  ;;  %v628_v59 = vld [vmem:[#allocation2 + $0x21] sm:$0xff] }
  0x3a   : > { %v641_v60 = vld [vmem:[#allocation2 + $0xc1] sm:$0xff]  ;;  %549 = vst.msk [vmem:[#allocation2 + $0x61] sm:$0xff] %vm486_vm0, %v460_v46  ;;  %550 = vst.msk [vmem:[#allocation2 + $0x69] sm:$0xff] %vm486_vm0, %v461_v47  ;;  %v446_v61 = vadd.f32 %v4362_v53, %v408_v48  ;;  %v447_v62 = vadd.f32 %v4362_v53, %v409_v49  ;;  %v394_v63 = vmul.f32 %v4344_v35, %v356_v44  ;;  %v642_v2 = vld [vmem:[#allocation2 + $0xc9] sm:$0xff] }
  0x3b   : > { %v395_v0 = vmul.f32 %v4344_v35, %v357_v45  ;;  %v4432_v1 = vpack.c.bf16 %v628_v59, %v627_v58  ;;  %v643_v3 = vld [vmem:[#allocation2 + $0xd9] sm:$0xff]  ;;  %v644_v4 = vld [vmem:[#allocation2 + $0xe1] sm:$0xff]  ;;  %v462_v5 = vmax.f32 %v430_v50, 0.0  ;;  %v463_v6 = vmax.f32 %v431_v51, 0.0 }
  0x3c   : > { %v476_v7 = vmax.f32 %v444_v52, 0.0  ;;  %v4439_v10 = vpack.c.bf16 %v642_v2, %v641_v60  ;;  %v4441_v11 = vpack.c.bf16 %v644_v4, %v643_v3  ;;  %v629_v12 = vld [vmem:[#allocation2 + $0x31] sm:$0xff]  ;;  %v630_v14 = vld [vmem:[#allocation2 + $0x39] sm:$0xff]  ;;  %v477_v15 = vmax.f32 %v445_v54, 0.0 }
  0x3d   : > { %v478_v16 = vmax.f32 %v446_v61, 0.0  ;;  %3840 = vmatmul.mubr.msk.bf16.vlgmr.msra.gmra.mxu0 %vm486_vm0, %v4432_v1  ;;  %v4446_v18 = vpack.c.bf16 %v630_v14, %v629_v12  ;;  %551 = vst.msk [vmem:[#allocation2 + $0x79] sm:$0xff] %vm486_vm0, %v462_v5  ;;  %552 = vst.msk [vmem:[#allocation2 + $0x81] sm:$0xff] %vm486_vm0, %v463_v6  ;;  %v479_v19 = vmax.f32 %v447_v62, 0.0  ;;  %v432_v20 = vadd.f32 %v4362_v53, %v394_v63  ;;  %v631_v25 = vld [vmem:[#allocation2 + $0x49] sm:$0xff]  ;;  %v632_v26 = vld [vmem:[#allocation2 + $0x51] sm:$0xff] }
  0x3e   : > { %565 = vst.msk [vmem:[#allocation2 + $0x121] sm:$0xff] %vm486_vm0, %v476_v7  ;;  %v433_v21 = vadd.f32 %v4362_v53, %v395_v0  ;;  %3855 = vmatprep.mubr.msk.bf16.mxu1 %vm486_vm0, %v4439_v10  ;;  %3906 = vmatpush3.bf16.msra.mxu0 %v4315_v13  ;;  %v645_v27 = vld [vmem:[#allocation2 + $0xf1] sm:$0xff]  ;;  %566 = vst.msk [vmem:[#allocation2 + $0x129] sm:$0xff] %vm486_vm0, %v477_v15  ;;  %v396_v28 = vmul.f32 %v4344_v35, %v358_v55  ;;  %v646_v13 = vld [vmem:[#allocation2 + $0xf9] sm:$0xff] }
  0x3f   : > { %567 = vst.msk [vmem:[#allocation2 + $0x139] sm:$0xff] %vm486_vm0, %v478_v16  ;;  %v397_v29 = vmul.f32 %v4344_v35, %v359_v56  ;;  %v410_v30 = vmul.f32 %v4344_v35, %v372_v57  ;;  %3856 = vmatmul.mubr.msk.bf16.vlgmr.msra.gmra.mxu1 %vm486_vm0, %v4441_v11  ;;  %3843 = vmatprep.mubr.msk.bf16.mxu0 %vm486_vm0, %v4446_v18  ;;  %v647_v31 = vld [vmem:[#allocation2 + $0x109] sm:$0xff]  ;;  %v648_v32 = vld [vmem:[#allocation2 + $0x111] sm:$0xff]  ;;  %568 = vst.msk [vmem:[#allocation2 + $0x141] sm:$0xff] %vm486_vm0, %v479_v19  ;;  %v464_v33 = vmax.f32 %v432_v20, 0.0 }
  0x40   : > { %v465_v34 = vmax.f32 %v433_v21, 0.0  ;;  %v411_v36 = vmul.f32 %v4344_v35, %v373_v17  ;;  %3872 = vmatpush3.bf16.msra.mxu1 %v4308_v9  ;;  %v4475_v37 = vpack.c.bf16 %v632_v26, %v631_v25  ;;  %v4477_v38 = vpack.c.bf16 %v646_v13, %v645_v27  ;;  %3973 = vmatprep.subr.bf16.mxu0 %v4458_v24  ;;  %v1106_v16 = vld [vmem:[#allocation2 + $0x2] sm:$0xff]  ;;  %v1107_v17 = vld [vmem:[#allocation2 + $0xa] sm:$0xff]  ;;  %v1110_v13 = vld [vmem:[#allocation2 + $0x32] sm:$0xff] }
  0x41   : > { %v434_v39 = vadd.f32 %v4362_v53, %v396_v28  ;;  %v435_v40 = vadd.f32 %v4362_v53, %v397_v29  ;;  %v633_v41 = vld [vmem:[#allocation2 + $0x61] sm:$0xff]  ;;  %v634_v42 = vld [vmem:[#allocation2 + $0x69] sm:$0xff]  ;;  %553 = vst.msk [vmem:[#allocation2 + $0x91] sm:$0xff] %vm486_vm0, %v464_v33  ;;  %v448_v43 = vadd.f32 %v4362_v53, %v410_v30  ;;  %v412_v9 = vmul.f32 %v4344_v35, %v374_v22  ;;  %v577_v30 = vld [vmem:[#allocation2 + $0x18] sm:$0xff] }
  0x42   : > { %554 = vst.msk [vmem:[#allocation2 + $0x99] sm:$0xff] %vm486_vm0, %v465_v34  ;;  %v449_v44 = vadd.f32 %v4362_v53, %v411_v36  ;;  %v413_v45 = vmul.f32 %v4344_v35, %v375_v23  ;;  %3939 = vmatprep.subr.bf16.mxu1 %v4437_v8  ;;  %3859 = vmatprep.mubr.msk.bf16.mxu1 %vm486_vm0, %v4477_v38  ;;  %v575_v22 = vld [vmem:[#allocation2] sm:$0xff]  ;;  %v576_v23 = vld [vmem:[#allocation2 + $0x8] sm:$0xff]  ;;  %v376_v33 = vld [vmem:[%s4331_s24 + $0xf0] sm:$0xff] }
  0x43   : > { %v4490_v46 = vpack.c.bf16 %v648_v32, %v647_v31  ;;  %v4492_v47 = vpack.c.bf16 %v634_v42, %v633_v41  ;;  %v466_v48 = vmax.f32 %v434_v39, 0.0  ;;  %v467_v49 = vmax.f32 %v435_v40, 0.0  ;;  %v1108_v28 = vld [vmem:[#allocation2 + $0x1a] sm:$0xff]  ;;  %v1109_v29 = vld [vmem:[#allocation2 + $0x22] sm:$0xff]  ;;  %v579_v39 = vld [vmem:[#allocation2 + $0x30] sm:$0xff] }
  0x44   : > { %v480_v50 = vmax.f32 %v448_v43, 0.0  ;;  %v481_v51 = vmax.f32 %v449_v44, 0.0  ;;  %v450_v52 = vadd.f32 %v4362_v53, %v412_v9  ;;  %v451_v54 = vadd.f32 %v4362_v53, %v413_v45  ;;  %v635_v59 = vld [vmem:[#allocation2 + $0x79] sm:$0xff]  ;;  %v636_v60 = vld [vmem:[#allocation2 + $0x81] sm:$0xff]  ;;  %v4552_v9 = vld [vmem:[%s5532_s5 + $0x30] sm:$0xff]  }
  0x45   : > { %v649_v55 = vld [vmem:[#allocation2 + $0x121] sm:$0xff]  ;;  %555 = vst.msk [vmem:[#allocation2 + $0xa9] sm:$0xff] %vm486_vm0, %v466_v48  ;;  %556 = vst.msk [vmem:[#allocation2 + $0xb1] sm:$0xff] %vm486_vm0, %v467_v49  ;;  %3844 = vmatmul.mubr.msk.bf16.gmra.mxu0 %vm486_vm0, %v4475_v37  ;;  %v650_v56 = vld [vmem:[#allocation2 + $0x129] sm:$0xff]  ;;  %v4513_v3 = vpack.c.bf16 %v636_v60, %v635_v59  ;;  %v1138_v25 = vpack.c.bf16 %v1107_v17, %v1106_v16  ;;  %v607_v27 = vpack.c.bf16 %v576_v23, %v575_v22 }
  0x46   : > { %569 = vst.msk [vmem:[#allocation2 + $0x151] sm:$0xff] %vm486_vm0, %v480_v50  ;;  %570 = vst.msk [vmem:[#allocation2 + $0x159] sm:$0xff] %vm486_vm0, %v481_v51  ;;  %v482_v57 = vmax.f32 %v450_v52, 0.0  ;;  %v483_v58 = vmax.f32 %v451_v54, 0.0  ;;  %3847 = vmatprep.mubr.msk.bf16.mxu0 %vm486_vm0, %v4492_v47  ;;  %v4505_v61 = vpack.c.bf16 %v650_v56, %v649_v55  ;;  %v651_v62 = vld [vmem:[#allocation2 + $0x139] sm:$0xff]  ;;  %v652_v63 = vld [vmem:[#allocation2 + $0x141] sm:$0xff]  ;;  %v4541_v36 = vpack.c.bf16 %v1109_v29, %v1108_v28 }
  0x47   : > { %3860 = vmatmul.mubr.msk.bf16.gmra.mxu1 %vm486_vm0, %v4490_v46  ;;  %v4517_v5 = vpack.c.bf16 %v652_v63, %v651_v62  ;;  %v1111_v31 = vld [vmem:[#allocation2 + $0x3a] sm:$0xff]  ;;  %v414_v41 = vmul.f32 %v4344_v35, %v376_v33  ;;  %v1112_v52 = vld [vmem:[#allocation2 + $0x4a] sm:$0xff]  ;;  %v1113_v54 = vld [vmem:[#allocation2 + $0x52] sm:$0xff] }
  0x48   : > { %571 = vst.msk [vmem:[#allocation2 + $0x169] sm:$0xff] %vm486_vm0, %v482_v57  ;;  %572 = vst.msk [vmem:[#allocation2 + $0x171] sm:$0xff] %vm486_vm0, %v483_v58  ;;  %3863 = vmatprep.mubr.msk.bf16.mxu1 %vm486_vm0, %v4505_v61  ;;  %v637_v0 = vld [vmem:[#allocation2 + $0x91] sm:$0xff]  ;;  %v578_v32 = vld [vmem:[#allocation2 + $0x20] sm:$0xff]  ;;  %v4545_v43 = vpack.c.bf16 %v1111_v31, %v1110_v13  ;;  %v4576_v57 = vpack.c.bf16 %v1113_v54, %v1112_v52 }
  0x49   : > { %v638_v2 = vld [vmem:[#allocation2 + $0x99] sm:$0xff]  ;;  %v4547_v44 = vpack.c.bf16 %v578_v32, %v577_v30  ;;  %v452_v45 = vadd.f32 %v4362_v53, %v414_v41  ;;  %v1115_v55 = vld [vmem:[#allocation2 + $0x6a] sm:$0xff]  ;;  %v1125_v41 = vld [vmem:[#allocation2 + $0xe2] sm:$0xff] }
  0x4a   : > { %v4515_v4 = vpack.c.bf16 %v638_v2, %v637_v0  ;;  %v377_v34 = vld [vmem:[%s4331_s24 + $0xf8] sm:$0xff]  ;;  %v582_v56 = vld [vmem:[#allocation2 + $0x50] sm:$0xff]  ;;  %v583_v58 = vld [vmem:[#allocation2 + $0x60] sm:$0xff]  ;;  %s5259_s24 = scalar_lea.vmem %s5533_s6, %s3682_s21 }
  0x4b   : > { %v580_v40 = vld [vmem:[#allocation2 + $0x38] sm:$0xff]  ;;  %v415_v42 = vmul.f32 %v4344_v35, %v377_v34  ;;  %v4563_v35 = vld [vmem:[%s5532_s5 + $0x28] sm:$0xff]   ;;  %v484_v50 = vmax.f32 %v452_v45, 0.0  ;;  %v587_v16 = vld [vmem:[#allocation2 + $0x90] sm:$0xff] }
  0x4c   : > { %v639_v14 = vld [vmem:[#allocation2 + $0xa9] sm:$0xff]  ;;  %v640_v15 = vld [vmem:[#allocation2 + $0xb1] sm:$0xff]  ;;  %v4556_v49 = vpack.c.bf16 %v580_v40, %v579_v39  ;;  %v591_v31 = vld [vmem:[#allocation2 + $0xc0] sm:$0xff] }
  0x4d   : > { %v653_v6 = vld [vmem:[#allocation2 + $0x151] sm:$0xff]  ;;  %v654_v7 = vld [vmem:[#allocation2 + $0x159] sm:$0xff]  ;;  %3848 = vmatmul.mubr.msk.bf16.gmra.mxu0 %vm486_vm0, %v4513_v3  ;;  %v4529_v21 = vpack.c.bf16 %v640_v15, %v639_v14  ;;  %v453_v48 = vadd.f32 %v4362_v53, %v415_v42  ;;  %v1114_v53 = vld [vmem:[#allocation2 + $0x62] sm:$0xff]  ;;  %573 = vst.msk [vmem:[#allocation2 + $0x181] sm:$0xff] %vm486_vm0, %v484_v50 }
  0x4e   : > { %v4521_v12 = vpack.c.bf16 %v654_v7, %v653_v6  ;;  %3851 = vmatprep.mubr.msk.bf16.mxu0 %vm486_vm0, %v4515_v4  ;;  %v584_v59 = vld [vmem:[#allocation2 + $0x68] sm:$0xff]  ;;  %v4579_v60 = vpack.c.bf16 %v1115_v55, %v1114_v53  ;;  %v1118_v2 = vld [vmem:[#allocation2 + $0x92] sm:$0xff]  ;;  %v1119_v6 = vld [vmem:[#allocation2 + $0x9a] sm:$0xff] }
  0x4f   : > { %3864 = vmatmul.mubr.msk.bf16.gmra.mxu1 %vm486_vm0, %v4517_v5  ;;  %v655_v19 = vld [vmem:[#allocation2 + $0x169] sm:$0xff]  ;;  %v656_v20 = vld [vmem:[#allocation2 + $0x171] sm:$0xff]  ;;  %v485_v51 = vmax.f32 %v453_v48, 0.0  ;;  %v4583_v63 = vpack.c.bf16 %v584_v59, %v583_v58  ;;  %v586_v14 = vld [vmem:[#allocation2 + $0x80] sm:$0xff] }
  0x50   : > { %3867 = vmatprep.mubr.msk.bf16.mxu1 %vm486_vm0, %v4521_v12  ;;  %v4531_v26 = vpack.c.bf16 %v656_v20, %v655_v19  ;;  %v1117_v0 = vld [vmem:[#allocation2 + $0x82] sm:$0xff]  ;;  %v585_v7 = vld [vmem:[#allocation2 + $0x78] sm:$0xff]  ;;  %v4595_v19 = vpack.c.bf16 %v1119_v6, %v1118_v2  ;;  %v1120_v23 = vld [vmem:[#allocation2 + $0xaa] sm:$0xff] }
  0x51   : > { %574 = vst.msk [vmem:[#allocation2 + $0x189] sm:$0xff] %vm486_vm0, %v485_v51  ;;  %v588_v17 = vld [vmem:[#allocation2 + $0x98] sm:$0xff]  ;;  %v4597_v20 = vpack.c.bf16 %v586_v14, %v585_v7  ;;  %v1123_v28 = vld [vmem:[#allocation2 + $0xca] sm:$0xff]  ;;  %v594_v50 = vld [vmem:[#allocation2 + $0xe0] sm:$0xff] }
  0x52   : > { %v4599_v22 = vpack.c.bf16 %v588_v17, %v587_v16  ;;  %v589_v29 = vld [vmem:[#allocation2 + $0xa8] sm:$0xff]  ;;  %v590_v30 = vld [vmem:[#allocation2 + $0xb0] sm:$0xff]  ;;  %v1124_v40 = vld [vmem:[#allocation2 + $0xda] sm:$0xff] }
  0x53   : > { %v592_v32 = vld [vmem:[#allocation2 + $0xc8] sm:$0xff]  ;;  %v4613_v34 = vpack.c.bf16 %v590_v30, %v589_v29  ;;  %v1126_v42 = vld [vmem:[#allocation2 + $0xf2] sm:$0xff]  ;;  %v1127_v45 = vld [vmem:[#allocation2 + $0xfa] sm:$0xff]  ;;  %v4625_v51 = vpack.c.bf16 %v1125_v41, %v1124_v40 }
  0x54   : > { %v4615_v39 = vpack.c.bf16 %v592_v32, %v591_v31  ;;  %v593_v48 = vld [vmem:[#allocation2 + $0xd8] sm:$0xff]  ;;  %v595_v52 = vld [vmem:[#allocation2 + $0xf0] sm:$0xff]  ;;  %v4627_v53 = vpack.c.bf16 %v1127_v45, %v1126_v42  ;;  %v1130_v59 = vld [vmem:[#allocation2 + $0x122] sm:$0xff] }
  0x55   : > { %3852 = vmatmul.mubr.msk.bf16.gmra.mxu0 %vm486_vm0, %v4529_v21  ;;  %v596_v54 = vld [vmem:[#allocation2 + $0xf8] sm:$0xff]  ;;  %v4629_v55 = vpack.c.bf16 %v594_v50, %v593_v48  ;;  %v598_v2 = vld [vmem:[#allocation2 + $0x110] sm:$0xff]  ;;  %v599_v7 = vld [vmem:[#allocation2 + $0x120] sm:$0xff] }
  0x56   : > { %3907 = vmatprep.mubr.msk.bf16.mxu0 %vm486_vm0, %v1138_v25  ;;  %v1121_v25 = vld [vmem:[#allocation2 + $0xb2] sm:$0xff]  ;;  %v600_v14 = vld [vmem:[#allocation2 + $0x128] sm:$0xff]  ;;  %v1135_v29 = vld [vmem:[#allocation2 + $0x15a] sm:$0xff] }
  0x57   : > { %3868 = vmatmul.mubr.msk.bf16.gmra.mxu1 %vm486_vm0, %v4531_v26  ;;  %v4609_v13 = vpack.c.bf16 %v1121_v25, %v1120_v23  ;;  %v1129_v58 = vld [vmem:[#allocation2 + $0x112] sm:$0xff]  ;;  %v4647_v23 = vpack.c.bf16 %v600_v14, %v599_v7  ;;  %v1132_v25 = vld [vmem:[#allocation2 + $0x13a] sm:$0xff]  ;;  %v1136_v50 = vld [vmem:[#allocation2 + $0x16a] sm:$0xff] }
  0x58   : > { %3873 = vmatprep.mubr.msk.bf16.mxu1 %vm486_vm0, %v607_v27  ;;  %v1122_v27 = vld [vmem:[#allocation2 + $0xc2] sm:$0xff]  ;;  %v601_v30 = vld [vmem:[#allocation2 + $0x138] sm:$0xff]  ;;  %v603_v40 = vld [vmem:[#allocation2 + $0x150] sm:$0xff] }
  0x59   : > { %v4611_v33 = vpack.c.bf16 %v1123_v28, %v1122_v27  ;;  %v1133_v27 = vld [vmem:[#allocation2 + $0x142] sm:$0xff]  ;;  %v1134_v28 = vld [vmem:[#allocation2 + $0x152] sm:$0xff] }
  0x5a   : > { %v602_v31 = vld [vmem:[#allocation2 + $0x140] sm:$0xff]  ;;  %v4657_v32 = vpack.c.bf16 %v1133_v27, %v1132_v25  ;;  %v604_v41 = vld [vmem:[#allocation2 + $0x158] sm:$0xff]  ;;  %v4659_v42 = vpack.c.bf16 %v1135_v29, %v1134_v28 }
  0x5b   : > { %v4661_v45 = vpack.c.bf16 %v602_v31, %v601_v30  ;;  %v4663_v48 = vpack.c.bf16 %v604_v41, %v603_v40  ;;  %v2598_v25 = vld [vmem:[#allocation2 + $0x39] sm:$0xff] }
  0x5d   : > { %3908 = vmatmul.mubr.msk.bf16.vlgmr.msra.gmra.mxu0 %vm486_vm0, %v4541_v36 }
  0x5e   : > { %3974 = vmatpush3.bf16.msra.mxu0 %v4458_v24  ;;  %3911 = vmatprep.mubr.msk.bf16.mxu0 %vm486_vm0, %v4545_v43  ;;  %v581_v24 = vld [vmem:[#allocation2 + $0x48] sm:$0xff] }
  0x5f   : > { %3874 = vmatmul.mubr.msk.bf16.vlgmr.msra.gmra.mxu1 %vm486_vm0, %v4547_v44  ;;  %4041 = vmatprep.subr.bf16.mxu0 %v4552_v9  ;;  %v4581_v62 = vpack.c.bf16 %v582_v56, %v581_v24  ;;  %v4631_v24 = vpack.c.bf16 %v596_v54, %v595_v52  ;;  %v1128_v56 = vld [vmem:[#allocation2 + $0x10a] sm:$0xff]  ;;  %v1137_v52 = vld [vmem:[#allocation2 + $0x172] sm:$0xff] }
  0x60   : > { %3940 = vmatpush3.bf16.msra.mxu1 %v4437_v8  ;;  %3877 = vmatprep.mubr.msk.bf16.mxu1 %vm486_vm0, %v4556_v49  ;;  %v1116_v8 = vld [vmem:[#allocation2 + $0x7a] sm:$0xff]  ;;  %v4641_v6 = vpack.c.bf16 %v1129_v58, %v1128_v56  ;;  %v605_v54 = vld [vmem:[#allocation2 + $0x168] sm:$0xff]  ;;  %v606_v56 = vld [vmem:[#allocation2 + $0x170] sm:$0xff]  ;;  %v4673_v58 = vpack.c.bf16 %v1137_v52, %v1136_v50 }
  0x61   : > { %4007 = vmatprep.subr.bf16.mxu1 %v4563_v35  ;;  %v4593_v15 = vpack.c.bf16 %v1117_v0, %v1116_v8  ;;  %v1131_v8 = vld [vmem:[#allocation2 + $0x12a] sm:$0xff] }
  0x62   : > { %v597_v0 = vld [vmem:[#allocation2 + $0x108] sm:$0xff]  ;;  %v4643_v16 = vpack.c.bf16 %v1131_v8, %v1130_v59  ;;  %v4675_v59 = vpack.c.bf16 %v606_v56, %v605_v54  ;;  %v4162_v8 = vld [vmem:[%s5532_s5 + $0x40] sm:$0xff]   ;;  %v2600_v50 = vld [vmem:[#allocation2 + $0x51] sm:$0xff] }
  0x63   : > { %v4645_v17 = vpack.c.bf16 %v598_v2, %v597_v0  ;;  %v4161_v0 = vld [vmem:[%s5532_s5 + $0x38] sm:$0xff]   ;;  %v2031_v2 = vld [vmem:[#allocation2 + $0x18a] sm:$0xff]  ;;  %v2601_v56 = vld [vmem:[#allocation2 + $0x61] sm:$0xff] }
  0x65   : > { %3912 = vmatmul.mubr.msk.bf16.gmra.mxu0 %vm486_vm0, %v4576_v57 }
  0x66   : > { %3915 = vmatprep.mubr.msk.bf16.mxu0 %vm486_vm0, %v4579_v60 }
  0x67   : > { %3878 = vmatmul.mubr.msk.bf16.gmra.mxu1 %vm486_vm0, %v4581_v62 }
  0x68   : > { %3881 = vmatprep.mubr.msk.bf16.mxu1 %vm486_vm0, %v4583_v63 }
  0x6d   : > { %3916 = vmatmul.mubr.msk.bf16.gmra.mxu0 %vm486_vm0, %v4593_v15 }
  0x6e   : > { %3919 = vmatprep.mubr.msk.bf16.mxu0 %vm486_vm0, %v4595_v19 }
  0x6f   : > { %3882 = vmatmul.mubr.msk.bf16.gmra.mxu1 %vm486_vm0, %v4597_v20 }
  0x70   : > { %3885 = vmatprep.mubr.msk.bf16.mxu1 %vm486_vm0, %v4599_v22 }
  0x75   : > { %3920 = vmatmul.mubr.msk.bf16.gmra.mxu0 %vm486_vm0, %v4609_v13 }
  0x76   : > { %3923 = vmatprep.mubr.msk.bf16.mxu0 %vm486_vm0, %v4611_v33 }
  0x77   : > { %3886 = vmatmul.mubr.msk.bf16.gmra.mxu1 %vm486_vm0, %v4613_v34 }
  0x78   : > { %3889 = vmatprep.mubr.msk.bf16.mxu1 %vm486_vm0, %v4615_v39 }
  0x7d   : > { %3924 = vmatmul.mubr.msk.bf16.gmra.mxu0 %vm486_vm0, %v4625_v51 }
  0x7e   : > { %3927 = vmatprep.mubr.msk.bf16.mxu0 %vm486_vm0, %v4627_v53 }
  0x7f   : > { %3890 = vmatmul.mubr.msk.bf16.gmra.mxu1 %vm486_vm0, %v4629_v55 }
  0x80   : > { %3893 = vmatprep.mubr.msk.bf16.mxu1 %vm486_vm0, %v4631_v24 }
  0x85   : > { %3928 = vmatmul.mubr.msk.bf16.gmra.mxu0 %vm486_vm0, %v4641_v6 }
  0x86   : > { %3931 = vmatprep.mubr.msk.bf16.mxu0 %vm486_vm0, %v4643_v16 }
  0x87   : > { %3894 = vmatmul.mubr.msk.bf16.gmra.mxu1 %vm486_vm0, %v4645_v17 }
  0x88   : > { %3897 = vmatprep.mubr.msk.bf16.mxu1 %vm486_vm0, %v4647_v23 }
  0x8d   : > { %3932 = vmatmul.mubr.msk.bf16.gmra.mxu0 %vm486_vm0, %v4657_v32 }
  0x8e   : > { %3935 = vmatprep.mubr.msk.bf16.mxu0 %vm486_vm0, %v4659_v42 }
  0x8f   : > { %3898 = vmatmul.mubr.msk.bf16.gmra.mxu1 %vm486_vm0, %v4661_v45 }
  0x90   : > { %3901 = vmatprep.mubr.msk.bf16.mxu1 %vm486_vm0, %v4663_v48 }
  0x95   : > { %3936 = vmatmul.mubr.msk.bf16.gmra.mxu0 %vm486_vm0, %v4673_v58 }
  0x96   : > { %3975 = vmatprep.mubr.msk.bf16.mxu0 %vm486_vm0, %v4432_v1  ;;  %v1732_v1 = vld [vmem:[#allocation2 + $0x181] sm:$0xff] }
  0x97   : > { %3902 = vmatmul.mubr.msk.bf16.gmra.mxu1 %vm486_vm0, %v4675_v59 }
  0x98   : > { %3941 = vmatprep.mubr.msk.bf16.mxu1 %vm486_vm0, %v4547_v44 }
  0x9d   : > { %3976 = vmatmul.mubr.msk.bf16.vlgmr.msra.gmra.mxu0 %vm486_vm0, %v4446_v18  ;;  %v1435_v18 = vld [vmem:[#allocation2 + $0x188] sm:$0xff] }
  0x9e   : > { %4042 = vmatpush3.bf16.msra.mxu0 %v4552_v9  ;;  %3979 = vmatprep.mubr.msk.bf16.mxu0 %vm486_vm0, %v4475_v37 }
  0x9f   : > { %3942 = vmatmul.mubr.msk.bf16.vlgmr.msra.gmra.mxu1 %vm486_vm0, %v4556_v49  ;;  %4109 = vmatprep.subr.bf16.mxu0 %v4162_v8 }
  0xa0   : > { %4008 = vmatpush3.bf16.msra.mxu1 %v4563_v35  ;;  %3945 = vmatprep.mubr.msk.bf16.mxu1 %vm486_vm0, %v4581_v62 }
  0xa1   : > { %4075 = vmatprep.subr.bf16.mxu1 %v4161_v0 }
  0xa5   : > { %3980 = vmatmul.mubr.msk.bf16.gmra.mxu0 %vm486_vm0, %v4492_v47 }
  0xa6   : > { %3983 = vmatprep.mubr.msk.bf16.mxu0 %vm486_vm0, %v4513_v3 }
  0xa7   : > { %3946 = vmatmul.mubr.msk.bf16.gmra.mxu1 %vm486_vm0, %v4583_v63 }
  0xa8   : > { %3949 = vmatprep.mubr.msk.bf16.mxu1 %vm486_vm0, %v4597_v20 }
  0xad   : > { %3984 = vmatmul.mubr.msk.bf16.gmra.mxu0 %vm486_vm0, %v4515_v4 }
  0xae   : > { %3987 = vmatprep.mubr.msk.bf16.mxu0 %vm486_vm0, %v4529_v21 }
  0xaf   : > { %3950 = vmatmul.mubr.msk.bf16.gmra.mxu1 %vm486_vm0, %v4599_v22 }
  0xb0   : > { %3953 = vmatprep.mubr.msk.bf16.mxu1 %vm486_vm0, %v4613_v34 }
  0xb5   : > { %3988 = vmatmul.mubr.msk.bf16.gmra.mxu0 %vm486_vm0, %v4439_v10  ;;  %v1733_v10 = vld [vmem:[#allocation2 + $0x189] sm:$0xff] }
  0xb6   : > { %3991 = vmatprep.mubr.msk.bf16.mxu0 %vm486_vm0, %v4441_v11  ;;  %v1434_v11 = vld [vmem:[#allocation2 + $0x180] sm:$0xff]  ;;  %v4749_v37 = vpack.c.bf16 %v1733_v10, %v1732_v1 }
  0xb7   : > { %3954 = vmatmul.mubr.msk.bf16.gmra.mxu1 %vm486_vm0, %v4615_v39 }
  0xb8   : > { %3957 = vmatprep.mubr.msk.bf16.mxu1 %vm486_vm0, %v4629_v55 }
  0xbd   : > { %3992 = vmatmul.mubr.msk.bf16.gmra.mxu0 %vm486_vm0, %v4477_v38  ;;  %v1451_v38 = vpack.c.bf16 %v1435_v18, %v1434_v11 }
  0xbe   : > { %3995 = vmatprep.mubr.msk.bf16.mxu0 %vm486_vm0, %v4490_v46 }
  0xbf   : > { %3958 = vmatmul.mubr.msk.bf16.gmra.mxu1 %vm486_vm0, %v4631_v24 }
  0xc0   : > { %3961 = vmatprep.mubr.msk.bf16.mxu1 %vm486_vm0, %v4645_v17 }
  0xc5   : > { %3996 = vmatmul.mubr.msk.bf16.gmra.mxu0 %vm486_vm0, %v4505_v61 }
  0xc6   : > { %3999 = vmatprep.mubr.msk.bf16.mxu0 %vm486_vm0, %v4517_v5 }
  0xc7   : > { %3962 = vmatmul.mubr.msk.bf16.gmra.mxu1 %vm486_vm0, %v4647_v23 }
  0xc8   : > { %3965 = vmatprep.mubr.msk.bf16.mxu1 %vm486_vm0, %v4661_v45 }
  0xcd   : > { %4000 = vmatmul.mubr.msk.bf16.gmra.mxu0 %vm486_vm0, %v4521_v12 }
  0xce   : > { %4003 = vmatprep.mubr.msk.bf16.mxu0 %vm486_vm0, %v4531_v26 }
  0xcf   : > { %3966 = vmatmul.mubr.msk.bf16.gmra.mxu1 %vm486_vm0, %v4663_v48 }
  0xd0   : > { %3969 = vmatprep.mubr.msk.bf16.mxu1 %vm486_vm0, %v4675_v59 }
  0xd5   : > { %4004 = vmatmul.mubr.msk.bf16.gmra.mxu0 %vm486_vm0, %v4749_v37 }
  0xd6   : > { %4043 = vmatprep.mubr.msk.bf16.mxu0 %vm486_vm0, %v4556_v49 }
  0xd7   : > { %3970 = vmatmul.mubr.msk.bf16.gmra.mxu1 %vm486_vm0, %v1451_v38 }
  0xd8   : > { %4009 = vmatprep.mubr.msk.bf16.mxu1 %vm486_vm0, %v4541_v36 }
  0xdd   : > { %4044 = vmatmul.mubr.msk.bf16.vlgmr.msra.gmra.mxu0 %vm486_vm0, %v4581_v62 }
  0xde   : > { %4110 = vmatpush3.bf16.msra.mxu0 %v4162_v8  ;;  %4047 = vmatprep.mubr.msk.bf16.mxu0 %vm486_vm0, %v4583_v63 }
  0xdf   : > { %4010 = vmatmul.mubr.msk.bf16.vlgmr.msra.gmra.mxu1 %vm486_vm0, %v4545_v43 }
  0xe0   : > { %4076 = vmatpush3.bf16.msra.mxu1 %v4161_v0  ;;  %4013 = vmatprep.mubr.msk.bf16.mxu1 %vm486_vm0, %v4576_v57 }
  0xe5   : > { %4048 = vmatmul.mubr.msk.bf16.gmra.mxu0 %vm486_vm0, %v4597_v20 }
  0xe6   : > { %4051 = vmatprep.mubr.msk.bf16.mxu0 %vm486_vm0, %v4599_v22  ;;  %v2329_v22 = vld [vmem:[#allocation2 + $0x198] sm:$0xff] }
  0xe7   : > { %4014 = vmatmul.mubr.msk.bf16.gmra.mxu1 %vm486_vm0, %v4579_v60 }
  0xe8   : > { %4017 = vmatprep.mubr.msk.bf16.mxu1 %vm486_vm0, %v4593_v15 }
  0xed   : > { %4052 = vmatmul.mubr.msk.bf16.gmra.mxu0 %vm486_vm0, %v4613_v34  ;;  %v2330_v34 = vld [vmem:[#allocation2 + $0x1a0] sm:$0xff] }
  0xee   : > { %4055 = vmatprep.mubr.msk.bf16.mxu0 %vm486_vm0, %v4615_v39 }
  0xef   : > { %4018 = vmatmul.mubr.msk.bf16.gmra.mxu1 %vm486_vm0, %v4595_v19 }
  0xf0   : > { %4021 = vmatprep.mubr.msk.bf16.mxu1 %vm486_vm0, %v4609_v13 }
  0xf5   : > { %4056 = vmatmul.mubr.msk.bf16.gmra.mxu0 %vm486_vm0, %v4629_v55 }
  0xf6   : > { %4059 = vmatprep.mubr.msk.bf16.mxu0 %vm486_vm0, %v4631_v24  ;;  %v2030_v24 = vld [vmem:[#allocation2 + $0x182] sm:$0xff] }
  0xf7   : > { %4022 = vmatmul.mubr.msk.bf16.gmra.mxu1 %vm486_vm0, %v4611_v33  ;;  %v4859_v29 = vpack.c.bf16 %v2031_v2, %v2030_v24  ;;  %v2604_v24 = vld [vmem:[#allocation2 + $0x81] sm:$0xff] }
  0xf8   : > { %4025 = vmatprep.mubr.msk.bf16.mxu1 %vm486_vm0, %v4625_v51 }
  0xfd   : > { %v4790_v46 = vpop.f32.mrf.mxu0  ;;  %4060 = vmatmul.mubr.msk.bf16.gmra.mxu0 %vm486_vm0, %v4645_v17  ;;  %v2346_v17 = vpack.c.bf16 %v2330_v34, %v2329_v22  ;;  %v2603_v34 = vld [vmem:[#allocation2 + $0x79] sm:$0xff] }
  0xfe   : > { %4063 = vmatprep.mubr.msk.bf16.mxu0 %vm486_vm0, %v4647_v23  ;;  %v2597_v23 = vld [vmem:[#allocation2 + $0x31] sm:$0xff] }
  0xff   : > { %v4796_v47 = vpop.f32.mrf.mxu1  ;;  %4026 = vmatmul.mubr.msk.bf16.gmra.mxu1 %vm486_vm0, %v4627_v53  ;;  %v4800_v61 = vpop.f32.mrf.mxu0  ;;  %v2629_v30 = vpack.c.bf16 %v2598_v25, %v2597_v23  ;;  %v2605_v23 = vld [vmem:[#allocation2 + $0x91] sm:$0xff]  ;;  %v2606_v25 = vld [vmem:[#allocation2 + $0x99] sm:$0xff] }
 0x100   : > { %4029 = vmatprep.mubr.msk.bf16.mxu1 %vm486_vm0, %v4641_v6 }
 0x101   : > { %v4804_v3 = vpop.f32.mrf.mxu1  ;;  %v4806_v4 = vpop.f32.mrf.mxu0 }
 0x103   : > { %v4808_v5 = vpop.f32.mrf.mxu1  ;;  %v4810_v12 = vpop.f32.mrf.mxu0 }
 0x105   : > { %v4812_v21 = vpop.f32.mrf.mxu1  ;;  %v4814_v26 = vpop.f32.mrf.mxu0  ;;  %4064 = vmatmul.mubr.msk.bf16.gmra.mxu0 %vm486_vm0, %v4661_v45 }
 0x106   : > { %4067 = vmatprep.mubr.msk.bf16.mxu0 %vm486_vm0, %v4663_v48  ;;  %v2599_v48 = vld [vmem:[#allocation2 + $0x49] sm:$0xff] }
 0x107   : > { %v4820_v36 = vpop.f32.mrf.mxu1  ;;  %4030 = vmatmul.mubr.msk.bf16.gmra.mxu1 %vm486_vm0, %v4643_v16  ;;  %v4824_v44 = vpop.f32.mrf.mxu0  ;;  %v2630_v0 = vpack.c.bf16 %v2600_v50, %v2599_v48  ;;  %v2632_v50 = vpack.c.bf16 %v2604_v24, %v2603_v34  ;;  %v2608_v34 = vld [vmem:[#allocation2 + $0xb1] sm:$0xff] }
 0x108   : > { %4033 = vmatprep.mubr.msk.bf16.mxu1 %vm486_vm0, %v4657_v32 }
 0x109   : > { %v4828_v9 = vpop.f32.mrf.mxu1  ;;  %v4830_v49 = vpop.f32.mrf.mxu0 }
 0x10b   : > { %v4832_v35 = vpop.f32.mrf.mxu1  ;;  %v4834_v62 = vpop.f32.mrf.mxu0 }
 0x10d   : > { %v4836_v63 = vpop.f32.mrf.mxu1  ;;  %v4838_v20 = vpop.f32.mrf.mxu0  ;;  %4068 = vmatmul.mubr.msk.bf16.gmra.mxu0 %vm486_vm0, %v4675_v59  ;;  %v2602_v59 = vld [vmem:[#allocation2 + $0x69] sm:$0xff] }
 0x10e   : > { %4071 = vmatprep.mubr.msk.bf16.mxu0 %vm486_vm0, %v1451_v38  ;;  %v2631_v1 = vpack.c.bf16 %v2602_v59, %v2601_v56  ;;  %v2633_v59 = vpack.c.bf16 %v2606_v25, %v2605_v23  ;;  %v2610_v23 = vld [vmem:[#allocation2 + $0xc9] sm:$0xff] }
 0x10f   : > { %v4843_v39 = vpop.f32.mrf.mxu1  ;;  %4034 = vmatmul.mubr.msk.bf16.gmra.mxu1 %vm486_vm0, %v4659_v42  ;;  %v4847_v55 = vpop.f32.mrf.mxu0 }
 0x110   : > { %4037 = vmatprep.mubr.msk.bf16.mxu1 %vm486_vm0, %v4673_v58 }
 0x111   : > { %v4851_v7 = vpop.f32.mrf.mxu1  ;;  %v4853_v14 = vpop.f32.mrf.mxu0 }
 0x113   : > { %v4855_v27 = vpop.f32.mrf.mxu1  ;;  %v4857_v28 = vpop.f32.mrf.mxu0 }
 0x115   : > { %v4861_v31 = vpop.f32.mrf.mxu1  ;;  %v4863_v40 = vpop.f32.mrf.mxu0  ;;  %4072 = vmatmul.mubr.msk.bf16.gmra.mxu0 %vm486_vm0, %v2346_v17 }
 0x116   : > { %4111 = vmatprep.mubr.msk.bf16.mxu0 %vm486_vm0, %v4545_v43 }
 0x117   : > { %v4868_v41 = vpop.f32.mrf.mxu1  ;;  %4038 = vmatmul.mubr.msk.bf16.gmra.mxu1 %vm486_vm0, %v4859_v29  ;;  %v4872_v45 = vpop.f32.mrf.mxu0 }
 0x118   : > { %4077 = vmatprep.mubr.msk.bf16.mxu1 %vm486_vm0, %v2629_v30 }
 0x119   : > { %v4875_v52 = vpop.f32.mrf.mxu1  ;;  %v4877_v54 = vpop.f32.mrf.mxu0 }
 0x11b   : > { %v4879_v8 = vpop.f32.mrf.mxu1  ;;  %v4881_v43 = vpop.f32.mrf.mxu0 }
 0x11d   : > { %v4883_v10 = vpop.f32.mrf.mxu1  ;;  %v3909_v11 = vpop.f32.mrf.mxu0  ;;  %4112 = vmatmul.mubr.msk.bf16.vlgmr.msra.gmra.mxu0 %vm486_vm0, %v4576_v57 }
 0x11e   : > { %4115 = vmatprep.mubr.msk.bf16.mxu0 %vm486_vm0, %v4579_v60 }
 0x11f   : > { %v3875_v18 = vpop.f32.mrf.mxu1  ;;  %4078 = vmatmul.mubr.msk.bf16.vlgmr.msra.gmra.mxu1 %vm486_vm0, %v2630_v0  ;;  %v1245_v38 = vpop.f32.mrf.mxu0 }
 0x120   : > { %v988_v22 = vadd.f32 %v3875_v18, %v4790_v46  ;;  %4081 = vmatprep.mubr.msk.bf16.mxu1 %vm486_vm0, %v2631_v1 }
 0x121   : > { %v979_v2 = vpop.f32.mrf.mxu1  ;;  %v3910_v17 = vpop.f32.mrf.mxu0 }
 0x122   : > { %v980_v30 = vadd.f32 %v979_v2, %v4800_v61  ;;  %v4893_v57 = vadd.f32 %v3909_v11, %v988_v22 }
 0x123   : > { %v3876_v48 = vpop.f32.mrf.mxu1  ;;  %v1248_v60 = vpop.f32.mrf.mxu0 }
 0x124   : > { %v991_v56 = vadd.f32 %v3876_v48, %v4806_v4  ;;  %v4896_v0 = vadd.f32 %v1245_v38, %v980_v30  ;;  %v2607_v38 = vld [vmem:[#allocation2 + $0xa9] sm:$0xff] }
 0x125   : > { %v982_v46 = vpop.f32.mrf.mxu1  ;;  %v3913_v1 = vpop.f32.mrf.mxu0  ;;  %4116 = vmatmul.mubr.msk.bf16.gmra.mxu0 %vm486_vm0, %v4593_v15  ;;  %v2634_v48 = vpack.c.bf16 %v2608_v34, %v2607_v38  ;;  %v2614_v34 = vld [vmem:[#allocation2 + $0xf9] sm:$0xff] }
 0x126   : > { %v983_v18 = vadd.f32 %v982_v46, %v4810_v12  ;;  %4119 = vmatprep.mubr.msk.bf16.mxu0 %vm486_vm0, %v4595_v19  ;;  %v4903_v61 = vadd.f32 %v3910_v17, %v991_v56  ;;  %v2609_v12 = vld [vmem:[#allocation2 + $0xc1] sm:$0xff] }
 0x127   : > { %v3879_v11 = vpop.f32.mrf.mxu1  ;;  %4082 = vmatmul.mubr.msk.bf16.gmra.mxu1 %vm486_vm0, %v2632_v50  ;;  %v1261_v22 = vpop.f32.mrf.mxu0 }
 0x128   : > { %v1004_v4 = vadd.f32 %v3879_v11, %v4814_v26  ;;  %4085 = vmatprep.mubr.msk.bf16.mxu1 %vm486_vm0, %v2633_v59  ;;  %v4908_v24 = vadd.f32 %v1248_v60, %v983_v18  ;;  %v2635_v26 = vpack.c.bf16 %v2610_v23, %v2609_v12  ;;  %v2611_v11 = vld [vmem:[#allocation2 + $0xd9] sm:$0xff] }
 0x129   : > { %v995_v15 = vpop.f32.mrf.mxu1  ;;  %v3914_v2 = vpop.f32.mrf.mxu0 }
 0x12a   : > { %v996_v19 = vadd.f32 %v995_v15, %v4824_v44  ;;  %v4911_v17 = vadd.f32 %v3913_v1, %v1004_v4 }
 0x12b   : > { %v3880_v25 = vpop.f32.mrf.mxu1  ;;  %v1264_v30 = vpop.f32.mrf.mxu0 }
 0x12c   : > { %v1007_v50 = vadd.f32 %v3880_v25, %v4830_v49  ;;  %v4914_v56 = vadd.f32 %v1261_v22, %v996_v19  ;;  %v2612_v22 = vld [vmem:[#allocation2 + $0xe1] sm:$0xff] }
 0x12d   : > { %v998_v59 = vpop.f32.mrf.mxu1  ;;  %v3917_v46 = vpop.f32.mrf.mxu0  ;;  %4120 = vmatmul.mubr.msk.bf16.gmra.mxu0 %vm486_vm0, %v4609_v13  ;;  %v2636_v23 = vpack.c.bf16 %v2612_v22, %v2611_v11 }
 0x12e   : > { %v999_v60 = vadd.f32 %v998_v59, %v4834_v62  ;;  %4123 = vmatprep.mubr.msk.bf16.mxu0 %vm486_vm0, %v4611_v33  ;;  %v4921_v44 = vadd.f32 %v3914_v2, %v1007_v50  ;;  %v2613_v62 = vld [vmem:[#allocation2 + $0xf1] sm:$0xff] }
 0x12f   : > { %v3883_v1 = vpop.f32.mrf.mxu1  ;;  %4086 = vmatmul.mubr.msk.bf16.gmra.mxu1 %vm486_vm0, %v2634_v48  ;;  %v1277_v18 = vpop.f32.mrf.mxu0 }
 0x130   : > { %v1020_v49 = vadd.f32 %v3883_v1, %v4838_v20  ;;  %4089 = vmatprep.mubr.msk.bf16.mxu1 %vm486_vm0, %v2635_v26  ;;  %v4926_v4 = vadd.f32 %v1264_v30, %v999_v60  ;;  %v2637_v20 = vpack.c.bf16 %v2614_v34, %v2613_v62  ;;  %v2616_v60 = vld [vmem:[#allocation2 + $0x111] sm:$0xff] }
 0x131   : > { %v1011_v13 = vpop.f32.mrf.mxu1  ;;  %v3918_v38 = vpop.f32.mrf.mxu0 }
 0x132   : > { %v1012_v33 = vadd.f32 %v1011_v13, %v4847_v55  ;;  %v4929_v15 = vadd.f32 %v3917_v46, %v1020_v49  ;;  %v2615_v46 = vld [vmem:[#allocation2 + $0x109] sm:$0xff] }
 0x133   : > { %v3884_v2 = vpop.f32.mrf.mxu1  ;;  %v1280_v12 = vpop.f32.mrf.mxu0  ;;  %v2618_v49 = vld [vmem:[#allocation2 + $0x129] sm:$0xff] }
 0x134   : > { %v1023_v19 = vadd.f32 %v3884_v2, %v4853_v14  ;;  %v4932_v25 = vadd.f32 %v1277_v18, %v1012_v33 }
 0x135   : > { %v1014_v48 = vpop.f32.mrf.mxu1  ;;  %v3921_v50 = vpop.f32.mrf.mxu0  ;;  %4124 = vmatmul.mubr.msk.bf16.gmra.mxu0 %vm486_vm0, %v4625_v51 }
 0x136   : > { %v1015_v30 = vadd.f32 %v1014_v48, %v4857_v28  ;;  %4127 = vmatprep.mubr.msk.bf16.mxu0 %vm486_vm0, %v4627_v53  ;;  %v4939_v55 = vadd.f32 %v3918_v38, %v1023_v19  ;;  %v2617_v28 = vld [vmem:[#allocation2 + $0x121] sm:$0xff]  ;;  %v2638_v38 = vpack.c.bf16 %v2616_v60, %v2615_v46 }
 0x137   : > { %v3887_v26 = vpop.f32.mrf.mxu1  ;;  %4090 = vmatmul.mubr.msk.bf16.gmra.mxu1 %vm486_vm0, %v2636_v23  ;;  %v1293_v59 = vpop.f32.mrf.mxu0  ;;  %v2620_v48 = vld [vmem:[#allocation2 + $0x141] sm:$0xff] }
 0x138   : > { %v1036_v14 = vadd.f32 %v3887_v26, %v4863_v40  ;;  %4093 = vmatprep.mubr.msk.bf16.mxu1 %vm486_vm0, %v2637_v20  ;;  %v4944_v1 = vadd.f32 %v1280_v12, %v1015_v30  ;;  %v2639_v40 = vpack.c.bf16 %v2618_v49, %v2617_v28  ;;  %v2619_v20 = vld [vmem:[#allocation2 + $0x139] sm:$0xff] }
 0x139   : > { %v1027_v51 = vpop.f32.mrf.mxu1  ;;  %v3922_v18 = vpop.f32.mrf.mxu0  ;;  %v2622_v26 = vld [vmem:[#allocation2 + $0x159] sm:$0xff]  ;;  %v2640_v60 = vpack.c.bf16 %v2620_v48, %v2619_v20 }
 0x13a   : > { %v1028_v53 = vadd.f32 %v1027_v51, %v4872_v45  ;;  %v4947_v11 = vadd.f32 %v3921_v50, %v1036_v14 }
 0x13b   : > { %v3888_v22 = vpop.f32.mrf.mxu1  ;;  %v1296_v13 = vpop.f32.mrf.mxu0 }
 0x13c   : > { %v1039_v62 = vadd.f32 %v3888_v22, %v4877_v54  ;;  %v4950_v34 = vadd.f32 %v1293_v59, %v1028_v53 }
 0x13d   : > { %v1030_v33 = vpop.f32.mrf.mxu1  ;;  %v3925_v2 = vpop.f32.mrf.mxu0  ;;  %4128 = vmatmul.mubr.msk.bf16.gmra.mxu0 %vm486_vm0, %v4641_v6 }
 0x13e   : > { %v1031_v12 = vadd.f32 %v1030_v33, %v4881_v43  ;;  %4131 = vmatprep.mubr.msk.bf16.mxu0 %vm486_vm0, %v4643_v16  ;;  %v4957_v45 = vadd.f32 %v3922_v18, %v1039_v62  ;;  %v2621_v43 = vld [vmem:[#allocation2 + $0x151] sm:$0xff] }
 0x13f   : > { %v3891_v23 = vpop.f32.mrf.mxu1  ;;  %4094 = vmatmul.mubr.msk.bf16.gmra.mxu1 %vm486_vm0, %v2638_v38  ;;  %v1309_v19 = vpop.f32.mrf.mxu0  ;;  %v2623_v38 = vld [vmem:[#allocation2 + $0x169] sm:$0xff]  ;;  %v2624_v62 = vld [vmem:[#allocation2 + $0x171] sm:$0xff] }
 0x140   : > { %v1052_v54 = vadd.f32 %v3891_v23, %v4796_v47  ;;  %4097 = vmatprep.mubr.msk.bf16.mxu1 %vm486_vm0, %v2639_v40  ;;  %v4962_v50 = vadd.f32 %v1296_v13, %v1031_v12  ;;  %v2641_v47 = vpack.c.bf16 %v2622_v26, %v2621_v43  ;;  %v2642_v23 = vpack.c.bf16 %v2624_v62, %v2623_v38 }
 0x141   : > { %v1043_v6 = vpop.f32.mrf.mxu1  ;;  %v3926_v30 = vpop.f32.mrf.mxu0 }
 0x142   : > { %v1044_v16 = vadd.f32 %v1043_v6, %v4804_v3  ;;  %v4965_v59 = vadd.f32 %v3925_v2, %v1052_v54  ;;  %v2926_v6 = vld [vmem:[#allocation2 + $0x1a2] sm:$0xff] }
 0x143   : > { %v3892_v14 = vpop.f32.mrf.mxu1  ;;  %v1312_v46 = vpop.f32.mrf.mxu0 }
 0x144   : > { %v1055_v51 = vadd.f32 %v3892_v14, %v4808_v5  ;;  %v4968_v18 = vadd.f32 %v1309_v19, %v1044_v16  ;;  %v2627_v16 = vld [vmem:[#allocation2 + $0x199] sm:$0xff] }
 0x145   : > { %v1046_v28 = vpop.f32.mrf.mxu1  ;;  %v3929_v49 = vpop.f32.mrf.mxu0  ;;  %4132 = vmatmul.mubr.msk.bf16.gmra.mxu0 %vm486_vm0, %v4657_v32 }
 0x146   : > { %v1047_v53 = vadd.f32 %v1046_v28, %v4812_v21  ;;  %4135 = vmatprep.mubr.msk.bf16.mxu0 %vm486_vm0, %v4659_v42  ;;  %v4975_v3 = vadd.f32 %v3926_v30, %v1055_v51 }
 0x147   : > { %v3895_v22 = vpop.f32.mrf.mxu1  ;;  %4098 = vmatmul.mubr.msk.bf16.gmra.mxu1 %vm486_vm0, %v2640_v60  ;;  %v1325_v13 = vpop.f32.mrf.mxu0 }
 0x148   : > { %v1068_v5 = vadd.f32 %v3895_v22, %v4820_v36  ;;  %4101 = vmatprep.mubr.msk.bf16.mxu1 %vm486_vm0, %v2641_v47  ;;  %v4980_v40 = vadd.f32 %v1312_v46, %v1047_v53 }
 0x149   : > { %v1059_v32 = vpop.f32.mrf.mxu1  ;;  %v3930_v33 = vpop.f32.mrf.mxu0 }
 0x14a   : > { %v1060_v21 = vadd.f32 %v1059_v32, %v4828_v9  ;;  %v4983_v2 = vadd.f32 %v3929_v49, %v1068_v5  ;;  %v2925_v9 = vld [vmem:[#allocation2 + $0x19a] sm:$0xff] }
 0x14b   : > { %v3896_v42 = vpop.f32.mrf.mxu1  ;;  %v1328_v12 = vpop.f32.mrf.mxu0 }
 0x14c   : > { %v1071_v19 = vadd.f32 %v3896_v42, %v4832_v35  ;;  %v4986_v54 = vadd.f32 %v1325_v13, %v1060_v21 }
 0x14d   : > { %v1062_v36 = vpop.f32.mrf.mxu1  ;;  %v3933_v20 = vpop.f32.mrf.mxu0  ;;  %4136 = vmatmul.mubr.msk.bf16.gmra.mxu0 %vm486_vm0, %v4673_v58  ;;  %v2628_v58 = vld [vmem:[#allocation2 + $0x1a1] sm:$0xff] }
 0x14e   : > { %v1063_v48 = vadd.f32 %v1062_v36, %v4836_v63  ;;  %4139 = vmatprep.mubr.msk.bf16.mxu0 %vm486_vm0, %v4859_v29  ;;  %v4993_v30 = vadd.f32 %v3930_v33, %v1071_v19  ;;  %v2942_v29 = vpack.c.bf16 %v2926_v6, %v2925_v9  ;;  %v2644_v49 = vpack.c.bf16 %v2628_v58, %v2627_v16 }
 0x14f   : > { %v3899_v43 = vpop.f32.mrf.mxu1  ;;  %4102 = vmatmul.mubr.msk.bf16.gmra.mxu1 %vm486_vm0, %v2642_v23  ;;  %v1341_v35 = vpop.f32.mrf.mxu0 }
 0x150   : > { %v1084_v26 = vadd.f32 %v3899_v43, %v4843_v39  ;;  %4105 = vmatprep.mubr.msk.bf16.mxu1 %vm486_vm0, %v4749_v37  ;;  %v4999_v14 = vadd.f32 %v1328_v12, %v1063_v48 }
 0x151   : > { %v1075_v63 = vpop.f32.mrf.mxu1  ;;  %v3934_v46 = vpop.f32.mrf.mxu0 }
 0x152   : > { %v1076_v60 = vadd.f32 %v1075_v63, %v4851_v7  ;;  %v5002_v51 = vadd.f32 %v3933_v20, %v1084_v26 }
 0x153   : > { %v3900_v47 = vpop.f32.mrf.mxu1  ;;  %v1344_v28 = vpop.f32.mrf.mxu0 }
 0x154   : > { %v1087_v53 = vadd.f32 %v3900_v47, %v4855_v27  ;;  %v5005_v39 = vadd.f32 %v1341_v35, %v1076_v60 }
 0x155   : > { %v1078_v22 = vpop.f32.mrf.mxu1  ;;  %v3937_v37 = vpop.f32.mrf.mxu0  ;;  %4140 = vmatmul.mubr.msk.bf16.gmra.mxu0 %vm486_vm0, %v2942_v29 }
 0x156   : > { %v1079_v13 = vadd.f32 %v1078_v22, %v4861_v31  ;;  %v5009_v5 = vadd.f32 %v3934_v46, %v1087_v53 }
 0x157   : > { %v3903_v38 = vpop.f32.mrf.mxu1  ;;  %4106 = vmatmul.mubr.msk.bf16.gmra.mxu1 %vm486_vm0, %v2644_v49  ;;  %v1357_v7 = vpop.f32.mrf.mxu0 }
 0x158   : > { %v1100_v62 = vadd.f32 %v3903_v38, %v4868_v41  ;;  %v5013_v32 = vadd.f32 %v1344_v28, %v1079_v13 }
 0x159   : > { %v1091_v33 = vpop.f32.mrf.mxu1  ;;  %v3938_v27 = vpop.f32.mrf.mxu0 }
 0x15a   : > { %v1092_v21 = vadd.f32 %v1091_v33, %v4875_v52  ;;  %v5016_v42 = vadd.f32 %v3937_v37, %v1100_v62 }
 0x15b   : > { %v3904_v12 = vpop.f32.mrf.mxu1  ;;  %v1360_v23 = vpop.f32.mrf.mxu0 }
 0x15c   : > { %v1103_v31 = vadd.f32 %v3904_v12, %v4879_v8  ;;  %v5019_v19 = vadd.f32 %v1357_v7, %v1092_v21 }
 0x15d   : > { %v1094_v36 = vpop.f32.mrf.mxu1  ;;  %v3977_v20 = vpop.f32.mrf.mxu0 }
 0x15e   : > { %v1095_v48 = vadd.f32 %v1094_v36, %v4883_v10  ;;  %v5022_v9 = vadd.f32 %v3938_v27, %v1103_v31 }
 0x15f   : > { %v3943_v41 = vpop.f32.mrf.mxu1  ;;  %v1841_v6 = vpop.f32.mrf.mxu0 }
 0x160   : > { %v1672_v43 = vadd.f32 %v3943_v41, %v4893_v57  ;;  %v5025_v35 = vadd.f32 %v1360_v23, %v1095_v48 }
 0x161   : > { %v1543_v52 = vpop.f32.mrf.mxu1  ;;  %v3978_v26 = vpop.f32.mrf.mxu0 }
 0x162   : > { %v1670_v16 = vadd.f32 %v1543_v52, %v4896_v0  ;;  %v5028_v58 = vadd.f32 %v3977_v20, %v1672_v43 }
 0x163   : > { %v3944_v8 = vpop.f32.mrf.mxu1  ;;  %v1844_v63 = vpop.f32.mrf.mxu0 }
 0x164   : > { %v1673_v46 = vadd.f32 %v3944_v8, %v4903_v61  ;;  %v5031_v29 = vadd.f32 %v1841_v6, %v1670_v16 }
 0x165   : > { %v1546_v10 = vpop.f32.mrf.mxu1  ;;  %v3981_v60 = vpop.f32.mrf.mxu0 }
 0x166   : > { %v1671_v47 = vadd.f32 %v1546_v10, %v4908_v24  ;;  %v5034_v28 = vadd.f32 %v3978_v26, %v1673_v46 }
 0x167   : > { %v3947_v57 = vpop.f32.mrf.mxu1  ;;  %v1857_v49 = vpop.f32.mrf.mxu0 }
 0x168   : > { %v1676_v53 = vadd.f32 %v3947_v57, %v4911_v17  ;;  %v5037_v22 = vadd.f32 %v1844_v63, %v1671_v47 }
 0x169   : > { %v1559_v0 = vpop.f32.mrf.mxu1  ;;  %v3982_v37 = vpop.f32.mrf.mxu0 }
 0x16a   : > { %v1674_v13 = vadd.f32 %v1559_v0, %v4914_v56  ;;  %v5040_v38 = vadd.f32 %v3981_v60, %v1676_v53 }
 0x16b   : > { %v3948_v61 = vpop.f32.mrf.mxu1  ;;  %v1860_v7 = vpop.f32.mrf.mxu0 }
 0x16c   : > { %v1677_v62 = vadd.f32 %v3948_v61, %v4921_v44  ;;  %v5043_v33 = vadd.f32 %v1857_v49, %v1674_v13 }
 0x16d   : > { %v1562_v24 = vpop.f32.mrf.mxu1  ;;  %v3985_v27 = vpop.f32.mrf.mxu0 }
 0x16e   : > { %v1675_v21 = vadd.f32 %v1562_v24, %v4926_v4  ;;  %v5046_v12 = vadd.f32 %v3982_v37, %v1677_v62 }
 0x16f   : > { %v3951_v17 = vpop.f32.mrf.mxu1  ;;  %v1873_v23 = vpop.f32.mrf.mxu0 }
 0x170   : > { %v1680_v31 = vadd.f32 %v3951_v17, %v4929_v15  ;;  %v5049_v36 = vadd.f32 %v1860_v7, %v1675_v21 }
 0x171   : > { %v1575_v56 = vpop.f32.mrf.mxu1  ;;  %v3986_v20 = vpop.f32.mrf.mxu0 }
 0x172   : > { %v1678_v48 = vadd.f32 %v1575_v56, %v4932_v25  ;;  %v5052_v41 = vadd.f32 %v3985_v27, %v1680_v31 }
 0x173   : > { %v3952_v44 = vpop.f32.mrf.mxu1  ;;  %v1876_v6 = vpop.f32.mrf.mxu0 }
 0x174   : > { %v1681_v43 = vadd.f32 %v3952_v44, %v4939_v55  ;;  %v5055_v52 = vadd.f32 %v1873_v23, %v1678_v48 }
 0x175   : > { %v1578_v4 = vpop.f32.mrf.mxu1  ;;  %v3989_v26 = vpop.f32.mrf.mxu0 }
 0x176   : > { %v1679_v16 = vadd.f32 %v1578_v4, %v4944_v1  ;;  %v5058_v8 = vadd.f32 %v3986_v20, %v1681_v43 }
 0x177   : > { %v3955_v15 = vpop.f32.mrf.mxu1  ;;  %v1889_v63 = vpop.f32.mrf.mxu0 }
 0x178   : > { %v1684_v46 = vadd.f32 %v3955_v15, %v4947_v11  ;;  %v5061_v10 = vadd.f32 %v1876_v6, %v1679_v16 }
 0x179   : > { %v1591_v25 = vpop.f32.mrf.mxu1  ;;  %v3990_v60 = vpop.f32.mrf.mxu0 }
 0x17a   : > { %v1682_v47 = vadd.f32 %v1591_v25, %v4950_v34  ;;  %v5064_v57 = vadd.f32 %v3989_v26, %v1684_v46 }
 0x17b   : > { %v3956_v55 = vpop.f32.mrf.mxu1  ;;  %v1892_v49 = vpop.f32.mrf.mxu0 }
 0x17c   : > { %v1685_v53 = vadd.f32 %v3956_v55, %v4957_v45  ;;  %v5067_v0 = vadd.f32 %v1889_v63, %v1682_v47 }
 0x17d   : > { %v1594_v1 = vpop.f32.mrf.mxu1  ;;  %v3993_v37 = vpop.f32.mrf.mxu0 }
 0x17e   : > { %v1683_v13 = vadd.f32 %v1594_v1, %v4962_v50  ;;  %v5070_v61 = vadd.f32 %v3990_v60, %v1685_v53 }
 0x17f   : > { %v3959_v11 = vpop.f32.mrf.mxu1  ;;  %v1905_v7 = vpop.f32.mrf.mxu0 }
 0x180   : > { %v1688_v62 = vadd.f32 %v3959_v11, %v4965_v59  ;;  %v5073_v24 = vadd.f32 %v1892_v49, %v1683_v13 }
 0x181   : > { %v1607_v34 = vpop.f32.mrf.mxu1  ;;  %v3994_v27 = vpop.f32.mrf.mxu0 }
 0x182   : > { %v1686_v21 = vadd.f32 %v1607_v34, %v4968_v18  ;;  %v5076_v17 = vadd.f32 %v3993_v37, %v1688_v62 }
 0x183   : > { %v3960_v45 = vpop.f32.mrf.mxu1  ;;  %v1908_v23 = vpop.f32.mrf.mxu0 }
 0x184   : > { %v1689_v31 = vadd.f32 %v3960_v45, %v4975_v3  ;;  %v5079_v56 = vadd.f32 %v1905_v7, %v1686_v21 }
 0x185   : > { %v1610_v50 = vpop.f32.mrf.mxu1  ;;  %v3997_v20 = vpop.f32.mrf.mxu0 }
 0x186   : > { %v1687_v48 = vadd.f32 %v1610_v50, %v4980_v40  ;;  %v5082_v44 = vadd.f32 %v3994_v27, %v1689_v31 }
 0x187   : > { %v3963_v59 = vpop.f32.mrf.mxu1  ;;  %v1921_v6 = vpop.f32.mrf.mxu0 }
 0x188   : > { %v1692_v43 = vadd.f32 %v3963_v59, %v4983_v2  ;;  %v5085_v4 = vadd.f32 %v1908_v23, %v1687_v48 }
 0x189   : > { %v1623_v18 = vpop.f32.mrf.mxu1  ;;  %v3998_v26 = vpop.f32.mrf.mxu0 }
 0x18a   : > { %5536 = vst [vmem:[#allocation3_spill] sm:$0xff] %v5085_v4  ;;  %v1690_v16 = vadd.f32 %v1623_v18, %v4986_v54  ;;  %v5088_v15 = vadd.f32 %v3997_v20, %v1692_v43 }
 0x18b   : > { %v3964_v3 = vpop.f32.mrf.mxu1  ;;  %v1924_v63 = vpop.f32.mrf.mxu0 }
 0x18c   : > { %5537 = vst [vmem:[#allocation4_spill] sm:$0xff] %v5088_v15  ;;  %v1693_v46 = vadd.f32 %v3964_v3, %v4993_v30  ;;  %v5091_v25 = vadd.f32 %v1921_v6, %v1690_v16 }
 0x18d   : > { %v1626_v40 = vpop.f32.mrf.mxu1  ;;  %v4001_v60 = vpop.f32.mrf.mxu0 }
 0x18e   : > { %5538 = vst [vmem:[#allocation5_spill] sm:$0xff] %v5091_v25  ;;  %v1691_v47 = vadd.f32 %v1626_v40, %v4999_v14  ;;  %v5094_v55 = vadd.f32 %v3998_v26, %v1693_v46 }
 0x18f   : > { %v3967_v2 = vpop.f32.mrf.mxu1  ;;  %v1937_v49 = vpop.f32.mrf.mxu0 }
 0x190   : > { %5539 = vst [vmem:[#allocation6_spill] sm:$0xff] %v5094_v55  ;;  %v1696_v53 = vadd.f32 %v3967_v2, %v5002_v51  ;;  %v5097_v1 = vadd.f32 %v1924_v63, %v1691_v47 }
 0x191   : > { %v1639_v54 = vpop.f32.mrf.mxu1  ;;  %v4002_v37 = vpop.f32.mrf.mxu0 }
 0x192   : > { %5540 = vst [vmem:[#allocation7_spill] sm:$0xff] %v5097_v1  ;;  %v1694_v13 = vadd.f32 %v1639_v54, %v5005_v39  ;;  %v5100_v11 = vadd.f32 %v4001_v60, %v1696_v53 }
 0x193   : > { %v3968_v30 = vpop.f32.mrf.mxu1  ;;  %v1940_v7 = vpop.f32.mrf.mxu0 }
 0x194   : > { %5541 = vst [vmem:[#allocation8_spill] sm:$0xff] %v5100_v11  ;;  %v1697_v62 = vadd.f32 %v3968_v30, %v5009_v5  ;;  %v5103_v34 = vadd.f32 %v1937_v49, %v1694_v13 }
 0x195   : > { %v1642_v14 = vpop.f32.mrf.mxu1  ;;  %v4005_v27 = vpop.f32.mrf.mxu0 }
 0x196   : > { %5542 = vst [vmem:[#allocation9_spill] sm:$0xff] %v5103_v34  ;;  %v1695_v21 = vadd.f32 %v1642_v14, %v5013_v32  ;;  %v5106_v45 = vadd.f32 %v4002_v37, %v1697_v62 }
 0x197   : > { %v3971_v51 = vpop.f32.mrf.mxu1  ;;  %v1953_v23 = vpop.f32.mrf.mxu0 }
 0x198   : > { %5543 = vst [vmem:[#allocation10_spill] sm:$0xff] %v5106_v45  ;;  %v1700_v31 = vadd.f32 %v3971_v51, %v5016_v42  ;;  %v5109_v50 = vadd.f32 %v1940_v7, %v1695_v21 }
 0x199   : > { %v1655_v39 = vpop.f32.mrf.mxu1  ;;  %v4006_v20 = vpop.f32.mrf.mxu0 }
 0x19a   : > { %5544 = vst [vmem:[#allocation11_spill] sm:$0xff] %v5109_v50  ;;  %v1698_v48 = vadd.f32 %v1655_v39, %v5019_v19  ;;  %v5112_v59 = vadd.f32 %v4005_v27, %v1700_v31 }
 0x19b   : > { %v3972_v5 = vpop.f32.mrf.mxu1  ;;  %v1956_v6 = vpop.f32.mrf.mxu0 }
 0x19c   : > { %5545 = vst [vmem:[#allocation12_spill] sm:$0xff] %v5112_v59  ;;  %v1701_v43 = vadd.f32 %v3972_v5, %v5022_v9  ;;  %v5115_v18 = vadd.f32 %v1953_v23, %v1698_v48 }
 0x19d   : > { %v1658_v32 = vpop.f32.mrf.mxu1  ;;  %v5117_v26 = vpop.f32.mrf.mxu0 }
 0x19e   : > { %5546 = vst [vmem:[#allocation13_spill] sm:$0xff] %v5115_v18  ;;  %v1699_v16 = vadd.f32 %v1658_v32, %v5025_v35  ;;  %v5120_v42 = vadd.f32 %v4006_v20, %v1701_v43 }
 0x19f   : > { %v4011_v3 = vpop.f32.mrf.mxu1  ;;  %v5122_v63 = vpop.f32.mrf.mxu0 }
 0x1a0   : > { %5547 = vst [vmem:[#allocation14_spill] sm:$0xff] %v5120_v42  ;;  %v5124_v46 = vadd.f32 %v1956_v6, %v1699_v16 }
 0x1a1   : > { %v2139_v19 = vpop.f32.mrf.mxu1  ;;  %v5126_v40 = vpop.f32.mrf.mxu0 }
 0x1a2   : > { %5548 = vst [vmem:[#allocation15_spill] sm:$0xff] %v5124_v46 }
 0x1a3   : > { %v4012_v60 = vpop.f32.mrf.mxu1  ;;  %v5128_v47 = vpop.f32.mrf.mxu0 }
 0x1a5   : > { %v2142_v9 = vpop.f32.mrf.mxu1  ;;  %v5130_v2 = vpop.f32.mrf.mxu0 }
 0x1a7   : > { %v4015_v49 = vpop.f32.mrf.mxu1  ;;  %v5132_v53 = vpop.f32.mrf.mxu0 }
 0x1a9   : > { %v2155_v35 = vpop.f32.mrf.mxu1  ;;  %v5134_v54 = vpop.f32.mrf.mxu0 }
 0x1ab   : > { %v5136_v37 = vpop.f32.mrf.mxu1  ;;  %v5138_v13 = vpop.f32.mrf.mxu0 }
 0x1ad   : > { %v5140_v30 = vpop.f32.mrf.mxu1  ;;  %v5142_v7 = vpop.f32.mrf.mxu0 }
 0x1af   : > { %v5144_v62 = vpop.f32.mrf.mxu1  ;;  %v5146_v14 = vpop.f32.mrf.mxu0 }
 0x1b1   : > { %v5148_v27 = vpop.f32.mrf.mxu1  ;;  %v5150_v21 = vpop.f32.mrf.mxu0 }
 0x1b3   : > { %v5152_v51 = vpop.f32.mrf.mxu1  ;;  %v5154_v23 = vpop.f32.mrf.mxu0 }
 0x1b5   : > { %v5156_v31 = vpop.f32.mrf.mxu1  ;;  %v5158_v39 = vpop.f32.mrf.mxu0 }
 0x1b7   : > { %v5160_v20 = vpop.f32.mrf.mxu1  ;;  %v5162_v48 = vpop.f32.mrf.mxu0 }
 0x1b9   : > { %v5164_v5 = vpop.f32.mrf.mxu1  ;;  %v5166_v6 = vpop.f32.mrf.mxu0 }
 0x1bb   : > { %v5168_v43 = vpop.f32.mrf.mxu1  ;;  %v5170_v32 = vpop.f32.mrf.mxu0 }
 0x1bc   : > { %5549 = vst [vmem:[#allocation16_spill] sm:$0xff] %v5170_v32 }
 0x1bd   : > { %v5172_v16 = vpop.f32.mrf.mxu1  ;;  %v5174_v46 = vpop.f32.mrf.mxu0 }
 0x1be   : > { %5550 = vst [vmem:[#allocation17_spill] sm:$0xff] %v5174_v46 }
 0x1bf   : > { %v5176_v42 = vpop.f32.mrf.mxu1  ;;  %v5178_v18 = vpop.f32.mrf.mxu0 }
 0x1c0   : > { %5551 = vst [vmem:[#allocation18_spill] sm:$0xff] %v5178_v18 }
 0x1c1   : > { %v5180_v59 = vpop.f32.mrf.mxu1  ;;  %v5182_v50 = vpop.f32.mrf.mxu0 }
 0x1c2   : > { %5552 = vst [vmem:[#allocation19_spill] sm:$0xff] %v5182_v50 }
 0x1c3   : > { %v5184_v45 = vpop.f32.mrf.mxu1  ;;  %v5186_v34 = vpop.f32.mrf.mxu0 }
 0x1c4   : > { %5553 = vst [vmem:[#allocation20_spill] sm:$0xff] %v5186_v34 }
 0x1c5   : > { %v5188_v11 = vpop.f32.mrf.mxu1  ;;  %v5190_v1 = vpop.f32.mrf.mxu0 }
 0x1c6   : > { %5554 = vst [vmem:[#allocation21_spill] sm:$0xff] %v5188_v11  ;;  %5555 = vst [vmem:[#allocation22_spill] sm:$0xff] %v5190_v1 }
 0x1c7   : > { %v5192_v55 = vpop.f32.mrf.mxu1  ;;  %v5194_v25 = vpop.f32.mrf.mxu0 }
 0x1c8   : > { %5556 = vst [vmem:[#allocation23_spill] sm:$0xff] %v5192_v55  ;;  %5557 = vst [vmem:[#allocation24_spill] sm:$0xff] %v5194_v25 }
 0x1c9   : > { %v5196_v15 = vpop.f32.mrf.mxu1  ;;  %v5198_v4 = vpop.f32.mrf.mxu0 }
 0x1ca   : > { %5558 = vst [vmem:[#allocation25_spill] sm:$0xff] %v5196_v15  ;;  %5559 = vst [vmem:[#allocation26_spill] sm:$0xff] %v5198_v4 }
 0x1cb   : > { %v5200_v18 = vpop.f32.mrf.mxu1  ;;  %v5202_v46 = vpop.f32.mrf.mxu0 }
 0x1cc   : > { %5560 = vst [vmem:[#allocation27_spill] sm:$0xff] %v5200_v18  ;;  %5561 = vst [vmem:[#allocation28_spill] sm:$0xff] %v5202_v46 }
 0x1cd   : > { %v5204_v50 = vpop.f32.mrf.mxu1  ;;  %v5206_v32 = vpop.f32.mrf.mxu0 }
 0x1ce   : > { %5562 = vst [vmem:[#allocation29_spill] sm:$0xff] %v5204_v50  ;;  %5563 = vst [vmem:[#allocation30_spill] sm:$0xff] %v5206_v32 }
 0x1cf   : > { %v5208_v34 = vpop.f32.mrf.mxu1  ;;  %v5210_v11 = vpop.f32.mrf.mxu0 }
 0x1d0   : > { %5564 = vst [vmem:[#allocation31_spill] sm:$0xff] %v5208_v34  ;;  %5565 = vst [vmem:[#allocation32_spill] sm:$0xff] %v5210_v11  ;;  %v2268_v11 = vadd.f32 %v4011_v3, %v5028_v58  ;;  %v2270_v58 = vadd.f32 %v2155_v35, %v5043_v33 }
 0x1d1   : > { %v5212_v1 = vpop.f32.mrf.mxu1  ;;  %v5214_v55 = vpop.f32.mrf.mxu0 }
 0x1d2   : > { %5566 = vst [vmem:[#allocation33_spill] sm:$0xff] %v5212_v1  ;;  %5567 = vst [vmem:[#allocation34_spill] sm:$0xff] %v5214_v55 }
 0x1d3   : > { %v5216_v25 = vpop.f32.mrf.mxu1  ;;  %v5218_v15 = vpop.f32.mrf.mxu0 }
 0x1d4   : > { %5568 = vst [vmem:[#allocation35_spill] sm:$0xff] %v5216_v25  ;;  %5569 = vst [vmem:[#allocation36_spill] sm:$0xff] %v5218_v15  ;;  %v2266_v15 = vadd.f32 %v2139_v19, %v5031_v29 }
 0x1d5   : > { %v5220_v4 = vpop.f32.mrf.mxu1  ;;  %v5222_v18 = vpop.f32.mrf.mxu0 }
 0x1d6   : > { %5570 = vst [vmem:[#allocation37_spill] sm:$0xff] %v5220_v4  ;;  %5571 = vst [vmem:[#allocation38_spill] sm:$0xff] %v5222_v18  ;;  %v2269_v4 = vadd.f32 %v4012_v60, %v5034_v28  ;;  %v2267_v18 = vadd.f32 %v2142_v9, %v5037_v22  ;;  %v2273_v22 = vadd.f32 %v5136_v37, %v5046_v12 }
 0x1d7   : > { %v5224_v46 = vpop.f32.mrf.mxu1  ;;  %v5226_v50 = vpop.f32.mrf.mxu0  ;;  %v2274_v12 = vadd.f32 %v5148_v27, %v5055_v52  ;;  %v2281_v52 = vadd.f32 %v5168_v43, %v5070_v61 }
 0x1d8   : > { %5572 = vst [vmem:[#allocation39_spill] sm:$0xff] %v5224_v46  ;;  %5573 = vst [vmem:[#allocation40_spill] sm:$0xff] %v5226_v50  ;;  %v2272_v46 = vadd.f32 %v4015_v49, %v5040_v38  ;;  %v2568_v29 = vadd.f32 %v5126_v40, %v2269_v4  ;;  %v2566_v28 = vadd.f32 %v5128_v47, %v2267_v18 }
 0x1d9   : > { %v5228_v32 = vpop.f32.mrf.mxu1  ;;  %v5230_v34 = vpop.f32.mrf.mxu0  ;;  %v2271_v38 = vadd.f32 %v5140_v30, %v5049_v36  ;;  %v2277_v36 = vadd.f32 %v5152_v51, %v5058_v8  ;;  %v2569_v40 = vadd.f32 %v5132_v53, %v2270_v58  ;;  %v2279_v8 = vadd.f32 %v5172_v16, %v5073_v24 }
 0x1da   : > { %5574 = vst [vmem:[#allocation41_spill] sm:$0xff] %v5228_v32  ;;  %5575 = vst [vmem:[#allocation42_spill] sm:$0xff] %v5230_v34  ;;  %v2567_v34 = vadd.f32 %v5117_v26, %v2268_v11  ;;  %v2276_v11 = vadd.f32 %v5144_v62, %v5052_v41  ;;  %v2275_v41 = vadd.f32 %v5156_v31, %v5061_v10  ;;  %v5582_v31 = vld [vmem:[#allocation21_spill] sm:$0xff] }
 0x1db   : > { %v5233_v1 = vpop.f32.mrf.mxu1  ;;  %v5235_v55 = vpop.f32.mrf.mxu0  ;;  %v2280_v26 = vadd.f32 %v5160_v20, %v5064_v57  ;;  %v2284_v57 = vadd.f32 %v5176_v42, %v5076_v17  ;;  %v2572_v47 = vadd.f32 %v5134_v54, %v2273_v22  ;;  %v2570_v61 = vadd.f32 %v5138_v13, %v2271_v38  ;;  %v5585_v22 = vld [vmem:[#allocation23_spill] sm:$0xff] }
 0x1dc   : > { %5576 = vst [vmem:[#allocation43_spill] sm:$0xff] %v5233_v1  ;;  %5577 = vst [vmem:[#allocation44_spill] sm:$0xff] %v5235_v55  ;;  %v2565_v55 = vadd.f32 %v5122_v63, %v2266_v15  ;;  %v2571_v15 = vadd.f32 %v5130_v2, %v2272_v46  ;;  %v2278_v63 = vadd.f32 %v5164_v5, %v5067_v0 }
 0x1dd   : > { %v5241_v50 = vpop.f32.mrf.mxu1  ;;  %v4113_v32 = vpop.f32.mrf.mxu0  ;;  %v2282_v0 = vadd.f32 %v5180_v59, %v5079_v56  ;;  %v2575_v9 = vadd.f32 %v5142_v7, %v2276_v11  ;;  %v5292_v17 = vadd.f32 %v5150_v21, %v2277_v36  ;;  %v2285_v56 = vadd.f32 %v5184_v45, %v5082_v44  ;;  %v5578_v44 = vld [vmem:[#allocation16_spill] sm:$0xff]  ;;  %v5580_v21 = vld [vmem:[#allocation18_spill] sm:$0xff] }
 0x1de   : > { %v5297_v49 = vadd.f32 %v5154_v23, %v2275_v41  ;;  %v5300_v53 = vadd.f32 %v5158_v39, %v2280_v26  ;;  %v5305_v54 = vadd.f32 %v5162_v48, %v2278_v63  ;;  %v5308_v37 = vadd.f32 %v5166_v6, %v2281_v52  ;;  %v5581_v23 = vld [vmem:[#allocation3_spill] sm:$0xff] }
 0x1df   : > { %v4079_v3 = vpop.f32.mrf.mxu1  ;;  %v3034_v1 = vpop.f32.mrf.mxu0  ;;  %v5311_v45 = vadd.f32 %v5578_v44, %v2279_v8  ;;  %v5317_v51 = vadd.f32 %v5580_v21, %v2282_v0  ;;  %v2283_v39 = vadd.f32 %v5582_v31, %v5581_v23 }
 0x1e0   : > { %v2865_v25 = vadd.f32 %v4079_v3, %v2567_v34  ;;  %v5583_v3 = vld [vmem:[#allocation19_spill] sm:$0xff] }
 0x1e1   : > { %v2736_v33 = vpop.f32.mrf.mxu1  ;;  %v4114_v4 = vpop.f32.mrf.mxu0 }
 0x1e2   : > { %v3163_v34 = vadd.f32 %v4113_v32, %v2865_v25  ;;  %v2863_v18 = vadd.f32 %v2736_v33, %v2565_v55 }
 0x1e3   : > { %v4080_v19 = vpop.f32.mrf.mxu1  ;;  %v3037_v46 = vpop.f32.mrf.mxu0 }
 0x1e4   : > { %3195 = vst.msk [vmem:[%s5259_s24 + $0x10] sm:$0xff] %vm486_vm0, %v3163_v34  ;;  %v3161_v10 = vadd.f32 %v3034_v1, %v2863_v18  ;;  %v2866_v25 = vadd.f32 %v4080_v19, %v2568_v29  ;;  %v5289_v1 = vadd.f32 %v5146_v14, %v2274_v12  ;;  %v5579_v14 = vld [vmem:[#allocation17_spill] sm:$0xff]  ;;  %v3297_v20 = vmul.f32 %v3163_v34, %v3163_v34 }
 0x1e5   : > { %v2739_v55 = vpop.f32.mrf.mxu1  ;;  %v4117_v60 = vpop.f32.mrf.mxu0  ;;  %v5314_v27 = vadd.f32 %v5579_v14, %v2284_v57  ;;  %v5326_v29 = vadd.f32 %v5583_v3, %v2285_v56  ;;  %v3228_v11 = vsel %vm486_vm0, %v3163_v34, 0.0  ;;  %v5586_v34 = vld [vmem:[#allocation20_spill] sm:$0xff] }
 0x1e6   : > { %3193 = vst.msk [vmem:[%s5259_s24] sm:$0xff] %vm486_vm0, %v3161_v10  ;;  %v3164_v24 = vadd.f32 %v4114_v4, %v2866_v25  ;;  %v2864_v59 = vadd.f32 %v2739_v55, %v2566_v28  ;;  %v3295_v13 = vmul.f32 %v3161_v10, %v3161_v10  ;;  %v3225_v6 = vsel %vm486_vm0, %v3161_v10, 0.0  ;;  %v5584_v28 = vld [vmem:[#allocation4_spill] sm:$0xff]  ;;  %v5587_v55 = vld [vmem:[#allocation5_spill] sm:$0xff] }
 0x1e7   : > { %v4083_v42 = vpop.f32.mrf.mxu1  ;;  %v3050_v2 = vpop.f32.mrf.mxu0  ;;  %v2288_v38 = vadd.f32 %v5585_v22, %v5584_v28  ;;  %v3330_v63 = vsel %vm486_vm0, %v3297_v20, 0.0 }
 0x1e8   : > { %3196 = vst.msk [vmem:[%s5259_s24 + $0x18] sm:$0xff] %vm486_vm0, %v3164_v24  ;;  %v2869_v35 = vadd.f32 %v4083_v42, %v2571_v15  ;;  %v3162_v30 = vadd.f32 %v3037_v46, %v2864_v59  ;;  %v3327_v15 = vsel %vm486_vm0, %v3295_v13, 0.0  ;;  %v3298_v12 = vmul.f32 %v3164_v24, %v3164_v24 }
 0x1e9   : > { %v2752_v7 = vpop.f32.mrf.mxu1  ;;  %v4118_v62 = vpop.f32.mrf.mxu0  ;;  %v3230_v52 = vsel %vm486_vm0, %v3164_v24, 0.0 }
 0x1ea   : > { %v3167_v48 = vadd.f32 %v4117_v60, %v2869_v35  ;;  %v2867_v5 = vadd.f32 %v2752_v7, %v2569_v40  ;;  %3194 = vst.msk [vmem:[%s5259_s24 + $0x8] sm:$0xff] %vm486_vm0, %v3162_v30  ;;  %v3226_v43 = vsel %vm486_vm0, %v3162_v30, 0.0  ;;  %v3296_v32 = vmul.f32 %v3162_v30, %v3162_v30  ;;  %v5588_v60 = vld [vmem:[#allocation25_spill] sm:$0xff]  ;;  %v5589_v30 = vld [vmem:[#allocation22_spill] sm:$0xff] }
 0x1eb   : > { %v4084_v16 = vpop.f32.mrf.mxu1  ;;  %v3053_v58 = vpop.f32.mrf.mxu0  ;;  %v3227_v33 = vadd.f32 %v3226_v43, %v3225_v6  ;;  %v5339_v40 = vadd.f32 %v5586_v34, %v2283_v39  ;;  %v5590_v6 = vld [vmem:[#allocation6_spill] sm:$0xff]  ;;  %v5591_v43 = vld [vmem:[#allocation27_spill] sm:$0xff] }
 0x1ec   : > { %3199 = vst.msk [vmem:[%s5259_s24 + $0x30] sm:$0xff] %vm486_vm0, %v3167_v48  ;;  %v3165_v4 = vadd.f32 %v3050_v2, %v2867_v5  ;;  %v3328_v36 = vsel %vm486_vm0, %v3296_v32, 0.0  ;;  %v2870_v18 = vadd.f32 %v4084_v16, %v2572_v47  ;;  %v2286_v47 = vadd.f32 %v5588_v60, %v5587_v55  ;;  %v5596_v55 = vld [vmem:[#allocation31_spill] sm:$0xff] }
 0x1ed   : > { %v2755_v41 = vpop.f32.mrf.mxu1  ;;  %v4121_v26 = vpop.f32.mrf.mxu0  ;;  %v3229_v19 = vadd.f32 %v3228_v11, %v3227_v33  ;;  %v3329_v46 = vadd.f32 %v3328_v36, %v3327_v15  ;;  %v3332_v2 = vsel %vm486_vm0, %v3298_v12, 0.0  ;;  %v3301_v23 = vmul.f32 %v3167_v48, %v3167_v48  ;;  %v5592_v36 = vld [vmem:[#allocation24_spill] sm:$0xff] }
 0x1ee   : > { %3197 = vst.msk [vmem:[%s5259_s24 + $0x20] sm:$0xff] %vm486_vm0, %v3165_v4  ;;  %v3299_v8 = vmul.f32 %v3165_v4, %v3165_v4  ;;  %v3168_v10 = vadd.f32 %v4118_v62, %v2870_v18  ;;  %v2868_v25 = vadd.f32 %v2755_v41, %v2570_v61  ;;  %v3232_v35 = vsel %vm486_vm0, %v3165_v4, 0.0 }
 0x1ef   : > { %v4087_v57 = vpop.f32.mrf.mxu1  ;;  %v3066_v0 = vpop.f32.mrf.mxu0  ;;  %v3331_v56 = vadd.f32 %v3330_v63, %v3329_v46  ;;  %v3231_v59 = vadd.f32 %v3230_v52, %v3229_v19  ;;  %v5349_v61 = vadd.f32 %v5589_v30, %v2288_v38  ;;  %v2289_v32 = vadd.f32 %v5591_v43, %v5590_v6 }
 0x1f0   : > { %v2873_v42 = vadd.f32 %v4087_v57, %v2575_v9  ;;  %3200 = vst.msk [vmem:[%s5259_s24 + $0x38] sm:$0xff] %vm486_vm0, %v3168_v10  ;;  %v3166_v44 = vadd.f32 %v3053_v58, %v2868_v25  ;;  %v3334_v9 = vsel %vm486_vm0, %v3299_v8, 0.0  ;;  %v3236_v16 = vsel %vm486_vm0, %v3167_v48, 0.0  ;;  %v5593_v8 = vld [vmem:[#allocation7_spill] sm:$0xff]  ;;  %v5594_v25 = vld [vmem:[#allocation29_spill] sm:$0xff] }
 0x1f1   : > { %v2768_v24 = vpop.f32.mrf.mxu1  ;;  %v4122_v13 = vpop.f32.mrf.mxu0  ;;  %v3233_v7 = vadd.f32 %v3232_v35, %v3231_v59  ;;  %v3333_v62 = vadd.f32 %v3332_v2, %v3331_v56  ;;  %v5365_v18 = vadd.f32 %v5592_v36, %v2286_v47  ;;  %v3338_v48 = vsel %vm486_vm0, %v3301_v23, 0.0 }
 0x1f2   : > { %v3171_v14 = vadd.f32 %v4121_v26, %v2873_v42  ;;  %v2871_v21 = vadd.f32 %v2768_v24, %v5289_v1  ;;  %3198 = vst.msk [vmem:[%s5259_s24 + $0x28] sm:$0xff] %vm486_vm0, %v3166_v44  ;;  %v3234_v31 = vsel %vm486_vm0, %v3166_v44, 0.0  ;;  %v3300_v39 = vmul.f32 %v3166_v44, %v3166_v44 }
 0x1f3   : > { %v4088_v20 = vpop.f32.mrf.mxu1  ;;  %v3069_v5 = vpop.f32.mrf.mxu0  ;;  %v3335_v58 = vadd.f32 %v3334_v9, %v3333_v62  ;;  %v3235_v3 = vadd.f32 %v3234_v31, %v3233_v7  ;;  %v3302_v1 = vmul.f32 %v3168_v10, %v3168_v10  ;;  %v3238_v41 = vsel %vm486_vm0, %v3168_v10, 0.0 }
 0x1f4   : > { %3203 = vst.msk [vmem:[%s5259_s24 + $0x50] sm:$0xff] %vm486_vm0, %v3171_v14  ;;  %v3336_v28 = vsel %vm486_vm0, %v3300_v39, 0.0  ;;  %v3169_v22 = vadd.f32 %v3066_v0, %v2871_v21  ;;  %v2874_v38 = vadd.f32 %v4088_v20, %v5292_v17  ;;  %v2287_v57 = vadd.f32 %v5594_v25, %v5593_v8  ;;  %v5595_v0 = vld [vmem:[#allocation8_spill] sm:$0xff] }
 0x1f5   : > { %v2771_v11 = vpop.f32.mrf.mxu1  ;;  %v4125_v33 = vpop.f32.mrf.mxu0  ;;  %v3237_v4 = vadd.f32 %v3236_v16, %v3235_v3  ;;  %v3337_v15 = vadd.f32 %v3336_v28, %v3335_v58  ;;  %v2292_v60 = vadd.f32 %v5596_v55, %v5595_v0  ;;  %v3340_v10 = vsel %vm486_vm0, %v3302_v1, 0.0  ;;  %v5597_v16 = vld [vmem:[#allocation26_spill] sm:$0xff] }
 0x1f6   : > { %v2872_v12 = vadd.f32 %v2771_v11, %v5297_v49  ;;  %3201 = vst.msk [vmem:[%s5259_s24 + $0x40] sm:$0xff] %vm486_vm0, %v3169_v22  ;;  %v3303_v26 = vmul.f32 %v3169_v22, %v3169_v22  ;;  %v3172_v63 = vadd.f32 %v4122_v13, %v2874_v38  ;;  %v3240_v47 = vsel %vm486_vm0, %v3169_v22, 0.0 }
 0x1f7   : > { %v4091_v17 = vpop.f32.mrf.mxu1  ;;  %v3082_v19 = vpop.f32.mrf.mxu0  ;;  %v3339_v46 = vadd.f32 %v3338_v48, %v3337_v15  ;;  %v3239_v34 = vadd.f32 %v3238_v41, %v3237_v4  ;;  %v3305_v44 = vmul.f32 %v3171_v14, %v3171_v14  ;;  %v3244_v39 = vsel %vm486_vm0, %v3171_v14, 0.0  ;;  %v5599_v15 = vld [vmem:[#allocation9_spill] sm:$0xff] }
 0x1f8   : > { %v3170_v52 = vadd.f32 %v3069_v5, %v2872_v12  ;;  %v2877_v49 = vadd.f32 %v4091_v17, %v5300_v53  ;;  %3204 = vst.msk [vmem:[%s5259_s24 + $0x58] sm:$0xff] %vm486_vm0, %v3172_v63  ;;  %v3342_v24 = vsel %vm486_vm0, %v3303_v26, 0.0  ;;  %v3306_v20 = vmul.f32 %v3172_v63, %v3172_v63 }
 0x1f9   : > { %v2784_v56 = vpop.f32.mrf.mxu1  ;;  %v4126_v59 = vpop.f32.mrf.mxu0  ;;  %v3241_v42 = vadd.f32 %v3240_v47, %v3239_v34  ;;  %v3341_v2 = vadd.f32 %v3340_v10, %v3339_v46  ;;  %v3346_v22 = vsel %vm486_vm0, %v3305_v44, 0.0 }
 0x1fa   : > { %3202 = vst.msk [vmem:[%s5259_s24 + $0x48] sm:$0xff] %vm486_vm0, %v3170_v52  ;;  %v3242_v53 = vsel %vm486_vm0, %v3170_v52, 0.0  ;;  %v3304_v35 = vmul.f32 %v3170_v52, %v3170_v52  ;;  %v3175_v13 = vadd.f32 %v4125_v33, %v2877_v49  ;;  %v2875_v30 = vadd.f32 %v2784_v56, %v5305_v54  ;;  %v5598_v33 = vld [vmem:[#allocation28_spill] sm:$0xff] }
 0x1fb   : > { %v4092_v7 = vpop.f32.mrf.mxu1  ;;  %v3085_v62 = vpop.f32.mrf.mxu0  ;;  %v3343_v21 = vadd.f32 %v3342_v24, %v3341_v2  ;;  %v3243_v23 = vadd.f32 %v3242_v53, %v3241_v42  ;;  %v5391_v54 = vadd.f32 %v5597_v16, %v2289_v32  ;;  %v5399_v4 = vadd.f32 %v5598_v33, %v2287_v57  ;;  %v5600_v32 = vld [vmem:[#allocation33_spill] sm:$0xff]  ;;  %v5602_v2 = vld [vmem:[#allocation10_spill] sm:$0xff]  ;;  %v5603_v53 = vld [vmem:[#allocation35_spill] sm:$0xff] }
 0x1fc   : > { %v3344_v9 = vsel %vm486_vm0, %v3304_v35, 0.0  ;;  %v2878_v31 = vadd.f32 %v4092_v7, %v5308_v37  ;;  %3207 = vst.msk [vmem:[%s5259_s24 + $0x70] sm:$0xff] %vm486_vm0, %v3175_v13  ;;  %v3173_v5 = vadd.f32 %v3082_v19, %v2875_v30  ;;  %v3246_v37 = vsel %vm486_vm0, %v3172_v63, 0.0  ;;  %v5606_v16 = vld [vmem:[#allocation37_spill] sm:$0xff] }
 0x1fd   : > { %v2787_v6 = vpop.f32.mrf.mxu1  ;;  %v4129_v43 = vpop.f32.mrf.mxu0  ;;  %v3245_v58 = vadd.f32 %v3244_v39, %v3243_v23  ;;  %v3345_v3 = vadd.f32 %v3344_v9, %v3343_v21  ;;  %v2290_v12 = vadd.f32 %v5600_v32, %v5599_v15  ;;  %v3348_v26 = vsel %vm486_vm0, %v3306_v20, 0.0 }
 0x1fe   : > { %v3176_v1 = vadd.f32 %v4126_v59, %v2878_v31  ;;  %v2876_v28 = vadd.f32 %v2787_v6, %v5311_v45  ;;  %3205 = vst.msk [vmem:[%s5259_s24 + $0x60] sm:$0xff] %vm486_vm0, %v3173_v5  ;;  %v3307_v14 = vmul.f32 %v3173_v5, %v3173_v5  ;;  %v5601_v45 = vld [vmem:[#allocation30_spill] sm:$0xff]  ;;  %v3248_v63 = vsel %vm486_vm0, %v3173_v5, 0.0 }
 0x1ff   : > { %v4095_v38 = vpop.f32.mrf.mxu1  ;;  %v3098_v11 = vpop.f32.mrf.mxu0  ;;  %v3347_v36 = vadd.f32 %v3346_v22, %v3345_v3  ;;  %v3247_v48 = vadd.f32 %v3246_v37, %v3245_v58  ;;  %v5406_v41 = vadd.f32 %v5601_v45, %v2292_v60  ;;  %v3309_v52 = vmul.f32 %v3175_v13, %v3175_v13 }
 0x200   : > { %3208 = vst.msk [vmem:[%s5259_s24 + $0x78] sm:$0xff] %vm486_vm0, %v3176_v1  ;;  %v3174_v17 = vadd.f32 %v3085_v62, %v2876_v28  ;;  %v2881_v19 = vadd.f32 %v4095_v38, %v5314_v27  ;;  %v3350_v57 = vsel %vm486_vm0, %v3307_v14, 0.0  ;;  %v3252_v35 = vsel %vm486_vm0, %v3175_v13, 0.0 }
 0x201   : > { %v2800_v46 = vpop.f32.mrf.mxu1  ;;  %v4130_v34 = vpop.f32.mrf.mxu0  ;;  %v3249_v49 = vadd.f32 %v3248_v63, %v3247_v48  ;;  %v3349_v8 = vadd.f32 %v3348_v26, %v3347_v36  ;;  %v3310_v44 = vmul.f32 %v3176_v1, %v3176_v1  ;;  %v3354_v62 = vsel %vm486_vm0, %v3309_v52, 0.0 }
 0x202   : > { %v2879_v25 = vadd.f32 %v2800_v46, %v5317_v51  ;;  %3206 = vst.msk [vmem:[%s5259_s24 + $0x68] sm:$0xff] %vm486_vm0, %v3174_v17  ;;  %v3250_v0 = vsel %vm486_vm0, %v3174_v17, 0.0  ;;  %v3308_v55 = vmul.f32 %v3174_v17, %v3174_v17  ;;  %v3179_v60 = vadd.f32 %v4129_v43, %v2881_v19  ;;  %v5605_v43 = vld [vmem:[#allocation11_spill] sm:$0xff]  ;;  %v5608_v19 = vld [vmem:[#allocation12_spill] sm:$0xff] }
 0x203   : > { %v4096_v10 = vpop.f32.mrf.mxu1  ;;  %v3101_v47 = vpop.f32.mrf.mxu0  ;;  %v3351_v27 = vadd.f32 %v3350_v57, %v3349_v8  ;;  %v3251_v56 = vadd.f32 %v3250_v0, %v3249_v49  ;;  %v2293_v51 = vadd.f32 %v5603_v53, %v5602_v2  ;;  %v3254_v31 = vsel %vm486_vm0, %v3176_v1, 0.0  ;;  %v5609_v46 = vld [vmem:[#allocation39_spill] sm:$0xff] }
 0x204   : > { %v3177_v59 = vadd.f32 %v3098_v11, %v2879_v25  ;;  %v2882_v42 = vadd.f32 %v4096_v10, %v5326_v29  ;;  %v3352_v24 = vsel %vm486_vm0, %v3308_v55, 0.0  ;;  %3211 = vst.msk [vmem:[%s5259_s24 + $0x90] sm:$0xff] %vm486_vm0, %v3179_v60  ;;  %v5604_v29 = vld [vmem:[#allocation32_spill] sm:$0xff]  ;;  %v2291_v58 = vadd.f32 %v5606_v16, %v5605_v43 }
 0x205   : > { %v2803_v30 = vpop.f32.mrf.mxu1  ;;  %v4133_v7 = vpop.f32.mrf.mxu0  ;;  %v3253_v21 = vadd.f32 %v3252_v35, %v3251_v56  ;;  %v3353_v23 = vadd.f32 %v3352_v24, %v3351_v27  ;;  %v5427_v9 = vadd.f32 %v5604_v29, %v2290_v12  ;;  %v3356_v37 = vsel %vm486_vm0, %v3310_v44, 0.0  ;;  %v5614_v29 = vld [vmem:[#allocation43_spill] sm:$0xff] }
 0x206   : > { %3209 = vst.msk [vmem:[%s5259_s24 + $0x80] sm:$0xff] %vm486_vm0, %v3177_v59  ;;  %v3311_v13 = vmul.f32 %v3177_v59, %v3177_v59  ;;  %v3180_v39 = vadd.f32 %v4130_v34, %v2882_v42  ;;  %v2880_v20 = vadd.f32 %v2803_v30, %v5339_v40  ;;  %v3256_v14 = vsel %vm486_vm0, %v3177_v59, 0.0  ;;  %v5607_v40 = vld [vmem:[#allocation34_spill] sm:$0xff]  ;;  %v5610_v59 = vld [vmem:[#allocation36_spill] sm:$0xff] }
 0x207   : > { %v4099_v5 = vpop.f32.mrf.mxu1  ;;  %v3114_v6 = vpop.f32.mrf.mxu0  ;;  %v3355_v3 = vadd.f32 %v3354_v62, %v3353_v23  ;;  %v3255_v28 = vadd.f32 %v3254_v31, %v3253_v21  ;;  %v2592_v33 = vadd.f32 %v5607_v40, %v2293_v51  ;;  %v3313_v48 = vmul.f32 %v3179_v60, %v3179_v60  ;;  %v5612_v62 = vld [vmem:[#allocation41_spill] sm:$0xff]  ;;  %v5613_v23 = vld [vmem:[#allocation14_spill] sm:$0xff] }
 0x208   : > { %v2885_v22 = vadd.f32 %v4099_v5, %v5349_v61  ;;  %3212 = vst.msk [vmem:[%s5259_s24 + $0x98] sm:$0xff] %vm486_vm0, %v3180_v39  ;;  %v3178_v1 = vadd.f32 %v3101_v47, %v2880_v20  ;;  %v3358_v61 = vsel %vm486_vm0, %v3311_v13, 0.0  ;;  %v2296_v34 = vadd.f32 %v5609_v46, %v5608_v19 }
 0x209   : > { %v2816_v38 = vpop.f32.mrf.mxu1  ;;  %v4134_v11 = vpop.f32.mrf.mxu0  ;;  %v3257_v15 = vadd.f32 %v3256_v14, %v3255_v28  ;;  %v3357_v32 = vadd.f32 %v3356_v37, %v3355_v3  ;;  %v3260_v52 = vsel %vm486_vm0, %v3179_v60, 0.0  ;;  %v2590_v42 = vadd.f32 %v5610_v59, %v2291_v58 }
 0x20a   : > { %v3183_v12 = vadd.f32 %v4133_v7, %v2885_v22  ;;  %v2883_v36 = vadd.f32 %v2816_v38, %v5365_v18  ;;  %3210 = vst.msk [vmem:[%s5259_s24 + $0x88] sm:$0xff] %vm486_vm0, %v3178_v1  ;;  %v3258_v45 = vsel %vm486_vm0, %v3178_v1, 0.0  ;;  %v3312_v26 = vmul.f32 %v3178_v1, %v3178_v1 }
 0x20b   : > { %v4100_v63 = vpop.f32.mrf.mxu1  ;;  %v3117_v17 = vpop.f32.mrf.mxu0  ;;  %v3359_v49 = vadd.f32 %v3358_v61, %v3357_v32  ;;  %v3259_v8 = vadd.f32 %v3258_v45, %v3257_v15  ;;  %v3314_v18 = vmul.f32 %v3180_v39, %v3180_v39  ;;  %v3362_v60 = vsel %vm486_vm0, %v3313_v48, 0.0  ;;  %v5615_v45 = vld [vmem:[#allocation38_spill] sm:$0xff] }
 0x20c   : > { %3215 = vst.msk [vmem:[%s5259_s24 + $0xb0] sm:$0xff] %vm486_vm0, %v3183_v12  ;;  %v3360_v25 = vsel %vm486_vm0, %v3312_v26, 0.0  ;;  %v3181_v57 = vadd.f32 %v3114_v6, %v2883_v36  ;;  %v2886_v0 = vadd.f32 %v4100_v63, %v5391_v54  ;;  %v3262_v2 = vsel %vm486_vm0, %v3180_v39, 0.0 }
 0x20d   : > { %v2819_v55 = vpop.f32.mrf.mxu1  ;;  %v4137_v10 = vpop.f32.mrf.mxu0  ;;  %v3261_v47 = vadd.f32 %v3260_v52, %v3259_v8  ;;  %v3361_v27 = vadd.f32 %v3360_v25, %v3359_v49  ;;  %v2297_v31 = vadd.f32 %v5614_v29, %v5613_v23  ;;  %v3364_v13 = vsel %vm486_vm0, %v3314_v18, 0.0  ;;  %v5616_v49 = vld [vmem:[#allocation40_spill] sm:$0xff]  ;;  %v5617_v18 = vld [vmem:[#allocation15_spill] sm:$0xff] }
 0x20e   : > { %v2884_v56 = vadd.f32 %v2819_v55, %v5399_v4  ;;  %3213 = vst.msk [vmem:[%s5259_s24 + $0xa0] sm:$0xff] %vm486_vm0, %v3181_v57  ;;  %v3315_v53 = vmul.f32 %v3181_v57, %v3181_v57  ;;  %v3184_v51 = vadd.f32 %v4134_v11, %v2886_v0  ;;  %v5611_v4 = vld [vmem:[#allocation13_spill] sm:$0xff]  ;;  %v3264_v39 = vsel %vm486_vm0, %v3181_v57, 0.0  ;;  %v5618_v55 = vld [vmem:[#allocation42_spill] sm:$0xff] }
 0x20f   : > { %v4103_v35 = vpop.f32.mrf.mxu1  ;;  %v3130_v54 = vpop.f32.mrf.mxu0  ;;  %v3363_v44 = vadd.f32 %v3362_v60, %v3361_v27  ;;  %v3263_v24 = vadd.f32 %v3262_v2, %v3261_v47  ;;  %v2294_v21 = vadd.f32 %v5612_v62, %v5611_v4  ;;  %v3317_v58 = vmul.f32 %v3183_v12, %v3183_v12 }
 0x210   : > { %v3182_v30 = vadd.f32 %v3117_v17, %v2884_v56  ;;  %v2889_v7 = vadd.f32 %v4103_v35, %v5406_v41  ;;  %3216 = vst.msk [vmem:[%s5259_s24 + $0xb8] sm:$0xff] %vm486_vm0, %v3184_v51  ;;  %v3366_v3 = vsel %vm486_vm0, %v3315_v53, 0.0  ;;  %v3268_v15 = vsel %vm486_vm0, %v3183_v12, 0.0 }
 0x211   : > { %v2832_v20 = vpop.f32.mrf.mxu1  ;;  %v4138_v5 = vpop.f32.mrf.mxu0  ;;  %v3265_v6 = vadd.f32 %v3264_v39, %v3263_v24  ;;  %v3365_v43 = vadd.f32 %v3364_v13, %v3363_v44  ;;  %v3318_v32 = vmul.f32 %v3184_v51, %v3184_v51  ;;  %v2595_v26 = vadd.f32 %v5615_v45, %v2296_v34  ;;  %v5619_v13 = vld [vmem:[#allocation44_spill] sm:$0xff] }
 0x212   : > { %3214 = vst.msk [vmem:[%s5259_s24 + $0xa8] sm:$0xff] %vm486_vm0, %v3182_v30  ;;  %v3266_v41 = vsel %vm486_vm0, %v3182_v30, 0.0  ;;  %v3316_v16 = vmul.f32 %v3182_v30, %v3182_v30  ;;  %v3187_v28 = vadd.f32 %v4137_v10, %v2889_v7  ;;  %v2887_v22 = vadd.f32 %v2832_v20, %v5427_v9 }
 0x213   : > { %v4104_v37 = vpop.f32.mrf.mxu1  ;;  %v3133_v14 = vpop.f32.mrf.mxu0  ;;  %v3367_v1 = vadd.f32 %v3366_v3, %v3365_v43  ;;  %v3267_v38 = vadd.f32 %v3266_v41, %v3265_v6  ;;  %v3370_v46 = vsel %vm486_vm0, %v3317_v58, 0.0  ;;  %v3270_v52 = vsel %vm486_vm0, %v3184_v51, 0.0 }
 0x214   : > { %v3368_v11 = vsel %vm486_vm0, %v3316_v16, 0.0  ;;  %v2890_v40 = vadd.f32 %v4104_v37, %v2592_v33  ;;  %3219 = vst.msk [vmem:[%s5259_s24 + $0xd0] sm:$0xff] %vm486_vm0, %v3187_v28  ;;  %v3185_v36 = vadd.f32 %v3130_v54, %v2887_v22  ;;  %v2593_v8 = vadd.f32 %v5616_v49, %v2294_v21 }
 0x215   : > { %v2835_v48 = vpop.f32.mrf.mxu1  ;;  %v4141_v61 = vpop.f32.mrf.mxu0  ;;  %v3269_v9 = vadd.f32 %v3268_v15, %v3267_v38  ;;  %v3369_v63 = vadd.f32 %v3368_v11, %v3367_v1  ;;  %v2295_v25 = vadd.f32 %v5241_v50, %v5617_v18  ;;  %v2596_v10 = vadd.f32 %v5618_v55, %v2297_v31 }
 0x216   : > { %v3188_v17 = vadd.f32 %v4138_v5, %v2890_v40  ;;  %v2888_v19 = vadd.f32 %v2835_v48, %v2590_v42  ;;  %3217 = vst.msk [vmem:[%s5259_s24 + $0xc0] sm:$0xff] %vm486_vm0, %v3185_v36  ;;  %v3319_v33 = vmul.f32 %v3185_v36, %v3185_v36  ;;  %v3372_v47 = vsel %vm486_vm0, %v3318_v32, 0.0 }
 0x217   : > { %v4107_v12 = vpop.f32.mrf.mxu1  ;;  %v3371_v57 = vadd.f32 %v3370_v46, %v3369_v63  ;;  %v3271_v34 = vadd.f32 %v3270_v52, %v3269_v9  ;;  %v3146_v0 = vpop.f32.mrf.mxu0  ;;  %v3272_v27 = vsel %vm486_vm0, %v3185_v36, 0.0  ;;  %v3321_v60 = vmul.f32 %v3187_v28, %v3187_v28 }
 0x218   : > { %3220 = vst.msk [vmem:[%s5259_s24 + $0xd8] sm:$0xff] %vm486_vm0, %v3188_v17  ;;  %v3186_v56 = vadd.f32 %v3133_v14, %v2888_v19  ;;  %v2893_v59 = vadd.f32 %v4107_v12, %v2595_v26  ;;  %v3374_v51 = vsel %vm486_vm0, %v3319_v33, 0.0  ;;  %v3276_v23 = vsel %vm486_vm0, %v3187_v28, 0.0 }
 0x219   : > { %v2848_v42 = vpop.f32.mrf.mxu1  ;;  %v3273_v2 = vadd.f32 %v3272_v27, %v3271_v34  ;;  %v3373_v53 = vadd.f32 %v3372_v47, %v3371_v57  ;;  %v4142_v62 = vpop.f32.mrf.mxu0  ;;  %v3322_v29 = vmul.f32 %v3188_v17, %v3188_v17  ;;  %v2594_v39 = vadd.f32 %v5619_v13, %v2295_v25 }
 0x21a   : > { %v2891_v50 = vadd.f32 %v2848_v42, %v2593_v8  ;;  %3218 = vst.msk [vmem:[%s5259_s24 + $0xc8] sm:$0xff] %vm486_vm0, %v3186_v56  ;;  %v3274_v35 = vsel %vm486_vm0, %v3186_v56, 0.0  ;;  %v3320_v54 = vmul.f32 %v3186_v56, %v3186_v56  ;;  %v3191_v44 = vadd.f32 %v4141_v61, %v2893_v59 }
 0x21b   : > { %v4108_v24 = vpop.f32.mrf.mxu1  ;;  %v3375_v30 = vadd.f32 %v3374_v51, %v3373_v53  ;;  %v3275_v7 = vadd.f32 %v3274_v35, %v3273_v2  ;;  %v3378_v5 = vsel %vm486_vm0, %v3321_v60, 0.0  ;;  %v3278_v41 = vsel %vm486_vm0, %v3188_v17, 0.0  ;;  %v3149_v37 = vpop.f32.mrf.mxu0 }
 0x21c   : > { %v3189_v4 = vadd.f32 %v3146_v0, %v2891_v50  ;;  %v2894_v21 = vadd.f32 %v4108_v24, %v2596_v10  ;;  %v3376_v31 = vsel %vm486_vm0, %v3320_v54, 0.0  ;;  %3223 = vst.msk [vmem:[%s5259_s24 + $0xf0] sm:$0xff] %vm486_vm0, %v3191_v44  ;;  %v3380_v14 = vsel %vm486_vm0, %v3322_v29, 0.0 }
 0x21d   : > { %v2851_v20 = vpop.f32.mrf.mxu1  ;;  %v3277_v6 = vadd.f32 %v3276_v23, %v3275_v7  ;;  %v3377_v43 = vadd.f32 %v3376_v31, %v3375_v30  ;;  %v3325_v15 = vmul.f32 %v3191_v44, %v3191_v44  ;;  %v3284_v26 = vsel %vm486_vm0, %v3191_v44, 0.0 }
 0x21e   : > { %3221 = vst.msk [vmem:[%s5259_s24 + $0xe0] sm:$0xff] %vm486_vm0, %v3189_v4  ;;  %v3323_v16 = vmul.f32 %v3189_v4, %v3189_v4  ;;  %v3192_v58 = vadd.f32 %v4142_v62, %v2894_v21  ;;  %v2892_v3 = vadd.f32 %v2851_v20, %v2594_v39  ;;  %v3280_v1 = vsel %vm486_vm0, %v3189_v4, 0.0 }
 0x21f   : > { %v3379_v28 = vadd.f32 %v3378_v5, %v3377_v43  ;;  %v3279_v22 = vadd.f32 %v3278_v41, %v3277_v6  ;;  %v3386_v46 = vsel %vm486_vm0, %v3325_v15, 0.0 }
 0x220   : > { %3224 = vst.msk [vmem:[%s5259_s24 + $0xf8] sm:$0xff] %vm486_vm0, %v3192_v58  ;;  %v3190_v38 = vadd.f32 %v3149_v37, %v2892_v3  ;;  %v3382_v32 = vsel %vm486_vm0, %v3323_v16, 0.0  ;;  %v3326_v9 = vmul.f32 %v3192_v58, %v3192_v58  ;;  %v3286_v52 = vsel %vm486_vm0, %v3192_v58, 0.0 }
 0x221   : > { %v3281_v11 = vadd.f32 %v3280_v1, %v3279_v22  ;;  %v3381_v40 = vadd.f32 %v3380_v14, %v3379_v28 }
 0x222   : > { %3222 = vst.msk [vmem:[%s5259_s24 + $0xe8] sm:$0xff] %vm486_vm0, %v3190_v38  ;;  %v3282_v36 = vsel %vm486_vm0, %v3190_v38, 0.0  ;;  %v3324_v48 = vmul.f32 %v3190_v38, %v3190_v38  ;;  %v3388_v49 = vsel %vm486_vm0, %v3326_v9, 0.0 }
 0x223   : > { %v3383_v61 = vadd.f32 %v3382_v32, %v3381_v40  ;;  %v3283_v45 = vadd.f32 %v3282_v36, %v3281_v11 }
 0x224   : > { %v3384_v63 = vsel %vm486_vm0, %v3324_v48, 0.0 }
 0x225   : > { %v3285_v17 = vadd.f32 %v3284_v26, %v3283_v45  ;;  %v3385_v19 = vadd.f32 %v3384_v63, %v3383_v61 }
 0x227   : > { %v3287_v33 = vadd.f32 %v3286_v52, %v3285_v17  ;;  %v3387_v12 = vadd.f32 %v3386_v46, %v3385_v19 }
 0x229   : > { %v3288_v8 = vrot.slane %v3287_v33, 4  ;;  %v3389_v18 = vadd.f32 %v3388_v49, %v3387_v12 }
 0x22b   : > { %v3289_v25 = vadd.f32 %v3288_v8, %v3287_v33  ;;  %v3390_v57 = vrot.slane %v3389_v18, 4 }
 0x22d   : > { %v3290_v34 = vrot.slane %v3289_v25, 2  ;;  %v3391_v0 = vadd.f32 %v3390_v57, %v3389_v18 }
 0x22f   : > { %v3291_v55 = vadd.f32 %v3290_v34, %v3289_v25  ;;  %v3392_v10 = vrot.slane %v3391_v0, 2 }
 0x231   : > { %v3292_v47 = vrot.slane %v3291_v55, 1  ;;  %v3393_v27 = vadd.f32 %v3392_v10, %v3391_v0 }
 0x233   : > { %v3293_v56 = vadd.f32 %v3292_v47, %v3291_v55  ;;  %v3394_v59 = vrot.slane %v3393_v27, 1 }
 0x235   : > { %3294 = vst.msk [vmem:[%s319_s26] sm:$0x1] %vm326_vm2, %v3293_v56  ;;  %v3395_v42 = vadd.f32 %v3394_v59, %v3393_v27 }
 0x237   : > { %3396 = vst.msk [vmem:[%s322_s9] sm:$0x1] %vm326_vm2, %v3395_v42 }
 0x238 PF: > { %s19_s27 = sadd.s32 1, %s4171_s27  }
 0x239   : > { %p16_p4 = scmp.ge.s32.totalorder %s19_s27, 4  }
 0x23b   :  { %18 = sbr.rel (!%p16_p4) target bundleno = 1 (0x1), region = 108 }

// kernel: fwd.9
= control target key start
LH: loop header
LB: loop body
LE: loop exit
PB: predicated region body
PF: predicated region fallthrough
CT: control target
= control target key end

     0   :  { %s1648_s15 = smov 0   ;;  %s1942_s0 = inlined_call_operand.vmem [shape: f32[8,9,9,16], index: 0, kind: input, shape index: {}]   ;;  %s1943_s1 = inlined_call_operand.vmem [shape: bf16[9,16,32], index: 1, kind: input, shape index: {}]   ;;  %s1944_s2 = inlined_call_operand.vmem [shape: f32[2,8,8,32], index: 2, kind: output, shape index: {0}]   ;;  %s1945_s3 = inlined_call_operand.vmem [shape: f32[2,1,32], index: 3, kind: output, shape index: {1}]   ;;  %s1946_s4 = inlined_call_operand.vmem [shape: f32[2,1,32], index: 4, kind: output, shape index: {2}]  }
   0x1 LB: > { %s1654_s16 = sadd.s32 4294967295, %s1621_s15   ;;  %p1335_p0 = scmp.ge.s32.totalorder %s1621_s15, 1  ;;  %s1621_s15 = sphi %s1648_s15, %s15_s15  }
   0x2   : > { %p169_p1 = scmp.lt.s32.totalorder %s1621_s15, 3 }
   0x4   : > { %p170_p2 = pnand %p1335_p0, %p169_p1 }
   0x5   : > { %s1336_s19 = sshll.u32 (!%p170_p2), %s1654_s16, 2  ;;  %p209_p4 = scmp.lt.s32.totalorder (!%p170_p2), %s1654_s16, 1 }
   0x6   : > { %173 = sbr.rel (%p170_p2) target bundleno = 310 (0x136), region = 28  ;;  %p203_p3 = scmp.lt.s32.totalorder (!%p170_p2), %s1336_s19, 7 }
   0xb   : > { %v1606_v0 = vld [vmem:[%s1943_s1 + $0x8] sm:$0xff]   ;;  %v1607_v1 = vld [vmem:[%s1943_s1] sm:$0xff]   ;;  %s1948_s19 = smov (!%p203_p3, %s1336_s19), 7  ;;  %v1608_v2 = vld [vmem:[%s1943_s1 + $0x10] sm:$0xff]   ;;  %vm257_vm0 = vcmask 130048   ;;  %s1950_s16 = smov (!%p209_p4, %s1654_s16), 1 }
   0xc   : > { %1595 = vmatprep.subr.bf16.mxu1 %v1606_v0  ;;  %1505 = vmatprep.subr.bf16.mxu0 %v1606_v0  ;;  %s1597_s24 = smul.u32 144, %s1948_s19  ;;  %v1609_v10 = vld [vmem:[%s1943_s1 + $0x18] sm:$0xff]   ;;  %v1610_v22 = vld [vmem:[%s1943_s1 + $0x20] sm:$0xff]   ;;  %v1611_v35 = vld [vmem:[%s1943_s1 + $0x28] sm:$0xff]   ;;  %s1459_s14 = sshll.u32 %s1950_s16, 6  ;;  %vm1164_vm1 = vcmask 261120  }
   0xd   : > { %1596 = vmatpush3.bf16.msra.mxu1 %v1606_v0  ;;  %1506 = vmatpush3.bf16.msra.mxu0 %v1606_v0  ;;  %v1612_v37 = vld [vmem:[%s1943_s1 + $0x30] sm:$0xff]   ;;  %v1613_v63 = vld [vmem:[%s1943_s1 + $0x38] sm:$0xff]   ;;  %v1614_v0 = vld [vmem:[%s1943_s1 + $0x40] sm:$0xff]   ;;  %s1894_s19 = scalar_lea.vmem %s1944_s2, %s1459_s14  ;;  %s216_s22 = scalar_lea.vmem %s1945_s3, %s1950_s16  ;;  %vm1194_vm2 = vcmask 253952  }
   0xe   : > { %1515 = vmatprep.subr.bf16.mxu1 %v1607_v1  ;;  %1525 = vmatprep.subr.bf16.mxu0 %v1608_v2  ;;  %s1671_s27 = scalar_lea.vmem %s1942_s0, %s1597_s24  ;;  %s219_s25 = scalar_lea.vmem %s1946_s4, %s1950_s16 }
   0xf   : > { %v1340_v3 = vld [vmem:[%s1671_s27 + $0x90] sm:$0xff]  ;;  %v1675_v4 = vld [vmem:[%s1671_s27 + $0xa0] sm:$0xff] }
  0x10   : > { %v1678_v5 = vld [vmem:[%s1671_s27 + $0xd0] sm:$0xff]  ;;  %v244_v6 = vpack.c.bf16 %v1675_v4, %v1340_v3  ;;  %v1682_v7 = vld [vmem:[%s1671_s27 + $0xe0] sm:$0xff] }
  0x11   : > { %v1685_v8 = vld [vmem:[%s1671_s27 + $0xb0] sm:$0xff]  ;;  %v1688_v9 = vld [vmem:[%s1671_s27 + $0xc0] sm:$0xff]  ;;  %v246_v11 = vpack.c.bf16 %v1682_v7, %v1678_v5 }
  0x12   : > { %v245_v12 = vpack.c.bf16 %v1688_v9, %v1685_v8  ;;  %v1698_v13 = vld [vmem:[%s1671_s27 + $0xf0] sm:$0xff]  ;;  %v1701_v14 = vld [vmem:[%s1671_s27 + $0x100] sm:$0xff]  ;;  %1507 = vmatprep.mubr.msk.bf16.mxu0 %vm257_vm0, %v244_v6 }
  0x13   : > { %v221_v15 = vld [vmem:[%s1671_s27] sm:$0xff]  ;;  %v247_v16 = vpack.c.bf16 %v1701_v14, %v1698_v13  ;;  %v1708_v17 = vld [vmem:[%s1671_s27 + $0x10] sm:$0xff]  ;;  %1511 = vmatprep.mubr.msk.bf16.mxu1 %vm257_vm0, %v246_v11 }
  0x14   : > { %v418_v18 = vld [vmem:[%s1671_s27 + $0x1] sm:$0xff]  ;;  %v1712_v19 = vld [vmem:[%s1671_s27 + $0x11] sm:$0xff]  ;;  %1508 = vmatmul.mubr.msk.bf16.vlgmr.msra.gmra.mxu0 %vm257_vm0, %v245_v12  ;;  %v229_v20 = vpack.c.bf16 %v1708_v17, %v221_v15 }
  0x15   : > { %v426_v21 = vpack.c.bf16 %v1712_v19, %v418_v18  ;;  %1512 = vmatmul.mubr.msk.bf16.vlgmr.msra.gmra.mxu1 %vm257_vm0, %v247_v16  ;;  %1526 = vmatpush3.bf16.msra.mxu0 %v1608_v2  ;;  %v1723_v23 = vld [vmem:[%s1671_s27 + $0x21] sm:$0xff]  ;;  %v1726_v24 = vld [vmem:[%s1671_s27 + $0x31] sm:$0xff] }
  0x16   : > { %1516 = vmatpush3.bf16.msra.mxu1 %v1607_v1  ;;  %1517 = vmatprep.mubr.msk.bf16.mxu1 %vm257_vm0, %v229_v20  ;;  %v1730_v25 = vld [vmem:[%s1671_s27 + $0x20] sm:$0xff]  ;;  %v1733_v26 = vld [vmem:[%s1671_s27 + $0x30] sm:$0xff]  ;;  %v427_v29 = vpack.c.bf16 %v1726_v24, %v1723_v23 }
  0x17   : > { %1527 = vmatprep.mubr.msk.bf16.mxu0 %vm257_vm0, %v426_v21  ;;  %1535 = vmatprep.subr.bf16.mxu1 %v1609_v10  ;;  %v1737_v27 = vld [vmem:[%s1671_s27 + $0x40] sm:$0xff]  ;;  %v1740_v28 = vld [vmem:[%s1671_s27 + $0x50] sm:$0xff]  ;;  %v230_v32 = vpack.c.bf16 %v1733_v26, %v1730_v25  ;;  %v853_v16 = vpack.c.bf16 %v1730_v25, %v1708_v17 }
  0x18   : > { %1545 = vmatprep.subr.bf16.mxu0 %v1610_v22  ;;  %v1745_v30 = vld [vmem:[%s1671_s27 + $0x41] sm:$0xff]  ;;  %v1748_v31 = vld [vmem:[%s1671_s27 + $0x51] sm:$0xff]  ;;  %v231_v33 = vpack.c.bf16 %v1740_v28, %v1737_v27 }
  0x19   : > { %v428_v34 = vpack.c.bf16 %v1748_v31, %v1745_v30  ;;  %v1761_v36 = vld [vmem:[%s1671_s27 + $0x60] sm:$0xff]  ;;  %v1768_v38 = vld [vmem:[%s1671_s27 + $0x70] sm:$0xff] }
  0x1a   : > { %v1771_v39 = vld [vmem:[%s1671_s27 + $0x61] sm:$0xff]  ;;  %v1774_v40 = vld [vmem:[%s1671_s27 + $0x71] sm:$0xff]  ;;  %v232_v46 = vpack.c.bf16 %v1768_v38, %v1761_v36 }
  0x1b   : > { %v1367_v41 = vld [vmem:[%s1671_s27 + $0x120] sm:$0xff]  ;;  %v1382_v42 = vld [vmem:[%s1671_s27 + $0x1b0] sm:$0xff]  ;;  %v429_v45 = vpack.c.bf16 %v1774_v40, %v1771_v39 }
  0x1c   : > { %1528 = vmatmul.mubr.msk.bf16.vlgmr.msra.gmra.mxu0 %vm257_vm0, %v427_v29  ;;  %v1383_v43 = vld [vmem:[%s1671_s27 + $0x1c0] sm:$0xff]  ;;  %v1368_v44 = vld [vmem:[%s1671_s27 + $0x130] sm:$0xff] }
  0x1d   : > { %1518 = vmatmul.mubr.msk.bf16.vlgmr.msra.gmra.mxu1 %vm257_vm0, %v230_v32  ;;  %1546 = vmatpush3.bf16.msra.mxu0 %v1610_v22  ;;  %v640_v47 = vpack.c.bf16 %v1383_v43, %v1382_v42  ;;  %v1787_v48 = vld [vmem:[%s1671_s27 + $0x110] sm:$0xff]  ;;  %v533_v49 = vpack.c.bf16 %v1368_v44, %v1367_v41  ;;  %v1385_v52 = vld [vmem:[%s1671_s27 + $0x1e0] sm:$0xff]  ;;  %v854_v32 = vpack.c.bf16 %v1737_v27, %v1733_v26 }
  0x1e   : > { %1536 = vmatpush3.bf16.msra.mxu1 %v1609_v10  ;;  %1521 = vmatprep.mubr.msk.bf16.mxu1 %vm257_vm0, %v231_v33  ;;  %v963_v50 = vpack.c.bf16 %v1787_v48, %v1701_v14  ;;  %v1384_v51 = vld [vmem:[%s1671_s27 + $0x1d0] sm:$0xff]  ;;  %v1369_v53 = vld [vmem:[%s1671_s27 + $0x140] sm:$0xff]  ;;  %v855_v33 = vpack.c.bf16 %v1761_v36, %v1740_v28  ;;  %v1066_v28 = vpack.c.bf16 %v1723_v23, %v1712_v19 }
  0x1f   : > { %1531 = vmatprep.mubr.msk.bf16.mxu0 %vm257_vm0, %v428_v34  ;;  %1555 = vmatprep.subr.bf16.mxu1 %v1611_v35  ;;  %v1370_v54 = vld [vmem:[%s1671_s27 + $0x150] sm:$0xff]  ;;  %v1371_v55 = vld [vmem:[%s1671_s27 + $0x160] sm:$0xff]  ;;  %v641_v57 = vpack.c.bf16 %v1385_v52, %v1384_v51  ;;  %v960_v36 = vpack.c.bf16 %v1685_v8, %v1675_v4  ;;  %v1067_v41 = vpack.c.bf16 %v1745_v30, %v1726_v24 }
  0x20   : > { %1565 = vmatprep.subr.bf16.mxu0 %v1612_v37  ;;  %v1372_v56 = vld [vmem:[%s1671_s27 + $0x170] sm:$0xff]  ;;  %v1387_v59 = vld [vmem:[%s1671_s27 + $0x200] sm:$0xff]  ;;  %v534_v60 = vpack.c.bf16 %v1370_v54, %v1369_v53  ;;  %v1068_v19 = vpack.c.bf16 %v1771_v39, %v1748_v31  ;;  %v962_v4 = vpack.c.bf16 %v1698_v13, %v1682_v7 }
  0x21   : > { %v1386_v58 = vld [vmem:[%s1671_s27 + $0x1f0] sm:$0xff]  ;;  %v535_v61 = vpack.c.bf16 %v1372_v56, %v1371_v55  ;;  %v1389_v2 = vld [vmem:[%s1671_s27 + $0x220] sm:$0xff] }
  0x22   : > { %v642_v62 = vpack.c.bf16 %v1387_v59, %v1386_v58  ;;  %v1388_v1 = vld [vmem:[%s1671_s27 + $0x210] sm:$0xff]  ;;  %v1373_v3 = vld [vmem:[%s1671_s27 + $0x180] sm:$0xff] }
  0x23   : > { %v1374_v6 = vld [vmem:[%s1671_s27 + $0x190] sm:$0xff]  ;;  %v1397_v10 = vld [vmem:[%s1671_s27 + $0x121] sm:$0xff]  ;;  %v643_v12 = vpack.c.bf16 %v1389_v2, %v1388_v1 }
  0x24   : > { %1532 = vmatmul.mubr.msk.bf16.gmra.mxu0 %vm257_vm0, %v429_v45  ;;  %v1398_v11 = vld [vmem:[%s1671_s27 + $0x131] sm:$0xff]  ;;  %v536_v15 = vpack.c.bf16 %v1374_v6, %v1373_v3  ;;  %v1399_v20 = vld [vmem:[%s1671_s27 + $0x141] sm:$0xff] }
  0x25   : > { %1522 = vmatmul.mubr.msk.bf16.gmra.mxu1 %vm257_vm0, %v232_v46  ;;  %1547 = vmatprep.mubr.msk.bf16.mxu0 %vm257_vm0, %v640_v47  ;;  %v746_v18 = vpack.c.bf16 %v1398_v11, %v1397_v10  ;;  %v1400_v21 = vld [vmem:[%s1671_s27 + $0x151] sm:$0xff]  ;;  %v1401_v22 = vld [vmem:[%s1671_s27 + $0x161] sm:$0xff] }
  0x26   : > { %1537 = vmatprep.mubr.msk.bf16.mxu1 %vm257_vm0, %v533_v49  ;;  %v1402_v29 = vld [vmem:[%s1671_s27 + $0x171] sm:$0xff]  ;;  %v747_v17 = vpack.c.bf16 %v1400_v21, %v1399_v20  ;;  %v1419_v34 = vld [vmem:[%s1671_s27 + $0x80] sm:$0xff] }
  0x27   : > { %v748_v25 = vpack.c.bf16 %v1402_v29, %v1401_v22  ;;  %v856_v26 = vpack.c.bf16 %v1419_v34, %v1768_v38  ;;  %v961_v38 = vpack.c.bf16 %v1678_v5, %v1688_v9  ;;  %v1449_v8 = vld [vmem:[%s1671_s27 + $0x81] sm:$0xff] }
  0x28   : > { %v1069_v23 = vpack.c.bf16 %v1449_v8, %v1774_v40 }
  0x2c   : > { %1548 = vmatmul.mubr.msk.bf16.vlgmr.msra.gmra.mxu0 %vm257_vm0, %v641_v57 }
  0x2d   : > { %1538 = vmatmul.mubr.msk.bf16.vlgmr.msra.gmra.mxu1 %vm257_vm0, %v534_v60  ;;  %1566 = vmatpush3.bf16.msra.mxu0 %v1612_v37  ;;  %v1404_v37 = vld [vmem:[%s1671_s27 + $0x191] sm:$0xff] }
  0x2e   : > { %1556 = vmatpush3.bf16.msra.mxu1 %v1611_v35  ;;  %1541 = vmatprep.mubr.msk.bf16.mxu1 %vm257_vm0, %v535_v61  ;;  %v1403_v35 = vld [vmem:[%s1671_s27 + $0x181] sm:$0xff] }
  0x2f   : > { %1551 = vmatprep.mubr.msk.bf16.mxu0 %vm257_vm0, %v642_v62  ;;  %1575 = vmatprep.subr.bf16.mxu1 %v1613_v63  ;;  %v749_v27 = vpack.c.bf16 %v1404_v37, %v1403_v35 }
  0x30   : > { %1585 = vmatprep.subr.bf16.mxu0 %v1614_v0 }
  0x34   : > { %1552 = vmatmul.mubr.msk.bf16.gmra.mxu0 %vm257_vm0, %v643_v12 }
  0x35   : > { %1542 = vmatmul.mubr.msk.bf16.gmra.mxu1 %vm257_vm0, %v536_v15  ;;  %1567 = vmatprep.mubr.msk.bf16.mxu0 %vm257_vm0, %v853_v16 }
  0x36   : > { %1557 = vmatprep.mubr.msk.bf16.mxu1 %vm257_vm0, %v746_v18 }
  0x3c   : > { %1568 = vmatmul.mubr.msk.bf16.vlgmr.msra.gmra.mxu0 %vm257_vm0, %v854_v32 }
  0x3d   : > { %1558 = vmatmul.mubr.msk.bf16.vlgmr.msra.gmra.mxu1 %vm257_vm0, %v747_v17  ;;  %1586 = vmatpush3.bf16.msra.mxu0 %v1614_v0 }
  0x3e   : > { %1576 = vmatpush3.bf16.msra.mxu1 %v1613_v63  ;;  %1561 = vmatprep.mubr.msk.bf16.mxu1 %vm257_vm0, %v748_v25 }
  0x3f   : > { %1571 = vmatprep.mubr.msk.bf16.mxu0 %vm257_vm0, %v855_v33 }
  0x44   : > { %1572 = vmatmul.mubr.msk.bf16.gmra.mxu0 %vm257_vm0, %v856_v26 }
  0x45   : > { %1562 = vmatmul.mubr.msk.bf16.gmra.mxu1 %vm257_vm0, %v749_v27  ;;  %1587 = vmatprep.mubr.msk.bf16.mxu0 %vm257_vm0, %v1066_v28 }
  0x46   : > { %1577 = vmatprep.mubr.msk.bf16.mxu1 %vm257_vm0, %v960_v36 }
  0x4c   : > { %1588 = vmatmul.mubr.msk.bf16.vlgmr.msra.gmra.mxu0 %vm257_vm0, %v1067_v41 }
  0x4d   : > { %1578 = vmatmul.mubr.msk.bf16.vlgmr.msra.gmra.mxu1 %vm257_vm0, %v961_v38  ;;  %1591 = vmatprep.mubr.msk.bf16.mxu0 %vm257_vm0, %v1068_v19 }
  0x4e   : > { %1581 = vmatprep.mubr.msk.bf16.mxu1 %vm257_vm0, %v962_v4 }
  0x54   : > { %1592 = vmatmul.mubr.msk.bf16.gmra.mxu0 %vm257_vm0, %v1069_v23 }
  0x55   : > { %1582 = vmatmul.mubr.msk.bf16.gmra.mxu1 %vm257_vm0, %v963_v50 }
  0xd4   : > { %v1509_v5 = vpop.f32.mrf.mxu0 }
  0xd5   : > { %v1513_v7 = vpop.f32.mrf.mxu1 }
  0xd6   : > { %v304_v9 = vpop.f32.mrf.mxu0 }
  0xd7   : > { %v320_v13 = vpop.f32.mrf.mxu1 }
  0xd8   : > { %v1510_v24 = vpop.f32.mrf.mxu0 }
  0xd9   : > { %v1868_v30 = vpop.f32.mrf.mxu1 }
  0xda   : > { %v307_v31 = vpop.f32.mrf.mxu0 }
  0xdb   : > { %v1870_v39 = vpop.f32.mrf.mxu1 }
  0xdc   : > { %v1529_v42 = vpop.f32.mrf.mxu0 }
  0xdd   : > { %v1519_v43 = vpop.f32.mrf.mxu1 }
  0xde   : > { %v485_v40 = vpop.f32.mrf.mxu0  ;;  %v396_v15 = vadd.f32 %v1519_v43, %v1509_v5 }
  0xdf   : > { %v387_v44 = vpop.f32.mrf.mxu1 }
  0xe0   : > { %v1530_v45 = vpop.f32.mrf.mxu0  ;;  %v388_v20 = vadd.f32 %v387_v44, %v304_v9  ;;  %v518_v29 = vadd.f32 %v1529_v42, %v396_v15 }
  0xe1   : > { %v1520_v46 = vpop.f32.mrf.mxu1 }
  0xe2   : > { %v488_v47 = vpop.f32.mrf.mxu0  ;;  %v399_v32 = vadd.f32 %v1520_v46, %v1510_v24  ;;  %v516_v33 = vadd.f32 %v485_v40, %v388_v20 }
  0xe3   : > { %v390_v14 = vpop.f32.mrf.mxu1 }
  0xe4   : > { %v1533_v48 = vpop.f32.mrf.mxu0  ;;  %v391_v37 = vadd.f32 %v390_v14, %v307_v31  ;;  %v519_v27 = vadd.f32 %v1530_v45, %v399_v32 }
  0xe5   : > { %v1523_v49 = vpop.f32.mrf.mxu1 }
  0xe6   : > { %v501_v50 = vpop.f32.mrf.mxu0  ;;  %v412_v28 = vadd.f32 %v1523_v49, %v1513_v7  ;;  %v517_v5 = vadd.f32 %v488_v47, %v391_v37 }
  0xe7   : > { %v403_v51 = vpop.f32.mrf.mxu1 }
  0xe8   : > { %v1872_v52 = vpop.f32.mrf.mxu0  ;;  %v404_v38 = vadd.f32 %v403_v51, %v320_v13  ;;  %v522_v24 = vadd.f32 %v1533_v48, %v412_v28 }
  0xe9   : > { %v1524_v53 = vpop.f32.mrf.mxu1 }
  0xea   : > { %v1874_v54 = vpop.f32.mrf.mxu0  ;;  %v520_v31 = vadd.f32 %v501_v50, %v404_v38  ;;  %v415_v7 = vadd.f32 %v1524_v53, %v1868_v30 }
  0xeb   : > { %v406_v55 = vpop.f32.mrf.mxu1 }
  0xec   : > { %v1549_v56 = vpop.f32.mrf.mxu0  ;;  %v407_v44 = vadd.f32 %v406_v55, %v1870_v39 }
  0xed   : > { %v1539_v57 = vpop.f32.mrf.mxu1 }
  0xee   : > { %v699_v58 = vpop.f32.mrf.mxu0  ;;  %v625_v34 = vadd.f32 %v1539_v57, %v518_v29  ;;  %v521_v50 = vadd.f32 %v1874_v54, %v407_v44 }
  0xef   : > { %v592_v59 = vpop.f32.mrf.mxu1 }
  0xf0   : > { %v1550_v60 = vpop.f32.mrf.mxu0  ;;  %v623_v36 = vadd.f32 %v592_v59, %v516_v33  ;;  %v732_v4 = vadd.f32 %v1549_v56, %v625_v34  ;;  %v523_v59 = vadd.f32 %v1872_v52, %v415_v7 }
  0xf1   : > { %v1540_v61 = vpop.f32.mrf.mxu1 }
  0xf2   : > { %v702_v62 = vpop.f32.mrf.mxu0  ;;  %v626_v8 = vadd.f32 %v1540_v61, %v519_v27  ;;  %v730_v42 = vadd.f32 %v699_v58, %v623_v36 }
  0xf3   : > { %v595_v63 = vpop.f32.mrf.mxu1 }
  0xf4   : > { %v1553_v0 = vpop.f32.mrf.mxu0  ;;  %v624_v13 = vadd.f32 %v595_v63, %v517_v5  ;;  %v733_v46 = vadd.f32 %v1550_v60, %v626_v8 }
  0xf5   : > { %v1543_v1 = vpop.f32.mrf.mxu1 }
  0xf6   : > { %v715_v2 = vpop.f32.mrf.mxu0  ;;  %v629_v14 = vadd.f32 %v1543_v1, %v522_v24  ;;  %v731_v61 = vadd.f32 %v702_v62, %v624_v13 }
  0xf7   : > { %v608_v3 = vpop.f32.mrf.mxu1 }
  0xf8   : > { %v1876_v6 = vpop.f32.mrf.mxu0  ;;  %v627_v51 = vadd.f32 %v608_v3, %v520_v31  ;;  %v736_v53 = vadd.f32 %v1553_v0, %v629_v14 }
  0xf9   : > { %v1544_v10 = vpop.f32.mrf.mxu1 }
  0xfa   : > { %v1878_v11 = vpop.f32.mrf.mxu0  ;;  %v734_v63 = vadd.f32 %v715_v2, %v627_v51  ;;  %v630_v1 = vadd.f32 %v1544_v10, %v523_v59 }
  0xfb   : > { %v611_v12 = vpop.f32.mrf.mxu1 }
  0xfc   : > { %v1569_v16 = vpop.f32.mrf.mxu0  ;;  %v628_v15 = vadd.f32 %v611_v12, %v521_v50 }
  0xfd   : > { %v1559_v18 = vpop.f32.mrf.mxu1 }
  0xfe   : > { %v912_v21 = vpop.f32.mrf.mxu0  ;;  %v838_v43 = vadd.f32 %v1559_v18, %v732_v4 }
  0xff   : > { %v805_v22 = vpop.f32.mrf.mxu1 }
 0x100   : > { %v1570_v17 = vpop.f32.mrf.mxu0  ;;  %v836_v49 = vadd.f32 %v805_v22, %v730_v42  ;;  %v945_v56 = vadd.f32 %v1569_v16, %v838_v43  ;;  %v737_v22 = vadd.f32 %v1876_v6, %v630_v1 }
 0x101   : > { %v1560_v25 = vpop.f32.mrf.mxu1 }
 0x102   : > { %v915_v35 = vpop.f32.mrf.mxu0  ;;  %v839_v57 = vadd.f32 %v1560_v25, %v733_v46  ;;  %v943_v39 = vadd.f32 %v912_v21, %v836_v49  ;;  %v735_v25 = vadd.f32 %v1878_v11, %v628_v15 }
 0x103   : > { %v808_v26 = vpop.f32.mrf.mxu1 }
 0x104   : > { %v1573_v41 = vpop.f32.mrf.mxu0  ;;  %v837_v3 = vadd.f32 %v808_v26, %v731_v61  ;;  %v946_v16 = vadd.f32 %v1570_v17, %v839_v57 }
 0x105   : > { %v1563_v19 = vpop.f32.mrf.mxu1 }
 0x106   : > { %v928_v23 = vpop.f32.mrf.mxu0  ;;  %v842_v54 = vadd.f32 %v1563_v19, %v736_v53  ;;  %v944_v29 = vadd.f32 %v915_v35, %v837_v3 }
 0x107   : > { %v821_v9 = vpop.f32.mrf.mxu1 }
 0x108   : > { %v1881_v40 = vpop.f32.mrf.mxu0  ;;  %v840_v21 = vadd.f32 %v821_v9, %v734_v63  ;;  %v949_v17 = vadd.f32 %v1573_v41, %v842_v54 }
 0x109   : > { %v1564_v45 = vpop.f32.mrf.mxu1 }
 0x10a   : > { %v931_v47 = vpop.f32.mrf.mxu0  ;;  %v843_v37 = vadd.f32 %v1564_v45, %v737_v22  ;;  %v947_v28 = vadd.f32 %v928_v23, %v840_v21 }
 0x10b   : > { %v824_v48 = vpop.f32.mrf.mxu1 }
 0x10c   : > { %v1589_v58 = vpop.f32.mrf.mxu0  ;;  %v841_v36 = vadd.f32 %v824_v48, %v735_v25  ;;  %v950_v5 = vadd.f32 %v1881_v40, %v843_v37 }
 0x10d   : > { %v1579_v30 = vpop.f32.mrf.mxu1 }
 0x10e   : > { %v1052_v55 = vadd.f32 %v1579_v30, %v945_v56  ;;  %v1125_v60 = vpop.f32.mrf.mxu0  ;;  %v948_v43 = vadd.f32 %v931_v47, %v841_v36 }
 0x10f   : > { %v1019_v52 = vpop.f32.mrf.mxu1 }
 0x110   : > { %v1158_v62 = vadd.f32 %v1589_v58, %v1052_v55  ;;  %v1050_v0 = vadd.f32 %v1019_v52, %v943_v39  ;;  %v1590_v18 = vpop.f32.mrf.mxu0 }
 0x111   : > { %v1580_v20 = vpop.f32.mrf.mxu1 }
 0x112   : > { %1167 = vst.msk [vmem:[%s1894_s19 + $0x10] sm:$0xff] %vm1164_vm1, %v1158_v62  ;;  %v1156_v2 = vadd.f32 %v1125_v60, %v1050_v0  ;;  %v1053_v10 = vadd.f32 %v1580_v20, %v946_v16  ;;  %v1128_v12 = vpop.f32.mrf.mxu0  ;;  %v1198_v11 = vmul.f32 %v1158_v62, %v1158_v62  ;;  %v1176_v31 = vsel %vm1164_vm1, %v1158_v62, 0.0 }
 0x113   : > { %v1022_v32 = vpop.f32.mrf.mxu1 }
 0x114   : > { %1165 = vst.msk [vmem:[%s1894_s19] sm:$0xff] %vm1164_vm1, %v1156_v2  ;;  %v1159_v33 = vadd.f32 %v1590_v18, %v1053_v10  ;;  %v1593_v34 = vpop.f32.mrf.mxu0  ;;  %v1051_v26 = vadd.f32 %v1022_v32, %v944_v29  ;;  %v1196_v6 = vmul.f32 %v1156_v2, %v1156_v2  ;;  %v1173_v9 = vsel %vm1164_vm1, %v1156_v2, 0.0 }
 0x115   : > { %v1583_v27 = vpop.f32.mrf.mxu1  ;;  %v1207_v51 = vsel %vm1164_vm1, %v1198_v11, 0.0 }
 0x116   : > { %1168 = vst.msk [vmem:[%s1894_s19 + $0x18] sm:$0xff] %vm1164_vm1, %v1159_v33  ;;  %v1056_v38 = vadd.f32 %v1583_v27, %v949_v17  ;;  %v1141_v19 = vpop.f32.mrf.mxu0  ;;  %v1157_v35 = vadd.f32 %v1128_v12, %v1051_v26  ;;  %v1204_v45 = vsel %vm1164_vm1, %v1196_v6, 0.0  ;;  %v1199_v40 = vmul.f32 %v1159_v33, %v1159_v33 }
 0x117   : > { %v1035_v4 = vpop.f32.mrf.mxu1  ;;  %v1178_v47 = vsel %vm1164_vm1, %v1159_v33, 0.0 }
 0x118   : > { %v1162_v41 = vadd.f32 %v1593_v34, %v1056_v38  ;;  %v1054_v8 = vadd.f32 %v1035_v4, %v947_v28  ;;  %1166 = vst.msk [vmem:[%s1894_s19 + $0x8] sm:$0xff] %vm1164_vm1, %v1157_v35  ;;  %v1174_v23 = vsel %vm1164_vm1, %v1157_v35, 0.0  ;;  %v1197_v24 = vmul.f32 %v1157_v35, %v1157_v35  ;;  %v1594_v13 = vpop.f32.mrf.mxu0 }
 0x119   : > { %v1584_v42 = vpop.f32.mrf.mxu1  ;;  %v1175_v7 = vadd.f32 %v1174_v23, %v1173_v9  ;;  %v1209_v53 = vsel %vm1164_vm1, %v1199_v40, 0.0 }
 0x11a   : > { %1171 = vst.msk [vmem:[%s1894_s19 + $0x30] sm:$0xff] %vm1164_vm1, %v1162_v41  ;;  %v1160_v44 = vadd.f32 %v1141_v19, %v1054_v8  ;;  %v1205_v46 = vsel %vm1164_vm1, %v1197_v24, 0.0  ;;  %v1057_v14 = vadd.f32 %v1584_v42, %v950_v5  ;;  %v1144_v30 = vpop.f32.mrf.mxu0  ;;  %v1202_v1 = vmul.f32 %v1162_v41, %v1162_v41 }
 0x11b   : > { %v1038_v49 = vpop.f32.mrf.mxu1  ;;  %v1177_v48 = vadd.f32 %v1176_v31, %v1175_v7  ;;  %v1206_v56 = vadd.f32 %v1205_v46, %v1204_v45  ;;  %v1184_v62 = vsel %vm1164_vm1, %v1162_v41, 0.0 }
 0x11c   : > { %1169 = vst.msk [vmem:[%s1894_s19 + $0x20] sm:$0xff] %vm1164_vm1, %v1160_v44  ;;  %v1200_v57 = vmul.f32 %v1160_v44, %v1160_v44  ;;  %v1163_v58 = vadd.f32 %v1594_v13, %v1057_v14  ;;  %v1055_v59 = vadd.f32 %v1038_v49, %v948_v43  ;;  %v1180_v39 = vsel %vm1164_vm1, %v1160_v44, 0.0 }
 0x11d   : > { %v1208_v50 = vadd.f32 %v1207_v51, %v1206_v56  ;;  %v1179_v61 = vadd.f32 %v1178_v47, %v1177_v48  ;;  %v1215_v2 = vsel %vm1164_vm1, %v1202_v1, 0.0 }
 0x11e   : > { %1172 = vst.msk [vmem:[%s1894_s19 + $0x38] sm:$0xff] %vm1164_vm1, %v1163_v58  ;;  %v1161_v55 = vadd.f32 %v1144_v30, %v1055_v59  ;;  %v1211_v15 = vsel %vm1164_vm1, %v1200_v57, 0.0  ;;  %v1203_v0 = vmul.f32 %v1163_v58, %v1163_v58  ;;  %v1186_v10 = vsel %vm1164_vm1, %v1163_v58, 0.0 }
 0x11f   : > { %v1181_v60 = vadd.f32 %v1180_v39, %v1179_v61  ;;  %v1210_v63 = vadd.f32 %v1209_v53, %v1208_v50 }
 0x120   : > { %1170 = vst.msk [vmem:[%s1894_s19 + $0x28] sm:$0xff] %vm1164_vm1, %v1161_v55  ;;  %v1182_v3 = vsel %vm1164_vm1, %v1161_v55, 0.0  ;;  %v1201_v52 = vmul.f32 %v1161_v55, %v1161_v55  ;;  %v1217_v29 = vsel %vm1164_vm1, %v1203_v0, 0.0 }
 0x121   : > { %v1212_v16 = vadd.f32 %v1211_v15, %v1210_v63  ;;  %v1183_v54 = vadd.f32 %v1182_v3, %v1181_v60 }
 0x122   : > { %v1213_v18 = vsel %vm1164_vm1, %v1201_v52, 0.0 }
 0x123   : > { %v1185_v20 = vadd.f32 %v1184_v62, %v1183_v54  ;;  %v1214_v21 = vadd.f32 %v1213_v18, %v1212_v16 }
 0x125   : > { %v1187_v12 = vadd.f32 %v1186_v10, %v1185_v20  ;;  %v1216_v22 = vadd.f32 %v1215_v2, %v1214_v21 }
 0x127   : > { %v1188_v32 = vrot.slane %v1187_v12, 4  ;;  %v1218_v25 = vadd.f32 %v1217_v29, %v1216_v22 }
 0x129   : > { %v1189_v17 = vadd.f32 %v1188_v32, %v1187_v12  ;;  %v1219_v33 = vrot.slane %v1218_v25, 4 }
 0x12b   : > { %v1190_v34 = vrot.slane %v1189_v17, 2  ;;  %v1220_v37 = vadd.f32 %v1219_v33, %v1218_v25 }
 0x12d   : > { %v1191_v26 = vadd.f32 %v1190_v34, %v1189_v17  ;;  %v1221_v27 = vrot.slane %v1220_v37, 2 }
 0x12f   : > { %v1192_v28 = vrot.slane %v1191_v26, 1  ;;  %v1222_v36 = vadd.f32 %v1221_v27, %v1220_v37 }
 0x131   : > { %v1193_v38 = vadd.f32 %v1192_v28, %v1191_v26  ;;  %v1223_v19 = vrot.slane %v1222_v36, 1 }
 0x133   : > { %1195 = vst.msk [vmem:[%s216_s22] sm:$0x1] %vm1194_vm2, %v1193_v38  ;;  %v1224_v6 = vadd.f32 %v1223_v19, %v1222_v36 }
 0x135   : > { %1225 = vst.msk [vmem:[%s219_s25] sm:$0x1] %vm1194_vm2, %v1224_v6 }
 0x136 PF: > { %s15_s15 = sadd.s32 1, %s1621_s15  }
 0x137   : > { %p12_p5 = scmp.ge.s32.totalorder %s15_s15, 4  }
 0x139   :  { %14 = sbr.rel (!%p12_p5) target bundleno = 1 (0x1), region = 95 }

// kernel: fwd.10
= control target key start
LH: loop header
LB: loop body
LE: loop exit
PB: predicated region body
PF: predicated region fallthrough
CT: control target
= control target key end

     0   :  { %s1944_s27 = smov 0   ;;  %s2262_s0 = inlined_call_operand.vmem [shape: f32[2,8,8,32], index: 0, kind: input, shape index: {}]   ;;  %s2263_s1 = inlined_call_operand.vmem [shape: f32[2,1,32], index: 1, kind: input, shape index: {}]   ;;  %s2264_s2 = inlined_call_operand.vmem [shape: f32[2,1,32], index: 2, kind: input, shape index: {}]   ;;  %s2265_s3 = inlined_call_operand.vmem [shape: f32[1,32], index: 3, kind: input, shape index: {}]   ;;  %s2266_s4 = inlined_call_operand.vmem [shape: f32[1,32], index: 4, kind: input, shape index: {}]   ;;  %s2267_s5 = inlined_call_operand.vmem [shape: bf16[9,32,32], index: 5, kind: input, shape index: {}]   ;;  %s2268_s6 = inlined_call_operand.vmem [shape: f32[2,8,8,32], index: 6, kind: output, shape index: {0}]   ;;  %s2269_s7 = inlined_call_operand.vmem [shape: f32[2,1,32], index: 7, kind: output, shape index: {1}]   ;;  %s2270_s8 = inlined_call_operand.vmem [shape: f32[2,1,32], index: 8, kind: output, shape index: {2}]  }
   0x1 LB: > { %s1596_s28 = sadd.s32 4294967295, %s1896_s27   ;;  %p1600_p0 = scmp.ge.s32.totalorder %s1896_s27, 1  ;;  %s1896_s27 = sphi %s1944_s27, %s19_s27  }
   0x2   : > { %p267_p1 = scmp.lt.s32.totalorder %s1896_s27, 3 }
   0x4   : > { %p268_p2 = pnand %p1600_p0, %p267_p1 }
   0x5   : > { %p307_p3 = scmp.lt.s32.totalorder (!%p268_p2), %s1596_s28, 1 }
   0x6   : > { %271 = sbr.rel (%p268_p2) target bundleno = 352 (0x160), region = 44 }
   0xb   : > { %v1870_v0 = vld [vmem:[%s2267_s5 + $0x18] sm:$0xff]   ;;  %v1871_v1 = vld [vmem:[%s2267_s5 + $0x10] sm:$0xff]   ;;  %vm326_vm0 = vcmask 253952   ;;  %v324_v2 = vld [vmem:[%s2263_s1] sm:$0x1]  ;;  %vm390_vm1 = vcmask 261120   ;;  %v355_v20 = vlaneseq }
   0xc   : > { %1857 = vmatprep.subr.bf16.mxu1 %v1870_v0  ;;  %1749 = vmatprep.subr.bf16.mxu0 %v1870_v0  ;;  %v325_v3 = vld [vmem:[%s2263_s1 + $0x1] sm:$0x1]  ;;  %v327_v4 = vsel %vm326_vm0, %v324_v2, 0.0  ;;  %v331_v6 = vld [vmem:[%s2264_s2] sm:$0x1]  ;;  %vm392_vm2 = vcmask 254976  }
   0xd   : > { %1859 = vmatpush3.bf16.msra.mxu1 %v1870_v0  ;;  %1750 = vmatpush3.bf16.msra.mxu0 %v1870_v0  ;;  %v328_v5 = vsel %vm326_vm0, %v325_v3, 0.0  ;;  %v332_v7 = vld [vmem:[%s2264_s2 + $0x1] sm:$0x1]  ;;  %v333_v9 = vsel %vm326_vm0, %v331_v6, 0.0  ;;  %v1977_v12 = vld [vmem:[%s2267_s5 + $0x8] sm:$0xff]   ;;  %v1898_v14 = vmov 0.0  }
   0xe   : > { %1858 = vmatprep.subr.bf16.mxu1 %v1871_v1  ;;  %1751 = vmatprep.subr.bf16.mxu0 %v1871_v1  ;;  %v329_v8 = vadd.f32 %v328_v5, %v327_v4  ;;  %v334_v10 = vsel %vm326_vm0, %v332_v7, 0.0  ;;  %391 = vst.msk [vmem:[#allocation2] sm:$0xff] %vm390_vm1, %v1898_v14  ;;  %394 = vst.msk [vmem:[#allocation2 + $0x10] sm:$0xff] %vm390_vm1, %v1898_v14  ;;  %v2003_v17 = vld [vmem:[%s2267_s5 + $0x28] sm:$0xff]   ;;  %s2272_s28 = smov (!%p307_p3, %s1596_s28), 1  ;;  %v356_v21 = vshrl.u32 %v355_v20, 7 }
   0xf   : > { %v335_v11 = vadd.f32 %v334_v10, %v333_v9  ;;  %393 = vst.msk [vmem:[#allocation2 + $0x8] sm:$0x3] %vm392_vm2, %v1898_v14  ;;  %395 = vst.msk [vmem:[#allocation2 + $0x18] sm:$0x3] %vm392_vm2, %v1898_v14  ;;  %s1693_s23 = sshll.u32 %s2272_s28, 6  ;;  %v1875_v5 = vld [vmem:[%s2267_s5 + $0x20] sm:$0xff]   ;;  %s319_s25 = scalar_lea.vmem %s2269_s7, %s2272_s28 }
  0x10   : > { %v330_v13 = vmul.f32 0.0078125, %v329_v8  ;;  %396 = vst.msk [vmem:[#allocation2 + $0x20] sm:$0xff] %vm390_vm1, %v1898_v14  ;;  %398 = vst.msk [vmem:[#allocation2 + $0x30] sm:$0xff] %vm390_vm1, %v1898_v14  ;;  %s311_s26 = scalar_lea.vmem %s2262_s0, %s1693_s23  ;;  %v339_v22 = vld [vmem:[%s2265_s3] sm:$0x1]  ;;  %v357_v23 = vsub.s32 0, %v356_v21  ;;  %s2213_s22 = scalar_lea.vmem %s2268_s6, %s1693_s23 }
  0x11   : > { %397 = vst.msk [vmem:[#allocation2 + $0x28] sm:$0x3] %vm392_vm2, %v1898_v14  ;;  %399 = vst.msk [vmem:[#allocation2 + $0x38] sm:$0x3] %vm392_vm2, %v1898_v14  ;;  %1860 = vmatpush3.bf16.msra.mxu1 %v1871_v1  ;;  %1752 = vmatpush3.bf16.msra.mxu0 %v1871_v1  ;;  %v336_v15 = vmul.f32 0.0078125, %v335_v11  ;;  %v346_v27 = vld [vmem:[%s311_s26] sm:$0xff]  ;;  %s322_s30 = scalar_lea.vmem %s2270_s8, %s2272_s28 }
  0x12   : > { %400 = vst.msk [vmem:[#allocation2 + $0x40] sm:$0xff] %vm390_vm1, %v1898_v14  ;;  %402 = vst.msk [vmem:[#allocation2 + $0x50] sm:$0xff] %vm390_vm1, %v1898_v14  ;;  %v337_v16 = vmul.f32 %v330_v13, %v330_v13  ;;  %1761 = vmatprep.subr.bf16.mxu1 %v1977_v12  ;;  %1773 = vmatprep.subr.bf16.mxu0 %v2003_v17  ;;  %v343_v26 = vld [vmem:[%s2266_s4] sm:$0x1]  ;;  %v349_v28 = vld [vmem:[%s311_s26 + $0x18] sm:$0xff] }
  0x13   : > { %401 = vst.msk [vmem:[#allocation2 + $0x48] sm:$0x3] %vm392_vm2, %v1898_v14  ;;  %403 = vst.msk [vmem:[#allocation2 + $0x58] sm:$0x3] %vm392_vm2, %v1898_v14  ;;  %v350_v29 = vld [vmem:[%s311_s26 + $0x20] sm:$0xff]  ;;  %v347_v30 = vld [vmem:[%s311_s26 + $0x8] sm:$0xff] }
  0x14   : > { %404 = vst.msk [vmem:[#allocation2 + $0x60] sm:$0xff] %vm390_vm1, %v1898_v14  ;;  %406 = vst.msk [vmem:[#allocation2 + $0x70] sm:$0xff] %vm390_vm1, %v1898_v14  ;;  %v338_v18 = vsub.f32 %v336_v15, %v337_v16  ;;  %v348_v33 = vld [vmem:[%s311_s26 + $0x10] sm:$0xff]  ;;  %v351_v34 = vld [vmem:[%s311_s26 + $0x28] sm:$0xff] }
  0x15   : > { %405 = vst.msk [vmem:[#allocation2 + $0x68] sm:$0x3] %vm392_vm2, %v1898_v14  ;;  %407 = vst.msk [vmem:[#allocation2 + $0x78] sm:$0x3] %vm392_vm2, %v1898_v14  ;;  %v352_v35 = vld [vmem:[%s311_s26 + $0x30] sm:$0xff]  ;;  %v353_v36 = vld [vmem:[%s311_s26 + $0x38] sm:$0xff] }
  0x16   : > { %408 = vst.msk [vmem:[#allocation2 + $0x80] sm:$0xff] %vm390_vm1, %v1898_v14  ;;  %410 = vst.msk [vmem:[#allocation2 + $0x90] sm:$0xff] %vm390_vm1, %v1898_v14  ;;  %v340_v19 = vadd.f32 1e-05, %v338_v18  ;;  %v437_v63 = vld [vmem:[#allocation2 + $0x1] sm:$0xff] }
  0x17   : > { %409 = vst.msk [vmem:[#allocation2 + $0x88] sm:$0x3] %vm392_vm2, %v1898_v14  ;;  %411 = vst.msk [vmem:[#allocation2 + $0x98] sm:$0x3] %vm392_vm2, %v1898_v14  ;;  %v421_v0 = vld [vmem:[#allocation2] sm:$0xff] }
  0x18   : > { %1888 = vrsqrt.f32 %v340_v19  ;;  %v632_v1 = vld [vmem:[#allocation2 + $0x2] sm:$0xff] }
  0x19   : > { %v1874_v18 = vld [vmem:[%s2267_s5] sm:$0xff]  }
  0x25   : > { %v1889_v24 = vpop.eup %1888 }
  0x26   : > { %v342_v25 = vmul.f32 %v1889_v24, %v339_v22 }
  0x28   : > { %v344_v31 = vmul.f32 %v342_v25, %v330_v13  ;;  %v358_v32 = vrot.slane %v342_v25, %v357_v23  ;;  %v1877_v25 = vld [vmem:[%s2267_s5 + $0x48] sm:$0xff]  }
  0x2a   : > { %v345_v37 = vsub.f32 %v343_v26, %v344_v31  ;;  %v360_v38 = vmul.f32 %v358_v32, %v346_v27  ;;  %v363_v39 = vmul.f32 %v358_v32, %v349_v28  ;;  %v364_v40 = vmul.f32 %v358_v32, %v350_v29 }
  0x2b   : > { %v361_v41 = vmul.f32 %v358_v32, %v347_v30  ;;  %v362_v42 = vmul.f32 %v358_v32, %v348_v33  ;;  %v365_v43 = vmul.f32 %v358_v32, %v351_v34  ;;  %v366_v44 = vmul.f32 %v358_v32, %v352_v35  ;;  %v1878_v33 = vld [vmem:[%s2267_s5 + $0x30] sm:$0xff]   ;;  %v1879_v34 = vld [vmem:[%s2267_s5 + $0x40] sm:$0xff]  }
  0x2c   : > { %v372_v45 = vrot.slane %v345_v37, %v357_v23  ;;  %v367_v46 = vmul.f32 %v358_v32, %v353_v36 }
  0x2e   : > { %v374_v47 = vadd.f32 %v372_v45, %v360_v38  ;;  %v377_v48 = vadd.f32 %v372_v45, %v363_v39  ;;  %v378_v49 = vadd.f32 %v372_v45, %v364_v40  ;;  %v375_v50 = vadd.f32 %v372_v45, %v361_v41  ;;  %v1881_v39 = vld [vmem:[%s2267_s5 + $0x68] sm:$0xff]   ;;  %v1880_v40 = vld [vmem:[%s2267_s5 + $0x58] sm:$0xff]  }
  0x2f   : > { %v376_v51 = vadd.f32 %v372_v45, %v362_v42  ;;  %v379_v52 = vadd.f32 %v372_v45, %v365_v43  ;;  %v380_v53 = vadd.f32 %v372_v45, %v366_v44  ;;  %v381_v54 = vadd.f32 %v372_v45, %v367_v46 }
  0x30   : > { %v382_v55 = vmax.f32 %v374_v47, 0.0  ;;  %v385_v56 = vmax.f32 %v377_v48, 0.0  ;;  %v386_v57 = vmax.f32 %v378_v49, 0.0  ;;  %v383_v58 = vmax.f32 %v375_v50, 0.0  ;;  %v1882_v49 = vld [vmem:[%s2267_s5 + $0x50] sm:$0xff]   ;;  %v1883_v50 = vld [vmem:[%s2267_s5 + $0x60] sm:$0xff]  }
  0x31   : > { %v384_v59 = vmax.f32 %v376_v51, 0.0  ;;  %v387_v60 = vmax.f32 %v379_v52, 0.0  ;;  %v388_v61 = vmax.f32 %v380_v53, 0.0  ;;  %v389_v62 = vmax.f32 %v381_v54, 0.0  ;;  %v1885_v53 = vld [vmem:[%s2267_s5 + $0x88] sm:$0xff]   ;;  %v1884_v54 = vld [vmem:[%s2267_s5 + $0x78] sm:$0xff]  }
  0x32   : > { %413 = vst.msk [vmem:[#allocation2 + $0x11] sm:$0xff] %vm390_vm1, %v382_v55  ;;  %416 = vst.msk [vmem:[#allocation2 + $0x41] sm:$0xff] %vm390_vm1, %v385_v56 }
  0x33   : > { %417 = vst.msk [vmem:[#allocation2 + $0x51] sm:$0xff] %vm390_vm1, %v386_v57  ;;  %414 = vst.msk [vmem:[#allocation2 + $0x21] sm:$0xff] %vm390_vm1, %v383_v58 }
  0x34   : > { %415 = vst.msk [vmem:[#allocation2 + $0x31] sm:$0xff] %vm390_vm1, %v384_v59  ;;  %418 = vst.msk [vmem:[#allocation2 + $0x61] sm:$0xff] %vm390_vm1, %v387_v60  ;;  %v1886_v60 = vld [vmem:[%s2267_s5 + $0x70] sm:$0xff]  }
  0x35   : > { %419 = vst.msk [vmem:[#allocation2 + $0x71] sm:$0xff] %vm390_vm1, %v388_v61  ;;  %420 = vst.msk [vmem:[#allocation2 + $0x81] sm:$0xff] %vm390_vm1, %v389_v62  ;;  %v1887_v61 = vld [vmem:[%s2267_s5 + $0x80] sm:$0xff]   ;;  %v1096_v62 = vld [vmem:[#allocation2 + $0x90] sm:$0xff] }
  0x39   : > { %v2032_v2 = vld [vmem:[#allocation2 + $0x11] sm:$0xff]  ;;  %v2034_v3 = vld [vmem:[#allocation2 + $0x41] sm:$0xff] }
  0x3a   : > { %v2036_v4 = vld [vmem:[#allocation2 + $0x51] sm:$0xff]  ;;  %v445_v6 = vpack.c.bf16 %v2032_v2, %v437_v63  ;;  %v2046_v8 = vld [vmem:[#allocation2 + $0x21] sm:$0xff] }
  0x3b   : > { %v2044_v7 = vpack.c.bf16 %v2036_v4, %v2034_v3  ;;  %v2048_v9 = vld [vmem:[#allocation2 + $0x31] sm:$0xff]  ;;  %v2050_v10 = vld [vmem:[#allocation2 + $0x61] sm:$0xff]  ;;  %v868_v43 = vpack.c.bf16 %v2046_v8, %v2032_v2 }
  0x3c   : > { %v2054_v11 = vpack.c.bf16 %v2048_v9, %v2046_v8  ;;  %v2056_v13 = vld [vmem:[#allocation2 + $0x71] sm:$0xff]  ;;  %1753 = vmatprep.mubr.msk.bf16.mxu0 %vm390_vm1, %v445_v6  ;;  %v2076_v21 = vld [vmem:[#allocation2 + $0x22] sm:$0xff]  ;;  %v869_v45 = vpack.c.bf16 %v2034_v3, %v2048_v9  ;;  %v870_v48 = vpack.c.bf16 %v2050_v10, %v2036_v4 }
  0x3d   : > { %v422_v14 = vld [vmem:[#allocation2 + $0x10] sm:$0xff]  ;;  %1757 = vmatprep.mubr.msk.bf16.mxu1 %vm390_vm1, %v2044_v7  ;;  %v2065_v16 = vpack.c.bf16 %v2056_v13, %v2050_v10  ;;  %v423_v23 = vld [vmem:[#allocation2 + $0x20] sm:$0xff] }
  0x3e   : > { %v2058_v15 = vld [vmem:[#allocation2 + $0x12] sm:$0xff]  ;;  %v429_v19 = vpack.c.bf16 %v422_v14, %v421_v0  ;;  %1754 = vmatmul.mubr.msk.bf16.vlgmr.msra.gmra.mxu0 %vm390_vm1, %v2054_v11  ;;  %v425_v26 = vld [vmem:[#allocation2 + $0x40] sm:$0xff]  ;;  %v754_v44 = vpack.c.bf16 %v423_v23, %v422_v14 }
  0x3f   : > { %v640_v20 = vpack.c.bf16 %v2058_v15, %v632_v1  ;;  %1758 = vmatmul.mubr.msk.bf16.vlgmr.msra.gmra.mxu1 %vm390_vm1, %v2065_v16  ;;  %1774 = vmatpush3.bf16.msra.mxu0 %v2003_v17  ;;  %v2078_v22 = vld [vmem:[#allocation2 + $0x32] sm:$0xff]  ;;  %v2093_v28 = vld [vmem:[#allocation2 + $0x42] sm:$0xff]  ;;  %v982_v57 = vpack.c.bf16 %v2076_v21, %v2058_v15 }
  0x40   : > { %1762 = vmatpush3.bf16.msra.mxu1 %v1977_v12  ;;  %1775 = vmatprep.subr.bf16.mxu0 %v1875_v5  ;;  %v424_v24 = vld [vmem:[#allocation2 + $0x30] sm:$0xff]  ;;  %v1876_v17 = vld [vmem:[%s2267_s5 + $0x38] sm:$0xff]   ;;  %v2091_v12 = vpack.c.bf16 %v2078_v22, %v2076_v21  ;;  %v638_v35 = vld [vmem:[#allocation2 + $0x62] sm:$0xff]  ;;  %v983_v58 = vpack.c.bf16 %v2093_v28, %v2078_v22 }
  0x41   : > { %1763 = vmatprep.subr.bf16.mxu1 %v1874_v18  ;;  %1765 = vmatprep.mubr.msk.bf16.mxu1 %vm390_vm1, %v429_v19  ;;  %v426_v27 = vld [vmem:[#allocation2 + $0x50] sm:$0xff]  ;;  %v430_v30 = vpack.c.bf16 %v424_v24, %v423_v23  ;;  %v427_v37 = vld [vmem:[#allocation2 + $0x60] sm:$0xff]  ;;  %v755_v46 = vpack.c.bf16 %v425_v26, %v424_v24 }
  0x42   : > { %1777 = vmatprep.mubr.msk.bf16.mxu0 %vm390_vm1, %v640_v20  ;;  %v2095_v29 = vld [vmem:[#allocation2 + $0x52] sm:$0xff]  ;;  %v2097_v31 = vpack.c.bf16 %v426_v27, %v425_v26  ;;  %v756_v47 = vpack.c.bf16 %v427_v37, %v426_v27  ;;  %v867_v51 = vld [vmem:[#allocation2 + $0x81] sm:$0xff] }
  0x43   : > { %1776 = vmatpush3.bf16.msra.mxu0 %v1875_v5  ;;  %v2101_v32 = vpack.c.bf16 %v2095_v29, %v2093_v28  ;;  %v2112_v36 = vld [vmem:[#allocation2 + $0x72] sm:$0xff]  ;;  %v753_v52 = vld [vmem:[#allocation2 + $0x80] sm:$0xff]  ;;  %v871_v55 = vpack.c.bf16 %v867_v51, %v2056_v13  ;;  %v984_v59 = vpack.c.bf16 %v638_v35, %v2095_v29 }
  0x44   : > { %1764 = vmatpush3.bf16.msra.mxu1 %v1874_v18  ;;  %1797 = vmatprep.subr.bf16.mxu0 %v1877_v25  ;;  %v428_v38 = vld [vmem:[#allocation2 + $0x70] sm:$0xff]  ;;  %v2125_v41 = vpack.c.bf16 %v2112_v36, %v638_v35  ;;  %v981_v63 = vld [vmem:[#allocation2 + $0x82] sm:$0xff]  ;;  %v1100_v0 = vpack.c.bf16 %v1096_v62, %v753_v52 }
  0x45   : > { %1785 = vmatprep.subr.bf16.mxu1 %v1876_v17  ;;  %v432_v42 = vpack.c.bf16 %v428_v38, %v427_v37  ;;  %v757_v56 = vpack.c.bf16 %v753_v52, %v428_v38  ;;  %v985_v1 = vpack.c.bf16 %v981_v63, %v2112_v36  ;;  %v1324_v2 = vld [vmem:[#allocation2 + $0x92] sm:$0xff] }
  0x46   : > { %1778 = vmatmul.mubr.msk.bf16.vlgmr.msra.gmra.mxu0 %vm390_vm1, %v2091_v12  ;;  %v1210_v3 = vld [vmem:[#allocation2 + $0x91] sm:$0xff]  ;;  %v1328_v4 = vpack.c.bf16 %v1324_v2, %v981_v63 }
  0x47   : > { %1766 = vmatmul.mubr.msk.bf16.vlgmr.msra.gmra.mxu1 %vm390_vm1, %v430_v30  ;;  %1798 = vmatpush3.bf16.msra.mxu0 %v1877_v25  ;;  %v1214_v5 = vpack.c.bf16 %v1210_v3, %v867_v51 }
  0x48   : > { %1786 = vmatpush3.bf16.msra.mxu1 %v1876_v17  ;;  %1769 = vmatprep.mubr.msk.bf16.mxu1 %vm390_vm1, %v2097_v31 }
  0x49   : > { %1781 = vmatprep.mubr.msk.bf16.mxu0 %vm390_vm1, %v2101_v32  ;;  %1787 = vmatprep.subr.bf16.mxu1 %v1878_v33 }
  0x4a   : > { %1799 = vmatprep.subr.bf16.mxu0 %v1879_v34 }
  0x4b   : > { %1800 = vmatpush3.bf16.msra.mxu0 %v1879_v34 }
  0x4c   : > { %1788 = vmatpush3.bf16.msra.mxu1 %v1878_v33  ;;  %1821 = vmatprep.subr.bf16.mxu0 %v1881_v39 }
  0x4d   : > { %1809 = vmatprep.subr.bf16.mxu1 %v1880_v40 }
  0x4e   : > { %1782 = vmatmul.mubr.msk.bf16.gmra.mxu0 %vm390_vm1, %v2125_v41 }
  0x4f   : > { %1770 = vmatmul.mubr.msk.bf16.gmra.mxu1 %vm390_vm1, %v432_v42  ;;  %1801 = vmatprep.mubr.msk.bf16.mxu0 %vm390_vm1, %v868_v43 }
  0x50   : > { %1789 = vmatprep.mubr.msk.bf16.mxu1 %vm390_vm1, %v754_v44 }
  0x56   : > { %1802 = vmatmul.mubr.msk.bf16.vlgmr.msra.gmra.mxu0 %vm390_vm1, %v869_v45 }
  0x57   : > { %1790 = vmatmul.mubr.msk.bf16.vlgmr.msra.gmra.mxu1 %vm390_vm1, %v755_v46  ;;  %1822 = vmatpush3.bf16.msra.mxu0 %v1881_v39 }
  0x58   : > { %1810 = vmatpush3.bf16.msra.mxu1 %v1880_v40  ;;  %1793 = vmatprep.mubr.msk.bf16.mxu1 %vm390_vm1, %v756_v47 }
  0x59   : > { %1805 = vmatprep.mubr.msk.bf16.mxu0 %vm390_vm1, %v870_v48  ;;  %1811 = vmatprep.subr.bf16.mxu1 %v1882_v49 }
  0x5a   : > { %1823 = vmatprep.subr.bf16.mxu0 %v1883_v50 }
  0x5b   : > { %1824 = vmatpush3.bf16.msra.mxu0 %v1883_v50 }
  0x5c   : > { %1812 = vmatpush3.bf16.msra.mxu1 %v1882_v49  ;;  %1845 = vmatprep.subr.bf16.mxu0 %v1885_v53 }
  0x5d   : > { %1833 = vmatprep.subr.bf16.mxu1 %v1884_v54 }
  0x5e   : > { %1806 = vmatmul.mubr.msk.bf16.gmra.mxu0 %vm390_vm1, %v871_v55 }
  0x5f   : > { %1794 = vmatmul.mubr.msk.bf16.gmra.mxu1 %vm390_vm1, %v757_v56  ;;  %1825 = vmatprep.mubr.msk.bf16.mxu0 %vm390_vm1, %v430_v30 }
  0x60   : > { %1813 = vmatprep.mubr.msk.bf16.mxu1 %vm390_vm1, %v982_v57 }
  0x66   : > { %1826 = vmatmul.mubr.msk.bf16.vlgmr.msra.gmra.mxu0 %vm390_vm1, %v2097_v31 }
  0x67   : > { %1814 = vmatmul.mubr.msk.bf16.vlgmr.msra.gmra.mxu1 %vm390_vm1, %v983_v58  ;;  %1846 = vmatpush3.bf16.msra.mxu0 %v1885_v53 }
  0x68   : > { %1834 = vmatpush3.bf16.msra.mxu1 %v1884_v54  ;;  %1817 = vmatprep.mubr.msk.bf16.mxu1 %vm390_vm1, %v984_v59 }
  0x69   : > { %1829 = vmatprep.mubr.msk.bf16.mxu0 %vm390_vm1, %v432_v42  ;;  %1835 = vmatprep.subr.bf16.mxu1 %v1886_v60 }
  0x6a   : > { %1847 = vmatprep.subr.bf16.mxu0 %v1887_v61 }
  0x6b   : > { %1848 = vmatpush3.bf16.msra.mxu0 %v1887_v61 }
  0x6c   : > { %1836 = vmatpush3.bf16.msra.mxu1 %v1886_v60 }
  0x6e   : > { %1830 = vmatmul.mubr.msk.bf16.gmra.mxu0 %vm390_vm1, %v1100_v0 }
  0x6f   : > { %1818 = vmatmul.mubr.msk.bf16.gmra.mxu1 %vm390_vm1, %v985_v1  ;;  %1849 = vmatprep.mubr.msk.bf16.mxu0 %vm390_vm1, %v2091_v12 }
  0x70   : > { %1837 = vmatprep.mubr.msk.bf16.mxu1 %vm390_vm1, %v2054_v11 }
  0x76   : > { %1850 = vmatmul.mubr.msk.bf16.vlgmr.msra.gmra.mxu0 %vm390_vm1, %v2101_v32 }
  0x77   : > { %1838 = vmatmul.mubr.msk.bf16.vlgmr.msra.gmra.mxu1 %vm390_vm1, %v2044_v7  ;;  %1853 = vmatprep.mubr.msk.bf16.mxu0 %vm390_vm1, %v2125_v41 }
  0x78   : > { %1841 = vmatprep.mubr.msk.bf16.mxu1 %vm390_vm1, %v2065_v16 }
  0x7e   : > { %1854 = vmatmul.mubr.msk.bf16.gmra.mxu0 %vm390_vm1, %v1328_v4 }
  0x7f   : > { %1842 = vmatmul.mubr.msk.bf16.gmra.mxu1 %vm390_vm1, %v1214_v5 }
  0xfe   : > { %v1755_v6 = vpop.f32.mrf.mxu0 }
  0xff   : > { %v1759_v8 = vpop.f32.mrf.mxu1 }
 0x100   : > { %v512_v9 = vpop.f32.mrf.mxu0 }
 0x101   : > { %v528_v10 = vpop.f32.mrf.mxu1 }
 0x102   : > { %v1756_v11 = vpop.f32.mrf.mxu0 }
 0x103   : > { %v2192_v7 = vpop.f32.mrf.mxu1 }
 0x104   : > { %v515_v13 = vpop.f32.mrf.mxu0 }
 0x105   : > { %v2194_v14 = vpop.f32.mrf.mxu1 }
 0x106   : > { %v1779_v15 = vpop.f32.mrf.mxu0 }
 0x107   : > { %v1767_v18 = vpop.f32.mrf.mxu1 }
 0x108   : > { %v707_v16 = vpop.f32.mrf.mxu0  ;;  %v610_v46 = vadd.f32 %v1767_v18, %v1755_v6 }
 0x109   : > { %v601_v19 = vpop.f32.mrf.mxu1 }
 0x10a   : > { %v1780_v20 = vpop.f32.mrf.mxu0  ;;  %v602_v49 = vadd.f32 %v601_v19, %v512_v9  ;;  %v740_v52 = vadd.f32 %v1779_v15, %v610_v46 }
 0x10b   : > { %v1768_v21 = vpop.f32.mrf.mxu1 }
 0x10c   : > { %v710_v22 = vpop.f32.mrf.mxu0  ;;  %v613_v53 = vadd.f32 %v1768_v21, %v1756_v11  ;;  %v738_v56 = vadd.f32 %v707_v16, %v602_v49 }
 0x10d   : > { %v604_v23 = vpop.f32.mrf.mxu1 }
 0x10e   : > { %v1783_v24 = vpop.f32.mrf.mxu0  ;;  %v605_v59 = vadd.f32 %v604_v23, %v515_v13  ;;  %v741_v61 = vadd.f32 %v1780_v20, %v613_v53 }
 0x10f   : > { %v1771_v25 = vpop.f32.mrf.mxu1 }
 0x110   : > { %v723_v17 = vpop.f32.mrf.mxu0  ;;  %v626_v62 = vadd.f32 %v1771_v25, %v1759_v8  ;;  %v739_v6 = vadd.f32 %v710_v22, %v605_v59 }
 0x111   : > { %v617_v26 = vpop.f32.mrf.mxu1 }
 0x112   : > { %v2196_v27 = vpop.f32.mrf.mxu0  ;;  %v618_v1 = vadd.f32 %v617_v26, %v528_v10  ;;  %v744_v15 = vadd.f32 %v1783_v24, %v626_v62 }
 0x113   : > { %v1772_v12 = vpop.f32.mrf.mxu1 }
 0x114   : > { %v2198_v28 = vpop.f32.mrf.mxu0  ;;  %v742_v16 = vadd.f32 %v723_v17, %v618_v1  ;;  %v629_v21 = vadd.f32 %v1772_v12, %v2192_v7 }
 0x115   : > { %v620_v29 = vpop.f32.mrf.mxu1 }
 0x116   : > { %v1803_v30 = vpop.f32.mrf.mxu0  ;;  %v621_v13 = vadd.f32 %v620_v29, %v2194_v14 }
 0x117   : > { %v1791_v31 = vpop.f32.mrf.mxu1 }
 0x118   : > { %v935_v32 = vpop.f32.mrf.mxu0  ;;  %v854_v57 = vadd.f32 %v1791_v31, %v740_v52  ;;  %v743_v17 = vadd.f32 %v2198_v28, %v621_v13 }
 0x119   : > { %v821_v33 = vpop.f32.mrf.mxu1 }
 0x11a   : > { %v1804_v34 = vpop.f32.mrf.mxu0  ;;  %v852_v63 = vadd.f32 %v821_v33, %v738_v56  ;;  %v968_v3 = vadd.f32 %v1803_v30, %v854_v57 }
 0x11b   : > { %v1792_v35 = vpop.f32.mrf.mxu1 }
 0x11c   : > { %v938_v36 = vpop.f32.mrf.mxu0  ;;  %v855_v4 = vadd.f32 %v1792_v35, %v741_v61  ;;  %v966_v11 = vadd.f32 %v935_v32, %v852_v63  ;;  %v745_v32 = vadd.f32 %v2196_v27, %v629_v21 }
 0x11d   : > { %v824_v37 = vpop.f32.mrf.mxu1 }
 0x11e   : > { %v1807_v38 = vpop.f32.mrf.mxu0  ;;  %v853_v20 = vadd.f32 %v824_v37, %v739_v6  ;;  %v969_v23 = vadd.f32 %v1804_v34, %v855_v4 }
 0x11f   : > { %v1795_v39 = vpop.f32.mrf.mxu1 }
 0x120   : > { %v951_v40 = vpop.f32.mrf.mxu0  ;;  %v858_v25 = vadd.f32 %v1795_v39, %v744_v15  ;;  %v967_v35 = vadd.f32 %v938_v36, %v853_v20 }
 0x121   : > { %v837_v41 = vpop.f32.mrf.mxu1 }
 0x122   : > { %v2200_v42 = vpop.f32.mrf.mxu0  ;;  %v856_v30 = vadd.f32 %v837_v41, %v742_v16  ;;  %v972_v12 = vadd.f32 %v1807_v38, %v858_v25 }
 0x123   : > { %v1796_v43 = vpop.f32.mrf.mxu1 }
 0x124   : > { %v2202_v44 = vpop.f32.mrf.mxu0  ;;  %v970_v34 = vadd.f32 %v951_v40, %v856_v30  ;;  %v859_v39 = vadd.f32 %v1796_v43, %v745_v32 }
 0x125   : > { %v840_v45 = vpop.f32.mrf.mxu1 }
 0x126   : > { %v1827_v47 = vpop.f32.mrf.mxu0  ;;  %v857_v46 = vadd.f32 %v840_v45, %v743_v17 }
 0x127   : > { %v1815_v48 = vpop.f32.mrf.mxu1 }
 0x128   : > { %v1164_v50 = vpop.f32.mrf.mxu0  ;;  %v1082_v18 = vadd.f32 %v1815_v48, %v968_v3 }
 0x129   : > { %v1049_v51 = vpop.f32.mrf.mxu1 }
 0x12a   : > { %v1828_v54 = vpop.f32.mrf.mxu0  ;;  %v1080_v10 = vadd.f32 %v1049_v51, %v966_v11  ;;  %v1197_v22 = vadd.f32 %v1827_v47, %v1082_v18  ;;  %v973_v51 = vadd.f32 %v2200_v42, %v859_v39 }
 0x12b   : > { %v1816_v55 = vpop.f32.mrf.mxu1 }
 0x12c   : > { %v1167_v58 = vpop.f32.mrf.mxu0  ;;  %v1083_v33 = vadd.f32 %v1816_v55, %v969_v23  ;;  %v1195_v14 = vadd.f32 %v1164_v50, %v1080_v10  ;;  %v971_v55 = vadd.f32 %v2202_v44, %v857_v46 }
 0x12d   : > { %v1052_v60 = vpop.f32.mrf.mxu1 }
 0x12e   : > { %v1831_v0 = vpop.f32.mrf.mxu0  ;;  %v1081_v48 = vadd.f32 %v1052_v60, %v967_v35  ;;  %v1198_v41 = vadd.f32 %v1828_v54, %v1083_v33 }
 0x12f   : > { %v1819_v2 = vpop.f32.mrf.mxu1 }
 0x130   : > { %v1180_v5 = vpop.f32.mrf.mxu0  ;;  %v1086_v28 = vadd.f32 %v1819_v2, %v972_v12  ;;  %v1196_v52 = vadd.f32 %v1167_v58, %v1081_v48 }
 0x131   : > { %v1065_v9 = vpop.f32.mrf.mxu1 }
 0x132   : > { %v1832_v19 = vpop.f32.mrf.mxu0  ;;  %v1084_v50 = vadd.f32 %v1065_v9, %v970_v34  ;;  %v1201_v54 = vadd.f32 %v1831_v0, %v1086_v28 }
 0x133   : > { %v1820_v8 = vpop.f32.mrf.mxu1 }
 0x134   : > { %v1183_v26 = vpop.f32.mrf.mxu0  ;;  %v1087_v59 = vadd.f32 %v1820_v8, %v973_v51  ;;  %v1199_v62 = vadd.f32 %v1180_v5, %v1084_v50 }
 0x135   : > { %v1068_v31 = vpop.f32.mrf.mxu1 }
 0x136   : > { %v1851_v24 = vpop.f32.mrf.mxu0  ;;  %v1085_v63 = vadd.f32 %v1068_v31, %v971_v55  ;;  %v1202_v6 = vadd.f32 %v1832_v19, %v1087_v59 }
 0x137   : > { %v1839_v7 = vpop.f32.mrf.mxu1 }
 0x138   : > { %v1311_v29 = vadd.f32 %v1839_v7, %v1197_v22  ;;  %v1392_v37 = vpop.f32.mrf.mxu0  ;;  %v1200_v18 = vadd.f32 %v1183_v26, %v1085_v63 }
 0x139   : > { %v1278_v27 = vpop.f32.mrf.mxu1 }
 0x13a   : > { %v1425_v36 = vadd.f32 %v1851_v24, %v1311_v29  ;;  %v1309_v38 = vadd.f32 %v1278_v27, %v1195_v14  ;;  %v1852_v47 = vpop.f32.mrf.mxu0 }
 0x13b   : > { %v1840_v49 = vpop.f32.mrf.mxu1 }
 0x13c   : > { %1433 = vst.msk [vmem:[%s2213_s22 + $0x10] sm:$0xff] %vm390_vm1, %v1425_v36  ;;  %v1423_v40 = vadd.f32 %v1392_v37, %v1309_v38  ;;  %v1312_v43 = vadd.f32 %v1840_v49, %v1198_v41  ;;  %v1395_v45 = vpop.f32.mrf.mxu0  ;;  %v1463_v44 = vmul.f32 %v1425_v36, %v1425_v36  ;;  %v1442_v16 = vsel %vm390_vm1, %v1425_v36, 0.0 }
 0x13d   : > { %v1281_v53 = vpop.f32.mrf.mxu1 }
 0x13e   : > { %1431 = vst.msk [vmem:[%s2213_s22] sm:$0xff] %vm390_vm1, %v1423_v40  ;;  %v1426_v56 = vadd.f32 %v1852_v47, %v1312_v43  ;;  %v1855_v57 = vpop.f32.mrf.mxu0  ;;  %v1310_v60 = vadd.f32 %v1281_v53, %v1196_v52  ;;  %v1461_v42 = vmul.f32 %v1423_v40, %v1423_v40  ;;  %v1439_v9 = vsel %vm390_vm1, %v1423_v40, 0.0 }
 0x13f   : > { %v1843_v61 = vpop.f32.mrf.mxu1  ;;  %v1472_v30 = vsel %vm390_vm1, %v1463_v44, 0.0 }
 0x140   : > { %1434 = vst.msk [vmem:[%s2213_s22 + $0x18] sm:$0xff] %vm390_vm1, %v1426_v56  ;;  %v1315_v1 = vadd.f32 %v1843_v61, %v1201_v54  ;;  %v1408_v2 = vpop.f32.mrf.mxu0  ;;  %v1424_v58 = vadd.f32 %v1395_v45, %v1310_v60  ;;  %v1469_v8 = vsel %vm390_vm1, %v1461_v42, 0.0  ;;  %v1464_v19 = vmul.f32 %v1426_v56, %v1426_v56 }
 0x141   : > { %v1294_v3 = vpop.f32.mrf.mxu1  ;;  %v1444_v26 = vsel %vm390_vm1, %v1426_v56, 0.0 }
 0x142   : > { %v1429_v0 = vadd.f32 %v1855_v57, %v1315_v1  ;;  %v1313_v4 = vadd.f32 %v1294_v3, %v1199_v62  ;;  %1432 = vst.msk [vmem:[%s2213_s22 + $0x8] sm:$0xff] %vm390_vm1, %v1424_v58  ;;  %v1440_v15 = vsel %vm390_vm1, %v1424_v58, 0.0  ;;  %v1462_v5 = vmul.f32 %v1424_v58, %v1424_v58  ;;  %v1856_v20 = vpop.f32.mrf.mxu0 }
 0x143   : > { %v1844_v11 = vpop.f32.mrf.mxu1  ;;  %v1441_v21 = vadd.f32 %v1440_v15, %v1439_v9  ;;  %v1474_v12 = vsel %vm390_vm1, %v1464_v19, 0.0 }
 0x144   : > { %1437 = vst.msk [vmem:[%s2213_s22 + $0x30] sm:$0xff] %vm390_vm1, %v1429_v0  ;;  %v1427_v13 = vadd.f32 %v1408_v2, %v1313_v4  ;;  %v1470_v23 = vsel %vm390_vm1, %v1462_v5, 0.0  ;;  %v1316_v25 = vadd.f32 %v1844_v11, %v1202_v6  ;;  %v1411_v7 = vpop.f32.mrf.mxu0  ;;  %v1467_v39 = vmul.f32 %v1429_v0, %v1429_v0 }
 0x145   : > { %v1297_v10 = vpop.f32.mrf.mxu1  ;;  %v1443_v31 = vadd.f32 %v1442_v16, %v1441_v21  ;;  %v1471_v22 = vadd.f32 %v1470_v23, %v1469_v8  ;;  %v1450_v36 = vsel %vm390_vm1, %v1429_v0, 0.0 }
 0x146   : > { %1435 = vst.msk [vmem:[%s2213_s22 + $0x20] sm:$0xff] %vm390_vm1, %v1427_v13  ;;  %v1465_v33 = vmul.f32 %v1427_v13, %v1427_v13  ;;  %v1430_v24 = vadd.f32 %v1856_v20, %v1316_v25  ;;  %v1314_v32 = vadd.f32 %v1297_v10, %v1200_v18  ;;  %v1446_v14 = vsel %vm390_vm1, %v1427_v13, 0.0 }
 0x147   : > { %v1473_v17 = vadd.f32 %v1472_v30, %v1471_v22  ;;  %v1445_v35 = vadd.f32 %v1444_v26, %v1443_v31  ;;  %v1480_v40 = vsel %vm390_vm1, %v1467_v39, 0.0 }
 0x148   : > { %1438 = vst.msk [vmem:[%s2213_s22 + $0x38] sm:$0xff] %vm390_vm1, %v1430_v24  ;;  %v1428_v29 = vadd.f32 %v1411_v7, %v1314_v32  ;;  %v1476_v46 = vsel %vm390_vm1, %v1465_v33, 0.0  ;;  %v1468_v38 = vmul.f32 %v1430_v24, %v1430_v24  ;;  %v1452_v43 = vsel %vm390_vm1, %v1430_v24, 0.0 }
 0x149   : > { %v1447_v37 = vadd.f32 %v1446_v14, %v1445_v35  ;;  %v1475_v34 = vadd.f32 %v1474_v12, %v1473_v17 }
 0x14a   : > { %1436 = vst.msk [vmem:[%s2213_s22 + $0x28] sm:$0xff] %vm390_vm1, %v1428_v29  ;;  %v1448_v48 = vsel %vm390_vm1, %v1428_v29, 0.0  ;;  %v1466_v27 = vmul.f32 %v1428_v29, %v1428_v29  ;;  %v1482_v52 = vsel %vm390_vm1, %v1468_v38, 0.0 }
 0x14b   : > { %v1477_v41 = vadd.f32 %v1476_v46, %v1475_v34  ;;  %v1449_v28 = vadd.f32 %v1448_v48, %v1447_v37 }
 0x14c   : > { %v1478_v47 = vsel %vm390_vm1, %v1466_v27, 0.0 }
 0x14d   : > { %v1451_v49 = vadd.f32 %v1450_v36, %v1449_v28  ;;  %v1479_v50 = vadd.f32 %v1478_v47, %v1477_v41 }
 0x14f   : > { %v1453_v45 = vadd.f32 %v1452_v43, %v1451_v49  ;;  %v1481_v51 = vadd.f32 %v1480_v40, %v1479_v50 }
 0x151   : > { %v1454_v53 = vrot.slane %v1453_v45, 4  ;;  %v1483_v55 = vadd.f32 %v1482_v52, %v1481_v51 }
 0x153   : > { %v1455_v54 = vadd.f32 %v1454_v53, %v1453_v45  ;;  %v1484_v56 = vrot.slane %v1483_v55, 4 }
 0x155   : > { %v1456_v57 = vrot.slane %v1455_v54, 2  ;;  %v1485_v59 = vadd.f32 %v1484_v56, %v1483_v55 }
 0x157   : > { %v1457_v60 = vadd.f32 %v1456_v57, %v1455_v54  ;;  %v1486_v61 = vrot.slane %v1485_v59, 2 }
 0x159   : > { %v1458_v62 = vrot.slane %v1457_v60, 1  ;;  %v1487_v63 = vadd.f32 %v1486_v61, %v1485_v59 }
 0x15b   : > { %v1459_v1 = vadd.f32 %v1458_v62, %v1457_v60  ;;  %v1488_v2 = vrot.slane %v1487_v63, 1 }
 0x15d   : > { %1460 = vst.msk [vmem:[%s319_s25] sm:$0x1] %vm326_vm0, %v1459_v1  ;;  %v1489_v42 = vadd.f32 %v1488_v2, %v1487_v63 }
 0x15f   : > { %1490 = vst.msk [vmem:[%s322_s30] sm:$0x1] %vm326_vm0, %v1489_v42 }
 0x160 PF: > { %s19_s27 = sadd.s32 1, %s1896_s27  }
 0x161   : > { %p16_p4 = scmp.ge.s32.totalorder %s19_s27, 4  }
 0x163   :  { %18 = sbr.rel (!%p16_p4) target bundleno = 1 (0x1), region = 108 }

// kernel: fwd.11
= control target key start
LH: loop header
LB: loop body
LE: loop exit
PB: predicated region body
PF: predicated region fallthrough
CT: control target
= control target key end

     0   :  { %s312_s25 = smov 8   ;;  %s568_s0 = inlined_call_operand.vmem [shape: f32[128,32], index: 0, kind: input, shape index: {}]   ;;  %s569_s1 = inlined_call_operand.vmem [shape: f32[2,1,32], index: 1, kind: input, shape index: {}]   ;;  %s570_s2 = inlined_call_operand.vmem [shape: f32[2,1,32], index: 2, kind: input, shape index: {}]   ;;  %s571_s3 = inlined_call_operand.vmem [shape: f32[1,32], index: 3, kind: input, shape index: {}]   ;;  %s572_s4 = inlined_call_operand.vmem [shape: f32[1,32], index: 4, kind: input, shape index: {}]   ;;  %s573_s5 = inlined_call_operand.vmem [shape: f32[128,16], index: 5, kind: input, shape index: {}]   ;;  %s574_s6 = inlined_call_operand.hbm [shape: f32[128,32], index: 6, kind: output, shape index: {}]  }
   0x1   :  { %v108_v0 = vld [vmem:[%s573_s5 + $0x10] sm:$0xff]  ;;  %v106_v1 = vld [vmem:[%s573_s5] sm:$0xff]  ;;  %v109_v2 = vld [vmem:[%s573_s5 + $0x18] sm:$0xff] }
   0x2   :  { %142 = vrot.lane.b32.xlu1 %v108_v0, %s312_s25  ;;  %138 = vrot.lane.b32.xlu0 %v106_v1, %s312_s25  ;;  %v107_v3 = vld [vmem:[%s573_s5 + $0x8] sm:$0xff]  ;;  %v110_v5 = vld [vmem:[%s573_s5 + $0x20] sm:$0xff] }
   0x3   :  { %v111_v4 = vld [vmem:[%s573_s5 + $0x28] sm:$0xff]  ;;  %v113_v6 = vld [vmem:[%s573_s5 + $0x38] sm:$0xff]  ;;  %v112_v7 = vld [vmem:[%s573_s5 + $0x30] sm:$0xff] }
   0x4   :  { %v115_v8 = vld [vmem:[%s573_s5 + $0x48] sm:$0xff]  ;;  %v114_v9 = vld [vmem:[%s573_s5 + $0x40] sm:$0xff] }
   0x6   :  { %144 = vrot.lane.b32.xlu1 %v109_v2, %s312_s25  ;;  %140 = vrot.lane.b32.xlu0 %v107_v3, %s312_s25 }
   0xa   :  { %148 = vrot.lane.b32.xlu1 %v111_v4, %s312_s25  ;;  %146 = vrot.lane.b32.xlu0 %v110_v5, %s312_s25 }
   0xe   :  { %152 = vrot.lane.b32.xlu1 %v113_v6, %s312_s25  ;;  %150 = vrot.lane.b32.xlu0 %v112_v7, %s312_s25 }
   0xf   :  { %11 = vsyncpa [#allocation3], 0  ;;  %v117_v10 = vld [vmem:[%s573_s5 + $0x58] sm:$0xff]  ;;  %v116_v11 = vld [vmem:[%s573_s5 + $0x50] sm:$0xff]  ;;  %vm26_vm0 = vcmask 253952   ;;  %v63_v31 = vlaneseq  ;;  %vm186_vm1 = vcmask 64512  }
  0x10   :  { %v119_v12 = vld [vmem:[%s573_s5 + $0x68] sm:$0xff]  ;;  %v118_v13 = vld [vmem:[%s573_s5 + $0x60] sm:$0xff]  ;;  %v121_v14 = vld [vmem:[%s573_s5 + $0x78] sm:$0xff]  ;;  %vm203_vm2 = vcmask 195584   ;;  %vm252_vm3 = vcmask 261120  }
  0x11   :  { %v120_v15 = vld [vmem:[%s573_s5 + $0x70] sm:$0xff]  ;;  %v24_v16 = vld [vmem:[%s569_s1] sm:$0x1]  ;;  %v25_v17 = vld [vmem:[%s569_s1 + $0x1] sm:$0x1]  ;;  %v64_v35 = vshrl.u32 %v63_v31, 7 }
  0x12   :  { %156 = vrot.lane.b32.xlu1 %v115_v8, %s312_s25  ;;  %154 = vrot.lane.b32.xlu0 %v114_v9, %s312_s25  ;;  %v27_v18 = vsel %vm26_vm0, %v24_v16, 0.0  ;;  %v28_v19 = vsel %vm26_vm0, %v25_v17, 0.0  ;;  %v31_v20 = vld [vmem:[%s570_s2] sm:$0x1]  ;;  %v32_v21 = vld [vmem:[%s570_s2 + $0x1] sm:$0x1] }
  0x13   :  { %v29_v22 = vadd.f32 %v28_v19, %v27_v18  ;;  %v33_v23 = vsel %vm26_vm0, %v31_v20, 0.0  ;;  %v34_v24 = vsel %vm26_vm0, %v32_v21, 0.0  ;;  %v39_v33 = vld [vmem:[%s571_s3] sm:$0x1]  ;;  %v65_v37 = vsub.s32 0, %v64_v35  ;;  %v48_v41 = vld [vmem:[%s568_s0 + $0x10] sm:$0xff] }
  0x14   :  { %v35_v26 = vadd.f32 %v34_v24, %v33_v23  ;;  %v43_v38 = vld [vmem:[%s572_s4] sm:$0x1]  ;;  %v49_v46 = vld [vmem:[%s568_s0 + $0x18] sm:$0xff]  ;;  %v47_v47 = vld [vmem:[%s568_s0 + $0x8] sm:$0xff] }
  0x15   :  { %v30_v25 = vmul.f32 0.0078125, %v29_v22  ;;  %v46_v42 = vld [vmem:[%s568_s0] sm:$0xff]  ;;  %v51_v52 = vld [vmem:[%s568_s0 + $0x28] sm:$0xff]  ;;  %v53_v2 = vld [vmem:[%s568_s0 + $0x38] sm:$0xff] }
  0x16   :  { %160 = vrot.lane.b32.xlu1 %v117_v10, %s312_s25  ;;  %158 = vrot.lane.b32.xlu0 %v116_v11, %s312_s25  ;;  %v36_v27 = vmul.f32 0.0078125, %v35_v26  ;;  %v50_v53 = vld [vmem:[%s568_s0 + $0x20] sm:$0xff]  ;;  %v52_v3 = vld [vmem:[%s568_s0 + $0x30] sm:$0xff] }
  0x17   :  { %v37_v28 = vmul.f32 %v30_v25, %v30_v25  ;;  %v55_v18 = vld [vmem:[%s568_s0 + $0x48] sm:$0xff]  ;;  %v54_v19 = vld [vmem:[%s568_s0 + $0x40] sm:$0xff]  ;;  %v56_v35 = vld [vmem:[%s568_s0 + $0x50] sm:$0xff] }
  0x19   :  { %v38_v29 = vsub.f32 %v36_v27, %v37_v28 }
  0x1a   :  { %164 = vrot.lane.b32.xlu1 %v119_v12, %s312_s25  ;;  %162 = vrot.lane.b32.xlu0 %v118_v13, %s312_s25 }
  0x1b   :  { %v40_v30 = vadd.f32 1e-05, %v38_v29 }
  0x1d   :  { %288 = vrsqrt.f32 %v40_v30 }
  0x1e   :  { %168 = vrot.lane.b32.xlu1 %v121_v14, %s312_s25  ;;  %166 = vrot.lane.b32.xlu0 %v120_v15, %s312_s25 }
  0x2a   :  { %v289_v32 = vpop.eup %288 }
  0x2b   :  { %v42_v34 = vmul.f32 %v289_v32, %v39_v33 }
  0x2d   :  { %v44_v36 = vmul.f32 %v42_v34, %v30_v25  ;;  %v432_v40 = vrot.slane %v42_v34, %v65_v37  ;;  %v57_v34 = vld [vmem:[%s568_s0 + $0x58] sm:$0xff] }
  0x2f   :  { %v45_v39 = vsub.f32 %v43_v38, %v44_v36  ;;  %v70_v43 = vmul.f32 %v432_v40, %v48_v41  ;;  %v68_v45 = vmul.f32 %v432_v40, %v46_v42  ;;  %v71_v50 = vmul.f32 %v432_v40, %v49_v46 }
  0x30   :  { %v69_v51 = vmul.f32 %v432_v40, %v47_v47  ;;  %v73_v60 = vmul.f32 %v432_v40, %v51_v52  ;;  %v72_v61 = vmul.f32 %v432_v40, %v50_v53  ;;  %v75_v12 = vmul.f32 %v432_v40, %v53_v2  ;;  %v59_v52 = vld [vmem:[%s568_s0 + $0x68] sm:$0xff]  ;;  %v58_v53 = vld [vmem:[%s568_s0 + $0x60] sm:$0xff] }
  0x31   :  { %v441_v44 = vrot.slane %v45_v39, %v65_v37  ;;  %v74_v13 = vmul.f32 %v432_v40, %v52_v3  ;;  %v77_v28 = vmul.f32 %v432_v40, %v55_v18  ;;  %v76_v29 = vmul.f32 %v432_v40, %v54_v19 }
  0x32   :  { %v79_v46 = vmul.f32 %v432_v40, %v57_v34  ;;  %v78_v47 = vmul.f32 %v432_v40, %v56_v35 }
  0x33   :  { %v92_v48 = vadd.f32 %v441_v44, %v70_v43  ;;  %v90_v49 = vadd.f32 %v441_v44, %v68_v45  ;;  %v93_v0 = vadd.f32 %v441_v44, %v71_v50  ;;  %v91_v1 = vadd.f32 %v441_v44, %v69_v51 }
  0x34   :  { %v95_v16 = vadd.f32 %v441_v44, %v73_v60  ;;  %v94_v17 = vadd.f32 %v441_v44, %v72_v61  ;;  %v97_v32 = vadd.f32 %v441_v44, %v75_v12  ;;  %v96_v33 = vadd.f32 %v441_v44, %v74_v13 }
  0x35   :  { %v99_v50 = vadd.f32 %v441_v44, %v77_v28  ;;  %v98_v51 = vadd.f32 %v441_v44, %v76_v29  ;;  %v101_v2 = vadd.f32 %v441_v44, %v79_v46  ;;  %v100_v3 = vadd.f32 %v441_v44, %v78_v47 }
  0x74   :  { %v143_v54 = vpop.permute.xlu1 %142  ;;  %v139_v55 = vpop.permute.xlu0 %138 }
  0x75   :  { %v189_v56 = vsel %vm186_vm1, 0.0, %v143_v54  ;;  %v187_v57 = vsel %vm186_vm1, 0.0, %v139_v55 }
  0x76   :  { %v206_v58 = vsel %vm203_vm2, %v189_v56, 0.0  ;;  %v204_v59 = vsel %vm203_vm2, %v187_v57, 0.0 }
  0x77   :  { %v222_v62 = vadd.f32 %v206_v58, %v92_v48  ;;  %v220_v63 = vadd.f32 %v204_v59, %v90_v49 }
  0x78   :  { %v145_v4 = vpop.permute.xlu1 %144  ;;  %v141_v5 = vpop.permute.xlu0 %140 }
  0x79   :  { %v238_v6 = vmax.f32 %v222_v62, 0.0  ;;  %v236_v7 = vmax.f32 %v220_v63, 0.0  ;;  %v190_v8 = vsel %vm186_vm1, 0.0, %v145_v4  ;;  %v188_v9 = vsel %vm186_vm1, 0.0, %v141_v5 }
  0x7a   :  { %v207_v10 = vsel %vm203_vm2, %v190_v8, 0.0  ;;  %v205_v11 = vsel %vm203_vm2, %v188_v9, 0.0  ;;  %v81_v62 = vmul.f32 %v432_v40, %v59_v52  ;;  %v80_v63 = vmul.f32 %v432_v40, %v58_v53 }
  0x7b   :  { %255 = vst.msk [vmem:[#allocation2 + $0x10] sm:$0xff] %vm252_vm3, %v238_v6  ;;  %253 = vst.msk [vmem:[#allocation2] sm:$0xff] %vm252_vm3, %v236_v7  ;;  %v223_v14 = vadd.f32 %v207_v10, %v93_v0  ;;  %v221_v15 = vadd.f32 %v205_v11, %v91_v1  ;;  %v61_v6 = vld [vmem:[%s568_s0 + $0x78] sm:$0xff]  ;;  %v60_v7 = vld [vmem:[%s568_s0 + $0x70] sm:$0xff]  ;;  %s313_s0 = smov [#allocation2]  }
  0x7c   :  { %v149_v20 = vpop.permute.xlu1 %148  ;;  %v147_v21 = vpop.permute.xlu0 %146  ;;  %v83_v18 = vmul.f32 %v432_v40, %v61_v6  ;;  %v82_v19 = vmul.f32 %v432_v40, %v60_v7  ;;  %s274_s3 = sshll.u32 %s313_s0, 4  ;;  %s275_s3 = int_to_ptr.vmem [resolvable:$true] %s274_s3 }
  0x7d   :  { %v239_v22 = vmax.f32 %v223_v14, 0.0  ;;  %v237_v23 = vmax.f32 %v221_v15, 0.0  ;;  %v192_v24 = vsel %vm186_vm1, 0.0, %v149_v20  ;;  %v191_v25 = vsel %vm186_vm1, 0.0, %v147_v21  ;;  %s290_s20 = scalar_lea.vmem %s275_s3, 2048  ;;  %p295_p1 = scmp.lt.s32.totalorder %s275_s3, %s275_s3 }
  0x7e   :  { %v209_v26 = vsel %vm203_vm2, %v192_v24, 0.0  ;;  %v208_v27 = vsel %vm203_vm2, %v191_v25, 0.0  ;;  %v103_v14 = vadd.f32 %v441_v44, %v81_v62  ;;  %v102_v15 = vadd.f32 %v441_v44, %v80_v63  ;;  %p291_p0 = scmp.ne.s32.totalorder %s275_s3, %s290_s20  ;;  %p296_p2 = scmp.lt.s32.totalorder %s290_s20, %s290_s20 }
  0x7f   :  { %256 = vst.msk [vmem:[#allocation2 + $0x18] sm:$0xff] %vm252_vm3, %v239_v22  ;;  %254 = vst.msk [vmem:[#allocation2 + $0x8] sm:$0xff] %vm252_vm3, %v237_v23  ;;  %v225_v30 = vadd.f32 %v209_v26, %v95_v16  ;;  %v224_v31 = vadd.f32 %v208_v27, %v94_v17  ;;  %v105_v40 = vadd.f32 %v441_v44, %v83_v18 }
  0x80   :  { %v153_v36 = vpop.permute.xlu1 %152  ;;  %v151_v37 = vpop.permute.xlu0 %150  ;;  %p297_p3 = por %p296_p2, %p295_p1 }
  0x81   :  { %v241_v38 = vmax.f32 %v225_v30, 0.0  ;;  %v240_v39 = vmax.f32 %v224_v31, 0.0  ;;  %v194_v41 = vsel %vm186_vm1, 0.0, %v153_v36  ;;  %v193_v42 = vsel %vm186_vm1, 0.0, %v151_v37 }
  0x82   :  { %v211_v43 = vsel %vm203_vm2, %v194_v41, 0.0  ;;  %v210_v45 = vsel %vm203_vm2, %v193_v42, 0.0  ;;  %v104_v30 = vadd.f32 %v441_v44, %v82_v19  ;;  %p298_p4 = pnand %p297_p3, %p291_p0 }
  0x83   :  { %258 = vst.msk [vmem:[#allocation2 + $0x28] sm:$0xff] %vm252_vm3, %v241_v38  ;;  %257 = vst.msk [vmem:[#allocation2 + $0x20] sm:$0xff] %vm252_vm3, %v240_v39  ;;  %v227_v48 = vadd.f32 %v211_v43, %v97_v32  ;;  %v226_v49 = vadd.f32 %v210_v45, %v96_v33 }
  0x84   :  { %v157_v54 = vpop.permute.xlu1 %156  ;;  %v155_v55 = vpop.permute.xlu0 %154 }
  0x85   :  { %v243_v56 = vmax.f32 %v227_v48, 0.0  ;;  %v242_v57 = vmax.f32 %v226_v49, 0.0  ;;  %v196_v58 = vsel %vm186_vm1, 0.0, %v157_v54  ;;  %v195_v59 = vsel %vm186_vm1, 0.0, %v155_v55 }
  0x86   :  { %v213_v60 = vsel %vm203_vm2, %v196_v58, 0.0  ;;  %v212_v61 = vsel %vm203_vm2, %v195_v59, 0.0 }
  0x87   :  { %260 = vst.msk [vmem:[#allocation2 + $0x38] sm:$0xff] %vm252_vm3, %v243_v56  ;;  %259 = vst.msk [vmem:[#allocation2 + $0x30] sm:$0xff] %vm252_vm3, %v242_v57  ;;  %v229_v0 = vadd.f32 %v213_v60, %v99_v50  ;;  %v228_v1 = vadd.f32 %v212_v61, %v98_v51 }
  0x88   :  { %v161_v4 = vpop.permute.xlu1 %160  ;;  %v159_v5 = vpop.permute.xlu0 %158 }
  0x89   :  { %v245_v8 = vmax.f32 %v229_v0, 0.0  ;;  %v244_v9 = vmax.f32 %v228_v1, 0.0  ;;  %v198_v10 = vsel %vm186_vm1, 0.0, %v161_v4  ;;  %v197_v11 = vsel %vm186_vm1, 0.0, %v159_v5 }
  0x8a   :  { %v215_v12 = vsel %vm203_vm2, %v198_v10, 0.0  ;;  %v214_v13 = vsel %vm203_vm2, %v197_v11, 0.0 }
  0x8b   :  { %262 = vst.msk [vmem:[#allocation2 + $0x48] sm:$0xff] %vm252_vm3, %v245_v8  ;;  %261 = vst.msk [vmem:[#allocation2 + $0x40] sm:$0xff] %vm252_vm3, %v244_v9  ;;  %v231_v16 = vadd.f32 %v215_v12, %v101_v2  ;;  %v230_v17 = vadd.f32 %v214_v13, %v100_v3 }
  0x8c   :  { %v165_v20 = vpop.permute.xlu1 %164  ;;  %v163_v21 = vpop.permute.xlu0 %162 }
  0x8d   :  { %v247_v22 = vmax.f32 %v231_v16, 0.0  ;;  %v246_v23 = vmax.f32 %v230_v17, 0.0  ;;  %v200_v24 = vsel %vm186_vm1, 0.0, %v165_v20  ;;  %v199_v25 = vsel %vm186_vm1, 0.0, %v163_v21 }
  0x8e   :  { %v217_v26 = vsel %vm203_vm2, %v200_v24, 0.0  ;;  %v216_v27 = vsel %vm203_vm2, %v199_v25, 0.0 }
  0x8f   :  { %264 = vst.msk [vmem:[#allocation2 + $0x58] sm:$0xff] %vm252_vm3, %v247_v22  ;;  %263 = vst.msk [vmem:[#allocation2 + $0x50] sm:$0xff] %vm252_vm3, %v246_v23  ;;  %v233_v28 = vadd.f32 %v217_v26, %v103_v14  ;;  %v232_v29 = vadd.f32 %v216_v27, %v102_v15 }
  0x90   :  { %v169_v31 = vpop.permute.xlu1 %168  ;;  %v167_v32 = vpop.permute.xlu0 %166 }
  0x91   :  { %v249_v33 = vmax.f32 %v233_v28, 0.0  ;;  %v248_v34 = vmax.f32 %v232_v29, 0.0  ;;  %v202_v35 = vsel %vm186_vm1, 0.0, %v169_v31  ;;  %v201_v36 = vsel %vm186_vm1, 0.0, %v167_v32 }
  0x92   :  { %v219_v37 = vsel %vm203_vm2, %v202_v35, 0.0  ;;  %v218_v38 = vsel %vm203_vm2, %v201_v36, 0.0 }
  0x93   :  { %266 = vst.msk [vmem:[#allocation2 + $0x68] sm:$0xff] %vm252_vm3, %v249_v33  ;;  %265 = vst.msk [vmem:[#allocation2 + $0x60] sm:$0xff] %vm252_vm3, %v248_v34  ;;  %v235_v39 = vadd.f32 %v219_v37, %v105_v40  ;;  %v234_v44 = vadd.f32 %v218_v38, %v104_v30 }
  0x95   :  { %v251_v41 = vmax.f32 %v235_v39, 0.0  ;;  %v250_v42 = vmax.f32 %v234_v44, 0.0 }
  0x97   :  { %268 = vst.msk [vmem:[#allocation2 + $0x78] sm:$0xff] %vm252_vm3, %v251_v41  ;;  %267 = vst.msk [vmem:[#allocation2 + $0x70] sm:$0xff] %vm252_vm3, %v250_v42 }
  0x98   :  { %301 = shalt.err (!%p298_p4)
}
  0x99   :  { %s314_s4 = smov 128  }
  0x9a   :  { %280 = dma.vmem_to_hbm [thread:$0]  %s275_s3, 2048, %s574_s6, [#allocation3], %s314_s4, %s314_s4, %s312_s25  }
  0x9b   :  { %310 = dma.done.wait [#allocation3], 2048  }
  0x9c   :  { %311 = vsyncadd [#allocation3], 4294965248 }
  0x9d   :  { %284 = vsyncpa [#allocation3], 1 }

</bundles_post_ra>
